<compile_context>
chip_gen: v7x
topology: tpu7x:2x2x1
jax: 0.10.0
libtpu: 0.0.40
codegen_flags: <defaults>
</compile_context>

<pallas_src>
import functools

import jax
import jax.numpy as jnp
from jax.experimental import pallas as pl
from jax.experimental.pallas import tpu as pltpu


def _pad_geom(H, W):
    """Geometry of the flat, pitched, zero-padded activation slab.

    h[i, j] lives at flat row  A_OFF + i*WP + j  (j in [0, W)).
    Tap (kh, kw) of the 3x3 conv reads the contiguous window
      [BASE + kh*WP + kw, BASE + kh*WP + kw + H*WP)
    and accumulates into acc[q], q = i*WP + j (columns j >= W are garbage and
    dropped in the wrapper).
    """
    WP = -(-(W + 2) // 8) * 8            # padded-row pitch, multiple of 8
    A_OFF = WP + 8                       # flat row of h[0, 0]; multiple of 8
    BASE = A_OFF - WP - 1                # >= 7
    NROWS = -(-(A_OFF + (H + 1) * WP + 1) // 8) * 8
    return WP, A_OFF, BASE, NROWS


def _leaky(x):
    return jnp.where(x >= 0, x, 0.1 * x)


def _basic_block_kernel(x_ref, w1_ref, b1_ref, w2_ref, b2_ref, mask_ref,
                        out_ref, pad_ref, acc_ref, *, H, W):
    # x_ref:    (1, NROWS, Cin) f32   pitched, zero-padded NHWC batch element
    # w1_ref:   (Cin, C1)       bf16  1x1 conv weight with BN1 scale folded in
    # b1_ref:   (1, C1)         f32   folded BN1 bias
    # w2_ref:   (9, C1, C2)     bf16  3x3 conv weight (kh*3+kw), BN2 scale folded
    # b2_ref:   (1, C2)         f32   folded BN2 bias
    # mask_ref: (NROWS, 1)      f32   1.0 at interior rows, 0.0 at halo/pitch pad
    # out_ref:  (1, H*WP, C2)   f32   pitched output (pad columns dropped outside)
    # pad_ref:  (NROWS, C1)     bf16  scratch: pitched conv1 activations
    # acc_ref:  (H*WP, C2)      f32   scratch: conv2 accumulator
    WP, A_OFF, BASE, _ = _pad_geom(H, W)

    xp = x_ref[0]                                        # (NROWS, Cin) f32

    # ---- conv1 (1x1) on the MXU: bf16 operands, f32 accumulation ----
    h = jnp.dot(xp.astype(jnp.bfloat16), w1_ref[...],
                preferred_element_type=jnp.float32)      # (NROWS, C1)
    h = h + b1_ref[...]                                  # BN1 bias (scale in w1)
    h = _leaky(h)                                        # LeakyReLU(0.1), f32 VPU
    h = h * mask_ref[...]                                # re-zero halo / pitch pad
    pad_ref[...] = h.astype(jnp.bfloat16)                # one aligned slab store

    # ---- conv2 (3x3, pad=1): 9 contiguous-view matmuls, f32 accumulator ----
    acc_ref[...] = jnp.zeros_like(acc_ref)
    for kh in range(3):
        for kw in range(3):
            off = BASE + kh * WP + kw
            acc_ref[...] += jnp.dot(pad_ref[off:off + H * WP, :],
                                    w2_ref[kh * 3 + kw],
                                    preferred_element_type=jnp.float32)

    o = acc_ref[...] + b2_ref[...]                       # BN2 bias (scale in w2)
    o = _leaky(o)                                        # LeakyReLU(0.1)
    o = o + x_ref[0, A_OFF:A_OFF + H * WP, :]            # residual add (f32)
    out_ref[0] = o.astype(out_ref.dtype)                 # one output store


def basic_block_forward(x_nchw, params):
    """x_nchw: (N, Cin, H, W) float32; returns (N, Cin, H, W)."""
    x = jnp.transpose(x_nchw, (0, 2, 3, 1)).astype(jnp.float32)     # NHWC
    N, H, W, Cin = x.shape
    C1 = params["w1"].shape[1]
    C2 = params["w2"].shape[2]
    assert C2 == Cin, "residual add requires planes[1] == inplanes"

    WP, A_OFF, _, NROWS = _pad_geom(H, W)

    # Pitched, zero-padded input slab (pure XLA layout work, outside kernel).
    xp = jnp.pad(x, ((0, 0), (0, 0), (0, WP - W), (0, 0)))          # (N,H,WP,Cin)
    xp = xp.reshape(N, H * WP, Cin)
    xp = jnp.pad(xp, ((0, 0), (A_OFF, NROWS - A_OFF - H * WP), (0, 0)))

    # {0,1} validity mask over pitched rows (zeros at halo / pitch-pad rows).
    col_valid = (jnp.arange(WP) < W).astype(jnp.float32)
    mask = jnp.concatenate([
        jnp.zeros((A_OFF,), jnp.float32),
        jnp.tile(col_valid, H),
        jnp.zeros((NROWS - A_OFF - H * WP,), jnp.float32),
    ]).reshape(NROWS, 1)

    # Fold the BN scales into the conv weights; ship weights as bf16.
    w1f = (params["w1"] * params["s1"]).astype(jnp.bfloat16)        # (Cin, C1)
    w2f = (params["w2"] * params["s2"]).astype(jnp.bfloat16)        # (9, C1, C2)
    b1 = params["b1"].astype(jnp.float32)                           # (1, C1)
    b2 = params["b2"].astype(jnp.float32)                           # (1, C2)

    kernel = functools.partial(_basic_block_kernel, H=H, W=W)

    out_p = pl.pallas_call(
        kernel,
        out_shape=jax.ShapeDtypeStruct((N, H * WP, C2), jnp.float32),
        grid_spec=pltpu.PrefetchScalarGridSpec(
            num_scalar_prefetch=0,
            grid=(N,),
            in_specs=[
                pl.BlockSpec((1, NROWS, Cin), lambda n: (n, 0, 0)),
                pl.BlockSpec((Cin, C1), lambda n: (0, 0)),
                pl.BlockSpec((1, C1), lambda n: (0, 0)),
                pl.BlockSpec((9, C1, C2), lambda n: (0, 0, 0)),
                pl.BlockSpec((1, C2), lambda n: (0, 0)),
                pl.BlockSpec((NROWS, 1), lambda n: (0, 0)),
            ],
            out_specs=pl.BlockSpec((1, H * WP, C2), lambda n: (n, 0, 0)),
            scratch_shapes=[
                pltpu.VMEM((NROWS, C1), jnp.bfloat16),
                pltpu.VMEM((H * WP, C2), jnp.float32),
            ]),
        compiler_params=pltpu.CompilerParams(
            dimension_semantics=("parallel",)),
    )(xp, w1f, b1, w2f, b2, mask)

    # Drop pitch-pad columns, back to NCHW.
    out = out_p.reshape(N, H, WP, C2)[:, :, :W, :]
    return jnp.transpose(out, (0, 3, 1, 2))


def make_params(key, inplanes, planes):
    """Deterministic synthetic params (shapes match the nn.Module's __init__)."""
    c1, c2 = planes
    k = jax.random.split(key, 10)
    eps = 1e-5
    w1 = jax.random.normal(k[0], (inplanes, c1), jnp.float32) * 0.1      # (Cin, C1)
    w2_hwio = jax.random.normal(k[1], (3, 3, c1, c2), jnp.float32) * 0.1
    g1 = 1.0 + 0.1 * jax.random.normal(k[2], (c1,), jnp.float32)
    be1 = 0.1 * jax.random.normal(k[3], (c1,), jnp.float32)
    m1 = 0.1 * jax.random.normal(k[4], (c1,), jnp.float32)
    v1 = jnp.abs(jax.random.normal(k[5], (c1,), jnp.float32)) + 0.5
    g2 = 1.0 + 0.1 * jax.random.normal(k[6], (c2,), jnp.float32)
    be2 = 0.1 * jax.random.normal(k[7], (c2,), jnp.float32)
    m2 = 0.1 * jax.random.normal(k[8], (c2,), jnp.float32)
    v2 = jnp.abs(jax.random.normal(k[9], (c2,), jnp.float32)) + 0.5
    s1 = g1 / jnp.sqrt(v1 + eps)
    b1 = be1 - m1 * s1
    s2 = g2 / jnp.sqrt(v2 + eps)
    b2 = be2 - m2 * s2
    return {
        "w1": w1,
        "s1": s1.reshape(1, c1),
        "b1": b1.reshape(1, c1),
        "w2": w2_hwio.reshape(9, c1, c2),
        "s2": s2.reshape(1, c2),
        "b2": b2.reshape(1, c2),
    }


def reference_forward(x_nchw, params):
    """Pure-JAX f32 reference (mirrors the PyTorch forward, eval-mode BN)."""
    c2 = params["w2"].shape[2]
    w1_oihw = jnp.transpose(params["w1"], (1, 0))[:, :, None, None]      # (C1,Cin,1,1)
    w2_oihw = jnp.transpose(params["w2"].reshape(3, 3, -1, c2),
                            (3, 2, 0, 1))                                # (C2,C1,3,3)
    dn = ("NCHW", "OIHW", "NCHW")
    h = jax.lax.conv_general_dilated(x_nchw, w1_oihw, (1, 1), "VALID",
                                     dimension_numbers=dn)
    h = h * params["s1"].reshape(1, -1, 1, 1) + params["b1"].reshape(1, -1, 1, 1)
    h = jnp.where(h >= 0, h, 0.1 * h)
    o = jax.lax.conv_general_dilated(h, w2_oihw, (1, 1), ((1, 1), (1, 1)),
                                     dimension_numbers=dn)
    o = o * params["s2"].reshape(1, -1, 1, 1) + params["b2"].reshape(1, -1, 1, 1)
    o = jnp.where(o >= 0, o, 0.1 * o)
    return o + x_nchw


if __name__ == "__main__":
    key = jax.random.PRNGKey(0)
    kx, kp = jax.random.split(key)

    N, Cin, H, W = 2, 4, 16, 16
    planes = (2, 4)                      # (planes[0], planes[1]); planes[1] == Cin

    x = jax.random.normal(kx, (N, Cin, H, W), jnp.float32)
    params = make_params(kp, Cin, planes)

    out = basic_block_forward(x, params)
    out = jax.block_until_ready(out)

    ref = reference_forward(x, params)
    assert out.shape == (N, Cin, H, W)
    # bf16 MXU operands (f32 accumulation) -> slightly looser tolerance vs f32 ref.
    assert jnp.allclose(out, ref, rtol=2e-2, atol=2e-2), "mismatch vs reference"

    print("KERNEL_OK")
</pallas_src>

<mosaic_0001>
module attributes {stable_mosaic.version = 11 : i64} {
  func.func @_basic_block_kernel(%arg0: i32, %arg1: memref<1x448x4xf32, #tpu.memory_space<vmem>>, %arg2: memref<4x2xbf16, #tpu.memory_space<vmem>>, %arg3: memref<1x2xf32, #tpu.memory_space<vmem>>, %arg4: memref<9x2x4xbf16, #tpu.memory_space<vmem>>, %arg5: memref<1x4xf32, #tpu.memory_space<vmem>>, %arg6: memref<448x1xf32, #tpu.memory_space<vmem>>, %arg7: memref<1x384x4xf32, #tpu.memory_space<vmem>>, %arg8: memref<448x2xbf16, #tpu.memory_space<vmem>>, %arg9: memref<384x4xf32, #tpu.memory_space<vmem>>) attributes {dimension_semantics = [#tpu.dimension_semantics<parallel>], iteration_bounds = array<i64: 2>, scalar_prefetch = 0 : i64, scratch_operands = 2 : i64, tpu.core_type = #tpu.core_type<tc>, window_params = [{transform_indices = @transform_0, window_bounds = array<i64: 1, 448, 4>}, {pipeline_mode = #tpu.pipeline_mode<synchronous>, transform_indices = @transform_1, window_bounds = array<i64: 4, 2>}, {pipeline_mode = #tpu.pipeline_mode<synchronous>, transform_indices = @transform_2, window_bounds = array<i64: 1, 2>}, {pipeline_mode = #tpu.pipeline_mode<synchronous>, transform_indices = @transform_3, window_bounds = array<i64: 9, 2, 4>}, {pipeline_mode = #tpu.pipeline_mode<synchronous>, transform_indices = @transform_4, window_bounds = array<i64: 1, 4>}, {pipeline_mode = #tpu.pipeline_mode<synchronous>, transform_indices = @transform_5, window_bounds = array<i64: 448, 1>}, {transform_indices = @transform_6, window_bounds = array<i64: 1, 384, 4>}]} {
    %c0 = arith.constant 0 : index
    %c0_0 = arith.constant 0 : index
    %c0_1 = arith.constant 0 : index
    %0 = vector.load %arg1[%c0, %c0_0, %c0_1] : memref<1x448x4xf32, #tpu.memory_space<vmem>>, vector<1x448x4xf32>
    %1 = vector.shape_cast %0 : vector<1x448x4xf32> to vector<448x4xf32>
    %2 = arith.truncf %1 : vector<448x4xf32> to vector<448x4xbf16>
    %c0_2 = arith.constant 0 : index
    %c0_3 = arith.constant 0 : index
    %3 = vector.load %arg2[%c0_2, %c0_3] : memref<4x2xbf16, #tpu.memory_space<vmem>>, vector<4x2xbf16>
    %cst = arith.constant dense<0.000000e+00> : vector<448x2xf32>
    %4 = tpu.matmul %2, %3, %cst {dimension_numbers = #tpu.dot_dimension_numbers<[1], [0], [0], [1], [0, 0, 1, 1], [], []>} : vector<448x4xbf16>, vector<4x2xbf16>, vector<448x2xf32> -> vector<448x2xf32>
    %c0_4 = arith.constant 0 : index
    %c0_5 = arith.constant 0 : index
    %5 = vector.load %arg3[%c0_4, %c0_5] : memref<1x2xf32, #tpu.memory_space<vmem>>, vector<1x2xf32>
    %6 = vector.broadcast %5 : vector<1x2xf32> to vector<448x2xf32>
    %7 = arith.addf %4, %6 : vector<448x2xf32>
    %cst_6 = arith.constant 0.000000e+00 : f32
    %8 = vector.broadcast %cst_6 : f32 to vector<448x2xf32>
    %9 = arith.cmpf oge, %7, %8 : vector<448x2xf32>
    %cst_7 = arith.constant 1.000000e-01 : f32
    %10 = vector.broadcast %cst_7 : f32 to vector<448x2xf32>
    %11 = arith.mulf %10, %7 : vector<448x2xf32>
    %12 = arith.select %9, %7, %11 : vector<448x2xi1>, vector<448x2xf32>
    %c0_8 = arith.constant 0 : index
    %c0_9 = arith.constant 0 : index
    %13 = vector.load %arg6[%c0_8, %c0_9] : memref<448x1xf32, #tpu.memory_space<vmem>>, vector<448x1xf32>
    %14 = vector.broadcast %13 : vector<448x1xf32> to vector<448x2xf32>
    %15 = arith.mulf %12, %14 : vector<448x2xf32>
    %16 = arith.truncf %15 : vector<448x2xf32> to vector<448x2xbf16>
    %c0_10 = arith.constant 0 : index
    %c0_11 = arith.constant 0 : index
    %17 = vector.load %arg8[%c0_10, %c0_11] : memref<448x2xbf16, #tpu.memory_space<vmem>>, vector<448x2xbf16>
    tpu.vector_store %arg8[%c0_10, %c0_11], %16 {strides = array<i32>} : memref<448x2xbf16, #tpu.memory_space<vmem>>, vector<448x2xbf16>,
    %cst_12 = arith.constant 0.000000e+00 : f32
    %18 = vector.broadcast %cst_12 : f32 to vector<384x4xf32>
    %c0_13 = arith.constant 0 : index
    %c0_14 = arith.constant 0 : index
    %19 = vector.load %arg9[%c0_13, %c0_14] : memref<384x4xf32, #tpu.memory_space<vmem>>, vector<384x4xf32>
    tpu.vector_store %arg9[%c0_13, %c0_14], %18 {strides = array<i32>} : memref<384x4xf32, #tpu.memory_space<vmem>>, vector<384x4xf32>,
    %c0_15 = arith.constant 0 : index
    %c0_16 = arith.constant 0 : index
    %20 = vector.load %arg9[%c0_15, %c0_16] : memref<384x4xf32, #tpu.memory_space<vmem>>, vector<384x4xf32>
    %c7 = arith.constant 7 : index
    %c0_17 = arith.constant 0 : index
    %21 = vector.load %arg8[%c7, %c0_17] : memref<448x2xbf16, #tpu.memory_space<vmem>>, vector<384x2xbf16>
    %c0_18 = arith.constant 0 : index
    %c0_19 = arith.constant 0 : index
    %c0_20 = arith.constant 0 : index
    %22 = vector.load %arg4[%c0_18, %c0_19, %c0_20] : memref<9x2x4xbf16, #tpu.memory_space<vmem>>, vector<1x2x4xbf16>
    %23 = vector.shape_cast %22 : vector<1x2x4xbf16> to vector<2x4xbf16>
    %cst_21 = arith.constant dense<0.000000e+00> : vector<384x4xf32>
    %24 = tpu.matmul %21, %23, %cst_21 {dimension_numbers = #tpu.dot_dimension_numbers<[1], [0], [0], [1], [0, 0, 1, 1], [], []>} : vector<384x2xbf16>, vector<2x4xbf16>, vector<384x4xf32> -> vector<384x4xf32>
    %25 = arith.addf %20, %24 : vector<384x4xf32>
    %c0_22 = arith.constant 0 : index
    %c0_23 = arith.constant 0 : index
    %26 = vector.load %arg9[%c0_22, %c0_23] : memref<384x4xf32, #tpu.memory_space<vmem>>, vector<384x4xf32>
    tpu.vector_store %arg9[%c0_22, %c0_23], %25 {strides = array<i32>} : memref<384x4xf32, #tpu.memory_space<vmem>>, vector<384x4xf32>,
    %c0_24 = arith.constant 0 : index
    %c0_25 = arith.constant 0 : index
    %27 = vector.load %arg9[%c0_24, %c0_25] : memref<384x4xf32, #tpu.memory_space<vmem>>, vector<384x4xf32>
    %c8 = arith.constant 8 : index
    %c0_26 = arith.constant 0 : index
    %28 = vector.load %arg8[%c8, %c0_26] : memref<448x2xbf16, #tpu.memory_space<vmem>>, vector<384x2xbf16>
    %c1 = arith.constant 1 : index
    %c0_27 = arith.constant 0 : index
    %c0_28 = arith.constant 0 : index
    %29 = vector.load %arg4[%c1, %c0_27, %c0_28] : memref<9x2x4xbf16, #tpu.memory_space<vmem>>, vector<1x2x4xbf16>
    %30 = vector.shape_cast %29 : vector<1x2x4xbf16> to vector<2x4xbf16>
    %cst_29 = arith.constant dense<0.000000e+00> : vector<384x4xf32>
    %31 = tpu.matmul %28, %30, %cst_29 {dimension_numbers = #tpu.dot_dimension_numbers<[1], [0], [0], [1], [0, 0, 1, 1], [], []>} : vector<384x2xbf16>, vector<2x4xbf16>, vector<384x4xf32> -> vector<384x4xf32>
    %32 = arith.addf %27, %31 : vector<384x4xf32>
    %c0_30 = arith.constant 0 : index
    %c0_31 = arith.constant 0 : index
    %33 = vector.load %arg9[%c0_30, %c0_31] : memref<384x4xf32, #tpu.memory_space<vmem>>, vector<384x4xf32>
    tpu.vector_store %arg9[%c0_30, %c0_31], %32 {strides = array<i32>} : memref<384x4xf32, #tpu.memory_space<vmem>>, vector<384x4xf32>,
    %c0_32 = arith.constant 0 : index
    %c0_33 = arith.constant 0 : index
    %34 = vector.load %arg9[%c0_32, %c0_33] : memref<384x4xf32, #tpu.memory_space<vmem>>, vector<384x4xf32>
    %c9 = arith.constant 9 : index
    %c0_34 = arith.constant 0 : index
    %35 = vector.load %arg8[%c9, %c0_34] : memref<448x2xbf16, #tpu.memory_space<vmem>>, vector<384x2xbf16>
    %c2 = arith.constant 2 : index
    %c0_35 = arith.constant 0 : index
    %c0_36 = arith.constant 0 : index
    %36 = vector.load %arg4[%c2, %c0_35, %c0_36] : memref<9x2x4xbf16, #tpu.memory_space<vmem>>, vector<1x2x4xbf16>
    %37 = vector.shape_cast %36 : vector<1x2x4xbf16> to vector<2x4xbf16>
    %cst_37 = arith.constant dense<0.000000e+00> : vector<384x4xf32>
    %38 = tpu.matmul %35, %37, %cst_37 {dimension_numbers = #tpu.dot_dimension_numbers<[1], [0], [0], [1], [0, 0, 1, 1], [], []>} : vector<384x2xbf16>, vector<2x4xbf16>, vector<384x4xf32> -> vector<384x4xf32>
    %39 = arith.addf %34, %38 : vector<384x4xf32>
    %c0_38 = arith.constant 0 : index
    %c0_39 = arith.constant 0 : index
    %40 = vector.load %arg9[%c0_38, %c0_39] : memref<384x4xf32, #tpu.memory_space<vmem>>, vector<384x4xf32>
    tpu.vector_store %arg9[%c0_38, %c0_39], %39 {strides = array<i32>} : memref<384x4xf32, #tpu.memory_space<vmem>>, vector<384x4xf32>,
    %c0_40 = arith.constant 0 : index
    %c0_41 = arith.constant 0 : index
    %41 = vector.load %arg9[%c0_40, %c0_41] : memref<384x4xf32, #tpu.memory_space<vmem>>, vector<384x4xf32>
    %c31 = arith.constant 31 : index
    %c0_42 = arith.constant 0 : index
    %42 = vector.load %arg8[%c31, %c0_42] : memref<448x2xbf16, #tpu.memory_space<vmem>>, vector<384x2xbf16>
    %c3 = arith.constant 3 : index
    %c0_43 = arith.constant 0 : index
    %c0_44 = arith.constant 0 : index
    %43 = vector.load %arg4[%c3, %c0_43, %c0_44] : memref<9x2x4xbf16, #tpu.memory_space<vmem>>, vector<1x2x4xbf16>
    %44 = vector.shape_cast %43 : vector<1x2x4xbf16> to vector<2x4xbf16>
    %cst_45 = arith.constant dense<0.000000e+00> : vector<384x4xf32>
    %45 = tpu.matmul %42, %44, %cst_45 {dimension_numbers = #tpu.dot_dimension_numbers<[1], [0], [0], [1], [0, 0, 1, 1], [], []>} : vector<384x2xbf16>, vector<2x4xbf16>, vector<384x4xf32> -> vector<384x4xf32>
    %46 = arith.addf %41, %45 : vector<384x4xf32>
    %c0_46 = arith.constant 0 : index
    %c0_47 = arith.constant 0 : index
    %47 = vector.load %arg9[%c0_46, %c0_47] : memref<384x4xf32, #tpu.memory_space<vmem>>, vector<384x4xf32>
    tpu.vector_store %arg9[%c0_46, %c0_47], %46 {strides = array<i32>} : memref<384x4xf32, #tpu.memory_space<vmem>>, vector<384x4xf32>,
    %c0_48 = arith.constant 0 : index
    %c0_49 = arith.constant 0 : index
    %48 = vector.load %arg9[%c0_48, %c0_49] : memref<384x4xf32, #tpu.memory_space<vmem>>, vector<384x4xf32>
    %c32 = arith.constant 32 : index
    %c0_50 = arith.constant 0 : index
    %49 = vector.load %arg8[%c32, %c0_50] : memref<448x2xbf16, #tpu.memory_space<vmem>>, vector<384x2xbf16>
    %c4 = arith.constant 4 : index
    %c0_51 = arith.constant 0 : index
    %c0_52 = arith.constant 0 : index
    %50 = vector.load %arg4[%c4, %c0_51, %c0_52] : memref<9x2x4xbf16, #tpu.memory_space<vmem>>, vector<1x2x4xbf16>
    %51 = vector.shape_cast %50 : vector<1x2x4xbf16> to vector<2x4xbf16>
    %cst_53 = arith.constant dense<0.000000e+00> : vector<384x4xf32>
    %52 = tpu.matmul %49, %51, %cst_53 {dimension_numbers = #tpu.dot_dimension_numbers<[1], [0], [0], [1], [0, 0, 1, 1], [], []>} : vector<384x2xbf16>, vector<2x4xbf16>, vector<384x4xf32> -> vector<384x4xf32>
    %53 = arith.addf %48, %52 : vector<384x4xf32>
    %c0_54 = arith.constant 0 : index
    %c0_55 = arith.constant 0 : index
    %54 = vector.load %arg9[%c0_54, %c0_55] : memref<384x4xf32, #tpu.memory_space<vmem>>, vector<384x4xf32>
    tpu.vector_store %arg9[%c0_54, %c0_55], %53 {strides = array<i32>} : memref<384x4xf32, #tpu.memory_space<vmem>>, vector<384x4xf32>,
    %c0_56 = arith.constant 0 : index
    %c0_57 = arith.constant 0 : index
    %55 = vector.load %arg9[%c0_56, %c0_57] : memref<384x4xf32, #tpu.memory_space<vmem>>, vector<384x4xf32>
    %c33 = arith.constant 33 : index
    %c0_58 = arith.constant 0 : index
    %56 = vector.load %arg8[%c33, %c0_58] : memref<448x2xbf16, #tpu.memory_space<vmem>>, vector<384x2xbf16>
    %c5 = arith.constant 5 : index
    %c0_59 = arith.constant 0 : index
    %c0_60 = arith.constant 0 : index
    %57 = vector.load %arg4[%c5, %c0_59, %c0_60] : memref<9x2x4xbf16, #tpu.memory_space<vmem>>, vector<1x2x4xbf16>
    %58 = vector.shape_cast %57 : vector<1x2x4xbf16> to vector<2x4xbf16>
    %cst_61 = arith.constant dense<0.000000e+00> : vector<384x4xf32>
    %59 = tpu.matmul %56, %58, %cst_61 {dimension_numbers = #tpu.dot_dimension_numbers<[1], [0], [0], [1], [0, 0, 1, 1], [], []>} : vector<384x2xbf16>, vector<2x4xbf16>, vector<384x4xf32> -> vector<384x4xf32>
    %60 = arith.addf %55, %59 : vector<384x4xf32>
    %c0_62 = arith.constant 0 : index
    %c0_63 = arith.constant 0 : index
    %61 = vector.load %arg9[%c0_62, %c0_63] : memref<384x4xf32, #tpu.memory_space<vmem>>, vector<384x4xf32>
    tpu.vector_store %arg9[%c0_62, %c0_63], %60 {strides = array<i32>} : memref<384x4xf32, #tpu.memory_space<vmem>>, vector<384x4xf32>,
    %c0_64 = arith.constant 0 : index
    %c0_65 = arith.constant 0 : index
    %62 = vector.load %arg9[%c0_64, %c0_65] : memref<384x4xf32, #tpu.memory_space<vmem>>, vector<384x4xf32>
    %c55 = arith.constant 55 : index
    %c0_66 = arith.constant 0 : index
    %63 = vector.load %arg8[%c55, %c0_66] : memref<448x2xbf16, #tpu.memory_space<vmem>>, vector<384x2xbf16>
    %c6 = arith.constant 6 : index
    %c0_67 = arith.constant 0 : index
    %c0_68 = arith.constant 0 : index
    %64 = vector.load %arg4[%c6, %c0_67, %c0_68] : memref<9x2x4xbf16, #tpu.memory_space<vmem>>, vector<1x2x4xbf16>
    %65 = vector.shape_cast %64 : vector<1x2x4xbf16> to vector<2x4xbf16>
    %cst_69 = arith.constant dense<0.000000e+00> : vector<384x4xf32>
    %66 = tpu.matmul %63, %65, %cst_69 {dimension_numbers = #tpu.dot_dimension_numbers<[1], [0], [0], [1], [0, 0, 1, 1], [], []>} : vector<384x2xbf16>, vector<2x4xbf16>, vector<384x4xf32> -> vector<384x4xf32>
    %67 = arith.addf %62, %66 : vector<384x4xf32>
    %c0_70 = arith.constant 0 : index
    %c0_71 = arith.constant 0 : index
    %68 = vector.load %arg9[%c0_70, %c0_71] : memref<384x4xf32, #tpu.memory_space<vmem>>, vector<384x4xf32>
    tpu.vector_store %arg9[%c0_70, %c0_71], %67 {strides = array<i32>} : memref<384x4xf32, #tpu.memory_space<vmem>>, vector<384x4xf32>,
    %c0_72 = arith.constant 0 : index
    %c0_73 = arith.constant 0 : index
    %69 = vector.load %arg9[%c0_72, %c0_73] : memref<384x4xf32, #tpu.memory_space<vmem>>, vector<384x4xf32>
    %c56 = arith.constant 56 : index
    %c0_74 = arith.constant 0 : index
    %70 = vector.load %arg8[%c56, %c0_74] : memref<448x2xbf16, #tpu.memory_space<vmem>>, vector<384x2xbf16>
    %c7_75 = arith.constant 7 : index
    %c0_76 = arith.constant 0 : index
    %c0_77 = arith.constant 0 : index
    %71 = vector.load %arg4[%c7_75, %c0_76, %c0_77] : memref<9x2x4xbf16, #tpu.memory_space<vmem>>, vector<1x2x4xbf16>
    %72 = vector.shape_cast %71 : vector<1x2x4xbf16> to vector<2x4xbf16>
    %cst_78 = arith.constant dense<0.000000e+00> : vector<384x4xf32>
    %73 = tpu.matmul %70, %72, %cst_78 {dimension_numbers = #tpu.dot_dimension_numbers<[1], [0], [0], [1], [0, 0, 1, 1], [], []>} : vector<384x2xbf16>, vector<2x4xbf16>, vector<384x4xf32> -> vector<384x4xf32>
    %74 = arith.addf %69, %73 : vector<384x4xf32>
    %c0_79 = arith.constant 0 : index
    %c0_80 = arith.constant 0 : index
    %75 = vector.load %arg9[%c0_79, %c0_80] : memref<384x4xf32, #tpu.memory_space<vmem>>, vector<384x4xf32>
    tpu.vector_store %arg9[%c0_79, %c0_80], %74 {strides = array<i32>} : memref<384x4xf32, #tpu.memory_space<vmem>>, vector<384x4xf32>,
    %c0_81 = arith.constant 0 : index
    %c0_82 = arith.constant 0 : index
    %76 = vector.load %arg9[%c0_81, %c0_82] : memref<384x4xf32, #tpu.memory_space<vmem>>, vector<384x4xf32>
    %c57 = arith.constant 57 : index
    %c0_83 = arith.constant 0 : index
    %77 = vector.load %arg8[%c57, %c0_83] : memref<448x2xbf16, #tpu.memory_space<vmem>>, vector<384x2xbf16>
    %c8_84 = arith.constant 8 : index
    %c0_85 = arith.constant 0 : index
    %c0_86 = arith.constant 0 : index
    %78 = vector.load %arg4[%c8_84, %c0_85, %c0_86] : memref<9x2x4xbf16, #tpu.memory_space<vmem>>, vector<1x2x4xbf16>
    %79 = vector.shape_cast %78 : vector<1x2x4xbf16> to vector<2x4xbf16>
    %cst_87 = arith.constant dense<0.000000e+00> : vector<384x4xf32>
    %80 = tpu.matmul %77, %79, %cst_87 {dimension_numbers = #tpu.dot_dimension_numbers<[1], [0], [0], [1], [0, 0, 1, 1], [], []>} : vector<384x2xbf16>, vector<2x4xbf16>, vector<384x4xf32> -> vector<384x4xf32>
    %81 = arith.addf %76, %80 : vector<384x4xf32>
    %c0_88 = arith.constant 0 : index
    %c0_89 = arith.constant 0 : index
    %82 = vector.load %arg9[%c0_88, %c0_89] : memref<384x4xf32, #tpu.memory_space<vmem>>, vector<384x4xf32>
    tpu.vector_store %arg9[%c0_88, %c0_89], %81 {strides = array<i32>} : memref<384x4xf32, #tpu.memory_space<vmem>>, vector<384x4xf32>,
    %c0_90 = arith.constant 0 : index
    %c0_91 = arith.constant 0 : index
    %83 = vector.load %arg9[%c0_90, %c0_91] : memref<384x4xf32, #tpu.memory_space<vmem>>, vector<384x4xf32>
    %c0_92 = arith.constant 0 : index
    %c0_93 = arith.constant 0 : index
    %84 = vector.load %arg5[%c0_92, %c0_93] : memref<1x4xf32, #tpu.memory_space<vmem>>, vector<1x4xf32>
    %85 = vector.broadcast %84 : vector<1x4xf32> to vector<384x4xf32>
    %86 = arith.addf %83, %85 : vector<384x4xf32>
    %cst_94 = arith.constant 0.000000e+00 : f32
    %87 = vector.broadcast %cst_94 : f32 to vector<384x4xf32>
    %88 = arith.cmpf oge, %86, %87 : vector<384x4xf32>
    %cst_95 = arith.constant 1.000000e-01 : f32
    %89 = vector.broadcast %cst_95 : f32 to vector<384x4xf32>
    %90 = arith.mulf %89, %86 : vector<384x4xf32>
    %91 = arith.select %88, %86, %90 : vector<384x4xi1>, vector<384x4xf32>
    %c0_96 = arith.constant 0 : index
    %c32_97 = arith.constant 32 : index
    %c0_98 = arith.constant 0 : index
    %92 = vector.load %arg1[%c0_96, %c32_97, %c0_98] : memref<1x448x4xf32, #tpu.memory_space<vmem>>, vector<1x384x4xf32>
    %93 = vector.shape_cast %92 : vector<1x384x4xf32> to vector<384x4xf32>
    %94 = arith.addf %91, %93 : vector<384x4xf32>
    %c0_99 = arith.constant 0 : index
    %c0_100 = arith.constant 0 : index
    %c0_101 = arith.constant 0 : index
    %95 = vector.load %arg7[%c0_99, %c0_100, %c0_101] : memref<1x384x4xf32, #tpu.memory_space<vmem>>, vector<1x384x4xf32>
    %96 = vector.shape_cast %95 : vector<1x384x4xf32> to vector<384x4xf32>
    %97 = vector.shape_cast %94 : vector<384x4xf32> to vector<1x384x4xf32>
    tpu.vector_store %arg7[%c0_99, %c0_100, %c0_101], %97 {strides = array<i32>} : memref<1x384x4xf32, #tpu.memory_space<vmem>>, vector<1x384x4xf32>,
    return
  }
  func.func @transform_0(%arg0: i32) -> (i32, i32, i32) {
    %c0_i32 = arith.constant 0 : i32
    %c0_i32_0 = arith.constant 0 : i32
    %c0_i32_1 = arith.constant 0 : i32
    return %arg0, %c0_i32, %c0_i32_0 : i32, i32, i32
  }
  func.func @transform_1(%arg0: i32) -> (i32, i32) {
    %c0_i32 = arith.constant 0 : i32
    %c0_i32_0 = arith.constant 0 : i32
    %c0_i32_1 = arith.constant 0 : i32
    return %c0_i32, %c0_i32_0 : i32, i32
  }
  func.func @transform_2(%arg0: i32) -> (i32, i32) {
    %c0_i32 = arith.constant 0 : i32
    %c0_i32_0 = arith.constant 0 : i32
    %c0_i32_1 = arith.constant 0 : i32
    return %c0_i32, %c0_i32_0 : i32, i32
  }
  func.func @transform_3(%arg0: i32) -> (i32, i32, i32) {
    %c0_i32 = arith.constant 0 : i32
    %c0_i32_0 = arith.constant 0 : i32
    %c0_i32_1 = arith.constant 0 : i32
    %c0_i32_2 = arith.constant 0 : i32
    return %c0_i32, %c0_i32_0, %c0_i32_1 : i32, i32, i32
  }
  func.func @transform_4(%arg0: i32) -> (i32, i32) {
    %c0_i32 = arith.constant 0 : i32
    %c0_i32_0 = arith.constant 0 : i32
    %c0_i32_1 = arith.constant 0 : i32
    return %c0_i32, %c0_i32_0 : i32, i32
  }
  func.func @transform_5(%arg0: i32) -> (i32, i32) {
    %c0_i32 = arith.constant 0 : i32
    %c0_i32_0 = arith.constant 0 : i32
    %c0_i32_1 = arith.constant 0 : i32
    return %c0_i32, %c0_i32_0 : i32, i32
  }
  func.func @transform_6(%arg0: i32) -> (i32, i32, i32) {
    %c0_i32 = arith.constant 0 : i32
    %c0_i32_0 = arith.constant 0 : i32
    %c0_i32_1 = arith.constant 0 : i32
    return %arg0, %c0_i32, %c0_i32_0 : i32, i32, i32
  }
}

</mosaic_0001>

<bundles_post_ra>
// kernel: tpu_custom_call.1
= control target key start
LH: loop header
LB: loop body
LE: loop exit
PB: predicated region body
PF: predicated region fallthrough
CT: control target
= control target key end

     0   :  { %s8598_s21 = smov 0   ;;  %s11626_s0 = inlined_call_operand.vmem [shape: f32[2,448,4], index: 0, kind: input, shape index: {}]   ;;  %s11627_s1 = inlined_call_operand.vmem [shape: bf16[4,2], index: 1, kind: input, shape index: {}]   ;;  %s11628_s2 = inlined_call_operand.vmem [shape: f32[1,2], index: 2, kind: input, shape index: {}]   ;;  %s11629_s3 = inlined_call_operand.vmem [shape: bf16[9,2,4], index: 3, kind: input, shape index: {}]   ;;  %s11630_s4 = inlined_call_operand.vmem [shape: f32[1,4], index: 4, kind: input, shape index: {}]   ;;  %s11631_s5 = inlined_call_operand.vmem [shape: f32[448,1], index: 5, kind: input, shape index: {}]   ;;  %s11632_s6 = inlined_call_operand.vmem [shape: f32[2,384,4], index: 6, kind: output, shape index: {}]  }
   0x1 LB: > { %s7481_s22 = sadd.s32 4294967295, %s8559_s21   ;;  %p7485_p0 = scmp.ge.s32.totalorder %s8559_s21, 1  ;;  %s8559_s21 = sphi %s8598_s21, %s16_s21  }
   0x2   : > { %p212_p1 = scmp.lt.s32.totalorder %s8559_s21, 3 }
   0x4   : > { %p213_p2 = pnand %p7485_p0, %p212_p1 }
   0x6   : > { %216 = sbr.rel (%p213_p2) target bundleno = 1023 (0x3ff), region = 44 }
   0xd   : > { %v861_v0 = vld [vmem:[%s11631_s5 + $0x10] sm:$0xff]  ;;  %v859_v1 = vld [vmem:[%s11631_s5] sm:$0xff]  ;;  %vm430_vm0 = vcmask 1041408   ;;  %p242_p3 = scmp.lt.s32.totalorder %s7481_s22, 1  ;;  %v8561_v2 = vmov 0   ;;  %v862_v5 = vld [vmem:[%s11631_s5 + $0x18] sm:$0xff] }
   0xe   : > { %8532 = vset.pattern.permute.xlu1 %v8561_v2  ;;  %8531 = vset.pattern.permute.xlu0 %v8561_v2  ;;  %v337_v3 = vld [vmem:[%s11627_s1] sm:$0x3]  ;;  %v860_v6 = vld [vmem:[%s11631_s5 + $0x8] sm:$0xff]  ;;  %vm345_vm1 = vcmask 31744   ;;  %v866_v23 = vld [vmem:[%s11631_s5 + $0x38] sm:$0xff]  ;;  %vm1727_vm2 = vcmask 1040384  }
   0xf   : > { %927 = vperm.xlu1 %8532, %v861_v0   ;;  %917 = vperm.xlu0 %8531, %v859_v1   ;;  %v432_v4 = vsel %vm430_vm0, %v337_v3, 0  ;;  %s11842_s22 = smov (!%p242_p3, %s7481_s22), 1  ;;  %v864_v7 = vld [vmem:[%s11631_s5 + $0x28] sm:$0xff]  ;;  %v863_v8 = vld [vmem:[%s11631_s5 + $0x20] sm:$0xff]  ;;  %v865_v24 = vld [vmem:[%s11631_s5 + $0x30] sm:$0xff]  ;;  %vm1279_vm3 = vcmask 15360  }
  0x10   : > { %8508 = vmatprep.subr.msk.bf16.mxu0 %vm430_vm0, %v337_v3  ;;  %8509 = vmatprep.subr.msk.bf16.mxu1 %vm430_vm0, %v337_v3  ;;  %s8519_s9 = smul.u32 448, %s11842_s22  ;;  %v868_v30 = vld [vmem:[%s11631_s5 + $0x48] sm:$0xff]  ;;  %v867_v31 = vld [vmem:[%s11631_s5 + $0x40] sm:$0xff]  ;;  %v870_v34 = vld [vmem:[%s11631_s5 + $0x58] sm:$0xff] }
  0x11   : > { %7999 = vmatpush3.bf16.msra.mxu0 %v432_v4  ;;  %8507 = vmatpush3.bf16.msra.mxu1 %v432_v4  ;;  %v869_v35 = vld [vmem:[%s11631_s5 + $0x50] sm:$0xff]  ;;  %v872_v40 = vld [vmem:[%s11631_s5 + $0x68] sm:$0xff]  ;;  %v871_v41 = vld [vmem:[%s11631_s5 + $0x60] sm:$0xff]  ;;  %s8520_s19 = smul.u32 384, %s11842_s22 }
  0x12   : > { %s8633_s16 = scalar_lea.vmem %s11626_s0, %s8519_s9  ;;  %v874_v44 = vld [vmem:[%s11631_s5 + $0x78] sm:$0xff]  ;;  %v873_v45 = vld [vmem:[%s11631_s5 + $0x70] sm:$0xff]  ;;  %v876_v50 = vld [vmem:[%s11631_s5 + $0x88] sm:$0xff] }
  0x13   : > { %932 = vperm.xlu1 %8532, %v862_v5   ;;  %922 = vperm.xlu0 %8531, %v860_v6   ;;  %v253_v9 = vld [vmem:[%s8633_s16] sm:$0xff]  ;;  %v254_v10 = vld [vmem:[%s8633_s16 + $0x8] sm:$0xff]  ;;  %v255_v11 = vld [vmem:[%s8633_s16 + $0x10] sm:$0xff]  ;;  %s11303_s23 = scalar_lea.vmem %s11632_s6, %s8520_s19 }
  0x14   : > { %v309_v12 = vpack.c.bf16 %v254_v10, %v253_v9  ;;  %v256_v13 = vld [vmem:[%s8633_s16 + $0x18] sm:$0xff]  ;;  %v305_v14 = vld [vmem:[%s8633_s16 + $0x1a0] sm:$0xff]  ;;  %v306_v15 = vld [vmem:[%s8633_s16 + $0x1a8] sm:$0xff] }
  0x15   : > { %v310_v16 = vpack.c.bf16 %v256_v13, %v255_v11  ;;  %v335_v17 = vpack.c.bf16 %v306_v15, %v305_v14  ;;  %v307_v18 = vld [vmem:[%s8633_s16 + $0x1b0] sm:$0xff]  ;;  %v308_v19 = vld [vmem:[%s8633_s16 + $0x1b8] sm:$0xff]  ;;  %v257_v20 = vld [vmem:[%s8633_s16 + $0x20] sm:$0xff] }
  0x16   : > { %v336_v21 = vpack.c.bf16 %v308_v19, %v307_v18  ;;  %v258_v22 = vld [vmem:[%s8633_s16 + $0x28] sm:$0xff]  ;;  %8000 = vmatprep.mubr.msk.bf16.mxu0 %vm345_vm1, %v309_v12  ;;  %v259_v26 = vld [vmem:[%s8633_s16 + $0x30] sm:$0xff]  ;;  %v260_v27 = vld [vmem:[%s8633_s16 + $0x38] sm:$0xff] }
  0x17   : > { %942 = vperm.xlu1 %8532, %v864_v7   ;;  %937 = vperm.xlu0 %8531, %v863_v8   ;;  %v311_v25 = vpack.c.bf16 %v258_v22, %v257_v20  ;;  %v261_v28 = vld [vmem:[%s8633_s16 + $0x40] sm:$0xff]  ;;  %v262_v29 = vld [vmem:[%s8633_s16 + $0x48] sm:$0xff]  ;;  %v312_v32 = vpack.c.bf16 %v260_v27, %v259_v26  ;;  %v263_v36 = vld [vmem:[%s8633_s16 + $0x50] sm:$0xff] }
  0x18   : > { %8052 = vmatprep.mubr.msk.bf16.mxu1 %vm345_vm1, %v335_v17  ;;  %8001 = vmatmul.mubr.msk.bf16.vlgmr.msra.gmra.mrb[0].mxu0 %vm345_vm1, %v310_v16  ;;  %v313_v33 = vpack.c.bf16 %v262_v29, %v261_v28  ;;  %v264_v37 = vld [vmem:[%s8633_s16 + $0x58] sm:$0xff]  ;;  %v265_v38 = vld [vmem:[%s8633_s16 + $0x60] sm:$0xff]  ;;  %v266_v39 = vld [vmem:[%s8633_s16 + $0x68] sm:$0xff] }
  0x19   : > { %8053 = vmatmul.mubr.msk.bf16.vlgmr.msra.gmra.mrb[0].mxu1 %vm345_vm1, %v336_v21  ;;  %8004 = vmatprep.mubr.msk.bf16.mxu0 %vm345_vm1, %v311_v25  ;;  %v314_v42 = vpack.c.bf16 %v264_v37, %v263_v36  ;;  %v315_v43 = vpack.c.bf16 %v266_v39, %v265_v38  ;;  %v267_v46 = vld [vmem:[%s8633_s16 + $0x70] sm:$0xff]  ;;  %v268_v47 = vld [vmem:[%s8633_s16 + $0x78] sm:$0xff]  ;;  %v269_v48 = vld [vmem:[%s8633_s16 + $0x80] sm:$0xff] }
  0x1a   : > { %v270_v49 = vld [vmem:[%s8633_s16 + $0x88] sm:$0xff]  ;;  %v875_v51 = vld [vmem:[%s11631_s5 + $0x80] sm:$0xff]  ;;  %v316_v52 = vpack.c.bf16 %v268_v47, %v267_v46  ;;  %v878_v54 = vld [vmem:[%s11631_s5 + $0x98] sm:$0xff] }
  0x1b   : > { %952 = vperm.xlu1 %8532, %v866_v23   ;;  %947 = vperm.xlu0 %8531, %v865_v24   ;;  %v317_v53 = vpack.c.bf16 %v270_v49, %v269_v48  ;;  %v877_v55 = vld [vmem:[%s11631_s5 + $0x90] sm:$0xff]  ;;  %v272_v57 = vld [vmem:[%s8633_s16 + $0x98] sm:$0xff]  ;;  %v273_v58 = vld [vmem:[%s8633_s16 + $0xa0] sm:$0xff] }
  0x1c   : > { %v271_v56 = vld [vmem:[%s8633_s16 + $0x90] sm:$0xff]  ;;  %v274_v59 = vld [vmem:[%s8633_s16 + $0xa8] sm:$0xff]  ;;  %v879_v61 = vld [vmem:[%s11631_s5 + $0xa0] sm:$0xff] }
  0x1d   : > { %v880_v60 = vld [vmem:[%s11631_s5 + $0xa8] sm:$0xff]  ;;  %v318_v62 = vpack.c.bf16 %v272_v57, %v271_v56  ;;  %v319_v63 = vpack.c.bf16 %v274_v59, %v273_v58  ;;  %v882_v0 = vld [vmem:[%s11631_s5 + $0xb8] sm:$0xff]  ;;  %v881_v1 = vld [vmem:[%s11631_s5 + $0xb0] sm:$0xff] }
  0x1e   : > { %v275_v2 = vld [vmem:[%s8633_s16 + $0xb0] sm:$0xff]  ;;  %v276_v3 = vld [vmem:[%s8633_s16 + $0xb8] sm:$0xff]  ;;  %v277_v4 = vld [vmem:[%s8633_s16 + $0xc0] sm:$0xff] }
  0x1f   : > { %962 = vperm.xlu1 %8532, %v868_v30   ;;  %957 = vperm.xlu0 %8531, %v867_v31   ;;  %v278_v5 = vld [vmem:[%s8633_s16 + $0xc8] sm:$0xff]  ;;  %v883_v7 = vld [vmem:[%s11631_s5 + $0xc0] sm:$0xff]  ;;  %v320_v8 = vpack.c.bf16 %v276_v3, %v275_v2  ;;  %v886_v10 = vld [vmem:[%s11631_s5 + $0xd8] sm:$0xff] }
  0x20   : > { %8005 = vmatmul.mubr.msk.bf16.gmra.mrb[4].mxu0 %vm345_vm1, %v312_v32  ;;  %v884_v6 = vld [vmem:[%s11631_s5 + $0xc8] sm:$0xff]  ;;  %v321_v9 = vpack.c.bf16 %v278_v5, %v277_v4  ;;  %v885_v11 = vld [vmem:[%s11631_s5 + $0xd0] sm:$0xff]  ;;  %v280_v13 = vld [vmem:[%s8633_s16 + $0xd8] sm:$0xff] }
  0x21   : > { %8008 = vmatprep.mubr.msk.bf16.mxu0 %vm345_vm1, %v313_v33  ;;  %v279_v12 = vld [vmem:[%s8633_s16 + $0xd0] sm:$0xff]  ;;  %v281_v14 = vld [vmem:[%s8633_s16 + $0xe0] sm:$0xff]  ;;  %v282_v15 = vld [vmem:[%s8633_s16 + $0xe8] sm:$0xff] }
  0x22   : > { %v888_v16 = vld [vmem:[%s11631_s5 + $0xe8] sm:$0xff]  ;;  %v887_v17 = vld [vmem:[%s11631_s5 + $0xe0] sm:$0xff]  ;;  %v322_v18 = vpack.c.bf16 %v280_v13, %v279_v12  ;;  %v323_v19 = vpack.c.bf16 %v282_v15, %v281_v14  ;;  %v890_v20 = vld [vmem:[%s11631_s5 + $0xf8] sm:$0xff] }
  0x23   : > { %972 = vperm.xlu1 %8532, %v870_v34   ;;  %967 = vperm.xlu0 %8531, %v869_v35   ;;  %v889_v21 = vld [vmem:[%s11631_s5 + $0xf0] sm:$0xff]  ;;  %v284_v23 = vld [vmem:[%s8633_s16 + $0xf8] sm:$0xff]  ;;  %v285_v24 = vld [vmem:[%s8633_s16 + $0x100] sm:$0xff] }
  0x24   : > { %v283_v22 = vld [vmem:[%s8633_s16 + $0xf0] sm:$0xff]  ;;  %v286_v25 = vld [vmem:[%s8633_s16 + $0x108] sm:$0xff]  ;;  %v891_v27 = vld [vmem:[%s11631_s5 + $0x100] sm:$0xff] }
  0x25   : > { %v892_v26 = vld [vmem:[%s11631_s5 + $0x108] sm:$0xff]  ;;  %v324_v28 = vpack.c.bf16 %v284_v23, %v283_v22  ;;  %v325_v29 = vpack.c.bf16 %v286_v25, %v285_v24  ;;  %v894_v30 = vld [vmem:[%s11631_s5 + $0x118] sm:$0xff]  ;;  %v893_v31 = vld [vmem:[%s11631_s5 + $0x110] sm:$0xff] }
  0x26   : > { %v287_v32 = vld [vmem:[%s8633_s16 + $0x110] sm:$0xff]  ;;  %v288_v33 = vld [vmem:[%s8633_s16 + $0x118] sm:$0xff]  ;;  %v289_v34 = vld [vmem:[%s8633_s16 + $0x120] sm:$0xff] }
  0x27   : > { %982 = vperm.xlu1 %8532, %v872_v40   ;;  %977 = vperm.xlu0 %8531, %v871_v41   ;;  %v290_v35 = vld [vmem:[%s8633_s16 + $0x128] sm:$0xff]  ;;  %v895_v37 = vld [vmem:[%s11631_s5 + $0x120] sm:$0xff]  ;;  %v326_v38 = vpack.c.bf16 %v288_v33, %v287_v32  ;;  %v898_v40 = vld [vmem:[%s11631_s5 + $0x138] sm:$0xff] }
  0x28   : > { %8009 = vmatmul.mubr.msk.bf16.gmra.mrb[8].mxu0 %vm345_vm1, %v314_v42  ;;  %v896_v36 = vld [vmem:[%s11631_s5 + $0x128] sm:$0xff]  ;;  %v327_v39 = vpack.c.bf16 %v290_v35, %v289_v34  ;;  %v897_v41 = vld [vmem:[%s11631_s5 + $0x130] sm:$0xff]  ;;  %v899_v47 = vld [vmem:[%s11631_s5 + $0x140] sm:$0xff] }
  0x29   : > { %8012 = vmatprep.mubr.msk.bf16.mxu0 %vm345_vm1, %v315_v43  ;;  %v291_v42 = vld [vmem:[%s8633_s16 + $0x130] sm:$0xff]  ;;  %v292_v43 = vld [vmem:[%s8633_s16 + $0x138] sm:$0xff]  ;;  %v900_v46 = vld [vmem:[%s11631_s5 + $0x148] sm:$0xff] }
  0x2a   : > { %v328_v48 = vpack.c.bf16 %v292_v43, %v291_v42  ;;  %v904_v56 = vld [vmem:[%s11631_s5 + $0x168] sm:$0xff]  ;;  %v903_v57 = vld [vmem:[%s11631_s5 + $0x160] sm:$0xff]  ;;  %v914_v13 = vld [vmem:[%s11631_s5 + $0x1b8] sm:$0xff] }
  0x2b   : > { %992 = vperm.xlu1 %8532, %v874_v44   ;;  %987 = vperm.xlu0 %8531, %v873_v45   ;;  %v293_v44 = vld [vmem:[%s8633_s16 + $0x140] sm:$0xff]  ;;  %v294_v45 = vld [vmem:[%s8633_s16 + $0x148] sm:$0xff]  ;;  %v913_v14 = vld [vmem:[%s11631_s5 + $0x1b0] sm:$0xff] }
  0x2c   : > { %v329_v49 = vpack.c.bf16 %v294_v45, %v293_v44  ;;  %v908_v2 = vld [vmem:[%s11631_s5 + $0x188] sm:$0xff]  ;;  %v907_v3 = vld [vmem:[%s11631_s5 + $0x180] sm:$0xff] }
  0x2d   : > { %v1429_v15 = vld [vmem:[%s11629_s3] sm:$0x1] }
  0x2e   : > { %8510 = vmatprep.subr.msk.bf16.mxu1 %vm1727_vm2, %v1429_v15 }
  0x2f   : > { %1002 = vperm.xlu1 %8532, %v876_v50   ;;  %997 = vperm.xlu0 %8531, %v875_v51   ;;  %v902_v50 = vld [vmem:[%s11631_s5 + $0x158] sm:$0xff]  ;;  %v901_v51 = vld [vmem:[%s11631_s5 + $0x150] sm:$0xff] }
  0x30   : > { %8013 = vmatmul.mubr.msk.bf16.gmra.mrb[12].mxu0 %vm345_vm1, %v316_v52  ;;  %v295_v52 = vld [vmem:[%s8633_s16 + $0x150] sm:$0xff] }
  0x31   : > { %8016 = vmatprep.mubr.msk.bf16.mxu0 %vm345_vm1, %v317_v53  ;;  %v296_v53 = vld [vmem:[%s8633_s16 + $0x158] sm:$0xff] }
  0x32   : > { %v330_v58 = vpack.c.bf16 %v296_v53, %v295_v52 }
  0x33   : > { %1012 = vperm.xlu1 %8532, %v878_v54   ;;  %1007 = vperm.xlu0 %8531, %v877_v55   ;;  %v297_v54 = vld [vmem:[%s8633_s16 + $0x160] sm:$0xff]  ;;  %v298_v55 = vld [vmem:[%s8633_s16 + $0x168] sm:$0xff] }
  0x34   : > { %v331_v59 = vpack.c.bf16 %v298_v55, %v297_v54 }
  0x37   : > { %1022 = vperm.xlu1 %8532, %v880_v60   ;;  %1017 = vperm.xlu0 %8531, %v879_v61   ;;  %v906_v60 = vld [vmem:[%s11631_s5 + $0x178] sm:$0xff]  ;;  %v905_v61 = vld [vmem:[%s11631_s5 + $0x170] sm:$0xff] }
  0x38   : > { %8017 = vmatmul.mubr.msk.bf16.gmra.mrb[16].mxu0 %vm345_vm1, %v318_v62  ;;  %v299_v62 = vld [vmem:[%s8633_s16 + $0x170] sm:$0xff] }
  0x39   : > { %8020 = vmatprep.mubr.msk.bf16.mxu0 %vm345_vm1, %v319_v63  ;;  %v300_v63 = vld [vmem:[%s8633_s16 + $0x178] sm:$0xff] }
  0x3a   : > { %v332_v4 = vpack.c.bf16 %v300_v63, %v299_v62 }
  0x3b   : > { %1032 = vperm.xlu1 %8532, %v882_v0   ;;  %1027 = vperm.xlu0 %8531, %v881_v1   ;;  %v301_v0 = vld [vmem:[%s8633_s16 + $0x180] sm:$0xff]  ;;  %v302_v1 = vld [vmem:[%s8633_s16 + $0x188] sm:$0xff] }
  0x3c   : > { %v333_v5 = vpack.c.bf16 %v302_v1, %v301_v0 }
  0x3f   : > { %1042 = vperm.xlu1 %8532, %v884_v6   ;;  %1037 = vperm.xlu0 %8531, %v883_v7   ;;  %v910_v6 = vld [vmem:[%s11631_s5 + $0x198] sm:$0xff]  ;;  %v909_v7 = vld [vmem:[%s11631_s5 + $0x190] sm:$0xff] }
  0x40   : > { %8021 = vmatmul.mubr.msk.bf16.gmra.mrb[20].mxu0 %vm345_vm1, %v320_v8  ;;  %v303_v8 = vld [vmem:[%s8633_s16 + $0x190] sm:$0xff] }
  0x41   : > { %8024 = vmatprep.mubr.msk.bf16.mxu0 %vm345_vm1, %v321_v9  ;;  %v304_v9 = vld [vmem:[%s8633_s16 + $0x198] sm:$0xff] }
  0x42   : > { %v334_v12 = vpack.c.bf16 %v304_v9, %v303_v8 }
  0x43   : > { %1052 = vperm.xlu1 %8532, %v886_v10   ;;  %1047 = vperm.xlu0 %8531, %v885_v11   ;;  %v912_v10 = vld [vmem:[%s11631_s5 + $0x1a8] sm:$0xff]  ;;  %v911_v11 = vld [vmem:[%s11631_s5 + $0x1a0] sm:$0xff] }
  0x47   : > { %1062 = vperm.xlu1 %8532, %v888_v16   ;;  %1057 = vperm.xlu0 %8531, %v887_v17  }
  0x48   : > { %8025 = vmatmul.mubr.msk.bf16.gmra.mrb[24].mxu0 %vm345_vm1, %v322_v18  ;;  %v1729_v18 = vsel %vm1727_vm2, %v1429_v15, 0 }
  0x49   : > { %8028 = vmatprep.mubr.msk.bf16.mxu0 %vm345_vm1, %v323_v19  ;;  %8057 = vmatpush3.bf16.msra.mxu1 %v1729_v18 }
  0x4b   : > { %1072 = vperm.xlu1 %8532, %v890_v20   ;;  %1067 = vperm.xlu0 %8531, %v889_v21   ;;  %v7566_v21 = vld [vmem:[%s11629_s3 + $0x2] sm:$0x1] }
  0x4c   : > { %8512 = vmatprep.subr.msk.bf16.mxu0 %vm1727_vm2, %v7566_v21  ;;  %v2971_v22 = vsel %vm1727_vm2, %v7566_v21, 0 }
  0x4d   : > { %8157 = vmatpush3.bf16.msra.mxu0 %v2971_v22 }
  0x4f   : > { %1082 = vperm.xlu1 %8532, %v892_v26   ;;  %1077 = vperm.xlu0 %8531, %v891_v27   ;;  %v8898_v27 = vld [vmem:[%s11629_s3 + $0x1] sm:$0x1] }
  0x50   : > { %8029 = vmatmul.mubr.msk.bf16.gmra.mrb[28].mxu0 %vm345_vm1, %v324_v28  ;;  %8511 = vmatprep.subr.msk.bf16.mxu1 %vm1727_vm2, %v8898_v27 }
  0x51   : > { %8032 = vmatprep.mubr.msk.bf16.mxu0 %vm345_vm1, %v325_v29 }
  0x53   : > { %1092 = vperm.xlu1 %8532, %v894_v30   ;;  %1087 = vperm.xlu0 %8531, %v893_v31  }
  0x57   : > { %1102 = vperm.xlu1 %8532, %v896_v36   ;;  %1097 = vperm.xlu0 %8531, %v895_v37  }
  0x58   : > { %8033 = vmatmul.mubr.msk.bf16.gmra.mrb[32].mxu0 %vm345_vm1, %v326_v38 }
  0x59   : > { %8036 = vmatprep.mubr.msk.bf16.mxu0 %vm345_vm1, %v327_v39 }
  0x5b   : > { %1112 = vperm.xlu1 %8532, %v898_v40   ;;  %1107 = vperm.xlu0 %8531, %v897_v41  }
  0x5f   : > { %1122 = vperm.xlu1 %8532, %v900_v46   ;;  %1117 = vperm.xlu0 %8531, %v899_v47  }
  0x60   : > { %8037 = vmatmul.mubr.msk.bf16.gmra.mrb[36].mxu0 %vm345_vm1, %v328_v48 }
  0x61   : > { %8040 = vmatprep.mubr.msk.bf16.mxu0 %vm345_vm1, %v329_v49 }
  0x63   : > { %1132 = vperm.xlu1 %8532, %v902_v50   ;;  %1127 = vperm.xlu0 %8531, %v901_v51  }
  0x67   : > { %1142 = vperm.xlu1 %8532, %v904_v56   ;;  %1137 = vperm.xlu0 %8531, %v903_v57  }
  0x68   : > { %8041 = vmatmul.mubr.msk.bf16.gmra.mrb[40].mxu0 %vm345_vm1, %v330_v58 }
  0x69   : > { %8044 = vmatprep.mubr.msk.bf16.mxu0 %vm345_vm1, %v331_v59 }
  0x6b   : > { %1152 = vperm.xlu1 %8532, %v906_v60   ;;  %1147 = vperm.xlu0 %8531, %v905_v61  }
  0x6f   : > { %1162 = vperm.xlu1 %8532, %v908_v2   ;;  %1157 = vperm.xlu0 %8531, %v907_v3  }
  0x70   : > { %8045 = vmatmul.mubr.msk.bf16.gmra.mrb[44].mxu0 %vm345_vm1, %v332_v4  ;;  %v8985_v4 = vld [vmem:[%s11628_s2] ss:$0 sm:$0xff] }
  0x71   : > { %8048 = vmatprep.mubr.msk.bf16.mxu0 %vm345_vm1, %v333_v5 }
  0x73   : > { %1172 = vperm.xlu1 %8532, %v910_v6   ;;  %1167 = vperm.xlu0 %8531, %v909_v7  }
  0x77   : > { %1182 = vperm.xlu1 %8532, %v912_v10   ;;  %1177 = vperm.xlu0 %8531, %v911_v11  }
  0x78   : > { %8049 = vmatmul.mubr.msk.bf16.gmra.mrb[48].mxu0 %vm345_vm1, %v334_v12 }
  0x7b   : > { %1192 = vperm.xlu1 %8532, %v914_v13   ;;  %1187 = vperm.xlu0 %8531, %v913_v14  }
  0x8e   : > { %v8872_v16 = vpop.permute.xlu1 %927  ;;  %v8874_v17 = vpop.permute.xlu0 %917 }
  0x92   : > { %v8878_v19 = vpop.permute.xlu1 %932  ;;  %v8880_v20 = vpop.permute.xlu0 %922 }
  0x96   : > { %v8887_v23 = vpop.permute.xlu1 %942  ;;  %v8889_v24 = vpop.permute.xlu0 %937 }
  0x9a   : > { %v8891_v25 = vpop.permute.xlu1 %952  ;;  %v8893_v26 = vpop.permute.xlu0 %947 }
  0x9e   : > { %v8902_v28 = vpop.permute.xlu1 %962  ;;  %v8904_v29 = vpop.permute.xlu0 %957 }
  0xa2   : > { %v8906_v30 = vpop.permute.xlu1 %972  ;;  %v8908_v31 = vpop.permute.xlu0 %967 }
  0xa6   : > { %v8910_v32 = vpop.permute.xlu1 %982  ;;  %v8912_v33 = vpop.permute.xlu0 %977 }
  0xaa   : > { %v8914_v34 = vpop.permute.xlu1 %992  ;;  %v8916_v35 = vpop.permute.xlu0 %987 }
  0xae   : > { %v8918_v36 = vpop.permute.xlu1 %1002  ;;  %v8920_v37 = vpop.permute.xlu0 %997 }
  0xb2   : > { %v8922_v38 = vpop.permute.xlu1 %1012  ;;  %v8924_v39 = vpop.permute.xlu0 %1007 }
  0xb6   : > { %v8926_v40 = vpop.permute.xlu1 %1022  ;;  %v8928_v41 = vpop.permute.xlu0 %1017 }
  0xba   : > { %v8930_v42 = vpop.permute.xlu1 %1032  ;;  %v8932_v43 = vpop.permute.xlu0 %1027 }
  0xbe   : > { %v8934_v44 = vpop.permute.xlu1 %1042  ;;  %v8936_v45 = vpop.permute.xlu0 %1037 }
  0xc2   : > { %v8938_v46 = vpop.permute.xlu1 %1052  ;;  %v8940_v47 = vpop.permute.xlu0 %1047 }
  0xc6   : > { %v8942_v48 = vpop.permute.xlu1 %1062  ;;  %v8944_v49 = vpop.permute.xlu0 %1057 }
  0xca   : > { %v8946_v50 = vpop.permute.xlu1 %1072  ;;  %v8948_v51 = vpop.permute.xlu0 %1067 }
  0xce   : > { %v8950_v52 = vpop.permute.xlu1 %1082  ;;  %v8952_v53 = vpop.permute.xlu0 %1077 }
  0xd2   : > { %v8954_v54 = vpop.permute.xlu1 %1092  ;;  %v8956_v55 = vpop.permute.xlu0 %1087 }
  0xd6   : > { %v8958_v56 = vpop.permute.xlu1 %1102  ;;  %v8960_v57 = vpop.permute.xlu0 %1097 }
  0xd7   : > { %11658 = vst [vmem:[#allocation4_spill] sm:$0xff] %v8958_v56 }
  0xda   : > { %v8962_v58 = vpop.permute.xlu1 %1112  ;;  %v8964_v59 = vpop.permute.xlu0 %1107 }
  0xdb   : > { %11659 = vst [vmem:[#allocation5_spill] sm:$0xff] %v8962_v58 }
  0xde   : > { %v8966_v60 = vpop.permute.xlu1 %1122  ;;  %v8968_v61 = vpop.permute.xlu0 %1117 }
  0xdf   : > { %11660 = vst [vmem:[#allocation6_spill] sm:$0xff] %v8966_v60  ;;  %11661 = vst [vmem:[#allocation7_spill] sm:$0xff] %v8968_v61 }
  0xe2   : > { %v8970_v62 = vpop.permute.xlu1 %1132  ;;  %v8972_v63 = vpop.permute.xlu0 %1127 }
  0xe3   : > { %11662 = vst [vmem:[#allocation8_spill] sm:$0xff] %v8970_v62  ;;  %11663 = vst [vmem:[#allocation9_spill] sm:$0xff] %v8972_v63 }
  0xe6   : > { %v8974_v0 = vpop.permute.xlu1 %1142  ;;  %v8976_v1 = vpop.permute.xlu0 %1137 }
  0xe7   : > { %11664 = vst [vmem:[#allocation10_spill] sm:$0xff] %v8974_v0  ;;  %11665 = vst [vmem:[#allocation11_spill] sm:$0xff] %v8976_v1 }
  0xea   : > { %v8978_v2 = vpop.permute.xlu1 %1152  ;;  %v8980_v3 = vpop.permute.xlu0 %1147 }
  0xeb   : > { %11666 = vst [vmem:[#allocation12_spill] sm:$0xff] %v8978_v2  ;;  %11667 = vst [vmem:[#allocation13_spill] sm:$0xff] %v8980_v3  ;;  %v8002_v5 = vpop.f32.mrb[0].mxu0 }
  0xec   : > { %v8054_v6 = vpop.f32.mrb[0].mxu1  ;;  %v477_v7 = vadd.f32 %v8002_v5, %v8985_v4  ;;  %v468_v8 = vpop.f32.mrb[1].mxu0 }
  0xed   : > { %v8989_v9 = vadd.f32 %v8054_v6, %v8985_v4  ;;  %v676_v10 = vpop.f32.mrb[1].mxu1  ;;  %v469_v11 = vadd.f32 %v8985_v4, %v468_v8  ;;  %v8003_v12 = vpop.f32.mrb[2].mxu0 }
  0xee   : > { %v8992_v13 = vpop.permute.xlu1 %1162  ;;  %v677_v14 = vadd.f32 %v8985_v4, %v676_v10  ;;  %vm693_vm4 = vcmp.ge.f32.partialorder %v477_v7, 0.0  ;;  %v749_v15 = vmul.f32 0.1, %v477_v7  ;;  %v480_v18 = vadd.f32 %v8003_v12, %v8985_v4  ;;  %v8996_v21 = vpop.permute.xlu0 %1157 }
  0xef   : > { %11668 = vst [vmem:[#allocation14_spill] sm:$0xff] %v8992_v13  ;;  %11669 = vst [vmem:[#allocation15_spill] sm:$0xff] %v8996_v21  ;;  %v471_v22 = vpop.f32.mrb[3].mxu0  ;;  %v8999_v5 = vmul.f32 0.1, %v8989_v9  ;;  %vm691_vm5 = vcmp.ge.f32.partialorder %v469_v11, 0.0 }
  0xf0   : > { %v747_v6 = vmul.f32 0.1, %v469_v11  ;;  %v472_v8 = vadd.f32 %v8985_v4, %v471_v22  ;;  %v799_v0 = vmul.f32 0.1, %v677_v14  ;;  %v8055_v2 = vpop.f32.mrb[2].mxu1  ;;  %v805_v1 = vsel %vm693_vm4, %v477_v7, %v749_v15 }
  0xf1   : > { %vm694_vm6 = vcmp.ge.f32.partialorder %v480_v18, 0.0  ;;  %v750_v13 = vmul.f32 0.1, %v480_v18  ;;  %v688_v10 = vadd.f32 %v8055_v2, %v8985_v4  ;;  %v679_v3 = vpop.f32.mrb[3].mxu1  ;;  %v1197_v12 = vmul.f32 %v8872_v16, %v805_v1 }
  0xf2   : > { %v803_v60 = vsel %vm691_vm5, %v469_v11, %v747_v6  ;;  %vm692_vm7 = vcmp.ge.f32.partialorder %v472_v8, 0.0  ;;  %v748_v21 = vmul.f32 0.1, %v472_v8  ;;  %v9004_v62 = vpop.permute.xlu1 %1172  ;;  %v680_v22 = vadd.f32 %v8985_v4, %v679_v3  ;;  %v9008_v58 = vpop.permute.xlu0 %1167 }
  0xf3   : > { %11670 = vst [vmem:[#allocation16_spill] sm:$0xff] %v9004_v62  ;;  %v1195_v61 = vmul.f32 %v8874_v17, %v803_v60  ;;  %v806_v63 = vsel %vm694_vm6, %v480_v18, %v750_v13  ;;  %v802_v56 = vmul.f32 0.1, %v688_v10  ;;  %11671 = vst [vmem:[#allocation17_spill] sm:$0xff] %v9008_v58  ;;  %v8006_v2 = vpop.f32.mrb[4].mxu0  ;;  %vm743_vm8 = vcmp.ge.f32.partialorder %v677_v14, 0.0 }
  0xf4   : > { %v1198_v7 = vmul.f32 %v8878_v19, %v806_v63  ;;  %v804_v15 = vsel %vm692_vm7, %v472_v8, %v748_v21  ;;  %vm746_vm9 = vcmp.ge.f32.partialorder %v688_v10, 0.0  ;;  %v800_v1 = vmul.f32 0.1, %v680_v22  ;;  %v484_v6 = vpop.f32.mrb[5].mxu0 }
  0xf5   : > { %v1196_v16 = vmul.f32 %v8880_v20, %v804_v15  ;;  %v493_v11 = vadd.f32 %v8006_v2, %v8985_v4  ;;  %vm744_vm10 = vcmp.ge.f32.partialorder %v680_v22, 0.0  ;;  %v485_v60 = vadd.f32 %v8985_v4, %v484_v6  ;;  %v8007_v13 = vpop.f32.mrb[6].mxu0 }
  0xf6   : > { %v1252_v17 = vpack.c.bf16 %v1198_v7, %v1197_v12  ;;  %v1183_v3 = vpop.permute.xlu1 %1182  ;;  %v855_v18 = vsel %vm743_vm8, %v677_v14, %v799_v0  ;;  %v858_v62 = vsel %vm746_vm9, %v688_v10, %v802_v56  ;;  %v496_v63 = vadd.f32 %v8007_v13, %v8985_v4  ;;  %v1178_v21 = vpop.permute.xlu0 %1177 }
  0xf7   : > { %v1251_v58 = vpack.c.bf16 %v1196_v16, %v1195_v61  ;;  %vm697_vm11 = vcmp.ge.f32.partialorder %v493_v11, 0.0  ;;  %v753_v19 = vmul.f32 0.1, %v493_v11  ;;  %v487_v8 = vpop.f32.mrb[7].mxu0  ;;  %vm695_vm12 = vcmp.ge.f32.partialorder %v485_v60, 0.0 }
  0xf8   : > { %1281 = vst.msk [vmem:[#allocation2 + $0x8] sm:$0xff] %vm1279_vm3, %v1252_v17  ;;  %v751_v20 = vmul.f32 0.1, %v485_v60  ;;  %v856_v15 = vsel %vm744_vm10, %v680_v22, %v800_v1  ;;  %v1247_v12 = vmul.f32 %v1178_v21, %v855_v18  ;;  %vm698_vm13 = vcmp.ge.f32.partialorder %v496_v63, 0.0 }
  0xf9   : > { %1280 = vst.msk [vmem:[#allocation2] sm:$0xff] %vm1279_vm3, %v1251_v58  ;;  %v809_v7 = vsel %vm697_vm11, %v493_v11, %v753_v19  ;;  %v754_v0 = vmul.f32 0.1, %v496_v63  ;;  %v1248_v56 = vmul.f32 %v1183_v3, %v856_v15  ;;  %v488_v14 = vadd.f32 %v8985_v4, %v487_v8 }
  0xfa   : > { %v1201_v61 = vmul.f32 %v8893_v26, %v809_v7  ;;  %v1193_v10 = vpop.permute.xlu1 %1192  ;;  %vm745_vm14 = vcmp.ge.f32.partialorder %v8989_v9, 0.0  ;;  %v807_v2 = vsel %vm695_vm12, %v485_v60, %v751_v20  ;;  %v1188_v13 = vpop.permute.xlu0 %1187  ;;  %v9028_v60 = vsel %vm1727_vm2, %v8898_v27, 0 }
  0xfb   : > { %v810_v16 = vsel %vm698_vm13, %v496_v63, %v754_v0  ;;  %v1277_v6 = vpack.c.bf16 %v1248_v56, %v1247_v12  ;;  %v1250_v17 = vmul.f32 %v1193_v10, %v858_v62  ;;  %vm696_vm15 = vcmp.ge.f32.partialorder %v488_v14, 0.0  ;;  %v8010_v11 = vpop.f32.mrb[8].mxu0 }
  0xfc   : > { %v1202_v22 = vmul.f32 %v8891_v25, %v810_v16  ;;  %v752_v58 = vmul.f32 0.1, %v488_v14  ;;  %v857_v1 = vsel %vm745_vm14, %v8989_v9, %v8999_v5  ;;  %v509_v3 = vadd.f32 %v8010_v11, %v8985_v4  ;;  %v500_v18 = vpop.f32.mrb[9].mxu0 }
  0xfd   : > { %1306 = vst.msk [vmem:[#allocation2 + $0xd0] sm:$0xff] %vm1279_vm3, %v1277_v6  ;;  %v1249_v26 = vmul.f32 %v1188_v13, %v857_v1  ;;  %v1199_v62 = vmul.f32 %v8889_v24, %v807_v2  ;;  %v501_v63 = vadd.f32 %v8985_v4, %v500_v18  ;;  %v8011_v21 = vpop.f32.mrb[10].mxu0  ;;  %vm1430_vm6 = vsmask.f32 4352 }
  0xfe   : > { %v1254_v19 = vpack.c.bf16 %v1202_v22, %v1201_v61  ;;  %v808_v25 = vsel %vm696_vm15, %v488_v14, %v752_v58  ;;  %vm701_vm0 = vcmp.ge.f32.partialorder %v509_v3, 0.0  ;;  %v757_v8 = vmul.f32 0.1, %v509_v3  ;;  %v503_v20 = vpop.f32.mrb[11].mxu0 }
  0xff   : > { %v1200_v9 = vmul.f32 %v8887_v23, %v808_v25  ;;  %v1278_v5 = vpack.c.bf16 %v1250_v17, %v1249_v26  ;;  %vm699_vm4 = vcmp.ge.f32.partialorder %v501_v63, 0.0  ;;  %v755_v15 = vmul.f32 0.1, %v501_v63  ;;  %v9037_v56 = vld [vmem:[#allocation2 + $0x8] sm:$0xff] }
 0x100   : > { %1283 = vst.msk [vmem:[#allocation2 + $0x18] sm:$0xff] %vm1279_vm3, %v1254_v19  ;;  %v512_v27 = vadd.f32 %v8011_v21, %v8985_v4  ;;  %v504_v12 = vadd.f32 %v8985_v4, %v503_v20  ;;  %v1404_v24 = vld [vmem:[#allocation2] sm:$0xf8]  ;;  %v813_v0 = vsel %vm701_vm0, %v509_v3, %v757_v8  ;;  %v1440_v11 = vshrl.u32 %v9037_v56, 16 }
 0x101   : > { %v1253_v7 = vpack.c.bf16 %v1200_v9, %v1199_v62  ;;  %1307 = vst.msk [vmem:[#allocation2 + $0xd8] sm:$0xff] %vm1279_vm3, %v1278_v5  ;;  %v1432_v23 = vshrl.u32 %v1404_v24, 16  ;;  %v1435_v61 = vshll.u32 %v1404_v24, 16  ;;  %v1205_v14 = vmul.f32 %v8908_v31, %v813_v0  ;;  %v2646_v16 = vld [vmem:[#allocation2] sm:$0xf0] }
 0x102   : > { %v811_v10 = vsel %vm699_vm4, %v501_v63, %v755_v15  ;;  %vm702_vm5 = vcmp.ge.f32.partialorder %v512_v27, 0.0  ;;  %v758_v2 = vmul.f32 0.1, %v512_v27  ;;  %vm700_vm7 = vcmp.ge.f32.partialorder %v504_v12, 0.0 }
 0x103   : > { %1282 = vst.msk [vmem:[#allocation2 + $0x10] sm:$0xff] %vm1279_vm3, %v1253_v7  ;;  %v1203_v6 = vmul.f32 %v8904_v29, %v811_v10  ;;  %v756_v17 = vmul.f32 0.1, %v504_v12  ;;  %v1434_v13 = vrot.slane %v1432_v23, 3  ;;  %v8014_v58 = vpop.f32.mrb[12].mxu0  ;;  %v1437_v1 = vrot.slane %v1435_v61, 4 }
 0x104   : > { %v814_v22 = vsel %vm702_vm5, %v512_v27, %v758_v2  ;;  %v1443_v26 = vshll.u32 %v9037_v56, 16  ;;  %v525_v18 = vadd.f32 %v8014_v58, %v8985_v4  ;;  %v516_v62 = vpop.f32.mrb[13].mxu0  ;;  %v2675_v19 = vshrl.u32 %v2646_v16, 16 }
 0x105   : > { %v1206_v31 = vmul.f32 %v8906_v30, %v814_v22  ;;  %v812_v3 = vsel %vm700_vm7, %v504_v12, %v756_v17  ;;  %v517_v29 = vadd.f32 %v8985_v4, %v516_v62  ;;  %v8015_v63 = vpop.f32.mrb[14].mxu0  ;;  %v1438_v21 = vor.u32 %v1437_v1, %v1434_v13 }
 0x106   : > { %v1204_v25 = vmul.f32 %v8902_v28, %v812_v3  ;;  %v1442_v9 = vrot.slane %v1440_v11, 3  ;;  %vm705_vm8 = vcmp.ge.f32.partialorder %v525_v18, 0.0  ;;  %v761_v8 = vmul.f32 0.1, %v525_v18  ;;  %v519_v15 = vpop.f32.mrb[15].mxu0 }
 0x107   : > { %v1256_v5 = vpack.c.bf16 %v1206_v31, %v1205_v14  ;;  %v528_v20 = vadd.f32 %v8015_v63, %v8985_v4  ;;  %vm2673_vm9 = vsmask.f32 3328  ;;  %vm703_vm10 = vcmp.ge.f32.partialorder %v517_v29, 0.0  ;;  %v7616_v28 = vld [vmem:[%s11629_s3 + $0x4] sm:$0x1] }
 0x108   : > { %v1255_v30 = vpack.c.bf16 %v1204_v25, %v1203_v6  ;;  %v759_v27 = vmul.f32 0.1, %v517_v29  ;;  %v520_v12 = vadd.f32 %v8985_v4, %v519_v15  ;;  %v817_v24 = vsel %vm705_vm8, %v525_v18, %v761_v8  ;;  %8514 = vmatprep.subr.msk.bf16.mxu0 %vm1727_vm2, %v7616_v28 }
 0x109   : > { %1285 = vst.msk [vmem:[#allocation2 + $0x28] sm:$0xff] %vm1279_vm3, %v1256_v5  ;;  %vm706_vm11 = vcmp.ge.f32.partialorder %v528_v20, 0.0  ;;  %v762_v7 = vmul.f32 0.1, %v528_v20  ;;  %v1445_v0 = vrot.slane %v1443_v26, 4  ;;  %v1209_v56 = vmul.f32 %v8916_v35, %v817_v24 }
 0x10a   : > { %1284 = vst.msk [vmem:[#allocation2 + $0x20] sm:$0xff] %vm1279_vm3, %v1255_v30  ;;  %v815_v23 = vsel %vm703_vm10, %v517_v29, %v759_v27  ;;  %vm704_vm12 = vcmp.ge.f32.partialorder %v520_v12, 0.0  ;;  %v760_v61 = vmul.f32 0.1, %v520_v12  ;;  %v2677_v6 = vrot.slane %v2675_v19, 4  ;;  %v1406_v17 = vld [vmem:[#allocation2 + $0x10] sm:$0xff] }
 0x10b   : > { %v1207_v14 = vmul.f32 %v8912_v33, %v815_v23  ;;  %v818_v10 = vsel %vm706_vm11, %v528_v20, %v762_v7  ;;  %v9058_v2 = vor.u32 %v1445_v0, %v1442_v9  ;;  %v2678_v58 = vshll.u32 %v2646_v16, 16  ;;  %v8018_v31 = vpop.f32.mrb[16].mxu0  ;;  %v1407_v27 = vld [vmem:[#allocation2 + $0x18] sm:$0xff] }
 0x10c   : > { %v1210_v13 = vmul.f32 %v8914_v34, %v818_v10  ;;  %v816_v22 = vsel %vm704_vm12, %v520_v12, %v760_v61  ;;  %v2685_v1 = vrot.slane %v1440_v11, 4  ;;  %v2688_v18 = vrot.slane %v1443_v26, 5  ;;  %v532_v33 = vpop.f32.mrb[17].mxu0 }
 0x10d   : > { %v1208_v3 = vmul.f32 %v8910_v32, %v816_v22  ;;  %v1447_v35 = vsel %vm1430_vm6, %v1438_v21, %v9058_v2  ;;  %v541_v62 = vadd.f32 %v8018_v31, %v8985_v4  ;;  %v2680_v19 = vrot.slane %v2678_v58, 5  ;;  %v8019_v34 = vpop.f32.mrb[18].mxu0 }
 0x10e   : > { %v1258_v25 = vpack.c.bf16 %v1210_v13, %v1209_v56  ;;  %8058 = vmatprep.mubr.msk.bf16.mxu1 %vm1279_vm3, %v1447_v35  ;;  %v533_v29 = vadd.f32 %v8985_v4, %v532_v33  ;;  %v1449_v63 = vshrl.u32 %v1406_v17, 16  ;;  %v2689_v11 = vor.u32 %v2688_v18, %v2685_v1  ;;  %v535_v32 = vpop.f32.mrb[19].mxu0 }
 0x10f   : > { %v1257_v16 = vpack.c.bf16 %v1208_v3, %v1207_v14  ;;  %vm709_vm13 = vcmp.ge.f32.partialorder %v541_v62, 0.0  ;;  %v765_v9 = vmul.f32 0.1, %v541_v62  ;;  %v2681_v21 = vor.u32 %v2680_v19, %v2677_v6 }
 0x110   : > { %1287 = vst.msk [vmem:[#allocation2 + $0x38] sm:$0xff] %vm1279_vm3, %v1258_v25  ;;  %vm707_vm14 = vcmp.ge.f32.partialorder %v533_v29, 0.0  ;;  %v763_v26 = vmul.f32 0.1, %v533_v29  ;;  %v544_v5 = vadd.f32 %v8019_v34, %v8985_v4  ;;  %v536_v20 = vadd.f32 %v8985_v4, %v535_v32 }
 0x111   : > { %1286 = vst.msk [vmem:[#allocation2 + $0x30] sm:$0xff] %vm1279_vm3, %v1257_v16  ;;  %v821_v8 = vsel %vm709_vm13, %v541_v62, %v765_v9  ;;  %v1451_v15 = vrot.slane %v1449_v63, 3  ;;  %v1452_v30 = vshll.u32 %v1406_v17, 16  ;;  %v2690_v12 = vsel %vm2673_vm9, %v2681_v21, %v2689_v11 }
 0x112   : > { %v1213_v28 = vmul.f32 %v8924_v39, %v821_v8  ;;  %v819_v24 = vsel %vm707_vm14, %v533_v29, %v763_v26  ;;  %vm710_vm15 = vcmp.ge.f32.partialorder %v544_v5, 0.0  ;;  %8158 = vmatprep.mubr.msk.bf16.mxu0 %vm1279_vm3, %v2690_v12  ;;  %v766_v0 = vmul.f32 0.1, %v544_v5  ;;  %v1408_v29 = vld [vmem:[#allocation2 + $0x20] sm:$0xff]  ;;  %v1409_v12 = vld [vmem:[#allocation2 + $0x28] sm:$0xff] }
 0x113   : > { %v1211_v7 = vmul.f32 %v8920_v37, %v819_v24  ;;  %vm708_vm0 = vcmp.ge.f32.partialorder %v536_v20, 0.0  ;;  %v764_v56 = vmul.f32 0.1, %v536_v20  ;;  %v1454_v23 = vrot.slane %v1452_v30, 4  ;;  %v8022_v6 = vpop.f32.mrb[20].mxu0 }
 0x114   : > { %v2694_v61 = vrot.slane %v1449_v63, 4  ;;  %v2697_v14 = vrot.slane %v1452_v30, 5  ;;  %v1458_v10 = vshrl.u32 %v1407_v27, 16  ;;  %v822_v17 = vsel %vm710_vm15, %v544_v5, %v766_v0  ;;  %v548_v39 = vpop.f32.mrb[21].mxu0 }
 0x115   : > { %v820_v13 = vsel %vm708_vm0, %v536_v20, %v764_v56  ;;  %v1461_v22 = vshll.u32 %v1407_v27, 16  ;;  %v557_v58 = vadd.f32 %v8022_v6, %v8985_v4  ;;  %v1214_v1 = vmul.f32 %v8922_v38, %v822_v17  ;;  %v8023_v35 = vpop.f32.mrb[22].mxu0 }
 0x116   : > { %v1212_v31 = vmul.f32 %v8918_v36, %v820_v13  ;;  %v1455_v3 = vor.u32 %v1454_v23, %v1451_v15  ;;  %v2698_v37 = vor.u32 %v2697_v14, %v2694_v61  ;;  %v1460_v18 = vrot.slane %v1458_v10, 3  ;;  %v551_v19 = vpop.f32.mrb[23].mxu0  ;;  %v7591_v36 = vld [vmem:[%s11629_s3 + $0x3] sm:$0x1] }
 0x117   : > { %v1463_v62 = vrot.slane %v1461_v22, 4  ;;  %v2703_v33 = vrot.slane %v1458_v10, 4  ;;  %v2706_v25 = vrot.slane %v1461_v22, 5  ;;  %v1260_v34 = vpack.c.bf16 %v1214_v1, %v1213_v28 }
 0x118   : > { %v1259_v63 = vpack.c.bf16 %v1212_v31, %v1211_v7  ;;  %v1456_v16 = vsel %vm1430_vm6, %v9058_v2, %v1455_v3  ;;  %v2699_v9 = vsel %vm2673_vm9, %v2689_v11, %v2698_v37  ;;  %vm713_vm4 = vcmp.ge.f32.partialorder %v557_v58, 0.0 }
 0x119   : > { %8059 = vmatmul.mubr.msk.bf16.vlgmr.msra.gmra.mrb[4].mxu1 %vm1279_vm3, %v1456_v16  ;;  %8159 = vmatmul.mubr.msk.bf16.vlgmr.msra.gmra.mrb[52].mxu0 %vm1279_vm3, %v2699_v9  ;;  %v1464_v38 = vor.u32 %v1463_v62, %v1460_v18  ;;  %v2707_v32 = vor.u32 %v2706_v25, %v2703_v33  ;;  %v769_v21 = vmul.f32 0.1, %v557_v58  ;;  %1289 = vst.msk [vmem:[#allocation2 + $0x48] sm:$0xff] %vm1279_vm3, %v1260_v34  ;;  %v1467_v5 = vshrl.u32 %v1408_v29, 16  ;;  %v1410_v33 = vld [vmem:[#allocation2 + $0x30] sm:$0xff] }
 0x11a   : > { %1288 = vst.msk [vmem:[#allocation2 + $0x40] sm:$0xff] %vm1279_vm3, %v1259_v63  ;;  %8107 = vmatpush3.bf16.msra.mxu1 %v9028_v60  ;;  %v549_v2 = vadd.f32 %v8985_v4, %v548_v39  ;;  %v560_v11 = vadd.f32 %v8023_v35, %v8985_v4  ;;  %v552_v26 = vadd.f32 %v8985_v4, %v551_v19  ;;  %v1470_v30 = vshll.u32 %v1408_v29, 16 }
 0x11b   : > { %v1465_v8 = vsel %vm1430_vm6, %v1455_v3, %v1464_v38  ;;  %v2708_v20 = vsel %vm2673_vm9, %v2698_v37, %v2707_v32  ;;  %v825_v15 = vsel %vm713_vm4, %v557_v58, %v769_v21  ;;  %8513 = vmatprep.subr.msk.bf16.mxu1 %vm1727_vm2, %v7591_v36  ;;  %v8026_v28 = vpop.f32.mrb[24].mxu0  ;;  %v1469_v0 = vrot.slane %v1467_v5, 3 }
 0x11c   : > { %8062 = vmatprep.mubr.msk.bf16.mxu1 %vm1279_vm3, %v1465_v8  ;;  %8162 = vmatprep.mubr.msk.bf16.mxu0 %vm1279_vm3, %v2708_v20  ;;  %v1217_v60 = vmul.f32 %v8932_v43, %v825_v15  ;;  %vm711_vm5 = vcmp.ge.f32.partialorder %v549_v2, 0.0  ;;  %v767_v27 = vmul.f32 0.1, %v549_v2  ;;  %vm714_vm7 = vcmp.ge.f32.partialorder %v560_v11, 0.0  ;;  %v564_v10 = vpop.f32.mrb[25].mxu0 }
 0x11d   : > { %v770_v24 = vmul.f32 0.1, %v560_v11  ;;  %vm712_vm8 = vcmp.ge.f32.partialorder %v552_v26, 0.0  ;;  %v768_v7 = vmul.f32 0.1, %v552_v26  ;;  %v1472_v23 = vrot.slane %v1470_v30, 4 }
 0x11e   : > { %v823_v56 = vsel %vm711_vm5, %v549_v2, %v767_v27  ;;  %v2712_v61 = vrot.slane %v1467_v5, 4  ;;  %v2715_v14 = vrot.slane %v1470_v30, 5  ;;  %v1476_v22 = vshrl.u32 %v1409_v12, 16  ;;  %v8027_v43 = vpop.f32.mrb[26].mxu0  ;;  %v9114_v27 = vld [vmem:[#allocation2 + $0x38] sm:$0xff] }
 0x11f   : > { %v1215_v6 = vmul.f32 %v8928_v41, %v823_v56  ;;  %v826_v17 = vsel %vm714_vm7, %v560_v11, %v770_v24  ;;  %v824_v13 = vsel %vm712_vm8, %v552_v26, %v768_v7  ;;  %v1473_v1 = vor.u32 %v1472_v23, %v1469_v0  ;;  %v567_v3 = vpop.f32.mrb[27].mxu0 }
 0x120   : > { %v1218_v58 = vmul.f32 %v8930_v42, %v826_v17  ;;  %v1216_v39 = vmul.f32 %v8926_v40, %v824_v13  ;;  %v2716_v31 = vor.u32 %v2715_v14, %v2712_v61  ;;  %v1478_v37 = vrot.slane %v1476_v22, 3 }
 0x121   : > { %v1479_v35 = vshll.u32 %v1409_v12, 16  ;;  %v2721_v18 = vrot.slane %v1476_v22, 4  ;;  %v573_v62 = vadd.f32 %v8026_v28, %v8985_v4  ;;  %v1474_v41 = vsel %vm1430_vm6, %v1464_v38, %v1473_v1 }
 0x122   : > { %v1262_v25 = vpack.c.bf16 %v1218_v58, %v1217_v60  ;;  %v1261_v19 = vpack.c.bf16 %v1216_v39, %v1215_v6  ;;  %v2717_v29 = vsel %vm2673_vm9, %v2707_v32, %v2716_v31  ;;  %8063 = vmatmul.mubr.msk.bf16.gmra.mrb[8].mxu1 %vm1279_vm3, %v1474_v41  ;;  %v565_v63 = vadd.f32 %v8985_v4, %v564_v10 }
 0x123   : > { %8163 = vmatmul.mubr.msk.bf16.gmra.mrb[56].mxu0 %vm1279_vm3, %v2717_v29  ;;  %v1481_v40 = vrot.slane %v1479_v35, 4  ;;  %v2724_v42 = vrot.slane %v1479_v35, 5  ;;  %vm717_vm10 = vcmp.ge.f32.partialorder %v573_v62, 0.0  ;;  %v773_v34 = vmul.f32 0.1, %v573_v62  ;;  %v8030_v38 = vpop.f32.mrb[28].mxu0 }
 0x124   : > { %1291 = vst.msk [vmem:[#allocation2 + $0x58] sm:$0xff] %vm1279_vm3, %v1262_v25  ;;  %1290 = vst.msk [vmem:[#allocation2 + $0x50] sm:$0xff] %vm1279_vm3, %v1261_v19  ;;  %v576_v16 = vadd.f32 %v8027_v43, %v8985_v4  ;;  %v568_v9 = vadd.f32 %v8985_v4, %v567_v3  ;;  %v1485_v36 = vshrl.u32 %v1410_v33, 16  ;;  %v1488_v11 = vshll.u32 %v1410_v33, 16  ;;  %v580_v26 = vpop.f32.mrb[29].mxu0  ;;  %v1412_v3 = vld [vmem:[#allocation2 + $0x40] sm:$0xff] }
 0x125   : > { %v1482_v32 = vor.u32 %v1481_v40, %v1478_v37  ;;  %v2725_v21 = vor.u32 %v2724_v42, %v2721_v18  ;;  %v829_v2 = vsel %vm717_vm10, %v573_v62, %v773_v34  ;;  %vm715_vm11 = vcmp.ge.f32.partialorder %v565_v63, 0.0  ;;  %v8031_v20 = vpop.f32.mrb[30].mxu0 }
 0x126   : > { %v1221_v5 = vmul.f32 %v8940_v47, %v829_v2  ;;  %v771_v8 = vmul.f32 0.1, %v565_v63  ;;  %vm718_vm12 = vcmp.ge.f32.partialorder %v576_v16, 0.0  ;;  %v774_v60 = vmul.f32 0.1, %v576_v16  ;;  %v583_v12 = vpop.f32.mrb[31].mxu0 }
 0x127   : > { %v1483_v15 = vsel %vm1430_vm6, %v1473_v1, %v1482_v32  ;;  %v2726_v30 = vsel %vm2673_vm9, %v2716_v31, %v2725_v21  ;;  %vm716_vm13 = vcmp.ge.f32.partialorder %v568_v9, 0.0  ;;  %v772_v24 = vmul.f32 0.1, %v568_v9  ;;  %v9138_v2 = vld [vmem:[#allocation2 + $0x48] sm:$0xff] }
 0x128   : > { %8066 = vmatprep.mubr.msk.bf16.mxu1 %vm1279_vm3, %v1483_v15  ;;  %8166 = vmatprep.mubr.msk.bf16.mxu0 %vm1279_vm3, %v2726_v30  ;;  %v827_v28 = vsel %vm715_vm11, %v565_v63, %v771_v8  ;;  %v1487_v47 = vrot.slane %v1485_v36, 3  ;;  %v1490_v7 = vrot.slane %v1488_v11, 4  ;;  %v830_v56 = vsel %vm718_vm12, %v576_v16, %v774_v60 }
 0x129   : > { %v1219_v0 = vmul.f32 %v8936_v45, %v827_v28  ;;  %v2730_v23 = vrot.slane %v1485_v36, 4  ;;  %v2733_v61 = vrot.slane %v1488_v11, 5  ;;  %v1222_v14 = vmul.f32 %v8938_v46, %v830_v56 }
 0x12a   : > { %v828_v10 = vsel %vm716_vm13, %v568_v9, %v772_v24  ;;  %v1491_v6 = vor.u32 %v1490_v7, %v1487_v47  ;;  %v1494_v17 = vshrl.u32 %v9114_v27, 16  ;;  %v1497_v43 = vshll.u32 %v9114_v27, 16 }
 0x12b   : > { %v1220_v13 = vmul.f32 %v8934_v44, %v828_v10  ;;  %v2734_v22 = vor.u32 %v2733_v61, %v2730_v23  ;;  %v589_v58 = vadd.f32 %v8030_v38, %v8985_v4  ;;  %v1264_v39 = vpack.c.bf16 %v1222_v14, %v1221_v5  ;;  %v8034_v37 = vpop.f32.mrb[32].mxu0 }
 0x12c   : > { %v1492_v1 = vsel %vm1430_vm6, %v1482_v32, %v1491_v6  ;;  %v1496_v45 = vrot.slane %v1494_v17, 3  ;;  %v2739_v31 = vrot.slane %v1494_v17, 4  ;;  %v1499_v18 = vrot.slane %v1497_v43, 4  ;;  %v596_v44 = vpop.f32.mrb[33].mxu0 }
 0x12d   : > { %v1263_v35 = vpack.c.bf16 %v1220_v13, %v1219_v0  ;;  %8067 = vmatmul.mubr.msk.bf16.gmra.mrb[12].mxu1 %vm1279_vm3, %v1492_v1  ;;  %v2735_v46 = vsel %vm2673_vm9, %v2725_v21, %v2734_v22  ;;  %v2742_v62 = vrot.slane %v1497_v43, 5  ;;  %1293 = vst.msk [vmem:[#allocation2 + $0x68] sm:$0xff] %vm1279_vm3, %v1264_v39  ;;  %vm721_vm14 = vcmp.ge.f32.partialorder %v589_v58, 0.0  ;;  %v8035_v41 = vpop.f32.mrb[34].mxu0 }
 0x12e   : > { %8167 = vmatmul.mubr.msk.bf16.gmra.mrb[60].mxu0 %vm1279_vm3, %v2735_v46  ;;  %v777_v33 = vmul.f32 0.1, %v589_v58  ;;  %v581_v25 = vadd.f32 %v8985_v4, %v580_v26  ;;  %v592_v19 = vadd.f32 %v8031_v20, %v8985_v4  ;;  %v1500_v29 = vor.u32 %v1499_v18, %v1496_v45  ;;  %v9133_v63 = vpop.f32.mrb[35].mxu0 }
 0x12f   : > { %1292 = vst.msk [vmem:[#allocation2 + $0x60] sm:$0xff] %vm1279_vm3, %v1263_v35  ;;  %v2743_v40 = vor.u32 %v2742_v62, %v2739_v31  ;;  %v584_v42 = vadd.f32 %v8985_v4, %v583_v12  ;;  %v1503_v34 = vshrl.u32 %v1412_v3, 16  ;;  %v1506_v15 = vshll.u32 %v1412_v3, 16  ;;  %v9165_v62 = vld [vmem:[#allocation2 + $0x58] sm:$0xff] }
 0x130   : > { %v833_v16 = vsel %vm721_vm14, %v589_v58, %v777_v33  ;;  %vm719_vm15 = vcmp.ge.f32.partialorder %v581_v25, 0.0  ;;  %v775_v9 = vmul.f32 0.1, %v581_v25  ;;  %vm722_vm0 = vcmp.ge.f32.partialorder %v592_v19, 0.0 }
 0x131   : > { %v1501_v36 = vsel %vm1430_vm6, %v1491_v6, %v1500_v29  ;;  %v2744_v38 = vsel %vm2673_vm9, %v2734_v22, %v2743_v40  ;;  %v1225_v32 = vmul.f32 %v8948_v51, %v833_v16  ;;  %v778_v21 = vmul.f32 0.1, %v592_v19 }
 0x132   : > { %8070 = vmatprep.mubr.msk.bf16.mxu1 %vm1279_vm3, %v1501_v36  ;;  %8170 = vmatprep.mubr.msk.bf16.mxu0 %vm1279_vm3, %v2744_v38  ;;  %v831_v11 = vsel %vm719_vm15, %v581_v25, %v775_v9  ;;  %vm720_vm4 = vcmp.ge.f32.partialorder %v584_v42, 0.0  ;;  %v776_v26 = vmul.f32 0.1, %v584_v42  ;;  %v1505_v5 = vrot.slane %v1503_v34, 3 }
 0x133   : > { %v1223_v8 = vmul.f32 %v8944_v49, %v831_v11  ;;  %v834_v20 = vsel %vm722_vm0, %v592_v19, %v778_v21  ;;  %v2748_v30 = vrot.slane %v1503_v34, 4  ;;  %v1512_v51 = vshrl.u32 %v9138_v2, 16  ;;  %v9146_v24 = vpop.f32.mrb[36].mxu0 }
 0x134   : > { %v1226_v60 = vmul.f32 %v8946_v50, %v834_v20  ;;  %v832_v12 = vsel %vm720_vm4, %v584_v42, %v776_v26  ;;  %v1515_v28 = vshll.u32 %v9138_v2, 16  ;;  %v1508_v7 = vrot.slane %v1506_v15, 4  ;;  %v9150_v23 = vpop.f32.mrb[37].mxu0 }
 0x135   : > { %v1224_v47 = vmul.f32 %v8942_v48, %v832_v12  ;;  %v2751_v0 = vrot.slane %v1506_v15, 5  ;;  %v605_v56 = vadd.f32 %v8034_v37, %v8985_v4  ;;  %v1514_v61 = vrot.slane %v1512_v51, 3  ;;  %v8039_v50 = vpop.f32.mrb[38].mxu0  ;;  %v9160_v37 = vld [vmem:[#allocation2 + $0x50] sm:$0xff] }
 0x136   : > { %v1266_v49 = vpack.c.bf16 %v1226_v60, %v1225_v32  ;;  %v1517_v14 = vrot.slane %v1515_v28, 4  ;;  %v2757_v10 = vrot.slane %v1512_v51, 4  ;;  %v1509_v17 = vor.u32 %v1508_v7, %v1505_v5  ;;  %v9152_v43 = vpop.f32.mrb[39].mxu0 }
 0x137   : > { %v1265_v6 = vpack.c.bf16 %v1224_v47, %v1223_v8  ;;  %v2752_v13 = vor.u32 %v2751_v0, %v2748_v30  ;;  %v2760_v22 = vrot.slane %v1515_v28, 5  ;;  %vm725_vm5 = vcmp.ge.f32.partialorder %v605_v56, 0.0 }
 0x138   : > { %1295 = vst.msk [vmem:[#allocation2 + $0x78] sm:$0xff] %vm1279_vm3, %v1266_v49  ;;  %v1518_v48 = vor.u32 %v1517_v14, %v1514_v61  ;;  %v781_v58 = vmul.f32 0.1, %v605_v56  ;;  %v597_v39 = vadd.f32 %v8985_v4, %v596_v44  ;;  %v1510_v1 = vsel %vm1430_vm6, %v1500_v29, %v1509_v17 }
 0x139   : > { %1294 = vst.msk [vmem:[#allocation2 + $0x70] sm:$0xff] %vm1279_vm3, %v1265_v6  ;;  %v2753_v45 = vsel %vm2673_vm9, %v2743_v40, %v2752_v13  ;;  %v2761_v31 = vor.u32 %v2760_v22, %v2757_v10  ;;  %v608_v3 = vadd.f32 %v8035_v41, %v8985_v4  ;;  %8071 = vmatmul.mubr.msk.bf16.gmra.mrb[16].mxu1 %vm1279_vm3, %v1510_v1  ;;  %v1521_v29 = vshrl.u32 %v9160_v37, 16  ;;  %v9196_v10 = vld [vmem:[#allocation2 + $0x60] sm:$0xff] }
 0x13a   : > { %8171 = vmatmul.mubr.msk.bf16.gmra.mrb[64].mxu0 %vm1279_vm3, %v2753_v45  ;;  %v1519_v35 = vsel %vm1430_vm6, %v1509_v17, %v1518_v48  ;;  %v837_v46 = vsel %vm725_vm5, %v605_v56, %v781_v58  ;;  %vm723_vm7 = vcmp.ge.f32.partialorder %v597_v39, 0.0  ;;  %v779_v18 = vmul.f32 0.1, %v597_v39 }
 0x13b   : > { %8074 = vmatprep.mubr.msk.bf16.mxu1 %vm1279_vm3, %v1519_v35  ;;  %v2762_v44 = vsel %vm2673_vm9, %v2752_v13, %v2761_v31  ;;  %v1229_v33 = vmul.f32 %v8956_v55, %v837_v46  ;;  %vm726_vm8 = vcmp.ge.f32.partialorder %v608_v3, 0.0  ;;  %v782_v25 = vmul.f32 0.1, %v608_v3  ;;  %v9175_v42 = vpop.f32.mrb[40].mxu0 }
 0x13c   : > { %8174 = vmatprep.mubr.msk.bf16.mxu0 %vm1279_vm3, %v2762_v44  ;;  %v835_v19 = vsel %vm723_vm7, %v597_v39, %v779_v18  ;;  %v600_v41 = vadd.f32 %v8985_v4, %v9133_v63  ;;  %v1524_v40 = vshll.u32 %v9160_v37, 16  ;;  %v1530_v9 = vshrl.u32 %v9165_v62, 16  ;;  %v9180_v36 = vpop.f32.mrb[41].mxu0 }
 0x13d   : > { %v1227_v34 = vmul.f32 %v8952_v53, %v835_v19  ;;  %v838_v16 = vsel %vm726_vm8, %v608_v3, %v782_v25  ;;  %v1533_v55 = vshll.u32 %v9165_v62, 16  ;;  %v1523_v63 = vrot.slane %v1521_v29, 3  ;;  %v9183_v21 = vpop.f32.mrb[42].mxu0  ;;  %v11672_v25 = vld [vmem:[#allocation5_spill] sm:$0xff] }
 0x13e   : > { %v1230_v38 = vmul.f32 %v8954_v54, %v838_v16  ;;  %vm724_vm10 = vcmp.ge.f32.partialorder %v600_v41, 0.0  ;;  %v780_v32 = vmul.f32 0.1, %v600_v41  ;;  %v1526_v11 = vrot.slane %v1524_v40, 4  ;;  %v9185_v20 = vpop.f32.mrb[43].mxu0 }
 0x13f   : > { %v2766_v26 = vrot.slane %v1521_v29, 4  ;;  %v2769_v5 = vrot.slane %v1524_v40, 5  ;;  %v1532_v8 = vrot.slane %v1530_v9, 3  ;;  %v1535_v30 = vrot.slane %v1533_v55, 4 }
 0x140   : > { %v1268_v53 = vpack.c.bf16 %v1230_v38, %v1229_v33  ;;  %v836_v15 = vsel %vm724_vm10, %v600_v41, %v780_v32  ;;  %v2775_v60 = vrot.slane %v1530_v9, 4  ;;  %v1527_v51 = vor.u32 %v1526_v11, %v1523_v63  ;;  %v11673_v38 = vld [vmem:[#allocation4_spill] sm:$0xff] }
 0x141   : > { %v1228_v12 = vmul.f32 %v8950_v52, %v836_v15  ;;  %v2770_v28 = vor.u32 %v2769_v5, %v2766_v26  ;;  %v2778_v54 = vrot.slane %v1533_v55, 5  ;;  %v1536_v47 = vor.u32 %v1535_v30, %v1532_v8 }
 0x142   : > { %1297 = vst.msk [vmem:[#allocation2 + $0x88] sm:$0xff] %vm1279_vm3, %v1268_v53  ;;  %v621_v7 = vadd.f32 %v9146_v24, %v8985_v4  ;;  %v613_v0 = vadd.f32 %v8985_v4, %v9150_v23  ;;  %v624_v56 = vadd.f32 %v8039_v50, %v8985_v4  ;;  %v1528_v61 = vsel %vm1430_vm6, %v1518_v48, %v1527_v51  ;;  %v9201_v23 = vld [vmem:[#allocation2 + $0x68] sm:$0xff] }
 0x143   : > { %v1267_v49 = vpack.c.bf16 %v1228_v12, %v1227_v34  ;;  %v2771_v14 = vsel %vm2673_vm9, %v2761_v31, %v2770_v28  ;;  %v2779_v52 = vor.u32 %v2778_v54, %v2775_v60  ;;  %8075 = vmatmul.mubr.msk.bf16.gmra.mrb[20].mxu1 %vm1279_vm3, %v1528_v61  ;;  %v1537_v6 = vsel %vm1430_vm6, %v1527_v51, %v1536_v47  ;;  %v9203_v50 = vpop.f32.mrb[44].mxu0  ;;  %v9251_v61 = vld [vmem:[%s11628_s2] ss:$0 sm:$0xff] }
 0x144   : > { %8175 = vmatmul.mubr.msk.bf16.gmra.mrb[68].mxu0 %vm1279_vm3, %v2771_v14  ;;  %vm729_vm11 = vcmp.ge.f32.partialorder %v621_v7, 0.0  ;;  %v785_v24 = vmul.f32 0.1, %v621_v7  ;;  %vm727_vm12 = vcmp.ge.f32.partialorder %v613_v0, 0.0  ;;  %8078 = vmatprep.mubr.msk.bf16.mxu1 %vm1279_vm3, %v1537_v6  ;;  %v783_v13 = vmul.f32 0.1, %v613_v0 }
 0x145   : > { %1296 = vst.msk [vmem:[#allocation2 + $0x80] sm:$0xff] %vm1279_vm3, %v1267_v49  ;;  %v2780_v17 = vsel %vm2673_vm9, %v2770_v28, %v2779_v52  ;;  %vm730_vm13 = vcmp.ge.f32.partialorder %v624_v56, 0.0  ;;  %v786_v22 = vmul.f32 0.1, %v624_v56  ;;  %v9208_v48 = vpop.f32.mrb[45].mxu0  ;;  %v616_v39 = vadd.f32 %v8985_v4, %v9152_v43 }
 0x146   : > { %8178 = vmatprep.mubr.msk.bf16.mxu0 %vm1279_vm3, %v2780_v17  ;;  %v841_v58 = vsel %vm729_vm11, %v621_v7, %v785_v24  ;;  %v1539_v1 = vshrl.u32 %v9196_v10, 16  ;;  %v1542_v45 = vshll.u32 %v9196_v10, 16  ;;  %v9215_v31 = vpop.f32.mrb[46].mxu0  ;;  %v839_v35 = vsel %vm727_vm12, %v613_v0, %v783_v13  ;;  %v9241_v7 = vld [vmem:[#allocation2 + $0x70] sm:$0xff]  ;;  %v11674_v24 = vld [vmem:[#allocation9_spill] sm:$0xff] }
 0x147   : > { %v1233_v3 = vmul.f32 %v8964_v59, %v841_v58  ;;  %v842_v46 = vsel %vm730_vm13, %v624_v56, %v786_v22  ;;  %v1548_v18 = vshrl.u32 %v9201_v23, 16  ;;  %v9220_v44 = vpop.f32.mrb[47].mxu0  ;;  %v1231_v33 = vmul.f32 %v8960_v57, %v839_v35 }
 0x148   : > { %v1234_v19 = vmul.f32 %v11672_v25, %v842_v46  ;;  %vm728_vm14 = vcmp.ge.f32.partialorder %v616_v39, 0.0  ;;  %v784_v43 = vmul.f32 0.1, %v616_v39  ;;  %v1541_v41 = vrot.slane %v1539_v1, 3 }
 0x149   : > { %v1544_v29 = vrot.slane %v1542_v45, 4  ;;  %v2784_v40 = vrot.slane %v1539_v1, 4  ;;  %v2787_v34 = vrot.slane %v1542_v45, 5  ;;  %v1550_v59 = vrot.slane %v1548_v18, 3  ;;  %v11676_v45 = vld [vmem:[#allocation8_spill] sm:$0xff] }
 0x14a   : > { %v1270_v16 = vpack.c.bf16 %v1234_v19, %v1233_v3  ;;  %v840_v9 = vsel %vm728_vm14, %v616_v39, %v784_v43  ;;  %v1551_v55 = vshll.u32 %v9201_v23, 16  ;;  %v2793_v26 = vrot.slane %v1548_v18, 4  ;;  %v11675_v39 = vld [vmem:[#allocation7_spill] sm:$0xff] }
 0x14b   : > { %v1232_v32 = vmul.f32 %v11673_v38, %v840_v9  ;;  %v1545_v63 = vor.u32 %v1544_v29, %v1541_v41  ;;  %v2788_v11 = vor.u32 %v2787_v34, %v2784_v40  ;;  %v637_v8 = vadd.f32 %v9175_v42, %v8985_v4  ;;  %v9231_v15 = vpop.f32.mrb[48].mxu0  ;;  %v11677_v29 = vld [vmem:[#allocation6_spill] sm:$0xff] }
 0x14c   : > { %1299 = vst.msk [vmem:[#allocation2 + $0x98] sm:$0xff] %vm1279_vm3, %v1270_v16  ;;  %v1553_v57 = vrot.slane %v1551_v55, 4  ;;  %v2796_v5 = vrot.slane %v1551_v55, 5  ;;  %v629_v53 = vadd.f32 %v8985_v4, %v9180_v36  ;;  %v640_v51 = vadd.f32 %v9183_v21, %v8985_v4  ;;  %v9237_v28 = vpop.f32.mrb[49].mxu0 }
 0x14d   : > { %v1269_v30 = vpack.c.bf16 %v1232_v32, %v1231_v33  ;;  %v1546_v60 = vsel %vm1430_vm6, %v1536_v47, %v1545_v63  ;;  %v2789_v12 = vsel %vm2673_vm9, %v2779_v52, %v2788_v11  ;;  %vm733_vm15 = vcmp.ge.f32.partialorder %v637_v8, 0.0  ;;  %v9243_v0 = vpop.f32.mrb[50].mxu0  ;;  %v9255_v52 = vld [vmem:[#allocation2 + $0x78] sm:$0xff] }
 0x14e   : > { %8079 = vmatmul.mubr.msk.bf16.gmra.mrb[24].mxu1 %vm1279_vm3, %v1546_v60  ;;  %8179 = vmatmul.mubr.msk.bf16.gmra.mrb[72].mxu0 %vm1279_vm3, %v2789_v12  ;;  %v1554_v42 = vor.u32 %v1553_v57, %v1550_v59  ;;  %v2797_v54 = vor.u32 %v2796_v5, %v2793_v26  ;;  %v789_v36 = vmul.f32 0.1, %v637_v8  ;;  %vm731_vm0 = vcmp.ge.f32.partialorder %v629_v53, 0.0  ;;  %v9257_v6 = vpop.f32.mrb[51].mxu0 }
 0x14f   : > { %1298 = vst.msk [vmem:[#allocation2 + $0x90] sm:$0xff] %vm1279_vm3, %v1269_v30  ;;  %v787_v47 = vmul.f32 0.1, %v629_v53  ;;  %vm734_vm4 = vcmp.ge.f32.partialorder %v640_v51, 0.0  ;;  %v790_v4 = vmul.f32 0.1, %v640_v51  ;;  %v632_v14 = vadd.f32 %v9251_v61, %v9185_v20 }
 0x150   : > { %v1555_v21 = vsel %vm1430_vm6, %v1545_v63, %v1554_v42  ;;  %v2798_v56 = vsel %vm2673_vm9, %v2788_v11, %v2797_v54  ;;  %v845_v49 = vsel %vm733_vm15, %v637_v8, %v789_v36  ;;  %v1557_v58 = vshrl.u32 %v9241_v7, 16  ;;  %v9283_v36 = vld [vmem:[#allocation2 + $0x88] sm:$0xff] }
 0x151   : > { %8082 = vmatprep.mubr.msk.bf16.mxu1 %vm1279_vm3, %v1555_v21  ;;  %8182 = vmatprep.mubr.msk.bf16.mxu0 %vm1279_vm3, %v2798_v56  ;;  %v1237_v17 = vmul.f32 %v11674_v24, %v845_v49  ;;  %v843_v13 = vsel %vm731_vm0, %v629_v53, %v787_v47  ;;  %v846_v22 = vsel %vm734_vm4, %v640_v51, %v790_v4  ;;  %vm732_vm5 = vcmp.ge.f32.partialorder %v632_v14, 0.0  ;;  %v9281_v51 = vld [vmem:[#allocation2 + $0x80] sm:$0xff]  ;;  %v11678_v47 = vld [vmem:[#allocation13_spill] sm:$0xff] }
 0x152   : > { %v1235_v1 = vmul.f32 %v11675_v39, %v843_v13  ;;  %v1238_v3 = vmul.f32 %v11676_v45, %v846_v22  ;;  %v788_v20 = vmul.f32 0.1, %v632_v14  ;;  %v1559_v35 = vrot.slane %v1557_v58, 3  ;;  %v11679_v22 = vld [vmem:[#allocation11_spill] sm:$0xff]  ;;  %v11680_v39 = vld [vmem:[#allocation12_spill] sm:$0xff] }
 0x153   : > { %v1560_v46 = vshll.u32 %v9241_v7, 16  ;;  %v2802_v18 = vrot.slane %v1557_v58, 4  ;;  %v1566_v33 = vshrl.u32 %v9255_v52, 16  ;;  %v1569_v43 = vshll.u32 %v9255_v52, 16 }
 0x154   : > { %v1272_v25 = vpack.c.bf16 %v1238_v3, %v1237_v17  ;;  %v844_v19 = vsel %vm732_vm5, %v632_v14, %v788_v20  ;;  %v653_v41 = vadd.f32 %v9251_v61, %v9203_v50  ;;  %v645_v50 = vadd.f32 %v9251_v61, %v9208_v48  ;;  %v11681_v20 = vld [vmem:[#allocation10_spill] sm:$0xff] }
 0x155   : > { %v1236_v40 = vmul.f32 %v11677_v29, %v844_v19  ;;  %v1562_v34 = vrot.slane %v1560_v46, 4  ;;  %v2805_v16 = vrot.slane %v1560_v46, 5  ;;  %v1568_v9 = vrot.slane %v1566_v33, 3 }
 0x156   : > { %1301 = vst.msk [vmem:[#allocation2 + $0xa8] sm:$0xff] %vm1279_vm3, %v1272_v25  ;;  %v1571_v59 = vrot.slane %v1569_v43, 4  ;;  %v2811_v55 = vrot.slane %v1566_v33, 4  ;;  %v2814_v38 = vrot.slane %v1569_v43, 5  ;;  %vm737_vm7 = vcmp.ge.f32.partialorder %v653_v41, 0.0 }
 0x157   : > { %v1271_v32 = vpack.c.bf16 %v1236_v40, %v1235_v1  ;;  %v1563_v63 = vor.u32 %v1562_v34, %v1559_v35  ;;  %v2806_v11 = vor.u32 %v2805_v16, %v2802_v18  ;;  %v793_v26 = vmul.f32 0.1, %v653_v41 }
 0x158   : > { %v1572_v57 = vor.u32 %v1571_v59, %v1568_v9  ;;  %v2815_v5 = vor.u32 %v2814_v38, %v2811_v55  ;;  %v656_v8 = vadd.f32 %v9251_v61, %v9215_v31  ;;  %v648_v12 = vadd.f32 %v9251_v61, %v9220_v44 }
 0x159   : > { %1300 = vst.msk [vmem:[#allocation2 + $0xa0] sm:$0xff] %vm1279_vm3, %v1271_v32  ;;  %v1564_v53 = vsel %vm1430_vm6, %v1554_v42, %v1563_v63  ;;  %v2807_v30 = vsel %vm2673_vm9, %v2797_v54, %v2806_v11  ;;  %v849_v60 = vsel %vm737_vm7, %v653_v41, %v793_v26  ;;  %vm735_vm8 = vcmp.ge.f32.partialorder %v645_v50, 0.0 }
 0x15a   : > { %8083 = vmatmul.mubr.msk.bf16.gmra.mrb[28].mxu1 %vm1279_vm3, %v1564_v53  ;;  %8183 = vmatmul.mubr.msk.bf16.gmra.mrb[76].mxu0 %vm1279_vm3, %v2807_v30  ;;  %v1573_v48 = vsel %vm1430_vm6, %v1563_v63, %v1572_v57  ;;  %v2816_v31 = vsel %vm2673_vm9, %v2806_v11, %v2815_v5  ;;  %v1241_v42 = vmul.f32 %v11678_v47, %v849_v60  ;;  %v791_v44 = vmul.f32 0.1, %v645_v50  ;;  %v9309_v11 = vld [vmem:[#allocation2 + $0x90] sm:$0xff] }
 0x15b   : > { %8086 = vmatprep.mubr.msk.bf16.mxu1 %vm1279_vm3, %v1573_v48  ;;  %8186 = vmatprep.mubr.msk.bf16.mxu0 %vm1279_vm3, %v2816_v31  ;;  %vm738_vm10 = vcmp.ge.f32.partialorder %v656_v8, 0.0  ;;  %v794_v54 = vmul.f32 0.1, %v656_v8  ;;  %vm736_vm11 = vcmp.ge.f32.partialorder %v648_v12, 0.0  ;;  %v792_v4 = vmul.f32 0.1, %v648_v12 }
 0x15c   : > { %v1575_v21 = vshrl.u32 %v9281_v51, 16  ;;  %v1578_v56 = vshll.u32 %v9281_v51, 16  ;;  %v1584_v49 = vshrl.u32 %v9283_v36, 16  ;;  %v847_v14 = vsel %vm735_vm8, %v645_v50, %v791_v44  ;;  %v11683_v31 = vld [vmem:[#allocation15_spill] sm:$0xff] }
 0x15d   : > { %v850_v24 = vsel %vm738_vm10, %v656_v8, %v794_v54  ;;  %v1587_v17 = vshll.u32 %v9283_v36, 16  ;;  %v669_v13 = vadd.f32 %v9251_v61, %v9231_v15  ;;  %v1239_v58 = vmul.f32 %v11679_v22, %v847_v14  ;;  %v9314_v8 = vld [vmem:[#allocation2 + $0x98] sm:$0xff] }
 0x15e   : > { %v1242_v1 = vmul.f32 %v11680_v39, %v850_v24  ;;  %v848_v45 = vsel %vm736_vm11, %v648_v12, %v792_v4  ;;  %v1577_v3 = vrot.slane %v1575_v21, 3  ;;  %v1580_v46 = vrot.slane %v1578_v56, 4  ;;  %v11684_v4 = vld [vmem:[#allocation16_spill] sm:$0xff] }
 0x15f   : > { %v1240_v35 = vmul.f32 %v11681_v20, %v848_v45  ;;  %v2820_v18 = vrot.slane %v1575_v21, 4  ;;  %v2823_v33 = vrot.slane %v1578_v56, 5  ;;  %v1586_v19 = vrot.slane %v1584_v49, 3  ;;  %v11685_v45 = vld [vmem:[#allocation14_spill] sm:$0xff] }
 0x160   : > { %v1274_v25 = vpack.c.bf16 %v1242_v1, %v1241_v42  ;;  %v1589_v43 = vrot.slane %v1587_v17, 4  ;;  %v2829_v41 = vrot.slane %v1584_v49, 4  ;;  %v1581_v40 = vor.u32 %v1580_v46, %v1577_v3 }
 0x161   : > { %v1273_v29 = vpack.c.bf16 %v1240_v35, %v1239_v58  ;;  %v2824_v34 = vor.u32 %v2823_v33, %v2820_v18  ;;  %v2832_v16 = vrot.slane %v1587_v17, 5  ;;  %vm741_vm12 = vcmp.ge.f32.partialorder %v669_v13, 0.0 }
 0x162   : > { %1303 = vst.msk [vmem:[#allocation2 + $0xb8] sm:$0xff] %vm1279_vm3, %v1274_v25  ;;  %v1590_v15 = vor.u32 %v1589_v43, %v1586_v19  ;;  %v797_v9 = vmul.f32 0.1, %v669_v13  ;;  %v661_v59 = vadd.f32 %v9251_v61, %v9237_v28  ;;  %v1582_v55 = vsel %vm1430_vm6, %v1572_v57, %v1581_v40 }
 0x163   : > { %1302 = vst.msk [vmem:[#allocation2 + $0xb0] sm:$0xff] %vm1279_vm3, %v1273_v29  ;;  %v2825_v38 = vsel %vm2673_vm9, %v2815_v5, %v2824_v34  ;;  %v2833_v32 = vor.u32 %v2832_v16, %v2829_v41  ;;  %v672_v63 = vadd.f32 %v9251_v61, %v9243_v0  ;;  %8087 = vmatmul.mubr.msk.bf16.gmra.mrb[32].mxu1 %vm1279_vm3, %v1582_v55  ;;  %v11682_v5 = vld [vmem:[#allocation17_spill] sm:$0xff]  ;;  %v1593_v12 = vshrl.u32 %v9309_v11, 16 }
 0x164   : > { %8187 = vmatmul.mubr.msk.bf16.gmra.mrb[80].mxu0 %vm1279_vm3, %v2825_v38  ;;  %v1591_v26 = vsel %vm1430_vm6, %v1581_v40, %v1590_v15  ;;  %v853_v50 = vsel %vm741_vm12, %v669_v13, %v797_v9  ;;  %vm739_vm13 = vcmp.ge.f32.partialorder %v661_v59, 0.0  ;;  %v795_v28 = vmul.f32 0.1, %v661_v59  ;;  %v9330_v13 = vld [vmem:[#allocation2 + $0xa8] sm:$0xff] }
 0x165   : > { %8090 = vmatprep.mubr.msk.bf16.mxu1 %vm1279_vm3, %v1591_v26  ;;  %v2834_v57 = vsel %vm2673_vm9, %v2824_v34, %v2833_v32  ;;  %v1245_v53 = vmul.f32 %v11682_v5, %v853_v50  ;;  %vm742_vm14 = vcmp.ge.f32.partialorder %v672_v63, 0.0  ;;  %v798_v0 = vmul.f32 0.1, %v672_v63 }
 0x166   : > { %8190 = vmatprep.mubr.msk.bf16.mxu0 %vm1279_vm3, %v2834_v57  ;;  %v851_v30 = vsel %vm739_vm13, %v661_v59, %v795_v28  ;;  %v664_v60 = vadd.f32 %v9251_v61, %v9257_v6  ;;  %v1596_v48 = vshll.u32 %v9309_v11, 16  ;;  %v1602_v44 = vshrl.u32 %v9314_v8, 16  ;;  %v9328_v6 = vld [vmem:[#allocation2 + $0xa0] sm:$0xff] }
 0x167   : > { %v1243_v47 = vmul.f32 %v11683_v31, %v851_v30  ;;  %v854_v42 = vsel %vm742_vm14, %v672_v63, %v798_v0  ;;  %v1605_v54 = vshll.u32 %v9314_v8, 16  ;;  %v1595_v49 = vrot.slane %v1593_v12, 3 }
 0x168   : > { %v1246_v21 = vmul.f32 %v11684_v4, %v854_v42  ;;  %vm740_vm15 = vcmp.ge.f32.partialorder %v664_v60, 0.0  ;;  %v796_v56 = vmul.f32 0.1, %v664_v60  ;;  %v1598_v14 = vrot.slane %v1596_v48, 4 }
 0x169   : > { %v2838_v24 = vrot.slane %v1593_v12, 4  ;;  %v2841_v17 = vrot.slane %v1596_v48, 5  ;;  %v1604_v61 = vrot.slane %v1602_v44, 3  ;;  %v1607_v39 = vrot.slane %v1605_v54, 4  ;;  %v9344_v38 = vld [vmem:[#allocation2 + $0xb8] sm:$0xff] }
 0x16a   : > { %v1276_v22 = vpack.c.bf16 %v1246_v21, %v1245_v53  ;;  %v852_v58 = vsel %vm740_vm15, %v664_v60, %v796_v56  ;;  %v2847_v1 = vrot.slane %v1602_v44, 4  ;;  %v1599_v20 = vor.u32 %v1598_v14, %v1595_v49  ;;  %v9339_v34 = vld [vmem:[#allocation2 + $0xb0] sm:$0xff] }
 0x16b   : > { %v1244_v3 = vmul.f32 %v11685_v45, %v852_v58  ;;  %v2842_v35 = vor.u32 %v2841_v17, %v2838_v24  ;;  %v2850_v46 = vrot.slane %v1605_v54, 5  ;;  %v1608_v18 = vor.u32 %v1607_v39, %v1604_v61 }
 0x16c   : > { %1305 = vst.msk [vmem:[#allocation2 + $0xc8] sm:$0xff] %vm1279_vm3, %v1276_v22  ;;  %v1611_v33 = vshrl.u32 %v9328_v6, 16  ;;  %v1614_v25 = vshll.u32 %v9328_v6, 16  ;;  %v1620_v19 = vshrl.u32 %v9330_v13, 16  ;;  %v1600_v41 = vsel %vm1430_vm6, %v1590_v15, %v1599_v20 }
 0x16d   : > { %v1275_v43 = vpack.c.bf16 %v1244_v3, %v1243_v47  ;;  %v2843_v29 = vsel %vm2673_vm9, %v2833_v32, %v2842_v35  ;;  %v2851_v40 = vor.u32 %v2850_v46, %v2847_v1  ;;  %8091 = vmatmul.mubr.msk.bf16.gmra.mrb[36].mxu1 %vm1279_vm3, %v1600_v41  ;;  %v1609_v16 = vsel %vm1430_vm6, %v1599_v20, %v1608_v18 }
 0x16e   : > { %8191 = vmatmul.mubr.msk.bf16.gmra.mrb[84].mxu0 %vm1279_vm3, %v2843_v29  ;;  %v1613_v9 = vrot.slane %v1611_v33, 3  ;;  %v1616_v59 = vrot.slane %v1614_v25, 4  ;;  %v2856_v55 = vrot.slane %v1611_v33, 4  ;;  %8094 = vmatprep.mubr.msk.bf16.mxu1 %vm1279_vm3, %v1609_v16  ;;  %v2859_v32 = vrot.slane %v1614_v25, 5  ;;  %v7666_v33 = vld [vmem:[%s11629_s3 + $0x6] sm:$0x1] }
 0x16f   : > { %1304 = vst.msk [vmem:[#allocation2 + $0xc0] sm:$0xff] %vm1279_vm3, %v1275_v43  ;;  %v2852_v15 = vsel %vm2673_vm9, %v2842_v35, %v2851_v40  ;;  %v1622_v63 = vrot.slane %v1620_v19, 3  ;;  %v1623_v26 = vshll.u32 %v9330_v13, 16  ;;  %v2865_v28 = vrot.slane %v1620_v19, 4  ;;  %v8534_v25 = vld [vmem:[%s11629_s3 + $0x4] sm:$0x1] }
 0x170   : > { %8194 = vmatprep.mubr.msk.bf16.mxu0 %vm1279_vm3, %v2852_v15  ;;  %v1617_v50 = vor.u32 %v1616_v59, %v1613_v9  ;;  %v1629_v57 = vshrl.u32 %v9339_v34, 16  ;;  %v1632_v5 = vshll.u32 %v9339_v34, 16  ;;  %v2860_v53 = vor.u32 %v2859_v32, %v2856_v55 }
 0x171   : > { %v1625_v0 = vrot.slane %v1623_v26, 4  ;;  %v2868_v30 = vrot.slane %v1623_v26, 5  ;;  %v1638_v60 = vshrl.u32 %v9344_v38, 16  ;;  %v1641_v56 = vshll.u32 %v9344_v38, 16  ;;  %v2101_v26 = vld [vmem:[#allocation2 + $0x8] sm:$0xff] }
 0x172   : > { %v1618_v12 = vsel %vm1430_vm6, %v1608_v18, %v1617_v50  ;;  %v1631_v48 = vrot.slane %v1629_v57, 3  ;;  %v1634_v31 = vrot.slane %v1632_v5, 4  ;;  %v2874_v47 = vrot.slane %v1629_v57, 4 }
 0x173   : > { %v2861_v42 = vsel %vm2673_vm9, %v2851_v40, %v2860_v53  ;;  %v1626_v44 = vor.u32 %v1625_v0, %v1622_v63  ;;  %v2869_v54 = vor.u32 %v2868_v30, %v2865_v28  ;;  %v2877_v4 = vrot.slane %v1632_v5, 5  ;;  %v2100_v63 = vld [vmem:[#allocation2] sm:$0xf0] }
 0x174   : > { %v1640_v21 = vrot.slane %v1638_v60, 3  ;;  %v2883_v49 = vrot.slane %v1638_v60, 4  ;;  %v1635_v17 = vor.u32 %v1634_v31, %v1631_v48  ;;  %v1643_v22 = vrot.slane %v1641_v56, 4  ;;  %v4012_v30 = vld [vmem:[#allocation2 + $0x20] sm:$0xff]  ;;  %v9391_v31 = vld [vmem:[#allocation2 + $0x28] sm:$0xff] }
 0x175   : > { %v1627_v14 = vsel %vm1430_vm6, %v1617_v50, %v1626_v44  ;;  %v2870_v24 = vsel %vm2673_vm9, %v2860_v53, %v2869_v54  ;;  %8095 = vmatmul.mubr.msk.bf16.gmra.mrb[40].mxu1 %vm1279_vm3, %v1618_v12  ;;  %v2878_v61 = vor.u32 %v2877_v4, %v2874_v47  ;;  %v2886_v58 = vrot.slane %v1641_v56, 5  ;;  %v9381_v53 = vld [vmem:[#allocation2 + $0x10] sm:$0xff]  ;;  %v4011_v12 = vld [vmem:[#allocation2 + $0x18] sm:$0xff] }
 0x176   : > { %8195 = vmatmul.mubr.msk.bf16.gmra.mrb[88].mxu0 %vm1279_vm3, %v2861_v42  ;;  %v1428_v39 = vld [vmem:[#allocation2 + $0xc0] sm:$0xf]  ;;  %8098 = vmatprep.mubr.msk.bf16.mxu1 %vm1279_vm3, %v1627_v14  ;;  %v1644_v35 = vor.u32 %v1643_v22, %v1640_v21  ;;  %v4109_v19 = vsel %vm1727_vm2, %v8534_v25, 0  ;;  %v1636_v43 = vsel %vm1430_vm6, %v1626_v44, %v1635_v17  ;;  %v2153_v50 = vrot.slane %v2100_v63, 4 }
 0x177   : > { %v2670_v1 = vld [vmem:[#allocation2 + $0xc0] sm:$0x1f]  ;;  %8198 = vmatprep.mubr.msk.bf16.mxu0 %vm1279_vm3, %v2870_v24  ;;  %v1647_v45 = vshrl.u32 %v1428_v39, 16  ;;  %v1650_v3 = vshll.u32 %v1428_v39, 16  ;;  %v2887_v46 = vor.u32 %v2886_v58, %v2883_v49  ;;  %v2879_v41 = vsel %vm2673_vm9, %v2869_v54, %v2878_v61  ;;  %8257 = vmatpush3.bf16.msra.mxu0 %v4109_v19  ;;  %v9398_v49 = vld [vmem:[#allocation2 + $0x30] sm:$0xff] }
 0x178   : > { %v2890_v20 = vshrl.u32 %v2670_v1, 16  ;;  %v2893_v18 = vshll.u32 %v2670_v1, 16  ;;  %8516 = vmatprep.subr.msk.bf16.mxu0 %vm1727_vm2, %v7666_v33  ;;  %v1645_v59 = vsel %vm1430_vm6, %v1635_v17, %v1644_v35  ;;  %v2154_v28 = vrot.slane %v2101_v26, 4  ;;  %v8535_v21 = vld [vmem:[%s11629_s3 + $0x3] sm:$0x1] }
 0x179   : > { %v1649_v29 = vrot.slane %v1647_v45, 3  ;;  %v1652_v40 = vrot.slane %v1650_v3, 4  ;;  %v2888_v55 = vsel %vm2673_vm9, %v2878_v61, %v2887_v46  ;;  %vm2152_vm0 = vcmask 1043456  }
 0x17a   : > { %v2892_v16 = vrot.slane %v2890_v20, 4  ;;  %v2895_v9 = vrot.slane %v2893_v18, 5  ;;  %v2155_v0 = vsel %vm2152_vm0, %v2153_v50, %v2154_v28  ;;  %v2156_v60 = vrot.slane %v9381_v53, 4  ;;  %v9411_v20 = vld [vmem:[%s11629_s3 + $0x5] sm:$0x1] }
 0x17b   : > { %v1653_v15 = vor.u32 %v1652_v40, %v1649_v29  ;;  %v3375_v48 = vshrl.u32 %v9381_v53, 16  ;;  %v5184_v47 = vshrl.u32 %v4012_v30, 16  ;;  %v5187_v42 = vshll.u32 %v4012_v30, 16 }
 0x17c   : > { %v2896_v32 = vor.u32 %v2895_v9, %v2892_v16  ;;  %v2158_v44 = vrot.slane %v4011_v12, 4  ;;  %v3383_v54 = vshrl.u32 %v4011_v12, 16  ;;  %v2157_v4 = vsel %vm2152_vm0, %v2154_v28, %v2156_v60 }
 0x17d   : > { %8099 = vmatmul.mubr.msk.bf16.gmra.mrb[44].mxu1 %vm1279_vm3, %v1636_v43  ;;  %v1654_v57 = vsel %vm1430_vm6, %v1644_v35, %v1653_v15  ;;  %v3639_v56 = vsel %vm1727_vm2, %v8535_v21, 0  ;;  %v5186_v14 = vrot.slane %v5184_v47, 3  ;;  %v5189_v24 = vrot.slane %v5187_v42, 4 }
 0x17e   : > { %8199 = vmatmul.mubr.msk.bf16.gmra.mrb[92].mxu0 %vm1279_vm3, %v2879_v41  ;;  %8102 = vmatprep.mubr.msk.bf16.mxu1 %vm1279_vm3, %v1645_v59  ;;  %v2897_v5 = vsel %vm2673_vm9, %v2887_v46, %v2896_v32  ;;  %v9400_v17 = vrot.slane %v3375_v48, 7  ;;  %v3385_v61 = vrot.slane %v3383_v54, 7  ;;  %v3386_v22 = vshll.u32 %v4011_v12, 16 }
 0x17f   : > { %8202 = vmatprep.mubr.msk.bf16.mxu0 %vm1279_vm3, %v2888_v55  ;;  %v5193_v58 = vshrl.u32 %v9391_v31, 16  ;;  %vm3369_vm4 = vsmask.f32 256  ;;  %v5472_v39 = vsel %vm1727_vm2, %v7666_v33, 0  ;;  %v5196_v1 = vshll.u32 %v9391_v31, 16 }
 0x180   : > { %v3393_v45 = vrot.slane %v5184_v47, 7  ;;  %v2159_v3 = vsel %vm2152_vm0, %v2156_v60, %v2158_v44  ;;  %v3388_v35 = vor.u32 %v3386_v22, %v3385_v61  ;;  %v5202_v18 = vshrl.u32 %v9398_v49, 16 }
 0x181   : > { %v5195_v46 = vrot.slane %v5193_v58, 3  ;;  %v9415_v33 = vor.u32 %v5189_v24, %v5186_v14  ;;  %v5198_v25 = vrot.slane %v5196_v1, 4  ;;  %v5205_v43 = vshll.u32 %v9398_v49, 16 }
 0x182   : > { %v3396_v19 = vor.u32 %v5187_v42, %v3393_v45  ;;  %v9421_v41 = vsel %vm3369_vm4, %v9400_v17, %v3388_v35  ;;  %v5204_v29 = vrot.slane %v5202_v18, 3  ;;  %v3401_v40 = vrot.slane %v5193_v58, 7 }
 0x183   : > { %v2160_v16 = vrot.slane %v4012_v30, 4  ;;  %v5199_v9 = vor.u32 %v5198_v25, %v5195_v46  ;;  %v5207_v55 = vrot.slane %v5205_v43, 4  ;;  %v2162_v15 = vrot.slane %v9391_v31, 4 }
 0x184   : > { %v9426_v59 = vsel %vm3369_vm4, %v3385_v61, %v3396_v19  ;;  %v3404_v32 = vor.u32 %v5196_v1, %v3401_v40  ;;  %v9429_v63 = vrot.slane %v5202_v18, 7  ;;  %v2164_v48 = vrot.slane %v9398_v49, 4  ;;  %v9570_v18 = vld [vmem:[%s11629_s3 + $0x8] sm:$0x1] }
 0x185   : > { %8103 = vmatmul.mubr.msk.bf16.gmra.mrb[48].mxu1 %vm1279_vm3, %v1654_v57  ;;  %v9433_v26 = vsel %vm1430_vm6, %v9415_v33, %v5199_v9  ;;  %v9435_v50 = vor.u32 %v5207_v55, %v5204_v29  ;;  %v2166_v47 = vrot.slane %v9114_v27, 4  ;;  %v8562_v42 = vmov 0.0   ;;  %v5148_v29 = vld [vmem:[#allocation2 + $0x18] sm:$0xf8]  ;;  %v3342_v55 = vld [vmem:[#allocation2 + $0x8] sm:$0x80] }
 0x186   : > { %8203 = vmatmul.mubr.msk.bf16.gmra.mrb[96].mxu0 %vm1279_vm3, %v2897_v5  ;;  %8108 = vmatprep.mubr.msk.bf16.mxu1 %vm1279_vm3, %v2155_v0  ;;  %v9438_v28 = vsel %vm3369_vm4, %v3393_v45, %v3404_v32  ;;  %v3412_v57 = vor.u32 %v5205_v43, %v9429_v63  ;;  %v2161_v5 = vsel %vm2152_vm0, %v2158_v44, %v2160_v16  ;;  %v8537_v44 = vld [vmem:[#allocation2 + $0x38] sm:$0xff]  ;;  %v2172_v14 = vrot.slane %v9160_v37, 4  ;;  %v2124_v32 = vld [vmem:[#allocation2 + $0xc0] sm:$0xf] }
 0x187   : > { %8258 = vmatprep.mubr.msk.bf16.mxu0 %vm1279_vm3, %v9381_v53  ;;  %v9444_v0 = vsel %vm1430_vm6, %v5199_v9, %v9435_v50  ;;  %1310 = vst.msk [vmem:[#allocation3 + $0x10] sm:$0xff] %vm345_vm1, %v8562_v42  ;;  %1308 = vst.msk [vmem:[#allocation3] sm:$0xff] %vm345_vm1, %v8562_v42  ;;  %v2165_v27 = vsel %vm2152_vm0, %v2162_v15, %v2164_v48  ;;  %v2167_v54 = vsel %vm2152_vm0, %v2164_v48, %v2166_v47  ;;  %vm4507_vm5 = vsmask.f32 7424 }
 0x188   : > { %v9453_v60 = vsel %vm3369_vm4, %v3401_v40, %v3412_v57  ;;  %1309 = vst.msk [vmem:[#allocation3 + $0x8] sm:$0xff] %vm345_vm1, %v8562_v42  ;;  %1311 = vst.msk [vmem:[#allocation3 + $0x18] sm:$0xff] %vm345_vm1, %v8562_v42  ;;  %v2174_v24 = vrot.slane %v9165_v62, 4  ;;  %v2176_v22 = vrot.slane %v9196_v10, 4  ;;  %v2184_v45 = vrot.slane %v9281_v51, 4 }
 0x189   : > { %1312 = vst.msk [vmem:[#allocation3 + $0x20] sm:$0xff] %vm345_vm1, %v8562_v42  ;;  %1313 = vst.msk [vmem:[#allocation3 + $0x28] sm:$0xff] %vm345_vm1, %v8562_v42  ;;  %v2188_v35 = vrot.slane %v9309_v11, 4  ;;  %v2194_v25 = vrot.slane %v9330_v13, 4  ;;  %v2196_v43 = vrot.slane %v9339_v34, 4  ;;  %v5176_v40 = vshrl.u32 %v5148_v29, 16 }
 0x18a   : > { %1314 = vst.msk [vmem:[#allocation3 + $0x30] sm:$0xff] %vm345_vm1, %v8562_v42  ;;  %1315 = vst.msk [vmem:[#allocation3 + $0x38] sm:$0xff] %vm345_vm1, %v8562_v42  ;;  %v2177_v58 = vsel %vm2152_vm0, %v2174_v24, %v2176_v22  ;;  %v3378_v57 = vshll.u32 %v9381_v53, 16  ;;  %v9608_v53 = vld [vmem:[#allocation2 + $0x38] sm:$0xff] }
 0x18b   : > { %1316 = vst.msk [vmem:[#allocation3 + $0x40] sm:$0xff] %vm345_vm1, %v8562_v42  ;;  %1317 = vst.msk [vmem:[#allocation3 + $0x48] sm:$0xff] %vm345_vm1, %v8562_v42  ;;  %v2197_v9 = vsel %vm2152_vm0, %v2194_v25, %v2196_v43 }
 0x18c   : > { %1318 = vst.msk [vmem:[#allocation3 + $0x50] sm:$0xff] %vm345_vm1, %v8562_v42  ;;  %1319 = vst.msk [vmem:[#allocation3 + $0x58] sm:$0xff] %vm345_vm1, %v8562_v42  ;;  %v3380_v48 = vor.u32 %v3378_v57, %v9400_v17  ;;  %v9612_v17 = vld [vmem:[#allocation2 + $0x40] sm:$0xff] }
 0x18d   : > { %8109 = vmatmul.mubr.msk.bf16.vlgmr.msra.gmra.mrb[52].mxu1 %vm1279_vm3, %v2157_v4  ;;  %1320 = vst.msk [vmem:[#allocation3 + $0x60] sm:$0xff] %vm345_vm1, %v8562_v42  ;;  %1321 = vst.msk [vmem:[#allocation3 + $0x68] sm:$0xff] %vm345_vm1, %v8562_v42  ;;  %v8538_v4 = vld [vmem:[#allocation2 + $0x40] sm:$0xff] }
 0x18e   : > { %8259 = vmatmul.mubr.msk.bf16.vlgmr.msra.gmra.mrb[100].mxu0 %vm1279_vm3, %v4011_v12  ;;  %8207 = vmatpush3.bf16.msra.mxu1 %v3639_v56  ;;  %v8536_v12 = vld [vmem:[#allocation2 + $0x30] sm:$0xff]  ;;  %1322 = vst.msk [vmem:[#allocation3 + $0x70] sm:$0xff] %vm345_vm1, %v8562_v42  ;;  %1323 = vst.msk [vmem:[#allocation3 + $0x78] sm:$0xff] %vm345_vm1, %v8562_v42  ;;  %v2168_v21 = vrot.slane %v8538_v4, 4  ;;  %v2170_v56 = vrot.slane %v9138_v2, 4 }
 0x18f   : > { %8112 = vmatprep.mubr.msk.bf16.mxu1 %vm1279_vm3, %v2159_v3  ;;  %8262 = vmatprep.mubr.msk.bf16.mxu0 %vm1279_vm3, %v4012_v30  ;;  %v2163_v30 = vsel %vm2152_vm0, %v2160_v16, %v2162_v15  ;;  %1324 = vst.msk [vmem:[#allocation3 + $0x80] sm:$0xff] %vm345_vm1, %v8562_v42  ;;  %1325 = vst.msk [vmem:[#allocation3 + $0x88] sm:$0xff] %vm345_vm1, %v8562_v42  ;;  %v5179_v16 = vshll.u32 %v5148_v29, 16  ;;  %v4032_v15 = vld [vmem:[#allocation2 + $0xc0] sm:$0xff] }
 0x190   : > { %8357 = vmatpush3.bf16.msra.mxu0 %v5472_v39  ;;  %8515 = vmatprep.subr.msk.bf16.mxu1 %vm1727_vm2, %v9411_v20  ;;  %1326 = vst.msk [vmem:[#allocation3 + $0x90] sm:$0xff] %vm345_vm1, %v8562_v42  ;;  %1327 = vst.msk [vmem:[#allocation3 + $0x98] sm:$0xff] %vm345_vm1, %v8562_v42  ;;  %v2169_v49 = vsel %vm2152_vm0, %v2166_v47, %v2168_v21  ;;  %v2173_v61 = vsel %vm2152_vm0, %v2170_v56, %v2172_v14  ;;  %v2180_v39 = vrot.slane %v9241_v7, 4  ;;  %v1360_v57 = vld [vmem:[#allocation3 + $0x20] sm:$0xff] }
 0x191   : > { %1328 = vst.msk [vmem:[#allocation3 + $0xa0] sm:$0xff] %vm345_vm1, %v8562_v42  ;;  %1329 = vst.msk [vmem:[#allocation3 + $0xa8] sm:$0xff] %vm345_vm1, %v8562_v42  ;;  %8518 = vmatprep.subr.msk.bf16.mxu0 %vm1727_vm2, %v9570_v18 }
 0x192   : > { %1330 = vst.msk [vmem:[#allocation3 + $0xb0] sm:$0xff] %vm345_vm1, %v8562_v42  ;;  %1331 = vst.msk [vmem:[#allocation3 + $0xb8] sm:$0xff] %vm345_vm1, %v8562_v42 }
 0x193   : > { %1332 = vst.msk [vmem:[#allocation3 + $0xc0] sm:$0xff] %vm345_vm1, %v8562_v42  ;;  %1333 = vst.msk [vmem:[#allocation3 + $0xc8] sm:$0xff] %vm345_vm1, %v8562_v42 }
 0x194   : > { %1334 = vst.msk [vmem:[#allocation3 + $0xd0] sm:$0xff] %vm345_vm1, %v8562_v42  ;;  %1335 = vst.msk [vmem:[#allocation3 + $0xd8] sm:$0xff] %vm345_vm1, %v8562_v42 }
 0x195   : > { %8113 = vmatmul.mubr.msk.bf16.gmra.mrb[56].mxu1 %vm1279_vm3, %v2161_v5  ;;  %1336 = vst.msk [vmem:[#allocation3 + $0xe0] sm:$0xff] %vm345_vm1, %v8562_v42  ;;  %1337 = vst.msk [vmem:[#allocation3 + $0xe8] sm:$0xff] %vm345_vm1, %v8562_v42  ;;  %v5178_v5 = vrot.slane %v5176_v40, 3 }
 0x196   : > { %8263 = vmatmul.mubr.msk.bf16.gmra.mrb[104].mxu0 %vm1279_vm3, %v9391_v31  ;;  %8116 = vmatprep.mubr.msk.bf16.mxu1 %vm1279_vm3, %v2163_v30  ;;  %1338 = vst.msk [vmem:[#allocation3 + $0xf0] sm:$0xff] %vm345_vm1, %v8562_v42  ;;  %1339 = vst.msk [vmem:[#allocation3 + $0xf8] sm:$0xff] %vm345_vm1, %v8562_v42  ;;  %v2171_v31 = vsel %vm2152_vm0, %v2168_v21, %v2170_v56  ;;  %v5181_v30 = vrot.slane %v5179_v16, 4  ;;  %v5214_v21 = vshll.u32 %v9608_v53, 16  ;;  %v5220_v56 = vshrl.u32 %v9612_v17, 16 }
 0x197   : > { %8266 = vmatprep.mubr.msk.bf16.mxu0 %vm1279_vm3, %v8536_v12  ;;  %1340 = vst.msk [vmem:[#allocation3 + $0x100] sm:$0xff] %vm345_vm1, %v8562_v42  ;;  %1341 = vst.msk [vmem:[#allocation3 + $0x108] sm:$0xff] %vm345_vm1, %v8562_v42  ;;  %v2200_v12 = vrot.slane %v2124_v32, 4 }
 0x198   : > { %1342 = vst.msk [vmem:[#allocation3 + $0x110] sm:$0xff] %vm345_vm1, %v8562_v42  ;;  %1343 = vst.msk [vmem:[#allocation3 + $0x118] sm:$0xff] %vm345_vm1, %v8562_v42 }
 0x199   : > { %1344 = vst.msk [vmem:[#allocation3 + $0x120] sm:$0xff] %vm345_vm1, %v8562_v42  ;;  %1345 = vst.msk [vmem:[#allocation3 + $0x128] sm:$0xff] %vm345_vm1, %v8562_v42 }
 0x19a   : > { %1346 = vst.msk [vmem:[#allocation3 + $0x130] sm:$0xff] %vm345_vm1, %v8562_v42  ;;  %1347 = vst.msk [vmem:[#allocation3 + $0x138] sm:$0xff] %vm345_vm1, %v8562_v42 }
 0x19b   : > { %1348 = vst.msk [vmem:[#allocation3 + $0x140] sm:$0xff] %vm345_vm1, %v8562_v42  ;;  %1349 = vst.msk [vmem:[#allocation3 + $0x148] sm:$0xff] %vm345_vm1, %v8562_v42 }
 0x19c   : > { %1350 = vst.msk [vmem:[#allocation3 + $0x150] sm:$0xff] %vm345_vm1, %v8562_v42  ;;  %1351 = vst.msk [vmem:[#allocation3 + $0x158] sm:$0xff] %vm345_vm1, %v8562_v42 }
 0x19d   : > { %1352 = vst.msk [vmem:[#allocation3 + $0x160] sm:$0xff] %vm345_vm1, %v8562_v42  ;;  %1353 = vst.msk [vmem:[#allocation3 + $0x168] sm:$0xff] %vm345_vm1, %v8562_v42  ;;  %8117 = vmatmul.mubr.msk.bf16.gmra.mrb[60].mxu1 %vm1279_vm3, %v2165_v27  ;;  %v4033_v27 = vld [vmem:[#allocation2 + $0xc8] sm:$0xff] }
 0x19e   : > { %1354 = vst.msk [vmem:[#allocation3 + $0x170] sm:$0xff] %vm345_vm1, %v8562_v42  ;;  %1355 = vst.msk [vmem:[#allocation3 + $0x178] sm:$0xff] %vm345_vm1, %v8562_v42  ;;  %8267 = vmatmul.mubr.msk.bf16.gmra.mrb[108].mxu0 %vm1279_vm3, %v8537_v44  ;;  %8120 = vmatprep.mubr.msk.bf16.mxu1 %vm1279_vm3, %v2167_v54  ;;  %v5182_v42 = vor.u32 %v5181_v30, %v5178_v5 }
 0x19f   : > { %8270 = vmatprep.mubr.msk.bf16.mxu0 %vm1279_vm3, %v8538_v4  ;;  %v5211_v4 = vshrl.u32 %v9608_v53, 16 }
 0x1a0   : > { %v5191_v54 = vsel %vm1430_vm6, %v5182_v42, %v9415_v33  ;;  %v4777_v33 = vsel %vm1727_vm2, %v9411_v20, 0  ;;  %v5222_v20 = vrot.slane %v5220_v56, 3 }
 0x1a1   : > { %v3417_v29 = vrot.slane %v5211_v4, 7 }
 0x1a3   : > { %v3420_v42 = vor.u32 %v5214_v21, %v3417_v29 }
 0x1a5   : > { %8121 = vmatmul.mubr.msk.bf16.gmra.mrb[64].mxu1 %vm1279_vm3, %v2169_v49  ;;  %v5223_v49 = vshll.u32 %v9612_v17, 16 }
 0x1a6   : > { %8271 = vmatmul.mubr.msk.bf16.gmra.mrb[112].mxu0 %vm1279_vm3, %v9138_v2  ;;  %8124 = vmatprep.mubr.msk.bf16.mxu1 %vm1279_vm3, %v2171_v31  ;;  %v2175_v2 = vsel %vm2152_vm0, %v2172_v14, %v2174_v24  ;;  %v1358_v31 = vld [vmem:[#allocation3 + $0x10] sm:$0xff]  ;;  %v1356_v14 = vld [vmem:[#allocation3] sm:$0xff]  ;;  %v9620_v24 = vld [vmem:[#allocation2 + $0x48] sm:$0xff] }
 0x1a7   : > { %8274 = vmatprep.mubr.msk.bf16.mxu0 %vm1279_vm3, %v9160_v37  ;;  %v2178_v37 = vrot.slane %v9201_v23, 4 }
 0x1a9   : > { %v2181_v1 = vsel %vm2152_vm0, %v2178_v37, %v2180_v39 }
 0x1ad   : > { %8125 = vmatmul.mubr.msk.bf16.gmra.mrb[68].mxu1 %vm1279_vm3, %v2173_v61 }
 0x1ae   : > { %8275 = vmatmul.mubr.msk.bf16.gmra.mrb[116].mxu0 %vm1279_vm3, %v9165_v62  ;;  %8128 = vmatprep.mubr.msk.bf16.mxu1 %vm1279_vm3, %v2175_v2  ;;  %v2179_v62 = vsel %vm2152_vm0, %v2176_v22, %v2178_v37  ;;  %v1359_v22 = vld [vmem:[#allocation3 + $0x18] sm:$0xff]  ;;  %v5213_v37 = vrot.slane %v5211_v4, 3  ;;  %v1361_v4 = vld [vmem:[#allocation3 + $0x28] sm:$0xff] }
 0x1af   : > { %8278 = vmatprep.mubr.msk.bf16.mxu0 %vm1279_vm3, %v9196_v10  ;;  %v2182_v10 = vrot.slane %v9255_v52, 4 }
 0x1b1   : > { %v2185_v3 = vsel %vm2152_vm0, %v2182_v10, %v2184_v45 }
 0x1b5   : > { %8129 = vmatmul.mubr.msk.bf16.gmra.mrb[72].mxu1 %vm1279_vm3, %v2177_v58  ;;  %v5216_v58 = vrot.slane %v5214_v21, 4 }
 0x1b6   : > { %8279 = vmatmul.mubr.msk.bf16.gmra.mrb[120].mxu0 %vm1279_vm3, %v9201_v23  ;;  %8132 = vmatprep.mubr.msk.bf16.mxu1 %vm1279_vm3, %v2179_v62  ;;  %v2183_v23 = vsel %vm2152_vm0, %v2180_v39, %v2182_v10 }
 0x1b7   : > { %8282 = vmatprep.mubr.msk.bf16.mxu0 %vm1279_vm3, %v9241_v7  ;;  %v2186_v7 = vrot.slane %v9283_v36, 4 }
 0x1b9   : > { %v2189_v46 = vsel %vm2152_vm0, %v2186_v7, %v2188_v35 }
 0x1bd   : > { %8133 = vmatmul.mubr.msk.bf16.gmra.mrb[76].mxu1 %vm1279_vm3, %v2181_v1  ;;  %v1357_v1 = vld [vmem:[#allocation3 + $0x8] sm:$0xff] }
 0x1be   : > { %8283 = vmatmul.mubr.msk.bf16.gmra.mrb[124].mxu0 %vm1279_vm3, %v9255_v52  ;;  %8136 = vmatprep.mubr.msk.bf16.mxu1 %vm1279_vm3, %v2183_v23  ;;  %v2187_v52 = vsel %vm2152_vm0, %v2184_v45, %v2186_v7  ;;  %v6712_v23 = vsel %vm1727_vm2, %v9570_v18, 0  ;;  %v5225_v45 = vrot.slane %v5223_v49, 4  ;;  %v5229_v18 = vshrl.u32 %v9620_v24, 16 }
 0x1bf   : > { %8286 = vmatprep.mubr.msk.bf16.mxu0 %vm1279_vm3, %v9281_v51  ;;  %v2190_v51 = vrot.slane %v9314_v8, 4 }
 0x1c0   : > { %v5231_v40 = vrot.slane %v5229_v18, 3 }
 0x1c5   : > { %8137 = vmatmul.mubr.msk.bf16.gmra.mrb[80].mxu1 %vm1279_vm3, %v2185_v3 }
 0x1c6   : > { %8287 = vmatmul.mubr.msk.bf16.gmra.mrb[128].mxu0 %vm1279_vm3, %v9283_v36  ;;  %8140 = vmatprep.mubr.msk.bf16.mxu1 %vm1279_vm3, %v2187_v52  ;;  %v2191_v36 = vsel %vm2152_vm0, %v2188_v35, %v2190_v51  ;;  %v9641_v35 = vld [vmem:[%s11629_s3 + $0x7] sm:$0x1] }
 0x1c7   : > { %8290 = vmatprep.mubr.msk.bf16.mxu0 %vm1279_vm3, %v9309_v11  ;;  %v2192_v11 = vrot.slane %v9328_v6, 4 }
 0x1c9   : > { %v2193_v19 = vsel %vm2152_vm0, %v2190_v51, %v2192_v11 }
 0x1cd   : > { %8141 = vmatmul.mubr.msk.bf16.gmra.mrb[84].mxu1 %vm1279_vm3, %v2189_v46 }
 0x1ce   : > { %8291 = vmatmul.mubr.msk.bf16.gmra.mrb[132].mxu0 %vm1279_vm3, %v9314_v8  ;;  %8144 = vmatprep.mubr.msk.bf16.mxu1 %vm1279_vm3, %v2191_v36  ;;  %v2195_v8 = vsel %vm2152_vm0, %v2192_v11, %v2194_v25  ;;  %v5232_v36 = vshll.u32 %v9620_v24, 16  ;;  %v9656_v25 = vld [vmem:[#allocation2 + $0x58] sm:$0xff] }
 0x1cf   : > { %8294 = vmatprep.mubr.msk.bf16.mxu0 %vm1279_vm3, %v9328_v6  ;;  %v2198_v6 = vrot.slane %v9344_v38, 4 }
 0x1d0   : > { %v5234_v16 = vrot.slane %v5232_v36, 4 }
 0x1d5   : > { %8145 = vmatmul.mubr.msk.bf16.gmra.mrb[88].mxu1 %vm1279_vm3, %v2193_v19  ;;  %v5226_v19 = vor.u32 %v5225_v45, %v5222_v20  ;;  %v3421_v20 = vsel %vm3369_vm4, %v9429_v63, %v3420_v42  ;;  %v9710_v45 = vld [vmem:[#allocation2 + $0x70] sm:$0xff] }
 0x1d6   : > { %8295 = vmatmul.mubr.msk.bf16.gmra.mrb[136].mxu0 %vm1279_vm3, %v9330_v13  ;;  %8148 = vmatprep.mubr.msk.bf16.mxu1 %vm1279_vm3, %v2195_v8  ;;  %v2199_v13 = vsel %vm2152_vm0, %v2196_v43, %v2198_v6  ;;  %v9663_v43 = vld [vmem:[#allocation2 + $0x60] sm:$0xff] }
 0x1d7   : > { %8298 = vmatprep.mubr.msk.bf16.mxu0 %vm1279_vm3, %v9339_v34  ;;  %v3371_v34 = vshrl.u32 %v3342_v55, 16  ;;  %v1362_v55 = vld [vmem:[#allocation3 + $0x30] sm:$0xff]  ;;  %v5256_v32 = vshrl.u32 %v9663_v43, 16 }
 0x1d9   : > { %v3373_v47 = vrot.slane %v3371_v34, 7  ;;  %v5259_v34 = vshll.u32 %v9663_v43, 16  ;;  %v5258_v21 = vrot.slane %v5256_v32, 3  ;;  %v9722_v63 = vrot.slane %v5256_v32, 7  ;;  %v6408_v43 = vld [vmem:[#allocation2 + $0xb8] sm:$0xff] }
 0x1da   : > { %v5277_v32 = vshll.u32 %v9710_v45, 16 }
 0x1db   : > { %v3381_v44 = vsel %vm3369_vm4, %v3373_v47, %v3380_v48 }
 0x1dd   : > { %8149 = vmatmul.mubr.msk.bf16.gmra.mrb[92].mxu1 %vm1279_vm3, %v2197_v9  ;;  %v5247_v9 = vshrl.u32 %v9656_v25, 16 }
 0x1de   : > { %8299 = vmatmul.mubr.msk.bf16.gmra.mrb[140].mxu0 %vm1279_vm3, %v9344_v38  ;;  %8152 = vmatprep.mubr.msk.bf16.mxu1 %vm1279_vm3, %v2199_v13  ;;  %v2201_v38 = vsel %vm2152_vm0, %v2198_v6, %v2200_v12  ;;  %v9665_v6 = vrot.slane %v5220_v56, 7  ;;  %v9691_v56 = vld [vmem:[#allocation2 + $0x68] sm:$0xff] }
 0x1df   : > { %8302 = vmatprep.mubr.msk.bf16.mxu0 %vm1279_vm3, %v4032_v15  ;;  %v5250_v15 = vshll.u32 %v9656_v25, 16 }
 0x1e1   : > { %v5252_v17 = vrot.slane %v5250_v15, 4 }
 0x1e5   : > { %8153 = vmatmul.mubr.msk.bf16.gmra.mrb[96].mxu1 %vm1279_vm3, %v2201_v38  ;;  %v3433_v38 = vrot.slane %v5229_v18, 7 }
 0x1e6   : > { %8303 = vmatmul.mubr.msk.bf16.gmra.mrb[144].mxu0 %vm1279_vm3, %v4033_v27  ;;  %8208 = vmatprep.mubr.msk.bf16.mxu1 %vm1279_vm3, %v3381_v44 }
 0x1e7   : > { %8358 = vmatprep.mubr.msk.bf16.mxu0 %vm1279_vm3, %v5191_v54 }
 0x1ec   : > { %v8060_v61 = vpop.f32.mrb[4].mxu1  ;;  %v9622_v2 = vpop.f32.mrb[52].mxu0 }
 0x1ed   : > { %v1958_v62 = vadd.f32 %v8060_v61, %v1358_v31  ;;  %v1765_v39 = vpop.f32.mrb[5].mxu1  ;;  %v9626_v10 = vpop.f32.mrb[53].mxu0  ;;  %8209 = vmatmul.mubr.msk.bf16.vlgmr.msra.gmra.mrb[100].mxu1 %vm1279_vm3, %v9421_v41  ;;  %v9645_v41 = vld [vmem:[#allocation2 + $0x50] sm:$0xff]  ;;  %v5235_v31 = vor.u32 %v5234_v16, %v5231_v40  ;;  %v6402_v16 = vld [vmem:[#allocation2 + $0x88] sm:$0xff] }
 0x1ee   : > { %8359 = vmatmul.mubr.msk.bf16.vlgmr.msra.gmra.mrb[148].mxu0 %vm1279_vm3, %v9433_v26  ;;  %v1956_v7 = vadd.f32 %v1765_v39, %v1356_v14  ;;  %v8061_v3 = vpop.f32.mrb[6].mxu1  ;;  %v9636_v52 = vpop.f32.mrb[54].mxu0  ;;  %8307 = vmatpush3.bf16.msra.mxu1 %v4777_v33  ;;  %v5238_v8 = vshrl.u32 %v9645_v41, 16  ;;  %v5249_v14 = vrot.slane %v5247_v9, 3  ;;  %v9734_v40 = vld [vmem:[#allocation2 + $0x70] sm:$0xff] }
 0x1ef   : > { %8212 = vmatprep.mubr.msk.bf16.mxu1 %vm1279_vm3, %v9426_v59  ;;  %2006 = vst.msk [vmem:[#allocation3 + $0x10] sm:$0xff] %vm345_vm1, %v1958_v62  ;;  %v1959_v26 = vadd.f32 %v8061_v3, %v1359_v22  ;;  %v1768_v51 = vpop.f32.mrb[7].mxu1  ;;  %v9648_v46 = vpop.f32.mrb[55].mxu0  ;;  %8362 = vmatprep.mubr.msk.bf16.mxu0 %vm1279_vm3, %v9444_v0  ;;  %v5217_v59 = vor.u32 %v5216_v58, %v5213_v37  ;;  %v5241_v0 = vshll.u32 %v9645_v41, 16  ;;  %11686 = vst [vmem:[#allocation5_spill] sm:$0xff] %v9734_v40 }
 0x1f0   : > { %2004 = vst.msk [vmem:[#allocation3] sm:$0xff] %vm345_vm1, %v1956_v7  ;;  %v1957_v11 = vadd.f32 %v1768_v51, %v1357_v1  ;;  %8457 = vmatpush3.bf16.msra.mxu0 %v6712_v23  ;;  %8517 = vmatprep.subr.msk.bf16.mxu1 %vm1727_vm2, %v9641_v35  ;;  %v5240_v30 = vrot.slane %v5238_v8, 3  ;;  %v5265_v1 = vshrl.u32 %v9691_v56, 16  ;;  %v5268_v23 = vshll.u32 %v9691_v56, 16 }
 0x1f1   : > { %2007 = vst.msk [vmem:[#allocation3 + $0x18] sm:$0xff] %vm345_vm1, %v1959_v26  ;;  %v5218_v13 = vsel %vm1430_vm6, %v9435_v50, %v5217_v59  ;;  %v5227_v5 = vsel %vm1430_vm6, %v5217_v59, %v5226_v19  ;;  %v5243_v12 = vrot.slane %v5241_v0, 4  ;;  %v1363_v50 = vld [vmem:[#allocation3 + $0x38] sm:$0xff]  ;;  %v3436_v3 = vor.u32 %v5232_v36, %v3433_v38 }
 0x1f2   : > { %2005 = vst.msk [vmem:[#allocation3 + $0x8] sm:$0xff] %vm345_vm1, %v1957_v11  ;;  %v9717_v26 = vrot.slane %v5247_v9, 7  ;;  %v5236_v51 = vsel %vm1430_vm6, %v5226_v19, %v5235_v31  ;;  %v5253_v18 = vor.u32 %v5252_v17, %v5249_v14  ;;  %v5267_v36 = vrot.slane %v5265_v1, 3  ;;  %v1366_v19 = vld [vmem:[#allocation3 + $0x50] sm:$0xff] }
 0x1f3   : > { %v5244_v62 = vor.u32 %v5243_v12, %v5240_v30  ;;  %v5270_v59 = vrot.slane %v5268_v23, 4  ;;  %v3437_v9 = vsel %vm3369_vm4, %v9665_v6, %v3436_v3  ;;  %v6401_v30 = vld [vmem:[#allocation2 + $0x80] sm:$0xff]  ;;  %v6404_v12 = vld [vmem:[#allocation2 + $0x98] sm:$0xff] }
 0x1f5   : > { %8213 = vmatmul.mubr.msk.bf16.gmra.mrb[104].mxu1 %vm1279_vm3, %v9438_v28  ;;  %v8064_v48 = vpop.f32.mrb[8].mxu1  ;;  %v3428_v28 = vor.u32 %v5223_v49, %v9665_v6  ;;  %v5261_v49 = vrot.slane %v5259_v34, 4  ;;  %v5245_v24 = vsel %vm1430_vm6, %v5235_v31, %v5244_v62  ;;  %v9751_v6 = vor.u32 %v5259_v34, %v9722_v63 }
 0x1f6   : > { %8363 = vmatmul.mubr.msk.bf16.gmra.mrb[152].mxu0 %vm1279_vm3, %v5218_v13  ;;  %v9679_v47 = vpop.f32.mrb[56].mxu0  ;;  %8216 = vmatprep.mubr.msk.bf16.mxu1 %vm1279_vm3, %v9453_v60  ;;  %v1962_v27 = vadd.f32 %v8064_v48, %v1362_v55  ;;  %v1781_v44 = vpop.f32.mrb[9].mxu1  ;;  %v9693_v60 = vrot.slane %v5238_v8, 7  ;;  %v5274_v8 = vshrl.u32 %v9710_v45, 16  ;;  %v9742_v13 = vor.u32 %v5250_v15, %v9717_v26 }
 0x1f7   : > { %8366 = vmatprep.mubr.msk.bf16.mxu0 %vm1279_vm3, %v5227_v5  ;;  %v9689_v54 = vpop.f32.mrb[57].mxu0  ;;  %v1960_v33 = vadd.f32 %v1781_v44, %v1360_v57  ;;  %v8065_v61 = vpop.f32.mrb[10].mxu1  ;;  %v3429_v7 = vsel %vm3369_vm4, %v3417_v29, %v3428_v28  ;;  %v9720_v11 = vor.u32 %v5261_v49, %v5258_v21  ;;  %v1364_v29 = vld [vmem:[#allocation3 + $0x40] sm:$0xff]  ;;  %v1367_v5 = vld [vmem:[#allocation3 + $0x58] sm:$0xff]  ;;  %v5254_v48 = vsel %vm1430_vm6, %v5244_v62, %v5253_v18  ;;  %v1365_v28 = vld [vmem:[#allocation3 + $0x48] sm:$0xff] }
 0x1f8   : > { %v9695_v53 = vpop.f32.mrb[58].mxu0  ;;  %2010 = vst.msk [vmem:[#allocation3 + $0x30] sm:$0xff] %vm345_vm1, %v1962_v27  ;;  %v1963_v22 = vadd.f32 %v8065_v61, %v1363_v50  ;;  %v1784_v37 = vpop.f32.mrb[11].mxu1  ;;  %v3444_v41 = vor.u32 %v5241_v0, %v9693_v60  ;;  %v6400_v0 = vld [vmem:[#allocation2 + $0x78] sm:$0xff]  ;;  %v6406_v27 = vld [vmem:[#allocation2 + $0xa8] sm:$0xff]  ;;  %v9755_v44 = vor.u32 %v5270_v59, %v5267_v36  ;;  %v6405_v61 = vld [vmem:[#allocation2 + $0xa0] sm:$0xff] }
 0x1f9   : > { %v9702_v58 = vpop.f32.mrb[59].mxu0  ;;  %2008 = vst.msk [vmem:[#allocation3 + $0x20] sm:$0xff] %vm345_vm1, %v1960_v33  ;;  %v1961_v39 = vadd.f32 %v1784_v37, %v1361_v4  ;;  %v5263_v50 = vsel %vm1430_vm6, %v5253_v18, %v9720_v11  ;;  %v5276_v4 = vrot.slane %v5274_v8, 3  ;;  %v11634_v34 = vrot.slane %v9734_v40, 4  ;;  %v9771_v36 = vld [vmem:[#allocation2 + $0x78] sm:$0xff]  ;;  %v9773_v59 = vld [vmem:[#allocation2 + $0xd0] sm:$0xff] }
 0x1fa   : > { %2011 = vst.msk [vmem:[#allocation3 + $0x38] sm:$0xff] %vm345_vm1, %v1963_v22  ;;  %v3445_v55 = vsel %vm3369_vm4, %v3433_v38, %v3444_v41  ;;  %v6403_v38 = vld [vmem:[#allocation2 + $0x90] sm:$0xff]  ;;  %v5918_v37 = vrot.slane %v6400_v0, 4  ;;  %v5920_v62 = vrot.slane %v6401_v30, 4  ;;  %v6409_v41 = vld [vmem:[#allocation2 + $0xc0] sm:$0xff]  ;;  %11687 = vst [vmem:[#allocation4_spill] sm:$0xff] %v9773_v59 }
 0x1fb   : > { %2009 = vst.msk [vmem:[#allocation3 + $0x28] sm:$0xff] %vm345_vm1, %v1961_v39  ;;  %v6407_v22 = vld [vmem:[#allocation2 + $0xb0] sm:$0xff]  ;;  %v5922_v39 = vrot.slane %v6402_v16, 4  ;;  %v5924_v18 = vrot.slane %v6403_v38, 4  ;;  %v5928_v16 = vrot.slane %v6405_v61, 4  ;;  %v5930_v30 = vrot.slane %v6406_v27, 4 }
 0x1fc   : > { %v9781_v0 = vsel %vm2152_vm0, %v5918_v37, %v5920_v62  ;;  %v5283_v38 = vshrl.u32 %v9771_v36, 16  ;;  %v6388_v40 = vld [vmem:[#allocation2 + $0x18] sm:$0xf0] }
 0x1fd   : > { %8217 = vmatmul.mubr.msk.bf16.gmra.mrb[108].mxu1 %vm1279_vm3, %v3421_v20  ;;  %v5279_v20 = vrot.slane %v5277_v32, 4  ;;  %11689 = vst [vmem:[#allocation7_spill] sm:$0xff] %v9781_v0 }
 0x1fe   : > { %8367 = vmatmul.mubr.msk.bf16.gmra.mrb[156].mxu0 %vm1279_vm3, %v5236_v51  ;;  %8220 = vmatprep.mubr.msk.bf16.mxu1 %vm1279_vm3, %v3429_v7  ;;  %v6410_v51 = vld [vmem:[#allocation2 + $0xc8] sm:$0xff] }
 0x1ff   : > { %8370 = vmatprep.mubr.msk.bf16.mxu0 %vm1279_vm3, %v5245_v24  ;;  %v5926_v24 = vrot.slane %v6404_v12, 4  ;;  %v5932_v12 = vrot.slane %v6407_v22, 4 }
 0x200   : > { %v8068_v57 = vpop.f32.mrb[12].mxu1 }
 0x201   : > { %v1966_v42 = vadd.f32 %v8068_v57, %v1366_v19  ;;  %v9753_v25 = vpop.f32.mrb[60].mxu0  ;;  %v1797_v15 = vpop.f32.mrb[13].mxu1  ;;  %v9778_v19 = vsel %vm2152_vm0, %v11634_v34, %v5918_v37  ;;  %v9790_v57 = vsel %vm2152_vm0, %v5922_v39, %v5924_v18  ;;  %v9807_v27 = vsel %vm2152_vm0, %v5930_v30, %v5932_v12 }
 0x202   : > { %v1964_v31 = vadd.f32 %v1797_v15, %v1364_v29  ;;  %v9759_v14 = vpop.f32.mrb[61].mxu0  ;;  %v8069_v33 = vpop.f32.mrb[14].mxu1  ;;  %11688 = vst [vmem:[#allocation9_spill] sm:$0xff] %v9778_v19  ;;  %v9784_v29 = vsel %vm2152_vm0, %v5920_v62, %v5922_v39  ;;  %11691 = vst [vmem:[#allocation6_spill] sm:$0xff] %v9790_v57  ;;  %v5936_v15 = vrot.slane %v6409_v41, 4  ;;  %v1370_v62 = vld [vmem:[#allocation3 + $0x70] sm:$0xff]  ;;  %v3453_v39 = vsel %vm3369_vm4, %v9693_v60, %v9742_v13 }
 0x203   : > { %2014 = vst.msk [vmem:[#allocation3 + $0x50] sm:$0xff] %vm345_vm1, %v1966_v42  ;;  %v1967_v17 = vadd.f32 %v8069_v33, %v1367_v5  ;;  %v9763_v21 = vpop.f32.mrb[62].mxu0  ;;  %v1800_v49 = vpop.f32.mrb[15].mxu1  ;;  %11690 = vst [vmem:[#allocation8_spill] sm:$0xff] %v9784_v29  ;;  %v9793_v5 = vsel %vm2152_vm0, %v5924_v18, %v5926_v24  ;;  %v9797_v42 = vld [vmem:[#allocation2 + $0x80] sm:$0xff]  ;;  %v5272_v41 = vsel %vm1430_vm6, %v9720_v11, %v9755_v44 }
 0x204   : > { %2012 = vst.msk [vmem:[#allocation3 + $0x40] sm:$0xff] %vm345_vm1, %v1964_v31  ;;  %v1965_v7 = vadd.f32 %v1800_v49, %v1365_v28  ;;  %v9768_v3 = vpop.f32.mrb[63].mxu0  ;;  %11692 = vst [vmem:[#allocation13_spill] sm:$0xff] %v9793_v5  ;;  %v5938_v28 = vrot.slane %v6410_v51, 4  ;;  %v9804_v31 = vsel %vm2152_vm0, %v5928_v16, %v5930_v30  ;;  %v5292_v49 = vshrl.u32 %v9797_v42, 16 }
 0x205   : > { %2015 = vst.msk [vmem:[#allocation3 + $0x58] sm:$0xff] %vm345_vm1, %v1967_v17  ;;  %8221 = vmatmul.mubr.msk.bf16.gmra.mrb[112].mxu1 %vm1279_vm3, %v3437_v9  ;;  %v9800_v9 = vsel %vm2152_vm0, %v5926_v24, %v5928_v16  ;;  %11694 = vst [vmem:[#allocation12_spill] sm:$0xff] %v9804_v31  ;;  %v5280_v17 = vor.u32 %v5279_v20, %v5276_v4  ;;  %v5295_v22 = vshll.u32 %v9797_v42, 16  ;;  %v3465_v4 = vrot.slane %v5265_v1, 7  ;;  %v1368_v20 = vld [vmem:[#allocation3 + $0x60] sm:$0xff]  ;;  %v10002_v31 = vld [vmem:[#allocation2 + $0xc8] sm:$0xff] }
 0x206   : > { %8371 = vmatmul.mubr.msk.bf16.gmra.mrb[160].mxu0 %vm1279_vm3, %v5254_v48  ;;  %2013 = vst.msk [vmem:[#allocation3 + $0x48] sm:$0xff] %vm345_vm1, %v1965_v7  ;;  %8224 = vmatprep.mubr.msk.bf16.mxu1 %vm1279_vm3, %v3445_v55  ;;  %11693 = vst [vmem:[#allocation11_spill] sm:$0xff] %v9800_v9  ;;  %v5934_v48 = vrot.slane %v6408_v43, 4  ;;  %v11633_v55 = vrot.slane %v9773_v59, 4  ;;  %v9818_v43 = vsel %vm2152_vm0, %v5936_v15, %v5938_v28  ;;  %v5285_v51 = vrot.slane %v5283_v38, 3 }
 0x207   : > { %8374 = vmatprep.mubr.msk.bf16.mxu0 %vm1279_vm3, %v5263_v50  ;;  %11695 = vst [vmem:[#allocation10_spill] sm:$0xff] %v9807_v27  ;;  %v5286_v50 = vshll.u32 %v9771_v36, 16  ;;  %11698 = vst [vmem:[#allocation16_spill] sm:$0xff] %v9818_v43  ;;  %v3461_v7 = vsel %vm3369_vm4, %v9717_v26, %v9751_v6  ;;  %v9842_v24 = vrot.slane %v5274_v8, 7  ;;  %v1371_v26 = vld [vmem:[#allocation3 + $0x78] sm:$0xff]  ;;  %v5281_v1 = vsel %vm1430_vm6, %v9755_v44, %v5280_v17  ;;  %v1369_v8 = vld [vmem:[#allocation3 + $0x68] sm:$0xff] }
 0x208   : > { %v9812_v33 = vsel %vm2152_vm0, %v5932_v12, %v5934_v48  ;;  %v9815_v61 = vsel %vm2152_vm0, %v5934_v48, %v5936_v15  ;;  %v9825_v37 = vsel %vm2152_vm0, %v5938_v28, %v11633_v55  ;;  %v5294_v11 = vrot.slane %v5292_v49, 3  ;;  %v9854_v48 = vld [vmem:[#allocation2 + $0x88] sm:$0xff]  ;;  %v9860_v44 = vld [vmem:[#allocation2 + $0x90] sm:$0xff] }
 0x209   : > { %11696 = vst [vmem:[#allocation17_spill] sm:$0xff] %v9812_v33  ;;  %11697 = vst [vmem:[#allocation15_spill] sm:$0xff] %v9815_v61  ;;  %v5288_v18 = vrot.slane %v5286_v50, 4  ;;  %v5297_v6 = vrot.slane %v5295_v22, 4 }
 0x20a   : > { %11699 = vst [vmem:[#allocation14_spill] sm:$0xff] %v9825_v37 }
 0x20b   : > { %v5289_v34 = vor.u32 %v5288_v18, %v5285_v51  ;;  %v5298_v56 = vor.u32 %v5297_v6, %v5294_v11  ;;  %v3481_v51 = vrot.slane %v5283_v38, 7  ;;  %v9877_v18 = vrot.slane %v5292_v49, 7 }
 0x20c   : > { %v8072_v60 = vpop.f32.mrb[16].mxu1 }
 0x20d   : > { %v9844_v13 = vpop.f32.mrb[64].mxu0  ;;  %8225 = vmatmul.mubr.msk.bf16.gmra.mrb[116].mxu1 %vm1279_vm3, %v3453_v39  ;;  %v1970_v16 = vadd.f32 %v8072_v60, %v1370_v62  ;;  %v1813_v30 = vpop.f32.mrb[17].mxu1  ;;  %v5299_v38 = vsel %vm1430_vm6, %v5289_v34, %v5298_v56 }
 0x20e   : > { %8375 = vmatmul.mubr.msk.bf16.gmra.mrb[164].mxu0 %vm1279_vm3, %v5272_v41  ;;  %v9852_v12 = vpop.f32.mrb[65].mxu0  ;;  %8228 = vmatprep.mubr.msk.bf16.mxu1 %vm1279_vm3, %v3461_v7  ;;  %v1968_v15 = vadd.f32 %v1813_v30, %v1368_v20  ;;  %v8073_v28 = vpop.f32.mrb[18].mxu1  ;;  %v3468_v41 = vor.u32 %v5268_v23, %v3465_v4  ;;  %v5301_v20 = vshrl.u32 %v9854_v48, 16  ;;  %v3476_v30 = vor.u32 %v5277_v32, %v9842_v24  ;;  %v1374_v32 = vld [vmem:[#allocation3 + $0x90] sm:$0xff] }
 0x20f   : > { %8378 = vmatprep.mubr.msk.bf16.mxu0 %vm1279_vm3, %v5281_v1  ;;  %v9858_v39 = vpop.f32.mrb[66].mxu0  ;;  %2018 = vst.msk [vmem:[#allocation3 + $0x70] sm:$0xff] %vm345_vm1, %v1970_v16  ;;  %v1971_v62 = vadd.f32 %v8073_v28, %v1371_v26  ;;  %v1816_v60 = vpop.f32.mrb[19].mxu1  ;;  %v11636_v1 = vshll.u32 %v9854_v48, 16  ;;  %v5310_v23 = vshrl.u32 %v9860_v44, 16  ;;  %v11635_v26 = vshll.u32 %v9860_v44, 16 }
 0x210   : > { %v9865_v55 = vpop.f32.mrb[67].mxu0  ;;  %2016 = vst.msk [vmem:[#allocation3 + $0x60] sm:$0xff] %vm345_vm1, %v1968_v15  ;;  %v1969_v7 = vadd.f32 %v1816_v60, %v1369_v8  ;;  %v3469_v16 = vsel %vm3369_vm4, %v9722_v63, %v3468_v41  ;;  %v5290_v8 = vsel %vm1430_vm6, %v5280_v17, %v5289_v34  ;;  %v5303_v15 = vrot.slane %v5301_v20, 3  ;;  %v1372_v63 = vld [vmem:[#allocation3 + $0x80] sm:$0xff]  ;;  %v9890_v28 = vld [vmem:[#allocation2 + $0x98] sm:$0xff] }
 0x211   : > { %2019 = vst.msk [vmem:[#allocation3 + $0x78] sm:$0xff] %vm345_vm1, %v1971_v62  ;;  %v5306_v45 = vrot.slane %v11636_v1, 4  ;;  %v3477_v11 = vsel %vm3369_vm4, %v3465_v4, %v3476_v30  ;;  %v5312_v49 = vrot.slane %v5310_v23, 3  ;;  %v5315_v6 = vrot.slane %v11635_v26, 4  ;;  %v1375_v62 = vld [vmem:[#allocation3 + $0x98] sm:$0xff]  ;;  %v9896_v60 = vld [vmem:[#allocation2 + $0xa0] sm:$0xff] }
 0x212   : > { %2017 = vst.msk [vmem:[#allocation3 + $0x68] sm:$0xff] %vm345_vm1, %v1969_v7  ;;  %v3484_v34 = vor.u32 %v5286_v50, %v3481_v51  ;;  %v3492_v4 = vor.u32 %v5295_v22, %v9877_v18  ;;  %v5319_v59 = vshrl.u32 %v9890_v28, 16  ;;  %v11639_v37 = vshll.u32 %v9890_v28, 16 }
 0x213   : > { %v5316_v36 = vor.u32 %v5315_v6, %v5312_v49 }
 0x214   : > { %v5324_v6 = vrot.slane %v11639_v37, 4 }
 0x215   : > { %8229 = vmatmul.mubr.msk.bf16.gmra.mrb[120].mxu1 %vm1279_vm3, %v3469_v16 }
 0x216   : > { %8379 = vmatmul.mubr.msk.bf16.gmra.mrb[168].mxu0 %vm1279_vm3, %v5290_v8  ;;  %8232 = vmatprep.mubr.msk.bf16.mxu1 %vm1279_vm3, %v3477_v11  ;;  %v8076_v17 = vpop.f32.mrb[20].mxu1  ;;  %v1373_v8 = vld [vmem:[#allocation3 + $0x88] sm:$0xff]  ;;  %v5307_v11 = vor.u32 %v5306_v45, %v5303_v15  ;;  %v3485_v45 = vsel %vm3369_vm4, %v9842_v24, %v3484_v34 }
 0x217   : > { %8382 = vmatprep.mubr.msk.bf16.mxu0 %vm1279_vm3, %v5299_v38  ;;  %v9894_v41 = vpop.f32.mrb[68].mxu0  ;;  %v1974_v7 = vadd.f32 %v8076_v17, %v1374_v32  ;;  %v1829_v30 = vpop.f32.mrb[21].mxu1  ;;  %v5328_v32 = vshrl.u32 %v9896_v60, 16  ;;  %v11638_v17 = vshll.u32 %v9896_v60, 16 }
 0x218   : > { %v9903_v16 = vpop.f32.mrb[69].mxu0  ;;  %v1972_v38 = vadd.f32 %v1829_v30, %v1372_v63  ;;  %v8077_v26 = vpop.f32.mrb[22].mxu1  ;;  %v3497_v63 = vrot.slane %v5301_v20, 7  ;;  %v5308_v49 = vsel %vm1430_vm6, %v5298_v56, %v5307_v11  ;;  %v5317_v24 = vsel %vm1430_vm6, %v5307_v11, %v5316_v36  ;;  %v9930_v56 = vld [vmem:[#allocation2 + $0xa8] sm:$0xff]  ;;  %v9934_v30 = vld [vmem:[#allocation2 + $0xb0] sm:$0xff] }
 0x219   : > { %v9905_v1 = vpop.f32.mrb[70].mxu0  ;;  %2022 = vst.msk [vmem:[#allocation3 + $0x90] sm:$0xff] %vm345_vm1, %v1974_v7  ;;  %v1975_v50 = vadd.f32 %v8077_v26, %v1375_v62  ;;  %v1832_v42 = vpop.f32.mrb[23].mxu1  ;;  %v5321_v26 = vrot.slane %v5319_v59, 3  ;;  %v9922_v62 = vrot.slane %v5310_v23, 7  ;;  %v3493_v7 = vsel %vm3369_vm4, %v3481_v51, %v3492_v4  ;;  %v1378_v23 = vld [vmem:[#allocation3 + $0xb0] sm:$0xff] }
 0x21a   : > { %v9910_v22 = vpop.f32.mrb[71].mxu0  ;;  %2020 = vst.msk [vmem:[#allocation3 + $0x80] sm:$0xff] %vm345_vm1, %v1972_v38  ;;  %v1973_v15 = vadd.f32 %v1832_v42, %v1373_v8  ;;  %v5330_v34 = vrot.slane %v5328_v32, 3  ;;  %v5333_v20 = vrot.slane %v11638_v17, 4  ;;  %v11700_v8 = vshll.u32 %v9854_v48, 16  ;;  %v1377_v48 = vld [vmem:[#allocation3 + $0xa8] sm:$0xff] }
 0x21b   : > { %2023 = vst.msk [vmem:[#allocation3 + $0x98] sm:$0xff] %vm345_vm1, %v1975_v50  ;;  %v1376_v50 = vld [vmem:[#allocation3 + $0xa0] sm:$0xff]  ;;  %v5325_v51 = vor.u32 %v5324_v6, %v5321_v26  ;;  %v11701_v4 = vshll.u32 %v9860_v44, 16  ;;  %v5346_v26 = vshrl.u32 %v9934_v30, 16  ;;  %v11702_v6 = vshll.u32 %v9930_v56, 16 }
 0x21c   : > { %2021 = vst.msk [vmem:[#allocation3 + $0x88] sm:$0xff] %vm345_vm1, %v1973_v15  ;;  %v3500_v38 = vor.u32 %v11700_v8, %v3497_v63 }
 0x21d   : > { %8233 = vmatmul.mubr.msk.bf16.gmra.mrb[124].mxu1 %vm1279_vm3, %v3485_v45  ;;  %v3508_v11 = vor.u32 %v11701_v4, %v9922_v62  ;;  %v1379_v45 = vld [vmem:[#allocation3 + $0xb8] sm:$0xff]  ;;  %v5326_v33 = vsel %vm1430_vm6, %v5316_v36, %v5325_v51  ;;  %v5342_v27 = vrot.slane %v11702_v6, 4  ;;  %v11703_v36 = vshll.u32 %v9934_v30, 16 }
 0x21e   : > { %8383 = vmatmul.mubr.msk.bf16.gmra.mrb[172].mxu0 %vm1279_vm3, %v5308_v49  ;;  %8236 = vmatprep.mubr.msk.bf16.mxu1 %vm1279_vm3, %v3493_v7  ;;  %v5337_v49 = vshrl.u32 %v9930_v56, 16  ;;  %v3501_v61 = vsel %vm3369_vm4, %v9877_v18, %v3500_v38  ;;  %v9969_v38 = vld [vmem:[#allocation2 + $0xb8] sm:$0xff] }
 0x21f   : > { %8386 = vmatprep.mubr.msk.bf16.mxu0 %vm1279_vm3, %v5317_v24  ;;  %v5334_v24 = vor.u32 %v5333_v20, %v5330_v34  ;;  %v3509_v18 = vsel %vm3369_vm4, %v3497_v63, %v3508_v11 }
 0x221   : > { %v8080_v42 = vpop.f32.mrb[24].mxu1  ;;  %v9941_v15 = vpop.f32.mrb[72].mxu0 }
 0x222   : > { %v1978_v17 = vadd.f32 %v8080_v42, %v1378_v23  ;;  %v1845_v37 = vpop.f32.mrb[25].mxu1  ;;  %v9945_v43 = vpop.f32.mrb[73].mxu0  ;;  %v3513_v23 = vrot.slane %v5319_v59, 7  ;;  %v9956_v42 = vrot.slane %v5328_v32, 7  ;;  %v5348_v59 = vrot.slane %v5346_v26, 3 }
 0x223   : > { %v1976_v44 = vadd.f32 %v1845_v37, %v1376_v50  ;;  %v8081_v8 = vpop.f32.mrb[26].mxu1  ;;  %v9949_v4 = vpop.f32.mrb[74].mxu0  ;;  %v5339_v50 = vrot.slane %v5337_v49, 3  ;;  %v5351_v32 = vrot.slane %v11703_v36, 4  ;;  %v1383_v36 = vld [vmem:[#allocation3 + $0xd8] sm:$0xff] }
 0x224   : > { %2026 = vst.msk [vmem:[#allocation3 + $0xb0] sm:$0xff] %vm345_vm1, %v1978_v17  ;;  %v1979_v7 = vadd.f32 %v8081_v8, %v1379_v45  ;;  %v1848_v34 = vpop.f32.mrb[27].mxu1  ;;  %v9954_v20 = vpop.f32.mrb[75].mxu0  ;;  %v5335_v17 = vsel %vm1430_vm6, %v5325_v51, %v5334_v24  ;;  %v11705_v51 = vshll.u32 %v9896_v60, 16 }
 0x225   : > { %2024 = vst.msk [vmem:[#allocation3 + $0xa0] sm:$0xff] %vm345_vm1, %v1976_v44  ;;  %v1977_v37 = vadd.f32 %v1848_v34, %v1377_v48  ;;  %8237 = vmatmul.mubr.msk.bf16.gmra.mrb[128].mxu1 %vm1279_vm3, %v3501_v61  ;;  %v9974_v61 = vld [vmem:[#allocation2 + $0xc0] sm:$0xff]  ;;  %v5343_v45 = vor.u32 %v5342_v27, %v5339_v50  ;;  %v11640_v48 = vshll.u32 %v9969_v38, 16  ;;  %v5352_v6 = vor.u32 %v5351_v32, %v5348_v59  ;;  %v1382_v34 = vld [vmem:[#allocation3 + $0xd0] sm:$0xff] }
 0x226   : > { %8387 = vmatmul.mubr.msk.bf16.gmra.mrb[176].mxu0 %vm1279_vm3, %v5326_v33  ;;  %2027 = vst.msk [vmem:[#allocation3 + $0xb8] sm:$0xff] %vm345_vm1, %v1979_v7  ;;  %8240 = vmatprep.mubr.msk.bf16.mxu1 %vm1279_vm3, %v3509_v18  ;;  %v11704_v33 = vshll.u32 %v9890_v28, 16  ;;  %v3524_v11 = vor.u32 %v11705_v51, %v9956_v42  ;;  %v5355_v7 = vshrl.u32 %v9969_v38, 16  ;;  %v5364_v44 = vshrl.u32 %v9974_v61, 16  ;;  %v1380_v18 = vld [vmem:[#allocation3 + $0xc0] sm:$0xff] }
 0x227   : > { %8390 = vmatprep.mubr.msk.bf16.mxu0 %vm1279_vm3, %v5335_v17  ;;  %2025 = vst.msk [vmem:[#allocation3 + $0xa8] sm:$0xff] %vm345_vm1, %v1977_v37  ;;  %v11641_v8 = vshll.u32 %v9974_v61, 16  ;;  %v3529_v17 = vrot.slane %v5337_v49, 7  ;;  %v5344_v60 = vsel %vm1430_vm6, %v5334_v24, %v5343_v45  ;;  %v5360_v59 = vrot.slane %v11640_v48, 4  ;;  %v1381_v24 = vld [vmem:[#allocation3 + $0xc8] sm:$0xff] }
 0x228   : > { %v3516_v63 = vor.u32 %v11704_v33, %v3513_v23  ;;  %v3525_v28 = vsel %vm3369_vm4, %v3513_v23, %v3524_v11  ;;  %v5357_v33 = vrot.slane %v5355_v7, 3  ;;  %v9993_v32 = vrot.slane %v5346_v26, 7 }
 0x229   : > { %v5366_v51 = vrot.slane %v5364_v44, 3  ;;  %v5369_v11 = vrot.slane %v11641_v8, 4  ;;  %v11706_v48 = vshll.u32 %v9930_v56, 16  ;;  %v3545_v56 = vrot.slane %v5355_v7, 7 }
 0x22a   : > { %v3517_v37 = vsel %vm3369_vm4, %v9922_v62, %v3516_v63  ;;  %v5353_v62 = vsel %vm1430_vm6, %v5343_v45, %v5352_v6  ;;  %v5361_v5 = vor.u32 %v5360_v59, %v5357_v33 }
 0x22b   : > { %v3532_v9 = vor.u32 %v11706_v48, %v3529_v17  ;;  %v10021_v48 = vrot.slane %v5364_v44, 7  ;;  %v1384_v44 = vld [vmem:[#allocation3 + $0xe0] sm:$0xff] }
 0x22c   : > { %v5362_v59 = vsel %vm1430_vm6, %v5352_v6, %v5361_v5  ;;  %v1387_v6 = vld [vmem:[#allocation3 + $0xf8] sm:$0xff] }
 0x22d   : > { %v8084_v27 = vpop.f32.mrb[28].mxu1  ;;  %v9989_v50 = vpop.f32.mrb[76].mxu0  ;;  %8241 = vmatmul.mubr.msk.bf16.gmra.mrb[132].mxu1 %vm1279_vm3, %v3517_v37  ;;  %v3533_v33 = vsel %vm3369_vm4, %v9956_v42, %v3532_v9 }
 0x22e   : > { %8391 = vmatmul.mubr.msk.bf16.gmra.mrb[180].mxu0 %vm1279_vm3, %v5344_v60  ;;  %v1982_v23 = vadd.f32 %v8084_v27, %v1382_v34  ;;  %v1861_v49 = vpop.f32.mrb[29].mxu1  ;;  %v9998_v63 = vpop.f32.mrb[77].mxu0  ;;  %8244 = vmatprep.mubr.msk.bf16.mxu1 %vm1279_vm3, %v3525_v28  ;;  %v5373_v28 = vshrl.u32 %v10002_v31, 16 }
 0x22f   : > { %8394 = vmatprep.mubr.msk.bf16.mxu0 %vm1279_vm3, %v5353_v62  ;;  %v1980_v26 = vadd.f32 %v1861_v49, %v1380_v18  ;;  %v8085_v37 = vpop.f32.mrb[30].mxu1  ;;  %v10006_v60 = vpop.f32.mrb[78].mxu0  ;;  %v11642_v18 = vshll.u32 %v10002_v31, 16  ;;  %v5171_v62 = vld [vmem:[#allocation2 + $0xd0] sm:$0xff]  ;;  %v5370_v49 = vor.u32 %v5369_v11, %v5366_v51  ;;  %v11709_v51 = vshll.u32 %v9969_v38, 16 }
 0x230   : > { %2030 = vst.msk [vmem:[#allocation3 + $0xd0] sm:$0xff] %vm345_vm1, %v1982_v23  ;;  %v1983_v45 = vadd.f32 %v8085_v37, %v1383_v36  ;;  %v1864_v34 = vpop.f32.mrb[31].mxu1  ;;  %v10009_v27 = vpop.f32.mrb[79].mxu0  ;;  %v11707_v36 = vshll.u32 %v9934_v30, 16  ;;  %v1386_v37 = vld [vmem:[#allocation3 + $0xf0] sm:$0xff] }
 0x231   : > { %2028 = vst.msk [vmem:[#allocation3 + $0xc0] sm:$0xff] %vm345_vm1, %v1980_v26  ;;  %v1981_v8 = vadd.f32 %v1864_v34, %v1381_v24  ;;  %v5382_v26 = vshrl.u32 %v5171_v62, 16  ;;  %v5385_v24 = vshll.u32 %v5171_v62, 16  ;;  %v5375_v34 = vrot.slane %v5373_v28, 3  ;;  %v10038_v62 = vld [vmem:[#allocation2 + $0x10] sm:$0xff] }
 0x232   : > { %2031 = vst.msk [vmem:[#allocation3 + $0xd8] sm:$0xff] %vm345_vm1, %v1983_v45  ;;  %v3540_v23 = vor.u32 %v11707_v36, %v9993_v32  ;;  %v5378_v45 = vrot.slane %v11642_v18, 4  ;;  %v5371_v7 = vsel %vm1430_vm6, %v5361_v5, %v5370_v49  ;;  %v3548_v11 = vor.u32 %v11709_v51, %v3545_v56  ;;  %v10040_v36 = vld [vmem:[#allocation2 + $0x20] sm:$0xff] }
 0x233   : > { %2029 = vst.msk [vmem:[#allocation3 + $0xc8] sm:$0xff] %vm345_vm1, %v1981_v8  ;;  %v5172_v8 = vld [vmem:[#allocation2 + $0xd8] sm:$0xf]  ;;  %v5387_v18 = vrot.slane %v5385_v24, 4 }
 0x234   : > { %v3541_v30 = vsel %vm3369_vm4, %v3529_v17, %v3540_v23  ;;  %v5379_v38 = vor.u32 %v5378_v45, %v5375_v34  ;;  %v5391_v51 = vshrl.u32 %v5172_v8, 16  ;;  %v5394_v19 = vshll.u32 %v5172_v8, 16 }
 0x235   : > { %8245 = vmatmul.mubr.msk.bf16.gmra.mrb[136].mxu1 %vm1279_vm3, %v3533_v33  ;;  %v1385_v33 = vld [vmem:[#allocation3 + $0xe8] sm:$0xff]  ;;  %v3549_v34 = vsel %vm3369_vm4, %v9993_v32, %v3548_v11  ;;  %v6419_v8 = vshll.u32 %v6388_v40, 16 }
 0x236   : > { %8395 = vmatmul.mubr.msk.bf16.gmra.mrb[184].mxu0 %vm1279_vm3, %v5362_v59  ;;  %8248 = vmatprep.mubr.msk.bf16.mxu1 %vm1279_vm3, %v3541_v30  ;;  %v8088_v9 = vpop.f32.mrb[32].mxu1  ;;  %v11711_v59 = vshll.u32 %v9974_v61, 16  ;;  %v11644_v61 = vshrl.u32 %v10040_v36, 16 }
 0x237   : > { %8398 = vmatprep.mubr.msk.bf16.mxu0 %vm1279_vm3, %v5371_v7  ;;  %v10034_v42 = vpop.f32.mrb[80].mxu0  ;;  %v1986_v17 = vadd.f32 %v8088_v9, %v1386_v37  ;;  %v1877_v23 = vpop.f32.mrb[33].mxu1  ;;  %v5384_v7 = vrot.slane %v5382_v26, 3  ;;  %v10062_v26 = vld [vmem:[#allocation2 + $0x18] sm:$0xff] }
 0x238   : > { %11708 = vst [vmem:[#allocation18_spill] sm:$0xff] %v10034_v42  ;;  %v10042_v5 = vpop.f32.mrb[81].mxu0  ;;  %v3556_v30 = vor.u32 %v11711_v59, %v10021_v48  ;;  %v1984_v57 = vadd.f32 %v1877_v23, %v1384_v44  ;;  %v8089_v29 = vpop.f32.mrb[34].mxu1  ;;  %v4511_v42 = vshll.u32 %v10038_v62, 16  ;;  %v3561_v44 = vrot.slane %v5373_v28, 7 }
 0x239   : > { %11710 = vst [vmem:[#allocation19_spill] sm:$0xff] %v10042_v5  ;;  %v10047_v0 = vpop.f32.mrb[82].mxu0  ;;  %2034 = vst.msk [vmem:[#allocation3 + $0xf0] sm:$0xff] %vm345_vm1, %v1986_v17  ;;  %v1987_v37 = vadd.f32 %v8089_v29, %v1387_v6  ;;  %v1880_v9 = vpop.f32.mrb[35].mxu1  ;;  %v5388_v45 = vor.u32 %v5387_v18, %v5384_v7  ;;  %v6416_v29 = vshrl.u32 %v6388_v40, 16  ;;  %v5380_v6 = vsel %vm1430_vm6, %v5370_v49, %v5379_v38  ;;  %v10071_v49 = vld [vmem:[#allocation2 + $0x28] sm:$0xff] }
 0x23a   : > { %v10050_v5 = vpop.f32.mrb[83].mxu0  ;;  %2032 = vst.msk [vmem:[#allocation3 + $0xe0] sm:$0xff] %vm345_vm1, %v1984_v57  ;;  %v1985_v24 = vadd.f32 %v1880_v9, %v1385_v33  ;;  %v3557_v17 = vsel %vm3369_vm4, %v3545_v56, %v3556_v30  ;;  %v5393_v23 = vrot.slane %v5391_v51, 3  ;;  %v5396_v59 = vrot.slane %v5394_v19, 4  ;;  %v1390_v19 = vld [vmem:[#allocation3 + $0x110] sm:$0xff]  ;;  %v1388_v33 = vld [vmem:[#allocation3 + $0x100] sm:$0xff] }
 0x23b   : > { %11712 = vst [vmem:[#allocation20_spill] sm:$0xff] %v10050_v5  ;;  %2035 = vst.msk [vmem:[#allocation3 + $0xf8] sm:$0xff] %vm345_vm1, %v1987_v37  ;;  %v5389_v57 = vsel %vm1430_vm6, %v5379_v38, %v5388_v45  ;;  %v4513_v32 = vrot.slane %v4511_v42, 1  ;;  %v6426_v40 = vrot.slane %v11644_v61, 4  ;;  %v11713_v28 = vshll.u32 %v10040_v36, 16  ;;  %v10079_v51 = vld [vmem:[#allocation2 + $0x30] sm:$0xff] }
 0x23c   : > { %2033 = vst.msk [vmem:[#allocation3 + $0xe8] sm:$0xff] %vm345_vm1, %v1985_v24  ;;  %v11714_v56 = vshll.u32 %v10002_v31, 16  ;;  %v4509_v30 = vshrl.u32 %v10038_v62, 16  ;;  %v4516_v42 = vshll.u32 %v10062_v26, 16  ;;  %v6418_v7 = vrot.slane %v6416_v29, 4  ;;  %v1391_v24 = vld [vmem:[#allocation3 + $0x118] sm:$0xff] }
 0x23d   : > { %8249 = vmatmul.mubr.msk.bf16.gmra.mrb[140].mxu1 %vm1279_vm3, %v3549_v34  ;;  %v6429_v18 = vrot.slane %v11713_v28, 5  ;;  %v6421_v38 = vrot.slane %v6419_v8, 5  ;;  %v5397_v34 = vor.u32 %v5396_v59, %v5393_v23  ;;  %v1389_v62 = vld [vmem:[#allocation3 + $0x108] sm:$0xff]  ;;  %v6445_v23 = vshll.u32 %v10079_v51, 16 }
 0x23e   : > { %8399 = vmatmul.mubr.msk.bf16.gmra.mrb[188].mxu0 %vm1279_vm3, %v5380_v6  ;;  %8252 = vmatprep.mubr.msk.bf16.mxu1 %vm1279_vm3, %v3557_v17  ;;  %v3564_v11 = vor.u32 %v11714_v56, %v3561_v44  ;;  %v11645_v6 = vshrl.u32 %v10071_v49, 16  ;;  %v6436_v17 = vshll.u32 %v10071_v49, 16  ;;  %v4514_v28 = vor.u32 %v4513_v32, %v4509_v30 }
 0x23f   : > { %8402 = vmatprep.mubr.msk.bf16.mxu0 %vm1279_vm3, %v5389_v57  ;;  %v10087_v56 = vor.u32 %v6429_v18, %v6426_v40  ;;  %v4518_v40 = vrot.slane %v4516_v42, 1  ;;  %v6422_v18 = vor.u32 %v6421_v38, %v6418_v7  ;;  %v5398_v30 = vsel %vm1430_vm6, %v5388_v45, %v5397_v34  ;;  %v1394_v7 = vld [vmem:[#allocation3 + $0x130] sm:$0xff] }
 0x240   : > { %v8092_v37 = vpop.f32.mrb[36].mxu1  ;;  %v3565_v32 = vsel %vm3369_vm4, %v10021_v48, %v3564_v11  ;;  %v11719_v42 = vshll.u32 %v10040_v36, 16  ;;  %v11720_v38 = vshrl.u32 %v10079_v51, 16  ;;  %v6447_v34 = vrot.slane %v6445_v23, 5 }
 0x241   : > { %v10081_v9 = vpop.f32.mrb[84].mxu0  ;;  %v1990_v31 = vadd.f32 %v8092_v37, %v1390_v19  ;;  %v1893_v44 = vpop.f32.mrb[37].mxu1  ;;  %v4519_v48 = vsel %vm4507_vm5, %v4514_v28, %v4518_v40  ;;  %v6431_v11 = vsel %vm2673_vm9, %v6422_v18, %v10087_v56 }
 0x242   : > { %11715 = vst [vmem:[#allocation21_spill] sm:$0xff] %v10081_v9  ;;  %v10085_v57 = vpop.f32.mrb[85].mxu0  ;;  %v1988_v29 = vadd.f32 %v1893_v44, %v1388_v33  ;;  %v8093_v8 = vpop.f32.mrb[38].mxu1  ;;  %v6435_v44 = vrot.slane %v11645_v6, 4  ;;  %v6438_v9 = vrot.slane %v6436_v17, 5  ;;  %v4526_v45 = vrot.slane %v11719_v42, 1 }
 0x243   : > { %11716 = vst [vmem:[#allocation22_spill] sm:$0xff] %v10085_v57  ;;  %v10089_v61 = vpop.f32.mrb[86].mxu0  ;;  %2038 = vst.msk [vmem:[#allocation3 + $0x110] sm:$0xff] %vm345_vm1, %v1990_v31  ;;  %v1991_v59 = vadd.f32 %v8093_v8, %v1391_v24  ;;  %v1896_v19 = vpop.f32.mrb[39].mxu1  ;;  %v6444_v24 = vrot.slane %v11720_v38, 4  ;;  %v10117_v31 = vld [vmem:[#allocation2 + $0x40] sm:$0xff] }
 0x244   : > { %11717 = vst [vmem:[#allocation23_spill] sm:$0xff] %v10089_v61  ;;  %v10094_v37 = vpop.f32.mrb[87].mxu0  ;;  %2036 = vst.msk [vmem:[#allocation3 + $0x100] sm:$0xff] %vm345_vm1, %v1988_v29  ;;  %v1989_v33 = vadd.f32 %v1896_v19, %v1389_v62  ;;  %v10102_v61 = vld [vmem:[#allocation2 + $0x38] sm:$0xff]  ;;  %v1392_v62 = vld [vmem:[#allocation3 + $0x120] sm:$0xff]  ;;  %v4520_v8 = vshrl.u32 %v10062_v26, 16  ;;  %v6439_v18 = vor.u32 %v6438_v9, %v6435_v44 }
 0x245   : > { %11718 = vst [vmem:[#allocation24_spill] sm:$0xff] %v10094_v37  ;;  %2039 = vst.msk [vmem:[#allocation3 + $0x118] sm:$0xff] %vm345_vm1, %v1991_v59  ;;  %8253 = vmatmul.mubr.msk.bf16.gmra.mrb[144].mxu1 %vm1279_vm3, %v3565_v32  ;;  %v1395_v32 = vld [vmem:[#allocation3 + $0x138] sm:$0xff]  ;;  %v11722_v42 = vshrl.u32 %v10040_v36, 16  ;;  %v11646_v6 = vshrl.u32 %v10117_v31, 16  ;;  %v6463_v28 = vshll.u32 %v10117_v31, 16  ;;  %v6448_v5 = vor.u32 %v6447_v34, %v6444_v24 }
 0x246   : > { %8403 = vmatmul.mubr.msk.bf16.gmra.mrb[192].mxu0 %vm1279_vm3, %v5398_v30  ;;  %2037 = vst.msk [vmem:[#allocation3 + $0x108] sm:$0xff] %vm345_vm1, %v1989_v33  ;;  %8308 = vmatprep.mubr.msk.bf16.mxu1 %vm1279_vm3, %v4519_v48  ;;  %v4522_v29 = vor.u32 %v4520_v8, %v4518_v40  ;;  %v6017_v36 = vsel %vm1727_vm2, %v9641_v35, 0  ;;  %v11724_v40 = vshll.u32 %v10102_v61, 16  ;;  %v6440_v24 = vsel %vm2673_vm9, %v10087_v56, %v6439_v18 }
 0x247   : > { %8458 = vmatprep.mubr.msk.bf16.mxu0 %vm1279_vm3, %v6431_v11  ;;  %v1393_v11 = vld [vmem:[#allocation3 + $0x128] sm:$0xff]  ;;  %v4530_v38 = vor.u32 %v11722_v42, %v4526_v45  ;;  %v4542_v34 = vrot.slane %v6445_v23, 1  ;;  %v6449_v56 = vsel %vm2673_vm9, %v6439_v18, %v6448_v5  ;;  %v1398_v23 = vld [vmem:[#allocation3 + $0x150] sm:$0xff] }
 0x248   : > { %v8096_v59 = vpop.f32.mrb[40].mxu1 }
 0x249   : > { %v10122_v19 = vpop.f32.mrb[88].mxu0  ;;  %v1994_v33 = vadd.f32 %v8096_v59, %v1394_v7  ;;  %v1909_v30 = vpop.f32.mrb[41].mxu1  ;;  %v11723_v59 = vshrl.u32 %v10102_v61, 16 }
 0x24a   : > { %11721 = vst [vmem:[#allocation25_spill] sm:$0xff] %v10122_v19  ;;  %v10124_v48 = vpop.f32.mrb[89].mxu0  ;;  %v1992_v37 = vadd.f32 %v1909_v30, %v1392_v62  ;;  %v8097_v26 = vpop.f32.mrb[42].mxu1  ;;  %v4534_v19 = vrot.slane %v6436_v17, 1  ;;  %v6456_v62 = vrot.slane %v11724_v40, 5  ;;  %v4527_v17 = vsel %vm4507_vm5, %v4522_v29, %v4526_v45  ;;  %v10156_v45 = vld [vmem:[#allocation2 + $0x50] sm:$0xff] }
 0x24b   : > { %v10130_v57 = vpop.f32.mrb[90].mxu0  ;;  %2042 = vst.msk [vmem:[#allocation3 + $0x130] sm:$0xff] %vm345_vm1, %v1994_v33  ;;  %v1995_v9 = vadd.f32 %v8097_v26, %v1395_v32  ;;  %v1912_v44 = vpop.f32.mrb[43].mxu1  ;;  %v6453_v42 = vrot.slane %v11723_v59, 4  ;;  %v6462_v32 = vrot.slane %v11646_v6, 4  ;;  %v6465_v33 = vrot.slane %v6463_v28, 5 }
 0x24c   : > { %v10133_v7 = vpop.f32.mrb[91].mxu0  ;;  %2040 = vst.msk [vmem:[#allocation3 + $0x120] sm:$0xff] %vm345_vm1, %v1992_v37  ;;  %v1993_v8 = vadd.f32 %v1912_v44, %v1393_v11  ;;  %v4535_v35 = vsel %vm4507_vm5, %v4530_v38, %v4534_v19  ;;  %v10151_v37 = vld [vmem:[#allocation2 + $0x48] sm:$0xff]  ;;  %v1396_v29 = vld [vmem:[#allocation3 + $0x140] sm:$0xff]  ;;  %v1399_v26 = vld [vmem:[#allocation3 + $0x158] sm:$0xff] }
 0x24d   : > { %2043 = vst.msk [vmem:[#allocation3 + $0x138] sm:$0xff] %vm345_vm1, %v1995_v9  ;;  %8309 = vmatmul.mubr.msk.bf16.vlgmr.msra.gmra.mrb[148].mxu1 %vm1279_vm3, %v4527_v17  ;;  %v6457_v30 = vor.u32 %v6456_v62, %v6453_v42  ;;  %v11726_v9 = vshrl.u32 %v10071_v49, 16  ;;  %v11647_v40 = vshrl.u32 %v10151_v37, 16  ;;  %v6472_v18 = vshll.u32 %v10151_v37, 16 }
 0x24e   : > { %8459 = vmatmul.mubr.msk.bf16.vlgmr.msra.gmra.mrb[196].mxu0 %vm1279_vm3, %v6440_v24  ;;  %2041 = vst.msk [vmem:[#allocation3 + $0x128] sm:$0xff] %vm345_vm1, %v1993_v8  ;;  %8407 = vmatpush3.bf16.msra.mxu1 %v6017_v36  ;;  %v11727_v36 = vshrl.u32 %v10079_v51, 16  ;;  %v6466_v42 = vor.u32 %v6465_v33, %v6462_v32  ;;  %v11731_v32 = vshll.u32 %v10102_v61, 16 }
 0x24f   : > { %8312 = vmatprep.mubr.msk.bf16.mxu1 %vm1279_vm3, %v4535_v35  ;;  %8462 = vmatprep.mubr.msk.bf16.mxu0 %vm1279_vm3, %v6449_v56  ;;  %v4538_v44 = vor.u32 %v11726_v9, %v4534_v19  ;;  %v1397_v35 = vld [vmem:[#allocation3 + $0x148] sm:$0xff]  ;;  %v6481_v56 = vshll.u32 %v10156_v45, 16 }
 0x250   : > { %v8100_v11 = vpop.f32.mrb[44].mxu1  ;;  %v4546_v59 = vor.u32 %v11727_v36, %v4542_v34  ;;  %v4550_v33 = vrot.slane %v11731_v32, 1  ;;  %v11735_v32 = vshrl.u32 %v10117_v31, 16 }
 0x251   : > { %v10159_v38 = vpop.f32.mrb[92].mxu0  ;;  %v1998_v8 = vadd.f32 %v8100_v11, %v1398_v23  ;;  %v1925_v17 = vpop.f32.mrb[45].mxu1  ;;  %v4543_v23 = vsel %vm4507_vm5, %v4538_v44, %v4542_v34  ;;  %v6458_v11 = vsel %vm2673_vm9, %v6448_v5, %v6457_v30  ;;  %v6467_v5 = vsel %vm2673_vm9, %v6457_v30, %v6466_v42 }
 0x252   : > { %11725 = vst [vmem:[#allocation26_spill] sm:$0xff] %v10159_v38  ;;  %v10167_v24 = vpop.f32.mrb[93].mxu0  ;;  %v1996_v6 = vadd.f32 %v1925_v17, %v1396_v29  ;;  %v8101_v49 = vpop.f32.mrb[46].mxu1  ;;  %v4558_v29 = vrot.slane %v6463_v28, 1  ;;  %v6471_v17 = vrot.slane %v11647_v40, 4  ;;  %v4551_v34 = vsel %vm4507_vm5, %v4546_v59, %v4550_v33  ;;  %v1402_v28 = vld [vmem:[#allocation3 + $0x170] sm:$0xff] }
 0x253   : > { %11728 = vst [vmem:[#allocation27_spill] sm:$0xff] %v10167_v24  ;;  %v10171_v19 = vpop.f32.mrb[94].mxu0  ;;  %2046 = vst.msk [vmem:[#allocation3 + $0x150] sm:$0xff] %vm345_vm1, %v1998_v8  ;;  %v1999_v51 = vadd.f32 %v8101_v49, %v1399_v26  ;;  %v1928_v9 = vpop.f32.mrb[47].mxu1  ;;  %v11732_v26 = vshrl.u32 %v10156_v45, 16  ;;  %v10190_v8 = vld [vmem:[#allocation2 + $0x58] sm:$0xff] }
 0x254   : > { %11729 = vst [vmem:[#allocation28_spill] sm:$0xff] %v10171_v19  ;;  %v10174_v36 = vpop.f32.mrb[95].mxu0  ;;  %2044 = vst.msk [vmem:[#allocation3 + $0x140] sm:$0xff] %vm345_vm1, %v1996_v6  ;;  %v1997_v62 = vadd.f32 %v1928_v9, %v1397_v35  ;;  %v6474_v19 = vrot.slane %v6472_v18, 5  ;;  %v6483_v6 = vrot.slane %v6481_v56, 5  ;;  %v10195_v35 = vld [vmem:[#allocation2 + $0x60] sm:$0xff] }
 0x255   : > { %11730 = vst [vmem:[#allocation29_spill] sm:$0xff] %v10174_v36  ;;  %2047 = vst.msk [vmem:[#allocation3 + $0x158] sm:$0xff] %vm345_vm1, %v1999_v51  ;;  %8313 = vmatmul.mubr.msk.bf16.gmra.mrb[152].mxu1 %vm1279_vm3, %v4543_v23  ;;  %v6480_v44 = vrot.slane %v11732_v26, 4  ;;  %v1400_v49 = vld [vmem:[#allocation3 + $0x160] sm:$0xff]  ;;  %v11733_v59 = vshrl.u32 %v10102_v61, 16  ;;  %v1403_v23 = vld [vmem:[#allocation3 + $0x178] sm:$0xff]  ;;  %v4562_v26 = vor.u32 %v11735_v32, %v4558_v29 }
 0x256   : > { %8463 = vmatmul.mubr.msk.bf16.gmra.mrb[200].mxu0 %vm1279_vm3, %v6458_v11  ;;  %2045 = vst.msk [vmem:[#allocation3 + $0x148] sm:$0xff] %vm345_vm1, %v1997_v62  ;;  %8316 = vmatprep.mubr.msk.bf16.mxu1 %vm1279_vm3, %v4551_v34  ;;  %v6475_v11 = vor.u32 %v6474_v19, %v6471_v17  ;;  %v6490_v34 = vshll.u32 %v10190_v8, 16  ;;  %v1401_v24 = vld [vmem:[#allocation3 + $0x168] sm:$0xff]  ;;  %v4574_v62 = vrot.slane %v6481_v56, 1 }
 0x257   : > { %8466 = vmatprep.mubr.msk.bf16.mxu0 %vm1279_vm3, %v6467_v5  ;;  %v4554_v51 = vor.u32 %v11733_v59, %v4550_v33  ;;  %v6484_v38 = vor.u32 %v6483_v6, %v6480_v44  ;;  %v6499_v33 = vshll.u32 %v10195_v35, 16 }
 0x258   : > { %v8104_v30 = vpop.f32.mrb[48].mxu1  ;;  %v6476_v6 = vsel %vm2673_vm9, %v6466_v42, %v6475_v11  ;;  %v6492_v61 = vrot.slane %v6490_v34, 5 }
 0x259   : > { %v10199_v9 = vpop.f32.mrb[96].mxu0  ;;  %v2002_v5 = vadd.f32 %v8104_v30, %v1402_v28  ;;  %v1941_v40 = vpop.f32.mrb[49].mxu1  ;;  %v4559_v28 = vsel %vm4507_vm5, %v4554_v51, %v4558_v29  ;;  %v4566_v30 = vrot.slane %v6472_v18, 1  ;;  %v6485_v56 = vsel %vm2673_vm9, %v6475_v11, %v6484_v38 }
 0x25a   : > { %11734 = vst [vmem:[#allocation30_spill] sm:$0xff] %v10199_v9  ;;  %v10205_v36 = vpop.f32.mrb[97].mxu0  ;;  %v2000_v59 = vadd.f32 %v1941_v40, %v1400_v49  ;;  %v8105_v9 = vpop.f32.mrb[50].mxu1  ;;  %v11739_v40 = vshrl.u32 %v10190_v8, 16  ;;  %v6501_v42 = vrot.slane %v6499_v33, 5  ;;  %v11742_v11 = vshrl.u32 %v10156_v45, 16 }
 0x25b   : > { %11736 = vst [vmem:[#allocation31_spill] sm:$0xff] %v10205_v36  ;;  %v10209_v19 = vpop.f32.mrb[98].mxu0  ;;  %2050 = vst.msk [vmem:[#allocation3 + $0x170] sm:$0xff] %vm345_vm1, %v2002_v5  ;;  %v2003_v31 = vadd.f32 %v8105_v9, %v1403_v23  ;;  %v1944_v17 = vpop.f32.mrb[51].mxu1  ;;  %v4567_v18 = vsel %vm4507_vm5, %v4562_v26, %v4566_v30  ;;  %v2054_v23 = vld [vmem:[#allocation3 + $0x10] sm:$0xff]  ;;  %v11745_v45 = vshrl.u32 %v10151_v37, 16 }
 0x25c   : > { %11737 = vst [vmem:[#allocation32_spill] sm:$0xff] %v10209_v19  ;;  %v10212_v32 = vpop.f32.mrb[99].mxu0  ;;  %2048 = vst.msk [vmem:[#allocation3 + $0x160] sm:$0xff] %vm345_vm1, %v2000_v59  ;;  %v2001_v44 = vadd.f32 %v1944_v17, %v1401_v24  ;;  %v6489_v49 = vrot.slane %v11739_v40, 4  ;;  %v10219_v19 = vld [vmem:[#allocation2 + $0x68] sm:$0xff]  ;;  %v11740_v24 = vshrl.u32 %v10195_v35, 16 }
 0x25d   : > { %11738 = vst [vmem:[#allocation33_spill] sm:$0xff] %v10212_v32  ;;  %2051 = vst.msk [vmem:[#allocation3 + $0x178] sm:$0xff] %vm345_vm1, %v2003_v31  ;;  %8317 = vmatmul.mubr.msk.bf16.gmra.mrb[156].mxu1 %vm1279_vm3, %v4559_v28  ;;  %v6508_v9 = vshll.u32 %v10219_v19, 16  ;;  %v4578_v31 = vor.u32 %v11742_v11, %v4574_v62  ;;  %v2052_v28 = vld [vmem:[#allocation3] sm:$0xff]  ;;  %v2055_v32 = vld [vmem:[#allocation3 + $0x18] sm:$0xff] }
 0x25e   : > { %8467 = vmatmul.mubr.msk.bf16.gmra.mrb[204].mxu0 %vm1279_vm3, %v6476_v6  ;;  %v6498_v29 = vrot.slane %v11740_v24, 4  ;;  %2049 = vst.msk [vmem:[#allocation3 + $0x168] sm:$0xff] %vm345_vm1, %v2001_v44  ;;  %8320 = vmatprep.mubr.msk.bf16.mxu1 %vm1279_vm3, %v4567_v18  ;;  %v6493_v26 = vor.u32 %v6492_v61, %v6489_v49  ;;  %v10241_v18 = vld [vmem:[#allocation2 + $0x70] sm:$0xff]  ;;  %v4570_v49 = vor.u32 %v11745_v45, %v4566_v30 }
 0x25f   : > { %8470 = vmatprep.mubr.msk.bf16.mxu0 %vm1279_vm3, %v6485_v56  ;;  %v6517_v24 = vshll.u32 %v10241_v18, 16  ;;  %v11746_v56 = vshrl.u32 %v10219_v19, 16  ;;  %v4598_v45 = vrot.slane %v6508_v9, 1 }
 0x260   : > { %v8110_v5 = vpop.f32.mrb[52].mxu1  ;;  %v10239_v40 = vor.u32 %v6501_v42, %v6498_v29  ;;  %v2053_v29 = vld [vmem:[#allocation3 + $0x8] sm:$0xff]  ;;  %v6494_v37 = vsel %vm2673_vm9, %v6484_v38, %v6493_v26 }
 0x261   : > { %v10233_v59 = vpop.f32.mrb[100].mxu0  ;;  %v2504_v17 = vadd.f32 %v8110_v5, %v2054_v23  ;;  %v2311_v6 = vpop.f32.mrb[53].mxu1  ;;  %v4582_v23 = vrot.slane %v6490_v34, 1  ;;  %v6507_v36 = vrot.slane %v11746_v56, 4 }
 0x262   : > { %11741 = vst [vmem:[#allocation34_spill] sm:$0xff] %v10233_v59  ;;  %v10237_v44 = vpop.f32.mrb[101].mxu0  ;;  %v2502_v51 = vadd.f32 %v2311_v6, %v2052_v28  ;;  %v8111_v59 = vpop.f32.mrb[54].mxu1  ;;  %v6510_v28 = vrot.slane %v6508_v9, 5 }
 0x263   : > { %11743 = vst [vmem:[#allocation35_spill] sm:$0xff] %v10237_v44  ;;  %v10245_v61 = vpop.f32.mrb[102].mxu0  ;;  %2552 = vst.msk [vmem:[#allocation3 + $0x10] sm:$0xff] %vm345_vm1, %v2504_v17  ;;  %v2505_v5 = vadd.f32 %v8111_v59, %v2055_v32  ;;  %v2314_v42 = vpop.f32.mrb[55].mxu1  ;;  %v4590_v44 = vrot.slane %v6499_v33, 1  ;;  %v4583_v34 = vsel %vm4507_vm5, %v4578_v31, %v4582_v23  ;;  %v6503_v33 = vsel %vm2673_vm9, %v6493_v26, %v10239_v40  ;;  %v2058_v17 = vld [vmem:[#allocation3 + $0x30] sm:$0xff] }
 0x264   : > { %11744 = vst [vmem:[#allocation36_spill] sm:$0xff] %v10245_v61  ;;  %v10250_v11 = vpop.f32.mrb[103].mxu0  ;;  %2550 = vst.msk [vmem:[#allocation3] sm:$0xff] %vm345_vm1, %v2502_v51  ;;  %v2503_v6 = vadd.f32 %v2314_v42, %v2053_v29  ;;  %v4575_v61 = vsel %vm4507_vm5, %v4570_v49, %v4574_v62  ;;  %v11747_v32 = vshrl.u32 %v10241_v18, 16  ;;  %v6519_v51 = vrot.slane %v6517_v24, 5  ;;  %v10274_v49 = vld [vmem:[#allocation2 + $0x78] sm:$0xff] }
 0x265   : > { %2553 = vst.msk [vmem:[#allocation3 + $0x18] sm:$0xff] %vm345_vm1, %v2505_v5  ;;  %8321 = vmatmul.mubr.msk.bf16.gmra.mrb[160].mxu1 %vm1279_vm3, %v4575_v61  ;;  %v6511_v38 = vor.u32 %v6510_v28, %v6507_v36  ;;  %v11748_v62 = vshrl.u32 %v10195_v35, 16  ;;  %v11749_v26 = vshrl.u32 %v10190_v8, 16 }
 0x266   : > { %8471 = vmatmul.mubr.msk.bf16.gmra.mrb[208].mxu0 %vm1279_vm3, %v6494_v37  ;;  %v6516_v30 = vrot.slane %v11747_v32, 4  ;;  %2551 = vst.msk [vmem:[#allocation3 + $0x8] sm:$0xff] %vm345_vm1, %v2503_v6  ;;  %8324 = vmatprep.mubr.msk.bf16.mxu1 %vm1279_vm3, %v4583_v34  ;;  %v2056_v6 = vld [vmem:[#allocation3 + $0x20] sm:$0xff] }
 0x267   : > { %8474 = vmatprep.mubr.msk.bf16.mxu0 %vm1279_vm3, %v6503_v33  ;;  %v4594_v59 = vor.u32 %v11748_v62, %v4590_v44  ;;  %v4586_v61 = vor.u32 %v11749_v26, %v4582_v23  ;;  %v10282_v37 = vld [vmem:[#allocation2 + $0x80] sm:$0xff]  ;;  %v2059_v23 = vld [vmem:[#allocation3 + $0x38] sm:$0xff]  ;;  %v6512_v34 = vsel %vm2673_vm9, %v10239_v40, %v6511_v38 }
 0x268   : > { %v8114_v56 = vpop.f32.mrb[56].mxu1  ;;  %v10280_v35 = vor.u32 %v6519_v51, %v6516_v30  ;;  %v6535_v8 = vshll.u32 %v10282_v37, 16  ;;  %v2057_v30 = vld [vmem:[#allocation3 + $0x28] sm:$0xff]  ;;  %v11753_v40 = vshrl.u32 %v10282_v37, 16 }
 0x269   : > { %v10270_v31 = vpop.f32.mrb[104].mxu0  ;;  %v2508_v42 = vadd.f32 %v8114_v56, %v2058_v17  ;;  %v2327_v36 = vpop.f32.mrb[57].mxu1  ;;  %v4591_v62 = vsel %vm4507_vm5, %v4586_v61, %v4590_v44  ;;  %v4606_v17 = vrot.slane %v6517_v24, 1  ;;  %v11751_v24 = vshrl.u32 %v10274_v49, 16 }
 0x26a   : > { %v10278_v28 = vpop.f32.mrb[105].mxu0  ;;  %v2506_v9 = vadd.f32 %v2327_v36, %v2056_v6  ;;  %v8115_v33 = vpop.f32.mrb[58].mxu1  ;;  %v2600_v56 = vld [vmem:[#allocation3 + $0x10] sm:$0xff]  ;;  %v4599_v6 = vsel %vm4507_vm5, %v4594_v59, %v4598_v45  ;;  %v6534_v59 = vrot.slane %v11753_v40, 4 }
 0x26b   : > { %v10286_v32 = vpop.f32.mrb[106].mxu0  ;;  %2556 = vst.msk [vmem:[#allocation3 + $0x30] sm:$0xff] %vm345_vm1, %v2508_v42  ;;  %v2509_v26 = vadd.f32 %v8115_v33, %v2059_v23  ;;  %v2330_v51 = vpop.f32.mrb[59].mxu1  ;;  %v3200_v36 = vadd.f32 %v9622_v2, %v2600_v56  ;;  %v2598_v5 = vld [vmem:[#allocation3] sm:$0xff]  ;;  %v6525_v61 = vrot.slane %v11751_v24, 4  ;;  %v11752_v42 = vshll.u32 %v10274_v49, 16 }
 0x26c   : > { %v10290_v29 = vpop.f32.mrb[107].mxu0  ;;  %2554 = vst.msk [vmem:[#allocation3 + $0x20] sm:$0xff] %vm345_vm1, %v2506_v9  ;;  %v2507_v44 = vadd.f32 %v2330_v51, %v2057_v30  ;;  %v3198_v33 = vadd.f32 %v9626_v10, %v2598_v5  ;;  %v6521_v2 = vsel %vm2673_vm9, %v6511_v38, %v10280_v35  ;;  %v6537_v9 = vrot.slane %v6535_v8, 5  ;;  %v10316_v38 = vld [vmem:[#allocation2 + $0x88] sm:$0xff]  ;;  %v2060_v24 = vld [vmem:[#allocation3 + $0x40] sm:$0xff]  ;;  %v10332_v40 = vld [vmem:[#allocation2 + $0x90] sm:$0xff] }
 0x26d   : > { %11750 = vst [vmem:[#allocation37_spill] sm:$0xff] %v10290_v29  ;;  %v6528_v23 = vrot.slane %v11752_v42, 5  ;;  %v2601_v29 = vld [vmem:[#allocation3 + $0x18] sm:$0xff]  ;;  %2557 = vst.msk [vmem:[#allocation3 + $0x38] sm:$0xff] %vm345_vm1, %v2509_v26  ;;  %8325 = vmatmul.mubr.msk.bf16.gmra.mrb[164].mxu1 %vm1279_vm3, %v4591_v62  ;;  %v2599_v30 = vld [vmem:[#allocation3 + $0x8] sm:$0xff]  ;;  %v11648_v5 = vshrl.u32 %v10316_v38, 16 }
 0x26e   : > { %8475 = vmatmul.mubr.msk.bf16.gmra.mrb[212].mxu0 %vm1279_vm3, %v6512_v34  ;;  %3248 = vst.msk [vmem:[#allocation3 + $0x10] sm:$0xff] %vm345_vm1, %v3200_v36  ;;  %v3201_v56 = vadd.f32 %v9636_v52, %v2601_v29  ;;  %2555 = vst.msk [vmem:[#allocation3 + $0x28] sm:$0xff] %vm345_vm1, %v2507_v44  ;;  %8328 = vmatprep.mubr.msk.bf16.mxu1 %vm1279_vm3, %v4599_v6  ;;  %v3199_v10 = vadd.f32 %v9648_v46, %v2599_v30  ;;  %v6544_v34 = vshll.u32 %v10316_v38, 16  ;;  %v2062_v52 = vld [vmem:[#allocation3 + $0x50] sm:$0xff] }
 0x26f   : > { %8478 = vmatprep.mubr.msk.bf16.mxu0 %vm1279_vm3, %v6521_v2  ;;  %3246 = vst.msk [vmem:[#allocation3] sm:$0xff] %vm345_vm1, %v3198_v33  ;;  %v11754_v26 = vshrl.u32 %v10219_v19, 16  ;;  %v6529_v6 = vor.u32 %v6528_v23, %v6525_v61  ;;  %v11755_v36 = vshrl.u32 %v10241_v18, 16  ;;  %v10330_v2 = vor.u32 %v6537_v9, %v6534_v59  ;;  %v2063_v61 = vld [vmem:[#allocation3 + $0x58] sm:$0xff]  ;;  %v2061_v9 = vld [vmem:[#allocation3 + $0x48] sm:$0xff] }
 0x270   : > { %3249 = vst.msk [vmem:[#allocation3 + $0x18] sm:$0xff] %vm345_vm1, %v3201_v56  ;;  %v8118_v29 = vpop.f32.mrb[60].mxu1  ;;  %3247 = vst.msk [vmem:[#allocation3 + $0x8] sm:$0xff] %vm345_vm1, %v3199_v10  ;;  %v11757_v10 = vshll.u32 %v10274_v49, 16 }
 0x271   : > { %v10321_v62 = vpop.f32.mrb[108].mxu0  ;;  %v4602_v51 = vor.u32 %v11754_v26, %v4598_v45  ;;  %v4610_v44 = vor.u32 %v11755_v36, %v4606_v17  ;;  %v2512_v46 = vadd.f32 %v8118_v29, %v2062_v52  ;;  %v2343_v42 = vpop.f32.mrb[61].mxu1  ;;  %v4622_v29 = vrot.slane %v6535_v8, 1 }
 0x272   : > { %v10328_v33 = vpop.f32.mrb[109].mxu0  ;;  %v2510_v45 = vadd.f32 %v2343_v42, %v2060_v24  ;;  %v8119_v23 = vpop.f32.mrb[62].mxu1  ;;  %v4614_v52 = vrot.slane %v11757_v10, 1  ;;  %v2604_v26 = vld [vmem:[#allocation3 + $0x30] sm:$0xff]  ;;  %v6543_v24 = vrot.slane %v11648_v5, 4  ;;  %v6546_v42 = vrot.slane %v6544_v34, 5 }
 0x273   : > { %v10336_v18 = vpop.f32.mrb[110].mxu0  ;;  %v4607_v30 = vsel %vm4507_vm5, %v4602_v51, %v4606_v17  ;;  %2560 = vst.msk [vmem:[#allocation3 + $0x50] sm:$0xff] %vm345_vm1, %v2512_v46  ;;  %v2513_v59 = vadd.f32 %v8119_v23, %v2063_v61  ;;  %v2346_v36 = vpop.f32.mrb[63].mxu1  ;;  %v3204_v19 = vadd.f32 %v9679_v47, %v2604_v26  ;;  %v6530_v8 = vsel %vm2673_vm9, %v10280_v35, %v6529_v6 }
 0x274   : > { %11756 = vst [vmem:[#allocation38_spill] sm:$0xff] %v10336_v18  ;;  %v10342_v56 = vpop.f32.mrb[111].mxu0  ;;  %v2602_v18 = vld [vmem:[#allocation3 + $0x20] sm:$0xff]  ;;  %2558 = vst.msk [vmem:[#allocation3 + $0x40] sm:$0xff] %vm345_vm1, %v2510_v45  ;;  %v2511_v17 = vadd.f32 %v2346_v36, %v2061_v9  ;;  %v4615_v51 = vsel %vm4507_vm5, %v4610_v44, %v4614_v52  ;;  %v2605_v61 = vld [vmem:[#allocation3 + $0x38] sm:$0xff]  ;;  %v6539_v47 = vsel %vm2673_vm9, %v6529_v6, %v10330_v2  ;;  %v11758_v45 = vshrl.u32 %v10332_v40, 16 }
 0x275   : > { %v3202_v46 = vadd.f32 %v9689_v54, %v2602_v18  ;;  %2561 = vst.msk [vmem:[#allocation3 + $0x58] sm:$0xff] %vm345_vm1, %v2513_v59  ;;  %8329 = vmatmul.mubr.msk.bf16.gmra.mrb[168].mxu1 %vm1279_vm3, %v4607_v30  ;;  %v11759_v10 = vshll.u32 %v10332_v40, 16  ;;  %3252 = vst.msk [vmem:[#allocation3 + $0x30] sm:$0xff] %vm345_vm1, %v3204_v19  ;;  %v3205_v54 = vadd.f32 %v9695_v53, %v2605_v61  ;;  %v2603_v44 = vld [vmem:[#allocation3 + $0x28] sm:$0xff]  ;;  %v11760_v30 = vshrl.u32 %v10282_v37, 16  ;;  %v2066_v19 = vld [vmem:[#allocation3 + $0x70] sm:$0xff] }
 0x276   : > { %8479 = vmatmul.mubr.msk.bf16.gmra.mrb[216].mxu0 %vm1279_vm3, %v6530_v8  ;;  %v6552_v23 = vrot.slane %v11758_v45, 4  ;;  %2559 = vst.msk [vmem:[#allocation3 + $0x48] sm:$0xff] %vm345_vm1, %v2511_v17  ;;  %8332 = vmatprep.mubr.msk.bf16.mxu1 %vm1279_vm3, %v4615_v51  ;;  %v3203_v6 = vadd.f32 %v9702_v58, %v2603_v44  ;;  %v6547_v18 = vor.u32 %v6546_v42, %v6543_v24  ;;  %v11761_v9 = vshrl.u32 %v10274_v49, 16  ;;  %v10375_v8 = vld [vmem:[#allocation2 + $0x98] sm:$0xff]  ;;  %v2064_v24 = vld [vmem:[#allocation3 + $0x60] sm:$0xff] }
 0x277   : > { %v6555_v35 = vrot.slane %v11759_v10, 5  ;;  %8482 = vmatprep.mubr.msk.bf16.mxu0 %vm1279_vm3, %v6539_v47  ;;  %3250 = vst.msk [vmem:[#allocation3 + $0x20] sm:$0xff] %vm345_vm1, %v3202_v46  ;;  %v4626_v26 = vor.u32 %v11760_v30, %v4622_v29  ;;  %3253 = vst.msk [vmem:[#allocation3 + $0x38] sm:$0xff] %vm345_vm1, %v3205_v54  ;;  %v4630_v17 = vrot.slane %v6544_v34, 1  ;;  %v11649_v51 = vshrl.u32 %v10375_v8, 16  ;;  %v10384_v47 = vld [vmem:[#allocation2 + $0xa0] sm:$0xff] }
 0x278   : > { %v8122_v59 = vpop.f32.mrb[64].mxu1  ;;  %v4618_v36 = vor.u32 %v11761_v9, %v4614_v52  ;;  %v6562_v58 = vshll.u32 %v10375_v8, 16  ;;  %3251 = vst.msk [vmem:[#allocation3 + $0x28] sm:$0xff] %vm345_vm1, %v3203_v6  ;;  %v11650_v49 = vshrl.u32 %v10384_v47, 16  ;;  %v6571_v34 = vshll.u32 %v10384_v47, 16  ;;  %v2067_v45 = vld [vmem:[#allocation3 + $0x78] sm:$0xff] }
 0x279   : > { %v10371_v53 = vpop.f32.mrb[112].mxu0  ;;  %v2516_v37 = vadd.f32 %v8122_v59, %v2066_v19  ;;  %v2359_v42 = vpop.f32.mrb[65].mxu1  ;;  %v10382_v61 = vor.u32 %v6555_v35, %v6552_v23  ;;  %v11762_v6 = vshll.u32 %v10332_v40, 16  ;;  %v2065_v35 = vld [vmem:[#allocation3 + $0x68] sm:$0xff] }
 0x27a   : > { %v10380_v46 = vpop.f32.mrb[113].mxu0  ;;  %v2514_v52 = vadd.f32 %v2359_v42, %v2064_v24  ;;  %v8123_v10 = vpop.f32.mrb[66].mxu1  ;;  %v4623_v44 = vsel %vm4507_vm5, %v4618_v36, %v4622_v29  ;;  %v2608_v19 = vld [vmem:[#allocation3 + $0x50] sm:$0xff]  ;;  %v6548_v24 = vsel %vm2673_vm9, %v10330_v2, %v6547_v18  ;;  %v4631_v42 = vsel %vm4507_vm5, %v4626_v26, %v4630_v17 }
 0x27b   : > { %v10388_v54 = vpop.f32.mrb[114].mxu0  ;;  %v10393_v30 = vrot.slane %v11762_v6, 1  ;;  %2564 = vst.msk [vmem:[#allocation3 + $0x70] sm:$0xff] %vm345_vm1, %v2516_v37  ;;  %v2517_v23 = vadd.f32 %v8123_v10, %v2067_v45  ;;  %v2362_v59 = vpop.f32.mrb[67].mxu1  ;;  %v3208_v5 = vadd.f32 %v9753_v25, %v2608_v19  ;;  %v2606_v29 = vld [vmem:[#allocation3 + $0x40] sm:$0xff]  ;;  %v6561_v6 = vrot.slane %v11649_v51, 4 }
 0x27c   : > { %v10396_v9 = vpop.f32.mrb[115].mxu0  ;;  %2562 = vst.msk [vmem:[#allocation3 + $0x60] sm:$0xff] %vm345_vm1, %v2514_v52  ;;  %v2515_v36 = vadd.f32 %v2362_v59, %v2065_v35  ;;  %v6564_v37 = vrot.slane %v6562_v58, 5  ;;  %v3206_v45 = vadd.f32 %v9759_v14, %v2606_v29  ;;  %v2609_v10 = vld [vmem:[#allocation3 + $0x58] sm:$0xff]  ;;  %v6557_v25 = vsel %vm2673_vm9, %v6547_v18, %v10382_v61  ;;  %v10439_v51 = vld [vmem:[#allocation2 + $0xb0] sm:$0xff] }
 0x27d   : > { %2565 = vst.msk [vmem:[#allocation3 + $0x78] sm:$0xff] %vm345_vm1, %v2517_v23  ;;  %8333 = vmatmul.mubr.msk.bf16.gmra.mrb[172].mxu1 %vm1279_vm3, %v4623_v44  ;;  %v6570_v2 = vrot.slane %v11650_v49, 4  ;;  %v6573_v26 = vrot.slane %v6571_v34, 5  ;;  %3256 = vst.msk [vmem:[#allocation3 + $0x50] sm:$0xff] %vm345_vm1, %v3208_v5  ;;  %v3209_v14 = vadd.f32 %v9763_v21, %v2609_v10  ;;  %v2607_v52 = vld [vmem:[#allocation3 + $0x48] sm:$0xff]  ;;  %v2070_v21 = vld [vmem:[#allocation3 + $0x90] sm:$0xff] }
 0x27e   : > { %8483 = vmatmul.mubr.msk.bf16.gmra.mrb[220].mxu0 %vm1279_vm3, %v6548_v24  ;;  %2563 = vst.msk [vmem:[#allocation3 + $0x68] sm:$0xff] %vm345_vm1, %v2515_v36  ;;  %8336 = vmatprep.mubr.msk.bf16.mxu1 %vm1279_vm3, %v4631_v42  ;;  %v10420_v44 = vld [vmem:[#allocation2 + $0xa8] sm:$0xff]  ;;  %3254 = vst.msk [vmem:[#allocation3 + $0x40] sm:$0xff] %vm345_vm1, %v3206_v45  ;;  %v3207_v23 = vadd.f32 %v9768_v3, %v2607_v52  ;;  %v11763_v59 = vshrl.u32 %v10316_v38, 16  ;;  %v6565_v42 = vor.u32 %v6564_v37, %v6561_v6  ;;  %v2071_v37 = vld [vmem:[#allocation3 + $0x98] sm:$0xff] }
 0x27f   : > { %8486 = vmatprep.mubr.msk.bf16.mxu0 %vm1279_vm3, %v6557_v25  ;;  %v11651_v18 = vshrl.u32 %v10420_v44, 16  ;;  %v11652_v19 = vshll.u32 %v10420_v44, 16  ;;  %3257 = vst.msk [vmem:[#allocation3 + $0x58] sm:$0xff] %vm345_vm1, %v3209_v14  ;;  %v11764_v29 = vshrl.u32 %v10332_v40, 16  ;;  %v4646_v10 = vrot.slane %v6562_v58, 1  ;;  %v2068_v25 = vld [vmem:[#allocation3 + $0x80] sm:$0xff] }
 0x280   : > { %v8126_v5 = vpop.f32.mrb[68].mxu1  ;;  %v4634_v24 = vor.u32 %v11763_v59, %v4630_v17  ;;  %3255 = vst.msk [vmem:[#allocation3 + $0x48] sm:$0xff] %vm345_vm1, %v3207_v23  ;;  %v10437_v14 = vor.u32 %v6573_v26, %v6570_v2  ;;  %v11653_v38 = vshrl.u32 %v10439_v51, 16  ;;  %v2069_v26 = vld [vmem:[#allocation3 + $0x88] sm:$0xff] }
 0x281   : > { %v10427_v35 = vpop.f32.mrb[116].mxu0  ;;  %v4642_v36 = vor.u32 %v11764_v29, %v10393_v30  ;;  %v2520_v45 = vadd.f32 %v8126_v5, %v2070_v21  ;;  %v2375_v3 = vpop.f32.mrb[69].mxu1  ;;  %v6579_v58 = vrot.slane %v11651_v18, 4  ;;  %v6582_v23 = vrot.slane %v11652_v19, 5 }
 0x282   : > { %v10435_v52 = vpop.f32.mrb[117].mxu0  ;;  %v2518_v6 = vadd.f32 %v2375_v3, %v2068_v25  ;;  %v8127_v40 = vpop.f32.mrb[70].mxu1  ;;  %v2612_v21 = vld [vmem:[#allocation3 + $0x70] sm:$0xff]  ;;  %v4639_v25 = vsel %vm4507_vm5, %v4634_v24, %v10393_v30  ;;  %v4654_v3 = vrot.slane %v6571_v34, 1  ;;  %v6588_v34 = vrot.slane %v11653_v38, 4 }
 0x283   : > { %v10443_v59 = vpop.f32.mrb[118].mxu0  ;;  %2568 = vst.msk [vmem:[#allocation3 + $0x90] sm:$0xff] %vm345_vm1, %v2520_v45  ;;  %v2521_v2 = vadd.f32 %v8127_v40, %v2071_v37  ;;  %v2378_v5 = vpop.f32.mrb[71].mxu1  ;;  %v3212_v49 = vadd.f32 %v9844_v13, %v2612_v21  ;;  %v2610_v18 = vld [vmem:[#allocation3 + $0x60] sm:$0xff]  ;;  %v6566_v45 = vsel %vm2673_vm9, %v10382_v61, %v6565_v42  ;;  %v4647_v37 = vsel %vm4507_vm5, %v4642_v36, %v4646_v10 }
 0x284   : > { %v10450_v29 = vpop.f32.mrb[119].mxu0  ;;  %2566 = vst.msk [vmem:[#allocation3 + $0x80] sm:$0xff] %vm345_vm1, %v2518_v6  ;;  %v2519_v19 = vadd.f32 %v2378_v5, %v2069_v26  ;;  %v3210_v40 = vadd.f32 %v9852_v12, %v2610_v18  ;;  %v2613_v17 = vld [vmem:[#allocation3 + $0x78] sm:$0xff]  ;;  %v6575_v13 = vsel %vm2673_vm9, %v6565_v42, %v10437_v14  ;;  %v11765_v30 = vshll.u32 %v10439_v51, 16  ;;  %v2072_v5 = vld [vmem:[#allocation3 + $0xa0] sm:$0xff] }
 0x285   : > { %2569 = vst.msk [vmem:[#allocation3 + $0x98] sm:$0xff] %vm345_vm1, %v2521_v2  ;;  %8337 = vmatmul.mubr.msk.bf16.gmra.mrb[176].mxu1 %vm1279_vm3, %v4639_v25  ;;  %3260 = vst.msk [vmem:[#allocation3 + $0x70] sm:$0xff] %vm345_vm1, %v3212_v49  ;;  %v3213_v12 = vadd.f32 %v9858_v39, %v2613_v17  ;;  %v2611_v18 = vld [vmem:[#allocation3 + $0x68] sm:$0xff]  ;;  %v6583_v24 = vor.u32 %v6582_v23, %v6579_v58  ;;  %v11766_v36 = vshrl.u32 %v10384_v47, 16  ;;  %v2074_v49 = vld [vmem:[#allocation3 + $0xb0] sm:$0xff]  ;;  %v11768_v2 = vshll.u32 %v10420_v44, 16 }
 0x286   : > { %8487 = vmatmul.mubr.msk.bf16.gmra.mrb[224].mxu0 %vm1279_vm3, %v6566_v45  ;;  %v6591_v61 = vrot.slane %v11765_v30, 5  ;;  %2567 = vst.msk [vmem:[#allocation3 + $0x88] sm:$0xff] %vm345_vm1, %v2519_v19  ;;  %8340 = vmatprep.mubr.msk.bf16.mxu1 %vm1279_vm3, %v4647_v37  ;;  %3258 = vst.msk [vmem:[#allocation3 + $0x60] sm:$0xff] %vm345_vm1, %v3210_v40  ;;  %v3211_v42 = vadd.f32 %v9865_v55, %v2611_v18  ;;  %v11767_v19 = vshrl.u32 %v10375_v8, 16  ;;  %v10489_v58 = vld [vmem:[#allocation2 + $0xb8] sm:$0xff]  ;;  %v10498_v8 = vld [vmem:[#allocation2 + $0xc0] sm:$0xff] }
 0x287   : > { %8490 = vmatprep.mubr.msk.bf16.mxu0 %vm1279_vm3, %v6575_v13  ;;  %v4658_v6 = vor.u32 %v11766_v36, %v4654_v3  ;;  %3261 = vst.msk [vmem:[#allocation3 + $0x78] sm:$0xff] %vm345_vm1, %v3213_v12  ;;  %v10487_v26 = vrot.slane %v11768_v2, 1  ;;  %v11655_v55 = vshrl.u32 %v10489_v58, 16  ;;  %v6598_v47 = vshll.u32 %v10489_v58, 16  ;;  %v2075_v30 = vld [vmem:[#allocation3 + $0xb8] sm:$0xff] }
 0x288   : > { %v8130_v21 = vpop.f32.mrb[72].mxu1  ;;  %v4650_v17 = vor.u32 %v11767_v19, %v4646_v10  ;;  %3259 = vst.msk [vmem:[#allocation3 + $0x68] sm:$0xff] %vm345_vm1, %v3211_v42  ;;  %v10496_v37 = vor.u32 %v6591_v61, %v6588_v34  ;;  %v11654_v10 = vshrl.u32 %v10498_v8, 16  ;;  %v6607_v40 = vshll.u32 %v10498_v8, 16  ;;  %v2073_v61 = vld [vmem:[#allocation3 + $0xa8] sm:$0xff] }
 0x289   : > { %v10481_v39 = vpop.f32.mrb[120].mxu0  ;;  %v2524_v23 = vadd.f32 %v8130_v21, %v2074_v49  ;;  %v2391_v25 = vpop.f32.mrb[73].mxu1  ;;  %v6584_v36 = vsel %vm2673_vm9, %v10437_v14, %v6583_v24  ;;  %v4663_v2 = vsel %vm4507_vm5, %v4658_v6, %v10487_v26 }
 0x28a   : > { %v10494_v45 = vpop.f32.mrb[121].mxu0  ;;  %v2522_v13 = vadd.f32 %v2391_v25, %v2072_v5  ;;  %v8131_v12 = vpop.f32.mrb[74].mxu1  ;;  %v4655_v42 = vsel %vm4507_vm5, %v4650_v17, %v4654_v3  ;;  %v2616_v49 = vld [vmem:[#allocation3 + $0x90] sm:$0xff]  ;;  %v11769_v5 = vshll.u32 %v10439_v51, 16  ;;  %v6597_v17 = vrot.slane %v11655_v55, 4 }
 0x28b   : > { %v10502_v18 = vpop.f32.mrb[122].mxu0  ;;  %2572 = vst.msk [vmem:[#allocation3 + $0xb0] sm:$0xff] %vm345_vm1, %v2524_v23  ;;  %v2525_v34 = vadd.f32 %v8131_v12, %v2075_v30  ;;  %v2394_v21 = vpop.f32.mrb[75].mxu1  ;;  %v3216_v38 = vadd.f32 %v9894_v41, %v2616_v49  ;;  %v2614_v3 = vld [vmem:[#allocation3 + $0x80] sm:$0xff]  ;;  %v6600_v23 = vrot.slane %v6598_v47, 5  ;;  %v6593_v41 = vsel %vm2673_vm9, %v6583_v24, %v10496_v37 }
 0x28c   : > { %v10508_v19 = vpop.f32.mrb[123].mxu0  ;;  %v4670_v25 = vrot.slane %v11769_v5, 1  ;;  %2570 = vst.msk [vmem:[#allocation3 + $0xa0] sm:$0xff] %vm345_vm1, %v2522_v13  ;;  %v2523_v14 = vadd.f32 %v2394_v21, %v2073_v61  ;;  %v3214_v30 = vadd.f32 %v9903_v16, %v2614_v3  ;;  %v2617_v12 = vld [vmem:[#allocation3 + $0x98] sm:$0xff]  ;;  %v6606_v6 = vrot.slane %v11654_v10, 4  ;;  %v2076_v5 = vld [vmem:[#allocation3 + $0xc0] sm:$0xff] }
 0x28d   : > { %2573 = vst.msk [vmem:[#allocation3 + $0xb8] sm:$0xff] %vm345_vm1, %v2525_v34  ;;  %8341 = vmatmul.mubr.msk.bf16.gmra.mrb[180].mxu1 %vm1279_vm3, %v4655_v42  ;;  %v6609_v13 = vrot.slane %v6607_v40, 5  ;;  %3264 = vst.msk [vmem:[#allocation3 + $0x90] sm:$0xff] %vm345_vm1, %v3216_v38  ;;  %v3217_v16 = vadd.f32 %v9905_v1, %v2617_v12  ;;  %v2615_v49 = vld [vmem:[#allocation3 + $0x88] sm:$0xff]  ;;  %v2078_v1 = vld [vmem:[#allocation3 + $0xd0] sm:$0xff]  ;;  %v6601_v21 = vor.u32 %v6600_v23, %v6597_v17  ;;  %v11770_v12 = vshrl.u32 %v10439_v51, 16 }
 0x28e   : > { %8491 = vmatmul.mubr.msk.bf16.gmra.mrb[228].mxu0 %vm1279_vm3, %v6584_v36  ;;  %2571 = vst.msk [vmem:[#allocation3 + $0xa8] sm:$0xff] %vm345_vm1, %v2523_v14  ;;  %8344 = vmatprep.mubr.msk.bf16.mxu1 %vm1279_vm3, %v4663_v2  ;;  %v10533_v42 = vld [vmem:[#allocation2 + $0xc8] sm:$0xff]  ;;  %3262 = vst.msk [vmem:[#allocation3 + $0x80] sm:$0xff] %vm345_vm1, %v3214_v30  ;;  %v3215_v34 = vadd.f32 %v9910_v22, %v2615_v49  ;;  %v4678_v30 = vrot.slane %v6598_v47, 1  ;;  %v11771_v17 = vshrl.u32 %v10420_v44, 16 }
 0x28f   : > { %8494 = vmatprep.mubr.msk.bf16.mxu0 %vm1279_vm3, %v6593_v41  ;;  %v11656_v24 = vshrl.u32 %v10533_v42, 16  ;;  %v11657_v36 = vshll.u32 %v10533_v42, 16  ;;  %3265 = vst.msk [vmem:[#allocation3 + $0x98] sm:$0xff] %vm345_vm1, %v3217_v16  ;;  %v4674_v41 = vor.u32 %v11770_v12, %v4670_v25  ;;  %v10547_v10 = vor.u32 %v6609_v13, %v6606_v6  ;;  %v2079_v16 = vld [vmem:[#allocation3 + $0xd8] sm:$0xff]  ;;  %v2077_v6 = vld [vmem:[#allocation3 + $0xc8] sm:$0xff] }
 0x290   : > { %v8134_v38 = vpop.f32.mrb[76].mxu1  ;;  %3263 = vst.msk [vmem:[#allocation3 + $0x88] sm:$0xff] %vm345_vm1, %v3215_v34  ;;  %v4666_v23 = vor.u32 %v11771_v17, %v10487_v26 }
 0x291   : > { %v10540_v61 = vpop.f32.mrb[124].mxu0  ;;  %v2528_v2 = vadd.f32 %v8134_v38, %v2078_v1  ;;  %v2407_v3 = vpop.f32.mrb[77].mxu1  ;;  %v6615_v34 = vrot.slane %v11656_v24, 4  ;;  %v6618_v1 = vrot.slane %v11657_v36, 5  ;;  %v6602_v36 = vsel %vm2673_vm9, %v10496_v37, %v6601_v21 }
 0x292   : > { %v10543_v14 = vpop.f32.mrb[125].mxu0  ;;  %v2526_v22 = vadd.f32 %v2407_v3, %v2076_v5  ;;  %v8135_v49 = vpop.f32.mrb[78].mxu1  ;;  %v2620_v51 = vld [vmem:[#allocation3 + $0xb0] sm:$0xff]  ;;  %v4671_v24 = vsel %vm4507_vm5, %v4666_v23, %v4670_v25  ;;  %v4686_v25 = vrot.slane %v6607_v40, 1 }
 0x293   : > { %v10549_v55 = vpop.f32.mrb[126].mxu0  ;;  %2576 = vst.msk [vmem:[#allocation3 + $0xd0] sm:$0xff] %vm345_vm1, %v2528_v2  ;;  %v2529_v47 = vadd.f32 %v8135_v49, %v2079_v16  ;;  %v2410_v13 = vpop.f32.mrb[79].mxu1  ;;  %v8551_v5 = vld [vmem:[#allocation2 + $0xd0] sm:$0xff]  ;;  %v3220_v44 = vadd.f32 %v9941_v15, %v2620_v51  ;;  %v2618_v26 = vld [vmem:[#allocation3 + $0xa0] sm:$0xff]  ;;  %v4679_v15 = vsel %vm4507_vm5, %v4674_v41, %v4678_v30 }
 0x294   : > { %v10559_v38 = vpop.f32.mrb[127].mxu0  ;;  %v6622_v3 = vshrl.u32 %v8551_v5, 16  ;;  %v6625_v12 = vshll.u32 %v8551_v5, 16  ;;  %2574 = vst.msk [vmem:[#allocation3 + $0xc0] sm:$0xff] %vm345_vm1, %v2526_v22  ;;  %v2527_v17 = vadd.f32 %v2410_v13, %v2077_v6  ;;  %v3218_v2 = vadd.f32 %v9945_v43, %v2618_v26  ;;  %v2621_v16 = vld [vmem:[#allocation3 + $0xb8] sm:$0xff]  ;;  %v2082_v40 = vld [vmem:[#allocation3 + $0xf0] sm:$0xff] }
 0x295   : > { %2577 = vst.msk [vmem:[#allocation3 + $0xd8] sm:$0xff] %vm345_vm1, %v2529_v47  ;;  %8345 = vmatmul.mubr.msk.bf16.gmra.mrb[184].mxu1 %vm1279_vm3, %v4671_v24  ;;  %v6611_v22 = vsel %vm2673_vm9, %v6601_v21, %v10547_v10  ;;  %v6412_v49 = vld [vmem:[#allocation2 + $0xd8] sm:$0x1f]  ;;  %3268 = vst.msk [vmem:[#allocation3 + $0xb0] sm:$0xff] %vm345_vm1, %v3220_v44  ;;  %v3221_v43 = vadd.f32 %v9949_v4, %v2621_v16  ;;  %v2619_v37 = vld [vmem:[#allocation3 + $0xa8] sm:$0xff]  ;;  %v11772_v4 = vshrl.u32 %v10489_v58, 16 }
 0x296   : > { %8495 = vmatmul.mubr.msk.bf16.gmra.mrb[232].mxu0 %vm1279_vm3, %v6602_v36  ;;  %2575 = vst.msk [vmem:[#allocation3 + $0xc8] sm:$0xff] %vm345_vm1, %v2527_v17  ;;  %8348 = vmatprep.mubr.msk.bf16.mxu1 %vm1279_vm3, %v4679_v15  ;;  %3266 = vst.msk [vmem:[#allocation3 + $0xa0] sm:$0xff] %vm345_vm1, %v3218_v2  ;;  %v3219_v24 = vadd.f32 %v9954_v20, %v2619_v37  ;;  %v6619_v36 = vor.u32 %v6618_v1, %v6615_v34  ;;  %v6624_v21 = vrot.slane %v6622_v3, 4  ;;  %v2080_v44 = vld [vmem:[#allocation3 + $0xe0] sm:$0xff] }
 0x297   : > { %8498 = vmatprep.mubr.msk.bf16.mxu0 %vm1279_vm3, %v6611_v22  ;;  %v6627_v41 = vrot.slane %v6625_v12, 5  ;;  %3269 = vst.msk [vmem:[#allocation3 + $0xb8] sm:$0xff] %vm345_vm1, %v3221_v43  ;;  %v4682_v47 = vor.u32 %v11772_v4, %v4678_v30  ;;  %v6631_v6 = vshrl.u32 %v6412_v49, 16  ;;  %v6634_v13 = vshll.u32 %v6412_v49, 16  ;;  %v2083_v12 = vld [vmem:[#allocation3 + $0xf8] sm:$0xff]  ;;  %v2081_v49 = vld [vmem:[#allocation3 + $0xe8] sm:$0xff] }
 0x298   : > { %v8138_v23 = vpop.f32.mrb[80].mxu1  ;;  %3267 = vst.msk [vmem:[#allocation3 + $0xa8] sm:$0xff] %vm345_vm1, %v3219_v24  ;;  %v11773_v34 = vshrl.u32 %v10498_v8, 16  ;;  %v11774_v30 = vshll.u32 %v10533_v42, 16  ;;  %v6620_v8 = vsel %vm2673_vm9, %v10547_v10, %v6619_v36 }
 0x299   : > { %v10583_v51 = vpop.f32.mrb[128].mxu0  ;;  %v2532_v5 = vadd.f32 %v8138_v23, %v2082_v40  ;;  %v2423_v26 = vpop.f32.mrb[81].mxu1  ;;  %v4687_v58 = vsel %vm4507_vm5, %v4682_v47, %v4686_v25  ;;  %v6628_v24 = vor.u32 %v6627_v41, %v6624_v21  ;;  %v4504_v40 = vld [vmem:[#allocation2 + $0xd0] sm:$0x1]  ;;  %v6633_v47 = vrot.slane %v6631_v6, 4  ;;  %v10615_v6 = vld [vmem:[#allocation2 + $0x20] sm:$0xff] }
 0x29a   : > { %v10588_v20 = vpop.f32.mrb[129].mxu0  ;;  %v4690_v1 = vor.u32 %v11773_v34, %v4686_v25  ;;  %v2530_v3 = vadd.f32 %v2423_v26, %v2080_v44  ;;  %v8139_v17 = vpop.f32.mrb[82].mxu1  ;;  %v4694_v16 = vrot.slane %v11774_v30, 1  ;;  %v2624_v15 = vld [vmem:[#allocation3 + $0xd0] sm:$0xff]  ;;  %v6636_v44 = vrot.slane %v6634_v13, 5  ;;  %v2084_v30 = vld [vmem:[#allocation3 + $0x100] sm:$0xff] }
 0x29b   : > { %v10592_v2 = vpop.f32.mrb[130].mxu0  ;;  %2580 = vst.msk [vmem:[#allocation3 + $0xf0] sm:$0xff] %vm345_vm1, %v2532_v5  ;;  %v2533_v22 = vadd.f32 %v8139_v17, %v2083_v12  ;;  %v2426_v43 = vpop.f32.mrb[83].mxu1  ;;  %v3224_v23 = vadd.f32 %v9989_v50, %v2624_v15  ;;  %v2622_v4 = vld [vmem:[#allocation3 + $0xc0] sm:$0xff]  ;;  %v6629_v21 = vsel %vm2673_vm9, %v6619_v36, %v6628_v24  ;;  %v2086_v36 = vld [vmem:[#allocation3 + $0x110] sm:$0xff] }
 0x29c   : > { %v10598_v37 = vpop.f32.mrb[131].mxu0  ;;  %2578 = vst.msk [vmem:[#allocation3 + $0xe0] sm:$0xff] %vm345_vm1, %v2530_v3  ;;  %v2531_v25 = vadd.f32 %v2426_v43, %v2081_v49  ;;  %v3222_v5 = vadd.f32 %v9998_v63, %v2622_v4  ;;  %v2625_v26 = vld [vmem:[#allocation3 + $0xd8] sm:$0xff]  ;;  %v4695_v10 = vsel %vm4507_vm5, %v4690_v1, %v4694_v16  ;;  %v4700_v63 = vshll.u32 %v4504_v40, 16 }
 0x29d   : > { %2581 = vst.msk [vmem:[#allocation3 + $0xf8] sm:$0xff] %vm345_vm1, %v2533_v22  ;;  %8349 = vmatmul.mubr.msk.bf16.gmra.mrb[188].mxu1 %vm1279_vm3, %v4687_v58  ;;  %3272 = vst.msk [vmem:[#allocation3 + $0xd0] sm:$0xff] %vm345_vm1, %v3224_v23  ;;  %v3225_v50 = vadd.f32 %v10006_v60, %v2625_v26  ;;  %v2623_v41 = vld [vmem:[#allocation3 + $0xc8] sm:$0xff]  ;;  %v11775_v60 = vshrl.u32 %v10533_v42, 16  ;;  %v6637_v12 = vor.u32 %v6636_v44, %v6633_v47  ;;  %v5843_v17 = vld [vmem:[#allocation2 + $0x18] sm:$0xf0] }
 0x29e   : > { %8499 = vmatmul.mubr.msk.bf16.gmra.mrb[236].mxu0 %vm1279_vm3, %v6620_v8  ;;  %2579 = vst.msk [vmem:[#allocation3 + $0xe8] sm:$0xff] %vm345_vm1, %v2531_v25  ;;  %8352 = vmatprep.mubr.msk.bf16.mxu1 %vm1279_vm3, %v4695_v10  ;;  %3270 = vst.msk [vmem:[#allocation3 + $0xc0] sm:$0xff] %vm345_vm1, %v3222_v5  ;;  %v3223_v13 = vadd.f32 %v10009_v27, %v2623_v41  ;;  %v5896_v27 = vrot.slane %v10615_v6, 4  ;;  %v2087_v43 = vld [vmem:[#allocation3 + $0x118] sm:$0xff]  ;;  %v4702_v23 = vrot.slane %v4700_v63, 1  ;;  %v5895_v44 = vrot.slane %v5843_v17, 4 }
 0x29f   : > { %8502 = vmatprep.mubr.msk.bf16.mxu0 %vm1279_vm3, %v6629_v21  ;;  %3273 = vst.msk [vmem:[#allocation3 + $0xd8] sm:$0xff] %vm345_vm1, %v3225_v50  ;;  %v4698_v3 = vor.u32 %v11775_v60, %v4694_v16  ;;  %v2085_v16 = vld [vmem:[#allocation3 + $0x108] sm:$0xff]  ;;  %v11776_v5 = vld [vmem:[#allocation18_spill] sm:$0xff]  ;;  %v6638_v41 = vsel %vm2673_vm9, %v6628_v24, %v6637_v12  ;;  %v11777_v63 = vld [vmem:[#allocation19_spill] sm:$0xff] }
 0x2a0   : > { %v8142_v34 = vpop.f32.mrb[84].mxu1  ;;  %3271 = vst.msk [vmem:[#allocation3 + $0xc8] sm:$0xff] %vm345_vm1, %v3223_v13  ;;  %v10646_v24 = vld [vmem:[#allocation2 + $0x30] sm:$0xff] }
 0x2a1   : > { %v10620_v1 = vpop.f32.mrb[132].mxu0  ;;  %v2536_v58 = vadd.f32 %v8142_v34, %v2086_v36  ;;  %v2439_v15 = vpop.f32.mrb[85].mxu1  ;;  %v4703_v50 = vsel %vm4507_vm5, %v4698_v3, %v4702_v23  ;;  %v5897_v36 = vsel %vm2152_vm0, %v5895_v44, %v5896_v27  ;;  %v5845_v34 = vld [vmem:[#allocation2 + $0x28] sm:$0xff]  ;;  %v11778_v3 = vld [vmem:[#allocation20_spill] sm:$0xff] }
 0x2a2   : > { %v10625_v22 = vpop.f32.mrb[133].mxu0  ;;  %v2534_v49 = vadd.f32 %v2439_v15, %v2084_v30  ;;  %v8143_v8 = vpop.f32.mrb[86].mxu1  ;;  %v2628_v4 = vld [vmem:[#allocation3 + $0xf0] sm:$0xff] }
 0x2a3   : > { %v10628_v40 = vpop.f32.mrb[134].mxu0  ;;  %2584 = vst.msk [vmem:[#allocation3 + $0x110] sm:$0xff] %vm345_vm1, %v2536_v58  ;;  %v2537_v42 = vadd.f32 %v8143_v8, %v2087_v43  ;;  %v2442_v25 = vpop.f32.mrb[87].mxu1  ;;  %v3228_v26 = vadd.f32 %v11776_v5, %v2628_v4  ;;  %v2626_v10 = vld [vmem:[#allocation3 + $0xe0] sm:$0xff]  ;;  %v2090_v58 = vld [vmem:[#allocation3 + $0x130] sm:$0xff]  ;;  %v5900_v4 = vrot.slane %v10646_v24, 4 }
 0x2a4   : > { %v10631_v47 = vpop.f32.mrb[135].mxu0  ;;  %2582 = vst.msk [vmem:[#allocation3 + $0x100] sm:$0xff] %vm345_vm1, %v2534_v49  ;;  %v2535_v21 = vadd.f32 %v2442_v25, %v2085_v16  ;;  %v3226_v6 = vadd.f32 %v11777_v63, %v2626_v10  ;;  %v2629_v13 = vld [vmem:[#allocation3 + $0xf8] sm:$0xff]  ;;  %v5898_v49 = vrot.slane %v5845_v34, 4  ;;  %v2088_v43 = vld [vmem:[#allocation3 + $0x120] sm:$0xff]  ;;  %v2089_v10 = vld [vmem:[#allocation3 + $0x128] sm:$0xff] }
 0x2a5   : > { %2585 = vst.msk [vmem:[#allocation3 + $0x118] sm:$0xff] %vm345_vm1, %v2537_v42  ;;  %8353 = vmatmul.mubr.msk.bf16.gmra.mrb[192].mxu1 %vm1279_vm3, %v4703_v50  ;;  %3276 = vst.msk [vmem:[#allocation3 + $0xf0] sm:$0xff] %vm345_vm1, %v3228_v26  ;;  %v3229_v60 = vadd.f32 %v10047_v0, %v2629_v13  ;;  %v2627_v17 = vld [vmem:[#allocation3 + $0xe8] sm:$0xff]  ;;  %v2091_v16 = vld [vmem:[#allocation3 + $0x138] sm:$0xff] }
 0x2a6   : > { %8503 = vmatmul.mubr.msk.bf16.gmra.mrb[240].mxu0 %vm1279_vm3, %v6638_v41  ;;  %2583 = vst.msk [vmem:[#allocation3 + $0x108] sm:$0xff] %vm345_vm1, %v2535_v21  ;;  %8408 = vmatprep.mubr.msk.bf16.mxu1 %vm1279_vm3, %v5897_v36  ;;  %3274 = vst.msk [vmem:[#allocation3 + $0xe0] sm:$0xff] %vm345_vm1, %v3226_v6  ;;  %v3227_v12 = vadd.f32 %v11778_v3, %v2627_v17  ;;  %v11779_v41 = vld [vmem:[#allocation21_spill] sm:$0xff]  ;;  %v5899_v36 = vsel %vm2152_vm0, %v5896_v27, %v5898_v49  ;;  %v11780_v34 = vld [vmem:[#allocation22_spill] sm:$0xff] }
 0x2a7   : > { %3277 = vst.msk [vmem:[#allocation3 + $0xf8] sm:$0xff] %vm345_vm1, %v3229_v60  ;;  %v5901_v24 = vsel %vm2152_vm0, %v5898_v49, %v5900_v4  ;;  %v5847_v3 = vld [vmem:[#allocation2 + $0x38] sm:$0xff]  ;;  %v10673_v27 = vld [vmem:[#allocation2 + $0x40] sm:$0xff] }
 0x2a8   : > { %v8146_v30 = vpop.f32.mrb[88].mxu1  ;;  %3275 = vst.msk [vmem:[#allocation3 + $0xe8] sm:$0xff] %vm345_vm1, %v3227_v12  ;;  %v11781_v12 = vld [vmem:[#allocation23_spill] sm:$0xff] }
 0x2a9   : > { %v10651_v15 = vpop.f32.mrb[136].mxu0  ;;  %v2540_v0 = vadd.f32 %v8146_v30, %v2090_v58  ;;  %v2455_v8 = vpop.f32.mrb[89].mxu1 }
 0x2aa   : > { %v10654_v23 = vpop.f32.mrb[137].mxu0  ;;  %v2538_v42 = vadd.f32 %v2455_v8, %v2088_v43  ;;  %v8147_v25 = vpop.f32.mrb[90].mxu1  ;;  %v2632_v5 = vld [vmem:[#allocation3 + $0x110] sm:$0xff] }
 0x2ab   : > { %v10657_v44 = vpop.f32.mrb[138].mxu0  ;;  %2588 = vst.msk [vmem:[#allocation3 + $0x130] sm:$0xff] %vm345_vm1, %v2540_v0  ;;  %v2541_v26 = vadd.f32 %v8147_v25, %v2091_v16  ;;  %v2458_v21 = vpop.f32.mrb[91].mxu1  ;;  %v3232_v63 = vadd.f32 %v11779_v41, %v2632_v5  ;;  %v2630_v6 = vld [vmem:[#allocation3 + $0x100] sm:$0xff]  ;;  %v2094_v8 = vld [vmem:[#allocation3 + $0x150] sm:$0xff]  ;;  %v5902_v16 = vrot.slane %v5847_v3, 4 }
 0x2ac   : > { %v10660_v50 = vpop.f32.mrb[139].mxu0  ;;  %2586 = vst.msk [vmem:[#allocation3 + $0x120] sm:$0xff] %vm345_vm1, %v2538_v42  ;;  %v2539_v13 = vadd.f32 %v2458_v21, %v2089_v10  ;;  %v3230_v60 = vadd.f32 %v11780_v34, %v2630_v6  ;;  %v2633_v17 = vld [vmem:[#allocation3 + $0x118] sm:$0xff]  ;;  %v11782_v0 = vld [vmem:[#allocation24_spill] sm:$0xff]  ;;  %v5904_v21 = vrot.slane %v10673_v27, 4  ;;  %v11783_v3 = vld [vmem:[#allocation25_spill] sm:$0xff] }
 0x2ad   : > { %2589 = vst.msk [vmem:[#allocation3 + $0x138] sm:$0xff] %vm345_vm1, %v2541_v26  ;;  %8409 = vmatmul.mubr.msk.bf16.vlgmr.msra.gmra.mrb[196].mxu1 %vm1279_vm3, %v5899_v36  ;;  %3280 = vst.msk [vmem:[#allocation3 + $0x110] sm:$0xff] %vm345_vm1, %v3232_v63  ;;  %v3233_v58 = vadd.f32 %v11781_v12, %v2633_v17  ;;  %v2631_v30 = vld [vmem:[#allocation3 + $0x108] sm:$0xff]  ;;  %v2092_v5 = vld [vmem:[#allocation3 + $0x140] sm:$0xff]  ;;  %v5903_v27 = vsel %vm2152_vm0, %v5900_v4, %v5902_v16 }
 0x2ae   : > { %2587 = vst.msk [vmem:[#allocation3 + $0x128] sm:$0xff] %vm345_vm1, %v2539_v13  ;;  %8412 = vmatprep.mubr.msk.bf16.mxu1 %vm1279_vm3, %v5901_v24  ;;  %3278 = vst.msk [vmem:[#allocation3 + $0x100] sm:$0xff] %vm345_vm1, %v3230_v60  ;;  %v3231_v43 = vadd.f32 %v11782_v0, %v2631_v30  ;;  %v2095_v63 = vld [vmem:[#allocation3 + $0x158] sm:$0xff]  ;;  %v2093_v60 = vld [vmem:[#allocation3 + $0x148] sm:$0xff] }
 0x2af   : > { %3281 = vst.msk [vmem:[#allocation3 + $0x118] sm:$0xff] %vm345_vm1, %v3233_v58  ;;  %v10700_v4 = vld [vmem:[#allocation2 + $0x50] sm:$0xff] }
 0x2b0   : > { %v8150_v49 = vpop.f32.mrb[92].mxu1  ;;  %3279 = vst.msk [vmem:[#allocation3 + $0x108] sm:$0xff] %vm345_vm1, %v3231_v43 }
 0x2b1   : > { %v10678_v42 = vpop.f32.mrb[140].mxu0  ;;  %v2544_v25 = vadd.f32 %v8150_v49, %v2094_v8  ;;  %v2471_v26 = vpop.f32.mrb[93].mxu1  ;;  %v5905_v8 = vsel %vm2152_vm0, %v5902_v16, %v5904_v21  ;;  %v5849_v49 = vld [vmem:[#allocation2 + $0x48] sm:$0xff] }
 0x2b2   : > { %v10681_v10 = vpop.f32.mrb[141].mxu0  ;;  %v2542_v41 = vadd.f32 %v2471_v26, %v2092_v5  ;;  %v8151_v6 = vpop.f32.mrb[94].mxu1  ;;  %v2636_v36 = vld [vmem:[#allocation3 + $0x130] sm:$0xff] }
 0x2b3   : > { %v10684_v13 = vpop.f32.mrb[142].mxu0  ;;  %2592 = vst.msk [vmem:[#allocation3 + $0x150] sm:$0xff] %vm345_vm1, %v2544_v25  ;;  %v2545_v34 = vadd.f32 %v8151_v6, %v2095_v63  ;;  %v2474_v17 = vpop.f32.mrb[95].mxu1  ;;  %v3236_v12 = vadd.f32 %v11783_v3, %v2636_v36  ;;  %v2634_v58 = vld [vmem:[#allocation3 + $0x120] sm:$0xff]  ;;  %v2098_v26 = vld [vmem:[#allocation3 + $0x170] sm:$0xff]  ;;  %v5906_v63 = vrot.slane %v5849_v49, 4 }
 0x2b4   : > { %v10687_v24 = vpop.f32.mrb[143].mxu0  ;;  %2590 = vst.msk [vmem:[#allocation3 + $0x140] sm:$0xff] %vm345_vm1, %v2542_v41  ;;  %v2543_v30 = vadd.f32 %v2474_v17, %v2093_v60  ;;  %v3234_v0 = vadd.f32 %v10124_v48, %v2634_v58  ;;  %v2637_v43 = vld [vmem:[#allocation3 + $0x138] sm:$0xff]  ;;  %v2096_v6 = vld [vmem:[#allocation3 + $0x160] sm:$0xff]  ;;  %v5908_v60 = vrot.slane %v10700_v4, 4 }
 0x2b5   : > { %2593 = vst.msk [vmem:[#allocation3 + $0x158] sm:$0xff] %vm345_vm1, %v2545_v34  ;;  %8413 = vmatmul.mubr.msk.bf16.gmra.mrb[200].mxu1 %vm1279_vm3, %v5903_v27  ;;  %3284 = vst.msk [vmem:[#allocation3 + $0x130] sm:$0xff] %vm345_vm1, %v3236_v12  ;;  %v3237_v25 = vadd.f32 %v10130_v57, %v2637_v43  ;;  %v2635_v5 = vld [vmem:[#allocation3 + $0x128] sm:$0xff]  ;;  %v2099_v3 = vld [vmem:[#allocation3 + $0x178] sm:$0xff]  ;;  %v5907_v4 = vsel %vm2152_vm0, %v5904_v21, %v5906_v63 }
 0x2b6   : > { %2591 = vst.msk [vmem:[#allocation3 + $0x148] sm:$0xff] %vm345_vm1, %v2543_v30  ;;  %8416 = vmatprep.mubr.msk.bf16.mxu1 %vm1279_vm3, %v5905_v8  ;;  %3282 = vst.msk [vmem:[#allocation3 + $0x120] sm:$0xff] %vm345_vm1, %v3234_v0  ;;  %v3235_v48 = vadd.f32 %v10133_v7, %v2635_v5  ;;  %v2097_v27 = vld [vmem:[#allocation3 + $0x168] sm:$0xff]  ;;  %v11784_v8 = vld [vmem:[#allocation26_spill] sm:$0xff] }
 0x2b7   : > { %3285 = vst.msk [vmem:[#allocation3 + $0x138] sm:$0xff] %vm345_vm1, %v3237_v25  ;;  %v10727_v21 = vld [vmem:[#allocation2 + $0x60] sm:$0xff] }
 0x2b8   : > { %v8154_v16 = vpop.f32.mrb[96].mxu1  ;;  %3283 = vst.msk [vmem:[#allocation3 + $0x128] sm:$0xff] %vm345_vm1, %v3235_v48  ;;  %v11785_v48 = vld [vmem:[#allocation27_spill] sm:$0xff] }
 0x2b9   : > { %v10705_v41 = vpop.f32.mrb[144].mxu0  ;;  %v2548_v57 = vadd.f32 %v8154_v16, %v2098_v26  ;;  %v2487_v36 = vpop.f32.mrb[97].mxu1 }
 0x2ba   : > { %v10708_v34 = vpop.f32.mrb[145].mxu0  ;;  %v2546_v17 = vadd.f32 %v2487_v36, %v2096_v6  ;;  %v8155_v12 = vpop.f32.mrb[98].mxu1  ;;  %v2640_v58 = vld [vmem:[#allocation3 + $0x150] sm:$0xff]  ;;  %v5851_v6 = vld [vmem:[#allocation2 + $0x58] sm:$0xff]  ;;  %v11786_v36 = vld [vmem:[#allocation28_spill] sm:$0xff] }
 0x2bb   : > { %v10711_v7 = vpop.f32.mrb[146].mxu0  ;;  %2596 = vst.msk [vmem:[#allocation3 + $0x170] sm:$0xff] %vm345_vm1, %v2548_v57  ;;  %v2549_v30 = vadd.f32 %v8155_v12, %v2099_v3  ;;  %v2490_v0 = vpop.f32.mrb[99].mxu1  ;;  %v3240_v49 = vadd.f32 %v11784_v8, %v2640_v58  ;;  %v2638_v25 = vld [vmem:[#allocation3 + $0x140] sm:$0xff]  ;;  %v5909_v57 = vsel %vm2152_vm0, %v5906_v63, %v5908_v60 }
 0x2bc   : > { %v10714_v43 = vpop.f32.mrb[147].mxu0  ;;  %2594 = vst.msk [vmem:[#allocation3 + $0x160] sm:$0xff] %vm345_vm1, %v2546_v17  ;;  %v2547_v5 = vadd.f32 %v2490_v0, %v2097_v27  ;;  %v3238_v26 = vadd.f32 %v11785_v48, %v2638_v25  ;;  %v2641_v16 = vld [vmem:[#allocation3 + $0x158] sm:$0xff]  ;;  %v11787_v17 = vld [vmem:[#allocation29_spill] sm:$0xff]  ;;  %v5910_v0 = vrot.slane %v5851_v6, 4 }
 0x2bd   : > { %2597 = vst.msk [vmem:[#allocation3 + $0x178] sm:$0xff] %vm345_vm1, %v2549_v30  ;;  %8417 = vmatmul.mubr.msk.bf16.gmra.mrb[204].mxu1 %vm1279_vm3, %v5907_v4  ;;  %3288 = vst.msk [vmem:[#allocation3 + $0x150] sm:$0xff] %vm345_vm1, %v3240_v49  ;;  %v3241_v3 = vadd.f32 %v11786_v36, %v2641_v16  ;;  %v2639_v12 = vld [vmem:[#allocation3 + $0x148] sm:$0xff]  ;;  %v3296_v30 = vld [vmem:[#allocation3 + $0x10] sm:$0xff]  ;;  %v5912_v4 = vrot.slane %v10727_v21, 4 }
 0x2be   : > { %2595 = vst.msk [vmem:[#allocation3 + $0x168] sm:$0xff] %vm345_vm1, %v2547_v5  ;;  %8420 = vmatprep.mubr.msk.bf16.mxu1 %vm1279_vm3, %v5909_v57  ;;  %3286 = vst.msk [vmem:[#allocation3 + $0x140] sm:$0xff] %vm345_vm1, %v3238_v26  ;;  %v3239_v58 = vadd.f32 %v11787_v17, %v2639_v12  ;;  %v3294_v49 = vld [vmem:[#allocation3] sm:$0xff]  ;;  %v3297_v26 = vld [vmem:[#allocation3 + $0x18] sm:$0xff]  ;;  %v5911_v21 = vsel %vm2152_vm0, %v5908_v60, %v5910_v0 }
 0x2bf   : > { %3289 = vst.msk [vmem:[#allocation3 + $0x158] sm:$0xff] %vm345_vm1, %v3241_v3  ;;  %v3295_v12 = vld [vmem:[#allocation3 + $0x8] sm:$0xff] }
 0x2c0   : > { %v8210_v63 = vpop.f32.mrb[100].mxu1  ;;  %3287 = vst.msk [vmem:[#allocation3 + $0x148] sm:$0xff] %vm345_vm1, %v3239_v58  ;;  %v11791_v58 = vld [vmem:[#allocation30_spill] sm:$0xff]  ;;  %v11794_v60 = vld [vmem:[#allocation33_spill] sm:$0xff] }
 0x2c1   : > { %v10732_v27 = vpop.f32.mrb[148].mxu0  ;;  %v3868_v8 = vadd.f32 %v8210_v63, %v3296_v30  ;;  %v3675_v25 = vpop.f32.mrb[101].mxu1 }
 0x2c2   : > { %11788 = vst [vmem:[#allocation18_spill] sm:$0xff] %v10732_v27  ;;  %v10735_v5 = vpop.f32.mrb[149].mxu0  ;;  %v3866_v48 = vadd.f32 %v3675_v25, %v3294_v49  ;;  %v8211_v16 = vpop.f32.mrb[102].mxu1  ;;  %v2644_v36 = vld [vmem:[#allocation3 + $0x170] sm:$0xff]  ;;  %v11792_v49 = vld [vmem:[#allocation31_spill] sm:$0xff] }
 0x2c3   : > { %11789 = vst [vmem:[#allocation19_spill] sm:$0xff] %v10735_v5  ;;  %v10738_v57 = vpop.f32.mrb[150].mxu0  ;;  %3916 = vst.msk [vmem:[#allocation3 + $0x10] sm:$0xff] %vm345_vm1, %v3868_v8  ;;  %v3869_v3 = vadd.f32 %v8211_v16, %v3297_v26  ;;  %v3678_v6 = vpop.f32.mrb[103].mxu1  ;;  %v3244_v30 = vadd.f32 %v11791_v58, %v2644_v36  ;;  %v2642_v63 = vld [vmem:[#allocation3 + $0x160] sm:$0xff]  ;;  %v5913_v8 = vsel %vm2152_vm0, %v5910_v0, %v5912_v4  ;;  %v5853_v26 = vld [vmem:[#allocation2 + $0x68] sm:$0xff] }
 0x2c4   : > { %v10741_v17 = vpop.f32.mrb[151].mxu0  ;;  %3914 = vst.msk [vmem:[#allocation3] sm:$0xff] %vm345_vm1, %v3866_v48  ;;  %v3867_v5 = vadd.f32 %v3678_v6, %v3295_v12  ;;  %v3242_v25 = vadd.f32 %v11792_v49, %v2642_v63  ;;  %v2645_v27 = vld [vmem:[#allocation3 + $0x178] sm:$0xff]  ;;  %v11793_v16 = vld [vmem:[#allocation32_spill] sm:$0xff]  ;;  %v5914_v0 = vrot.slane %v5853_v26, 4  ;;  %v11798_v26 = vld [vmem:[#allocation34_spill] sm:$0xff] }
 0x2c5   : > { %11790 = vst [vmem:[#allocation20_spill] sm:$0xff] %v10741_v17  ;;  %3917 = vst.msk [vmem:[#allocation3 + $0x18] sm:$0xff] %vm345_vm1, %v3869_v3  ;;  %8421 = vmatmul.mubr.msk.bf16.gmra.mrb[208].mxu1 %vm1279_vm3, %v5911_v21  ;;  %v3245_v36 = vadd.f32 %v11793_v16, %v2645_v27  ;;  %v2643_v58 = vld [vmem:[#allocation3 + $0x168] sm:$0xff]  ;;  %v3300_v3 = vld [vmem:[#allocation3 + $0x30] sm:$0xff] }
 0x2c6   : > { %3292 = vst.msk [vmem:[#allocation3 + $0x170] sm:$0xff] %vm345_vm1, %v3244_v30  ;;  %3915 = vst.msk [vmem:[#allocation3 + $0x8] sm:$0xff] %vm345_vm1, %v3867_v5  ;;  %8424 = vmatprep.mubr.msk.bf16.mxu1 %vm1279_vm3, %v5913_v8  ;;  %v3243_v48 = vadd.f32 %v11794_v60, %v2643_v58  ;;  %v3298_v27 = vld [vmem:[#allocation3 + $0x20] sm:$0xff]  ;;  %v3301_v49 = vld [vmem:[#allocation3 + $0x38] sm:$0xff] }
 0x2c7   : > { %3290 = vst.msk [vmem:[#allocation3 + $0x160] sm:$0xff] %vm345_vm1, %v3242_v25  ;;  %3293 = vst.msk [vmem:[#allocation3 + $0x178] sm:$0xff] %vm345_vm1, %v3245_v36  ;;  %v3299_v58 = vld [vmem:[#allocation3 + $0x28] sm:$0xff] }
 0x2c8   : > { %v8214_v12 = vpop.f32.mrb[104].mxu1  ;;  %3291 = vst.msk [vmem:[#allocation3 + $0x168] sm:$0xff] %vm345_vm1, %v3243_v48 }
 0x2c9   : > { %v10757_v6 = vpop.f32.mrb[152].mxu0  ;;  %v3872_v30 = vadd.f32 %v8214_v12, %v3300_v3  ;;  %v3691_v63 = vpop.f32.mrb[105].mxu1 }
 0x2ca   : > { %11795 = vst [vmem:[#allocation21_spill] sm:$0xff] %v10757_v6  ;;  %v10760_v21 = vpop.f32.mrb[153].mxu0  ;;  %v3870_v5 = vadd.f32 %v3691_v63, %v3298_v27  ;;  %v8215_v8 = vpop.f32.mrb[106].mxu1  ;;  %v3964_v16 = vld [vmem:[#allocation3 + $0x10] sm:$0xff]  ;;  %v5915_v27 = vsel %vm2152_vm0, %v5912_v4, %v5914_v0  ;;  %v11799_v63 = vld [vmem:[#allocation35_spill] sm:$0xff] }
 0x2cb   : > { %11796 = vst [vmem:[#allocation22_spill] sm:$0xff] %v10760_v21  ;;  %v10762_v25 = vpop.f32.mrb[154].mxu0  ;;  %3920 = vst.msk [vmem:[#allocation3 + $0x30] sm:$0xff] %vm345_vm1, %v3872_v30  ;;  %v3873_v36 = vadd.f32 %v8215_v8, %v3301_v49  ;;  %v3694_v60 = vpop.f32.mrb[107].mxu1  ;;  %v4338_v48 = vadd.f32 %v11798_v26, %v3964_v16  ;;  %v3962_v3 = vld [vmem:[#allocation3] sm:$0xff]  ;;  %v11800_v30 = vld [vmem:[#allocation5_spill] sm:$0xff] }
 0x2cc   : > { %v10765_v6 = vpop.f32.mrb[155].mxu0  ;;  %3918 = vst.msk [vmem:[#allocation3 + $0x20] sm:$0xff] %vm345_vm1, %v3870_v5  ;;  %v3871_v12 = vadd.f32 %v3694_v60, %v3299_v58  ;;  %v4336_v21 = vadd.f32 %v11799_v63, %v3962_v3  ;;  %v3965_v17 = vld [vmem:[#allocation3 + $0x18] sm:$0xff]  ;;  %v11801_v49 = vrot.slane %v11800_v30, 4  ;;  %v11802_v16 = vld [vmem:[#allocation36_spill] sm:$0xff]  ;;  %v3304_v5 = vld [vmem:[#allocation3 + $0x50] sm:$0xff] }
 0x2cd   : > { %11797 = vst [vmem:[#allocation23_spill] sm:$0xff] %v10765_v6  ;;  %3921 = vst.msk [vmem:[#allocation3 + $0x38] sm:$0xff] %vm345_vm1, %v3873_v36  ;;  %8425 = vmatmul.mubr.msk.bf16.gmra.mrb[212].mxu1 %vm1279_vm3, %v5915_v27  ;;  %v4339_v26 = vadd.f32 %v11802_v16, %v3965_v17  ;;  %v3963_v6 = vld [vmem:[#allocation3 + $0x8] sm:$0xff]  ;;  %v3302_v60 = vld [vmem:[#allocation3 + $0x40] sm:$0xff] }
 0x2ce   : > { %v5917_v8 = vsel %vm2152_vm0, %v5914_v0, %v11801_v49  ;;  %4386 = vst.msk [vmem:[#allocation3 + $0x10] sm:$0xff] %vm345_vm1, %v4338_v48  ;;  %3919 = vst.msk [vmem:[#allocation3 + $0x28] sm:$0xff] %vm345_vm1, %v3871_v12  ;;  %v4337_v4 = vadd.f32 %v10250_v11, %v3963_v6  ;;  %v3305_v12 = vld [vmem:[#allocation3 + $0x58] sm:$0xff]  ;;  %v3303_v6 = vld [vmem:[#allocation3 + $0x48] sm:$0xff] }
 0x2cf   : > { %8428 = vmatprep.mubr.msk.bf16.mxu1 %vm1279_vm3, %v5917_v8  ;;  %4384 = vst.msk [vmem:[#allocation3] sm:$0xff] %vm345_vm1, %v4336_v21  ;;  %4387 = vst.msk [vmem:[#allocation3 + $0x18] sm:$0xff] %vm345_vm1, %v4339_v26 }
 0x2d0   : > { %v8218_v36 = vpop.f32.mrb[108].mxu1  ;;  %4385 = vst.msk [vmem:[#allocation3 + $0x8] sm:$0xff] %vm345_vm1, %v4337_v4 }
 0x2d1   : > { %v10783_v58 = vpop.f32.mrb[156].mxu0  ;;  %v3876_v0 = vadd.f32 %v8218_v36, %v3304_v5  ;;  %v3707_v17 = vpop.f32.mrb[109].mxu1  ;;  %v11803_v36 = vld [vmem:[#allocation9_spill] sm:$0xff] }
 0x2d2   : > { %v10786_v48 = vpop.f32.mrb[157].mxu0  ;;  %v3874_v3 = vadd.f32 %v3707_v17, %v3302_v60  ;;  %v8219_v27 = vpop.f32.mrb[110].mxu1  ;;  %v3968_v21 = vld [vmem:[#allocation3 + $0x30] sm:$0xff]  ;;  %v11805_v17 = vld [vmem:[#allocation37_spill] sm:$0xff] }
 0x2d3   : > { %v10788_v63 = vpop.f32.mrb[158].mxu0  ;;  %3924 = vst.msk [vmem:[#allocation3 + $0x50] sm:$0xff] %vm345_vm1, %v3876_v0  ;;  %v3877_v11 = vadd.f32 %v8219_v27, %v3305_v12  ;;  %v3710_v30 = vpop.f32.mrb[111].mxu1  ;;  %v4342_v8 = vadd.f32 %v10270_v31, %v3968_v21  ;;  %v3966_v16 = vld [vmem:[#allocation3 + $0x20] sm:$0xff]  ;;  %v11804_v31 = vld [vmem:[#allocation7_spill] sm:$0xff] }
 0x2d4   : > { %v10791_v49 = vpop.f32.mrb[159].mxu0  ;;  %3922 = vst.msk [vmem:[#allocation3 + $0x40] sm:$0xff] %vm345_vm1, %v3874_v3  ;;  %v3875_v26 = vadd.f32 %v3710_v30, %v3303_v6  ;;  %v4340_v4 = vadd.f32 %v10278_v28, %v3966_v16  ;;  %v3969_v5 = vld [vmem:[#allocation3 + $0x38] sm:$0xff]  ;;  %v3308_v3 = vld [vmem:[#allocation3 + $0x70] sm:$0xff] }
 0x2d5   : > { %3925 = vst.msk [vmem:[#allocation3 + $0x58] sm:$0xff] %vm345_vm1, %v3877_v11  ;;  %8429 = vmatmul.mubr.msk.bf16.gmra.mrb[216].mxu1 %vm1279_vm3, %v11803_v36  ;;  %4390 = vst.msk [vmem:[#allocation3 + $0x30] sm:$0xff] %vm345_vm1, %v4342_v8  ;;  %v4343_v0 = vadd.f32 %v10286_v32, %v3969_v5  ;;  %v3967_v60 = vld [vmem:[#allocation3 + $0x28] sm:$0xff]  ;;  %v3306_v32 = vld [vmem:[#allocation3 + $0x60] sm:$0xff] }
 0x2d6   : > { %3923 = vst.msk [vmem:[#allocation3 + $0x48] sm:$0xff] %vm345_vm1, %v3875_v26  ;;  %8432 = vmatprep.mubr.msk.bf16.mxu1 %vm1279_vm3, %v11804_v31  ;;  %4388 = vst.msk [vmem:[#allocation3 + $0x20] sm:$0xff] %vm345_vm1, %v4340_v4  ;;  %v4341_v28 = vadd.f32 %v11805_v17, %v3967_v60  ;;  %v3309_v8 = vld [vmem:[#allocation3 + $0x78] sm:$0xff]  ;;  %v3307_v36 = vld [vmem:[#allocation3 + $0x68] sm:$0xff] }
 0x2d7   : > { %4391 = vst.msk [vmem:[#allocation3 + $0x38] sm:$0xff] %vm345_vm1, %v4343_v0 }
 0x2d8   : > { %v8222_v12 = vpop.f32.mrb[112].mxu1  ;;  %4389 = vst.msk [vmem:[#allocation3 + $0x28] sm:$0xff] %vm345_vm1, %v4341_v28 }
 0x2d9   : > { %v10807_v27 = vpop.f32.mrb[160].mxu0  ;;  %v3880_v21 = vadd.f32 %v8222_v12, %v3308_v3  ;;  %v3723_v11 = vpop.f32.mrb[113].mxu1 }
 0x2da   : > { %v10810_v6 = vpop.f32.mrb[161].mxu0  ;;  %v3878_v30 = vadd.f32 %v3723_v11, %v3306_v32  ;;  %v8223_v16 = vpop.f32.mrb[114].mxu1  ;;  %v3972_v4 = vld [vmem:[#allocation3 + $0x50] sm:$0xff]  ;;  %v11806_v32 = vld [vmem:[#allocation8_spill] sm:$0xff] }
 0x2db   : > { %v10812_v26 = vpop.f32.mrb[162].mxu0  ;;  %3928 = vst.msk [vmem:[#allocation3 + $0x70] sm:$0xff] %vm345_vm1, %v3880_v21  ;;  %v3881_v5 = vadd.f32 %v8223_v16, %v3309_v8  ;;  %v3726_v0 = vpop.f32.mrb[115].mxu1  ;;  %v4346_v31 = vadd.f32 %v10321_v62, %v3972_v4  ;;  %v3970_v17 = vld [vmem:[#allocation3 + $0x40] sm:$0xff]  ;;  %v11807_v21 = vld [vmem:[#allocation38_spill] sm:$0xff] }
 0x2dc   : > { %v10815_v60 = vpop.f32.mrb[163].mxu0  ;;  %3926 = vst.msk [vmem:[#allocation3 + $0x60] sm:$0xff] %vm345_vm1, %v3878_v30  ;;  %v3879_v28 = vadd.f32 %v3726_v0, %v3307_v36  ;;  %v4344_v3 = vadd.f32 %v10328_v33, %v3970_v17  ;;  %v3973_v12 = vld [vmem:[#allocation3 + $0x58] sm:$0xff]  ;;  %v11808_v62 = vld [vmem:[#allocation6_spill] sm:$0xff]  ;;  %v3310_v36 = vld [vmem:[#allocation3 + $0x80] sm:$0xff] }
 0x2dd   : > { %3929 = vst.msk [vmem:[#allocation3 + $0x78] sm:$0xff] %vm345_vm1, %v3881_v5  ;;  %8433 = vmatmul.mubr.msk.bf16.gmra.mrb[220].mxu1 %vm1279_vm3, %v11806_v32  ;;  %4394 = vst.msk [vmem:[#allocation3 + $0x50] sm:$0xff] %vm345_vm1, %v4346_v31  ;;  %v4347_v11 = vadd.f32 %v11807_v21, %v3973_v12  ;;  %v3971_v8 = vld [vmem:[#allocation3 + $0x48] sm:$0xff]  ;;  %v3312_v30 = vld [vmem:[#allocation3 + $0x90] sm:$0xff] }
 0x2de   : > { %3927 = vst.msk [vmem:[#allocation3 + $0x68] sm:$0xff] %vm345_vm1, %v3879_v28  ;;  %8436 = vmatprep.mubr.msk.bf16.mxu1 %vm1279_vm3, %v11808_v62  ;;  %4392 = vst.msk [vmem:[#allocation3 + $0x40] sm:$0xff] %vm345_vm1, %v4344_v3  ;;  %v4345_v33 = vadd.f32 %v10342_v56, %v3971_v8  ;;  %v3313_v28 = vld [vmem:[#allocation3 + $0x98] sm:$0xff]  ;;  %v3311_v21 = vld [vmem:[#allocation3 + $0x88] sm:$0xff] }
 0x2df   : > { %4395 = vst.msk [vmem:[#allocation3 + $0x58] sm:$0xff] %vm345_vm1, %v4347_v11 }
 0x2e0   : > { %v8226_v16 = vpop.f32.mrb[116].mxu1  ;;  %4393 = vst.msk [vmem:[#allocation3 + $0x48] sm:$0xff] %vm345_vm1, %v4345_v33 }
 0x2e1   : > { %v10831_v4 = vpop.f32.mrb[164].mxu0  ;;  %v3884_v5 = vadd.f32 %v8226_v16, %v3312_v30  ;;  %v3739_v0 = vpop.f32.mrb[117].mxu1 }
 0x2e2   : > { %v10834_v31 = vpop.f32.mrb[165].mxu0  ;;  %v3882_v17 = vadd.f32 %v3739_v0, %v3310_v36  ;;  %v8227_v12 = vpop.f32.mrb[118].mxu1  ;;  %v3976_v3 = vld [vmem:[#allocation3 + $0x70] sm:$0xff]  ;;  %v11809_v0 = vld [vmem:[#allocation13_spill] sm:$0xff] }
 0x2e3   : > { %v10836_v32 = vpop.f32.mrb[166].mxu0  ;;  %3932 = vst.msk [vmem:[#allocation3 + $0x90] sm:$0xff] %vm345_vm1, %v3884_v5  ;;  %v3885_v56 = vadd.f32 %v8227_v12, %v3313_v28  ;;  %v3742_v11 = vpop.f32.mrb[119].mxu1  ;;  %v4350_v62 = vadd.f32 %v10371_v53, %v3976_v3  ;;  %v3974_v33 = vld [vmem:[#allocation3 + $0x60] sm:$0xff]  ;;  %v11810_v53 = vld [vmem:[#allocation11_spill] sm:$0xff] }
 0x2e4   : > { %v10839_v8 = vpop.f32.mrb[167].mxu0  ;;  %3930 = vst.msk [vmem:[#allocation3 + $0x80] sm:$0xff] %vm345_vm1, %v3882_v17  ;;  %v3883_v30 = vadd.f32 %v3742_v11, %v3311_v21  ;;  %v4348_v16 = vadd.f32 %v10380_v46, %v3974_v33  ;;  %v3977_v36 = vld [vmem:[#allocation3 + $0x78] sm:$0xff]  ;;  %v3316_v17 = vld [vmem:[#allocation3 + $0xb0] sm:$0xff] }
 0x2e5   : > { %3933 = vst.msk [vmem:[#allocation3 + $0x98] sm:$0xff] %vm345_vm1, %v3885_v56  ;;  %8437 = vmatmul.mubr.msk.bf16.gmra.mrb[224].mxu1 %vm1279_vm3, %v11809_v0  ;;  %4398 = vst.msk [vmem:[#allocation3 + $0x70] sm:$0xff] %vm345_vm1, %v4350_v62  ;;  %v4351_v5 = vadd.f32 %v10388_v54, %v3977_v36  ;;  %v3975_v28 = vld [vmem:[#allocation3 + $0x68] sm:$0xff]  ;;  %v3314_v54 = vld [vmem:[#allocation3 + $0xa0] sm:$0xff] }
 0x2e6   : > { %3931 = vst.msk [vmem:[#allocation3 + $0x88] sm:$0xff] %vm345_vm1, %v3883_v30  ;;  %8440 = vmatprep.mubr.msk.bf16.mxu1 %vm1279_vm3, %v11810_v53  ;;  %4396 = vst.msk [vmem:[#allocation3 + $0x60] sm:$0xff] %vm345_vm1, %v4348_v16  ;;  %v4349_v46 = vadd.f32 %v10396_v9, %v3975_v28  ;;  %v3317_v33 = vld [vmem:[#allocation3 + $0xb8] sm:$0xff]  ;;  %v3315_v0 = vld [vmem:[#allocation3 + $0xa8] sm:$0xff] }
 0x2e7   : > { %4399 = vst.msk [vmem:[#allocation3 + $0x78] sm:$0xff] %vm345_vm1, %v4351_v5 }
 0x2e8   : > { %v8230_v12 = vpop.f32.mrb[120].mxu1  ;;  %4397 = vst.msk [vmem:[#allocation3 + $0x68] sm:$0xff] %vm345_vm1, %v4349_v46 }
 0x2e9   : > { %v10855_v3 = vpop.f32.mrb[168].mxu0  ;;  %v3888_v56 = vadd.f32 %v8230_v12, %v3316_v17  ;;  %v3755_v21 = vpop.f32.mrb[121].mxu1 }
 0x2ea   : > { %v10858_v11 = vpop.f32.mrb[169].mxu0  ;;  %v3886_v62 = vadd.f32 %v3755_v21, %v3314_v54  ;;  %v8231_v30 = vpop.f32.mrb[122].mxu1  ;;  %v3980_v16 = vld [vmem:[#allocation3 + $0x90] sm:$0xff]  ;;  %v11811_v21 = vld [vmem:[#allocation12_spill] sm:$0xff] }
 0x2eb   : > { %v10860_v36 = vpop.f32.mrb[170].mxu0  ;;  %3936 = vst.msk [vmem:[#allocation3 + $0xb0] sm:$0xff] %vm345_vm1, %v3888_v56  ;;  %v3889_v9 = vadd.f32 %v8231_v30, %v3317_v33  ;;  %v3758_v5 = vpop.f32.mrb[123].mxu1  ;;  %v4354_v53 = vadd.f32 %v10427_v35, %v3980_v16  ;;  %v3978_v46 = vld [vmem:[#allocation3 + $0x80] sm:$0xff]  ;;  %v11812_v35 = vld [vmem:[#allocation10_spill] sm:$0xff] }
 0x2ec   : > { %v10863_v28 = vpop.f32.mrb[171].mxu0  ;;  %3934 = vst.msk [vmem:[#allocation3 + $0xa0] sm:$0xff] %vm345_vm1, %v3886_v62  ;;  %v3887_v17 = vadd.f32 %v3758_v5, %v3315_v0  ;;  %v4352_v12 = vadd.f32 %v10435_v52, %v3978_v46  ;;  %v3981_v54 = vld [vmem:[#allocation3 + $0x98] sm:$0xff]  ;;  %v3320_v62 = vld [vmem:[#allocation3 + $0xd0] sm:$0xff] }
 0x2ed   : > { %3937 = vst.msk [vmem:[#allocation3 + $0xb8] sm:$0xff] %vm345_vm1, %v3889_v9  ;;  %8441 = vmatmul.mubr.msk.bf16.gmra.mrb[228].mxu1 %vm1279_vm3, %v11811_v21  ;;  %4402 = vst.msk [vmem:[#allocation3 + $0x90] sm:$0xff] %vm345_vm1, %v4354_v53  ;;  %v4355_v56 = vadd.f32 %v10443_v59, %v3981_v54  ;;  %v3979_v33 = vld [vmem:[#allocation3 + $0x88] sm:$0xff]  ;;  %v3318_v59 = vld [vmem:[#allocation3 + $0xc0] sm:$0xff] }
 0x2ee   : > { %3935 = vst.msk [vmem:[#allocation3 + $0xa8] sm:$0xff] %vm345_vm1, %v3887_v17  ;;  %8444 = vmatprep.mubr.msk.bf16.mxu1 %vm1279_vm3, %v11812_v35  ;;  %4400 = vst.msk [vmem:[#allocation3 + $0x80] sm:$0xff] %vm345_vm1, %v4352_v12  ;;  %v4353_v52 = vadd.f32 %v10450_v29, %v3979_v33  ;;  %v3321_v46 = vld [vmem:[#allocation3 + $0xd8] sm:$0xff]  ;;  %v3319_v21 = vld [vmem:[#allocation3 + $0xc8] sm:$0xff] }
 0x2ef   : > { %4403 = vst.msk [vmem:[#allocation3 + $0x98] sm:$0xff] %vm345_vm1, %v4355_v56 }
 0x2f0   : > { %v8234_v30 = vpop.f32.mrb[124].mxu1  ;;  %4401 = vst.msk [vmem:[#allocation3 + $0x88] sm:$0xff] %vm345_vm1, %v4353_v52 }
 0x2f1   : > { %v10879_v16 = vpop.f32.mrb[172].mxu0  ;;  %v3892_v9 = vadd.f32 %v8234_v30, %v3320_v62  ;;  %v3771_v0 = vpop.f32.mrb[125].mxu1 }
 0x2f2   : > { %v10882_v5 = vpop.f32.mrb[173].mxu0  ;;  %v3890_v53 = vadd.f32 %v3771_v0, %v3318_v59  ;;  %v8235_v17 = vpop.f32.mrb[126].mxu1  ;;  %v3984_v12 = vld [vmem:[#allocation3 + $0xb0] sm:$0xff]  ;;  %v11813_v0 = vld [vmem:[#allocation17_spill] sm:$0xff] }
 0x2f3   : > { %v10884_v54 = vpop.f32.mrb[174].mxu0  ;;  %3940 = vst.msk [vmem:[#allocation3 + $0xd0] sm:$0xff] %vm345_vm1, %v3892_v9  ;;  %v3893_v29 = vadd.f32 %v8235_v17, %v3321_v46  ;;  %v3774_v56 = vpop.f32.mrb[127].mxu1  ;;  %v4358_v35 = vadd.f32 %v10481_v39, %v3984_v12  ;;  %v3982_v52 = vld [vmem:[#allocation3 + $0xa0] sm:$0xff]  ;;  %v11814_v39 = vld [vmem:[#allocation15_spill] sm:$0xff] }
 0x2f4   : > { %v10887_v33 = vpop.f32.mrb[175].mxu0  ;;  %3938 = vst.msk [vmem:[#allocation3 + $0xc0] sm:$0xff] %vm345_vm1, %v3890_v53  ;;  %v3891_v62 = vadd.f32 %v3774_v56, %v3319_v21  ;;  %v4356_v30 = vadd.f32 %v10494_v45, %v3982_v52  ;;  %v3985_v59 = vld [vmem:[#allocation3 + $0xb8] sm:$0xff]  ;;  %v3324_v53 = vld [vmem:[#allocation3 + $0xf0] sm:$0xff] }
 0x2f5   : > { %3941 = vst.msk [vmem:[#allocation3 + $0xd8] sm:$0xff] %vm345_vm1, %v3893_v29  ;;  %8445 = vmatmul.mubr.msk.bf16.gmra.mrb[232].mxu1 %vm1279_vm3, %v11813_v0  ;;  %4406 = vst.msk [vmem:[#allocation3 + $0xb0] sm:$0xff] %vm345_vm1, %v4358_v35  ;;  %v4359_v9 = vadd.f32 %v10502_v18, %v3985_v59  ;;  %v3983_v46 = vld [vmem:[#allocation3 + $0xa8] sm:$0xff]  ;;  %v3322_v18 = vld [vmem:[#allocation3 + $0xe0] sm:$0xff] }
 0x2f6   : > { %3939 = vst.msk [vmem:[#allocation3 + $0xc8] sm:$0xff] %vm345_vm1, %v3891_v62  ;;  %8448 = vmatprep.mubr.msk.bf16.mxu1 %vm1279_vm3, %v11814_v39  ;;  %4404 = vst.msk [vmem:[#allocation3 + $0xa0] sm:$0xff] %vm345_vm1, %v4356_v30  ;;  %v4357_v45 = vadd.f32 %v10508_v19, %v3983_v46  ;;  %v3325_v52 = vld [vmem:[#allocation3 + $0xf8] sm:$0xff]  ;;  %v3323_v0 = vld [vmem:[#allocation3 + $0xe8] sm:$0xff] }
 0x2f7   : > { %4407 = vst.msk [vmem:[#allocation3 + $0xb8] sm:$0xff] %vm345_vm1, %v4359_v9 }
 0x2f8   : > { %v8238_v17 = vpop.f32.mrb[128].mxu1  ;;  %4405 = vst.msk [vmem:[#allocation3 + $0xa8] sm:$0xff] %vm345_vm1, %v4357_v45 }
 0x2f9   : > { %v10903_v12 = vpop.f32.mrb[176].mxu0  ;;  %v3896_v29 = vadd.f32 %v8238_v17, %v3324_v53  ;;  %v3787_v21 = vpop.f32.mrb[129].mxu1 }
 0x2fa   : > { %v10906_v56 = vpop.f32.mrb[177].mxu0  ;;  %v3894_v35 = vadd.f32 %v3787_v21, %v3322_v18  ;;  %v8239_v62 = vpop.f32.mrb[130].mxu1  ;;  %v3988_v30 = vld [vmem:[#allocation3 + $0xd0] sm:$0xff]  ;;  %v11815_v21 = vld [vmem:[#allocation16_spill] sm:$0xff] }
 0x2fb   : > { %v10908_v59 = vpop.f32.mrb[178].mxu0  ;;  %3944 = vst.msk [vmem:[#allocation3 + $0xf0] sm:$0xff] %vm345_vm1, %v3896_v29  ;;  %v3897_v19 = vadd.f32 %v8239_v62, %v3325_v52  ;;  %v3790_v9 = vpop.f32.mrb[131].mxu1  ;;  %v4362_v39 = vadd.f32 %v10540_v61, %v3988_v30  ;;  %v3986_v45 = vld [vmem:[#allocation3 + $0xc0] sm:$0xff]  ;;  %v5867_v29 = vld [vmem:[#allocation2 + $0xd8] sm:$0xf] }
 0x2fc   : > { %v10911_v46 = vpop.f32.mrb[179].mxu0  ;;  %3942 = vst.msk [vmem:[#allocation3 + $0xe0] sm:$0xff] %vm345_vm1, %v3894_v35  ;;  %v3895_v53 = vadd.f32 %v3790_v9, %v3323_v0  ;;  %v4360_v17 = vadd.f32 %v10543_v14, %v3986_v45  ;;  %v3989_v18 = vld [vmem:[#allocation3 + $0xd8] sm:$0xff]  ;;  %v11816_v61 = vld [vmem:[#allocation14_spill] sm:$0xff]  ;;  %v5942_v0 = vrot.slane %v5867_v29, 4  ;;  %v3326_v9 = vld [vmem:[#allocation3 + $0x100] sm:$0xff] }
 0x2fd   : > { %3945 = vst.msk [vmem:[#allocation3 + $0xf8] sm:$0xff] %vm345_vm1, %v3897_v19  ;;  %8449 = vmatmul.mubr.msk.bf16.gmra.mrb[236].mxu1 %vm1279_vm3, %v11815_v21  ;;  %4410 = vst.msk [vmem:[#allocation3 + $0xd0] sm:$0xff] %vm345_vm1, %v4362_v39  ;;  %v4363_v52 = vadd.f32 %v10549_v55, %v3989_v18  ;;  %v3987_v62 = vld [vmem:[#allocation3 + $0xc8] sm:$0xff]  ;;  %v3328_v35 = vld [vmem:[#allocation3 + $0x110] sm:$0xff] }
 0x2fe   : > { %3943 = vst.msk [vmem:[#allocation3 + $0xe8] sm:$0xff] %vm345_vm1, %v3895_v53  ;;  %8452 = vmatprep.mubr.msk.bf16.mxu1 %vm1279_vm3, %v11816_v61  ;;  %4408 = vst.msk [vmem:[#allocation3 + $0xc0] sm:$0xff] %vm345_vm1, %v4360_v17  ;;  %v4361_v14 = vadd.f32 %v10559_v38, %v3987_v62  ;;  %v3329_v18 = vld [vmem:[#allocation3 + $0x118] sm:$0xff]  ;;  %v3327_v62 = vld [vmem:[#allocation3 + $0x108] sm:$0xff] }
 0x2ff   : > { %4411 = vst.msk [vmem:[#allocation3 + $0xd8] sm:$0xff] %vm345_vm1, %v4363_v52 }
 0x300   : > { %v8242_v30 = vpop.f32.mrb[132].mxu1  ;;  %4409 = vst.msk [vmem:[#allocation3 + $0xc8] sm:$0xff] %vm345_vm1, %v4361_v14 }
 0x301   : > { %v10927_v19 = vpop.f32.mrb[180].mxu0  ;;  %v3900_v55 = vadd.f32 %v8242_v30, %v3328_v35  ;;  %v3803_v39 = vpop.f32.mrb[133].mxu1  ;;  %v11820_v30 = vld [vmem:[#allocation4_spill] sm:$0xff] }
 0x302   : > { %11817 = vst [vmem:[#allocation24_spill] sm:$0xff] %v10927_v19  ;;  %v10930_v45 = vpop.f32.mrb[181].mxu0  ;;  %v3898_v53 = vadd.f32 %v3803_v39, %v3326_v9  ;;  %v8243_v21 = vpop.f32.mrb[134].mxu1  ;;  %v3992_v38 = vld [vmem:[#allocation3 + $0xf0] sm:$0xff]  ;;  %v11821_v9 = vrot.slane %v11820_v30, 4 }
 0x303   : > { %11818 = vst [vmem:[#allocation25_spill] sm:$0xff] %v10930_v45  ;;  %v10932_v17 = vpop.f32.mrb[182].mxu0  ;;  %3948 = vst.msk [vmem:[#allocation3 + $0x110] sm:$0xff] %vm345_vm1, %v3900_v55  ;;  %v3901_v52 = vadd.f32 %v8243_v21, %v3329_v18  ;;  %v3806_v61 = vpop.f32.mrb[135].mxu1  ;;  %v4366_v29 = vadd.f32 %v10583_v51, %v3992_v38  ;;  %v3990_v14 = vld [vmem:[#allocation3 + $0xe0] sm:$0xff] }
 0x304   : > { %11819 = vst [vmem:[#allocation26_spill] sm:$0xff] %v10932_v17  ;;  %v10935_v19 = vpop.f32.mrb[183].mxu0  ;;  %3946 = vst.msk [vmem:[#allocation3 + $0x100] sm:$0xff] %vm345_vm1, %v3898_v53  ;;  %v3899_v35 = vadd.f32 %v3806_v61, %v3327_v62  ;;  %v5943_v39 = vsel %vm2152_vm0, %v11821_v9, %v5942_v0  ;;  %v4364_v17 = vadd.f32 %v10588_v20, %v3990_v14  ;;  %v3993_v45 = vld [vmem:[#allocation3 + $0xf8] sm:$0xff]  ;;  %v3332_v0 = vld [vmem:[#allocation3 + $0x130] sm:$0xff] }
 0x305   : > { %3949 = vst.msk [vmem:[#allocation3 + $0x118] sm:$0xff] %vm345_vm1, %v3901_v52  ;;  %8453 = vmatmul.mubr.msk.bf16.gmra.mrb[240].mxu1 %vm1279_vm3, %v5943_v39  ;;  %4414 = vst.msk [vmem:[#allocation3 + $0xf0] sm:$0xff] %vm345_vm1, %v4366_v29  ;;  %v4367_v55 = vadd.f32 %v10592_v2, %v3993_v45  ;;  %v3991_v51 = vld [vmem:[#allocation3 + $0xe8] sm:$0xff]  ;;  %v3330_v38 = vld [vmem:[#allocation3 + $0x120] sm:$0xff] }
 0x306   : > { %3947 = vst.msk [vmem:[#allocation3 + $0x108] sm:$0xff] %vm345_vm1, %v3899_v35  ;;  %4412 = vst.msk [vmem:[#allocation3 + $0xe0] sm:$0xff] %vm345_vm1, %v4364_v17  ;;  %v4365_v53 = vadd.f32 %v10598_v37, %v3991_v51  ;;  %v3333_v45 = vld [vmem:[#allocation3 + $0x138] sm:$0xff]  ;;  %v3331_v14 = vld [vmem:[#allocation3 + $0x128] sm:$0xff] }
 0x307   : > { %4415 = vst.msk [vmem:[#allocation3 + $0xf8] sm:$0xff] %vm345_vm1, %v4367_v55 }
 0x308   : > { %v8246_v20 = vpop.f32.mrb[136].mxu1  ;;  %4413 = vst.msk [vmem:[#allocation3 + $0xe8] sm:$0xff] %vm345_vm1, %v4365_v53 }
 0x309   : > { %v10951_v18 = vpop.f32.mrb[184].mxu0  ;;  %v3904_v21 = vadd.f32 %v8246_v20, %v3332_v0  ;;  %v3819_v52 = vpop.f32.mrb[137].mxu1 }
 0x30a   : > { %v10954_v62 = vpop.f32.mrb[185].mxu0  ;;  %v3902_v2 = vadd.f32 %v3819_v52, %v3330_v38  ;;  %v8247_v61 = vpop.f32.mrb[138].mxu1  ;;  %v3996_v17 = vld [vmem:[#allocation3 + $0x110] sm:$0xff] }
 0x30b   : > { %v10956_v29 = vpop.f32.mrb[186].mxu0  ;;  %3952 = vst.msk [vmem:[#allocation3 + $0x130] sm:$0xff] %vm345_vm1, %v3904_v21  ;;  %v3905_v37 = vadd.f32 %v8247_v61, %v3333_v45  ;;  %v3822_v35 = vpop.f32.mrb[139].mxu1  ;;  %v4370_v9 = vadd.f32 %v10620_v1, %v3996_v17  ;;  %v3994_v39 = vld [vmem:[#allocation3 + $0x100] sm:$0xff]  ;;  %v3336_v21 = vld [vmem:[#allocation3 + $0x150] sm:$0xff]  ;;  %v3337_v17 = vld [vmem:[#allocation3 + $0x158] sm:$0xff] }
 0x30c   : > { %v10959_v30 = vpop.f32.mrb[187].mxu0  ;;  %3950 = vst.msk [vmem:[#allocation3 + $0x120] sm:$0xff] %vm345_vm1, %v3902_v2  ;;  %v3903_v55 = vadd.f32 %v3822_v35, %v3331_v14  ;;  %v4368_v51 = vadd.f32 %v10625_v22, %v3994_v39  ;;  %v3997_v53 = vld [vmem:[#allocation3 + $0x118] sm:$0xff]  ;;  %v3334_v2 = vld [vmem:[#allocation3 + $0x140] sm:$0xff] }
 0x30d   : > { %3953 = vst.msk [vmem:[#allocation3 + $0x138] sm:$0xff] %vm345_vm1, %v3905_v37  ;;  %4418 = vst.msk [vmem:[#allocation3 + $0x110] sm:$0xff] %vm345_vm1, %v4370_v9  ;;  %v4371_v0 = vadd.f32 %v10628_v40, %v3997_v53  ;;  %v3995_v20 = vld [vmem:[#allocation3 + $0x108] sm:$0xff] }
 0x30e   : > { %3951 = vst.msk [vmem:[#allocation3 + $0x128] sm:$0xff] %vm345_vm1, %v3903_v55  ;;  %4416 = vst.msk [vmem:[#allocation3 + $0x100] sm:$0xff] %vm345_vm1, %v4368_v51  ;;  %v4369_v1 = vadd.f32 %v10631_v47, %v3995_v20  ;;  %v3335_v9 = vld [vmem:[#allocation3 + $0x148] sm:$0xff] }
 0x30f   : > { %4419 = vst.msk [vmem:[#allocation3 + $0x118] sm:$0xff] %vm345_vm1, %v4371_v0 }
 0x310   : > { %v8250_v38 = vpop.f32.mrb[140].mxu1  ;;  %4417 = vst.msk [vmem:[#allocation3 + $0x108] sm:$0xff] %vm345_vm1, %v4369_v1 }
 0x311   : > { %v10971_v52 = vpop.f32.mrb[188].mxu0  ;;  %v3908_v22 = vadd.f32 %v8250_v38, %v3336_v21  ;;  %v3835_v45 = vpop.f32.mrb[141].mxu1 }
 0x312   : > { %v10974_v61 = vpop.f32.mrb[189].mxu0  ;;  %v3906_v40 = vadd.f32 %v3835_v45, %v3334_v2  ;;  %v8251_v37 = vpop.f32.mrb[142].mxu1  ;;  %v4000_v35 = vld [vmem:[#allocation3 + $0x130] sm:$0xff] }
 0x313   : > { %v10976_v14 = vpop.f32.mrb[190].mxu0  ;;  %3956 = vst.msk [vmem:[#allocation3 + $0x150] sm:$0xff] %vm345_vm1, %v3908_v22  ;;  %v3909_v47 = vadd.f32 %v8251_v37, %v3337_v17  ;;  %v3838_v39 = vpop.f32.mrb[143].mxu1  ;;  %v4374_v51 = vadd.f32 %v10651_v15, %v4000_v35  ;;  %v3998_v53 = vld [vmem:[#allocation3 + $0x120] sm:$0xff]  ;;  %v3340_v22 = vld [vmem:[#allocation3 + $0x170] sm:$0xff]  ;;  %v3341_v35 = vld [vmem:[#allocation3 + $0x178] sm:$0xff] }
 0x314   : > { %v10979_v55 = vpop.f32.mrb[191].mxu0  ;;  %3954 = vst.msk [vmem:[#allocation3 + $0x140] sm:$0xff] %vm345_vm1, %v3906_v40  ;;  %v3907_v0 = vadd.f32 %v3838_v39, %v3335_v9  ;;  %v4372_v20 = vadd.f32 %v10654_v23, %v3998_v53  ;;  %v4001_v1 = vld [vmem:[#allocation3 + $0x138] sm:$0xff]  ;;  %v3338_v40 = vld [vmem:[#allocation3 + $0x160] sm:$0xff] }
 0x315   : > { %3957 = vst.msk [vmem:[#allocation3 + $0x158] sm:$0xff] %vm345_vm1, %v3909_v47  ;;  %4422 = vst.msk [vmem:[#allocation3 + $0x130] sm:$0xff] %vm345_vm1, %v4374_v51  ;;  %v4375_v21 = vadd.f32 %v10657_v44, %v4001_v1  ;;  %v3999_v38 = vld [vmem:[#allocation3 + $0x128] sm:$0xff] }
 0x316   : > { %3955 = vst.msk [vmem:[#allocation3 + $0x148] sm:$0xff] %vm345_vm1, %v3907_v0  ;;  %4420 = vst.msk [vmem:[#allocation3 + $0x120] sm:$0xff] %vm345_vm1, %v4372_v20  ;;  %v4373_v15 = vadd.f32 %v10660_v50, %v3999_v38  ;;  %v3339_v51 = vld [vmem:[#allocation3 + $0x168] sm:$0xff] }
 0x317   : > { %4423 = vst.msk [vmem:[#allocation3 + $0x138] sm:$0xff] %vm345_vm1, %v4375_v21 }
 0x318   : > { %v8254_v2 = vpop.f32.mrb[144].mxu1  ;;  %4421 = vst.msk [vmem:[#allocation3 + $0x128] sm:$0xff] %vm345_vm1, %v4373_v15 }
 0x319   : > { %v10991_v45 = vpop.f32.mrb[192].mxu0  ;;  %v3912_v23 = vadd.f32 %v8254_v2, %v3340_v22  ;;  %v3851_v17 = vpop.f32.mrb[145].mxu1 }
 0x31a   : > { %v10994_v37 = vpop.f32.mrb[193].mxu0  ;;  %v3910_v44 = vadd.f32 %v3851_v17, %v3338_v40  ;;  %v8255_v47 = vpop.f32.mrb[146].mxu1  ;;  %v4004_v39 = vld [vmem:[#allocation3 + $0x150] sm:$0xff] }
 0x31b   : > { %v10996_v9 = vpop.f32.mrb[194].mxu0  ;;  %3960 = vst.msk [vmem:[#allocation3 + $0x170] sm:$0xff] %vm345_vm1, %v3912_v23  ;;  %v3913_v50 = vadd.f32 %v8255_v47, %v3341_v35  ;;  %v3854_v53 = vpop.f32.mrb[147].mxu1  ;;  %v4378_v20 = vadd.f32 %v10678_v42, %v4004_v39  ;;  %v4002_v1 = vld [vmem:[#allocation3 + $0x140] sm:$0xff]  ;;  %v4434_v23 = vld [vmem:[#allocation3 + $0x10] sm:$0xff]  ;;  %v4435_v39 = vld [vmem:[#allocation3 + $0x18] sm:$0xff] }
 0x31c   : > { %v10999_v0 = vpop.f32.mrb[195].mxu0  ;;  %3958 = vst.msk [vmem:[#allocation3 + $0x160] sm:$0xff] %vm345_vm1, %v3910_v44  ;;  %v3911_v21 = vadd.f32 %v3854_v53, %v3339_v51  ;;  %v4376_v38 = vadd.f32 %v10681_v10, %v4002_v1  ;;  %v4005_v15 = vld [vmem:[#allocation3 + $0x158] sm:$0xff]  ;;  %v4432_v44 = vld [vmem:[#allocation3] sm:$0xff] }
 0x31d   : > { %3961 = vst.msk [vmem:[#allocation3 + $0x178] sm:$0xff] %vm345_vm1, %v3913_v50  ;;  %4426 = vst.msk [vmem:[#allocation3 + $0x150] sm:$0xff] %vm345_vm1, %v4378_v20  ;;  %v4379_v22 = vadd.f32 %v10684_v13, %v4005_v15  ;;  %v4003_v2 = vld [vmem:[#allocation3 + $0x148] sm:$0xff] }
 0x31e   : > { %3959 = vst.msk [vmem:[#allocation3 + $0x168] sm:$0xff] %vm345_vm1, %v3911_v21  ;;  %4424 = vst.msk [vmem:[#allocation3 + $0x140] sm:$0xff] %vm345_vm1, %v4376_v38  ;;  %v4377_v42 = vadd.f32 %v10687_v24, %v4003_v2  ;;  %v4433_v20 = vld [vmem:[#allocation3 + $0x8] sm:$0xff] }
 0x31f   : > { %4427 = vst.msk [vmem:[#allocation3 + $0x158] sm:$0xff] %vm345_vm1, %v4379_v22 }
 0x320   : > { %v8310_v40 = vpop.f32.mrb[148].mxu1  ;;  %4425 = vst.msk [vmem:[#allocation3 + $0x148] sm:$0xff] %vm345_vm1, %v4377_v42 }
 0x321   : > { %v11011_v17 = vpop.f32.mrb[196].mxu0  ;;  %v5006_v10 = vadd.f32 %v8310_v40, %v4434_v23  ;;  %v4813_v35 = vpop.f32.mrb[149].mxu1 }
 0x322   : > { %v11014_v47 = vpop.f32.mrb[197].mxu0  ;;  %v5004_v13 = vadd.f32 %v4813_v35, %v4432_v44  ;;  %v8311_v50 = vpop.f32.mrb[150].mxu1  ;;  %v4008_v53 = vld [vmem:[#allocation3 + $0x170] sm:$0xff] }
 0x323   : > { %v11016_v51 = vpop.f32.mrb[198].mxu0  ;;  %5054 = vst.msk [vmem:[#allocation3 + $0x10] sm:$0xff] %vm345_vm1, %v5006_v10  ;;  %v5007_v24 = vadd.f32 %v8311_v50, %v4435_v39  ;;  %v4816_v1 = vpop.f32.mrb[151].mxu1  ;;  %v4382_v38 = vadd.f32 %v10705_v41, %v4008_v53  ;;  %v4006_v15 = vld [vmem:[#allocation3 + $0x160] sm:$0xff]  ;;  %v4438_v10 = vld [vmem:[#allocation3 + $0x30] sm:$0xff]  ;;  %v4439_v53 = vld [vmem:[#allocation3 + $0x38] sm:$0xff] }
 0x324   : > { %v11019_v21 = vpop.f32.mrb[199].mxu0  ;;  %5052 = vst.msk [vmem:[#allocation3] sm:$0xff] %vm345_vm1, %v5004_v13  ;;  %v5005_v22 = vadd.f32 %v4816_v1, %v4433_v20  ;;  %v4380_v2 = vadd.f32 %v10708_v34, %v4006_v15  ;;  %v4009_v42 = vld [vmem:[#allocation3 + $0x178] sm:$0xff]  ;;  %v4436_v13 = vld [vmem:[#allocation3 + $0x20] sm:$0xff] }
 0x325   : > { %5055 = vst.msk [vmem:[#allocation3 + $0x18] sm:$0xff] %vm345_vm1, %v5007_v24  ;;  %4430 = vst.msk [vmem:[#allocation3 + $0x170] sm:$0xff] %vm345_vm1, %v4382_v38  ;;  %v4383_v23 = vadd.f32 %v10711_v7, %v4009_v42  ;;  %v4007_v40 = vld [vmem:[#allocation3 + $0x168] sm:$0xff] }
 0x326   : > { %5053 = vst.msk [vmem:[#allocation3 + $0x8] sm:$0xff] %vm345_vm1, %v5005_v22  ;;  %4428 = vst.msk [vmem:[#allocation3 + $0x160] sm:$0xff] %vm345_vm1, %v4380_v2  ;;  %v4381_v41 = vadd.f32 %v10714_v43, %v4007_v40  ;;  %v4437_v38 = vld [vmem:[#allocation3 + $0x28] sm:$0xff]  ;;  %v11822_v2 = vld [vmem:[#allocation18_spill] sm:$0xff] }
 0x327   : > { %4431 = vst.msk [vmem:[#allocation3 + $0x178] sm:$0xff] %vm345_vm1, %v4383_v23 }
 0x328   : > { %v8314_v44 = vpop.f32.mrb[152].mxu1  ;;  %4429 = vst.msk [vmem:[#allocation3 + $0x168] sm:$0xff] %vm345_vm1, %v4381_v41  ;;  %v11823_v41 = vld [vmem:[#allocation19_spill] sm:$0xff] }
 0x329   : > { %v11031_v35 = vpop.f32.mrb[200].mxu0  ;;  %v5010_v34 = vadd.f32 %v8314_v44, %v4438_v10  ;;  %v4829_v39 = vpop.f32.mrb[153].mxu1 }
 0x32a   : > { %v11034_v50 = vpop.f32.mrb[201].mxu0  ;;  %v5008_v7 = vadd.f32 %v4829_v39, %v4436_v13  ;;  %v8315_v24 = vpop.f32.mrb[154].mxu1  ;;  %v5102_v1 = vld [vmem:[#allocation3 + $0x10] sm:$0xff]  ;;  %v11824_v39 = vld [vmem:[#allocation20_spill] sm:$0xff] }
 0x32b   : > { %v11036_v20 = vpop.f32.mrb[202].mxu0  ;;  %5058 = vst.msk [vmem:[#allocation3 + $0x30] sm:$0xff] %vm345_vm1, %v5010_v34  ;;  %v5011_v43 = vadd.f32 %v8315_v24, %v4439_v53  ;;  %v4832_v15 = vpop.f32.mrb[155].mxu1  ;;  %v5701_v42 = vadd.f32 %v11822_v2, %v5102_v1  ;;  %v5100_v23 = vld [vmem:[#allocation3] sm:$0xff] }
 0x32c   : > { %v11039_v22 = vpop.f32.mrb[203].mxu0  ;;  %5056 = vst.msk [vmem:[#allocation3 + $0x20] sm:$0xff] %vm345_vm1, %v5008_v7  ;;  %v5009_v40 = vadd.f32 %v4832_v15, %v4437_v38  ;;  %v5699_v10 = vadd.f32 %v11823_v41, %v5100_v23  ;;  %v5103_v44 = vld [vmem:[#allocation3 + $0x18] sm:$0xff]  ;;  %v4442_v7 = vld [vmem:[#allocation3 + $0x50] sm:$0xff]  ;;  %v4440_v38 = vld [vmem:[#allocation3 + $0x40] sm:$0xff] }
 0x32d   : > { %5059 = vst.msk [vmem:[#allocation3 + $0x38] sm:$0xff] %vm345_vm1, %v5011_v43  ;;  %5749 = vst.msk [vmem:[#allocation3 + $0x10] sm:$0xff] %vm345_vm1, %v5701_v42  ;;  %v5702_v34 = vadd.f32 %v10738_v57, %v5103_v44  ;;  %v5101_v13 = vld [vmem:[#allocation3 + $0x8] sm:$0xff]  ;;  %v4443_v42 = vld [vmem:[#allocation3 + $0x58] sm:$0xff] }
 0x32e   : > { %5057 = vst.msk [vmem:[#allocation3 + $0x28] sm:$0xff] %vm345_vm1, %v5009_v40  ;;  %5747 = vst.msk [vmem:[#allocation3] sm:$0xff] %vm345_vm1, %v5699_v10  ;;  %v5700_v53 = vadd.f32 %v11824_v39, %v5101_v13  ;;  %v4441_v44 = vld [vmem:[#allocation3 + $0x48] sm:$0xff] }
 0x32f   : > { %5750 = vst.msk [vmem:[#allocation3 + $0x18] sm:$0xff] %vm345_vm1, %v5702_v34  ;;  %v11827_v39 = vld [vmem:[#allocation21_spill] sm:$0xff] }
 0x330   : > { %v8318_v24 = vpop.f32.mrb[156].mxu1  ;;  %5748 = vst.msk [vmem:[#allocation3 + $0x8] sm:$0xff] %vm345_vm1, %v5700_v53 }
 0x331   : > { %v11051_v1 = vpop.f32.mrb[204].mxu0  ;;  %v5014_v43 = vadd.f32 %v8318_v24, %v4442_v7  ;;  %v4845_v15 = vpop.f32.mrb[157].mxu1 }
 0x332   : > { %v11054_v2 = vpop.f32.mrb[205].mxu0  ;;  %v5012_v57 = vadd.f32 %v4845_v15, %v4440_v38  ;;  %v8319_v23 = vpop.f32.mrb[158].mxu1  ;;  %v5106_v41 = vld [vmem:[#allocation3 + $0x30] sm:$0xff] }
 0x333   : > { %11825 = vst [vmem:[#allocation27_spill] sm:$0xff] %v11054_v2  ;;  %v11056_v40 = vpop.f32.mrb[206].mxu0  ;;  %5062 = vst.msk [vmem:[#allocation3 + $0x50] sm:$0xff] %vm345_vm1, %v5014_v43  ;;  %v5015_v10 = vadd.f32 %v8319_v23, %v4443_v42  ;;  %v4848_v34 = vpop.f32.mrb[159].mxu1  ;;  %v5705_v53 = vadd.f32 %v11827_v39, %v5106_v41  ;;  %v5104_v7 = vld [vmem:[#allocation3 + $0x20] sm:$0xff]  ;;  %v11828_v2 = vld [vmem:[#allocation22_spill] sm:$0xff] }
 0x334   : > { %v11059_v13 = vpop.f32.mrb[207].mxu0  ;;  %5060 = vst.msk [vmem:[#allocation3 + $0x40] sm:$0xff] %vm345_vm1, %v5012_v57  ;;  %v5013_v24 = vadd.f32 %v4848_v34, %v4441_v44  ;;  %v5703_v38 = vadd.f32 %v11828_v2, %v5104_v7  ;;  %v5107_v15 = vld [vmem:[#allocation3 + $0x38] sm:$0xff]  ;;  %v4446_v57 = vld [vmem:[#allocation3 + $0x70] sm:$0xff] }
 0x335   : > { %11826 = vst [vmem:[#allocation28_spill] sm:$0xff] %v11059_v13  ;;  %5063 = vst.msk [vmem:[#allocation3 + $0x58] sm:$0xff] %vm345_vm1, %v5015_v10  ;;  %v5706_v43 = vadd.f32 %v10762_v25, %v5107_v15  ;;  %v5105_v42 = vld [vmem:[#allocation3 + $0x28] sm:$0xff]  ;;  %v11829_v23 = vld [vmem:[#allocation23_spill] sm:$0xff] }
 0x336   : > { %5753 = vst.msk [vmem:[#allocation3 + $0x30] sm:$0xff] %vm345_vm1, %v5705_v53  ;;  %5061 = vst.msk [vmem:[#allocation3 + $0x48] sm:$0xff] %vm345_vm1, %v5013_v24  ;;  %v5704_v41 = vadd.f32 %v11829_v23, %v5105_v42  ;;  %v4444_v10 = vld [vmem:[#allocation3 + $0x60] sm:$0xff]  ;;  %v4447_v7 = vld [vmem:[#allocation3 + $0x78] sm:$0xff] }
 0x337   : > { %5751 = vst.msk [vmem:[#allocation3 + $0x20] sm:$0xff] %vm345_vm1, %v5703_v38  ;;  %5754 = vst.msk [vmem:[#allocation3 + $0x38] sm:$0xff] %vm345_vm1, %v5706_v43  ;;  %v4445_v42 = vld [vmem:[#allocation3 + $0x68] sm:$0xff] }
 0x338   : > { %v8322_v44 = vpop.f32.mrb[160].mxu1  ;;  %5752 = vst.msk [vmem:[#allocation3 + $0x28] sm:$0xff] %vm345_vm1, %v5704_v41 }
 0x339   : > { %v11071_v34 = vpop.f32.mrb[208].mxu0  ;;  %v5018_v2 = vadd.f32 %v8322_v44, %v4446_v57  ;;  %v4861_v39 = vpop.f32.mrb[161].mxu1 }
 0x33a   : > { %v11074_v53 = vpop.f32.mrb[209].mxu0  ;;  %v5016_v25 = vadd.f32 %v4861_v39, %v4444_v10  ;;  %v8323_v24 = vpop.f32.mrb[162].mxu1  ;;  %v5110_v38 = vld [vmem:[#allocation3 + $0x50] sm:$0xff] }
 0x33b   : > { %v11076_v15 = vpop.f32.mrb[210].mxu0  ;;  %5066 = vst.msk [vmem:[#allocation3 + $0x70] sm:$0xff] %vm345_vm1, %v5018_v2  ;;  %v5019_v43 = vadd.f32 %v8323_v24, %v4447_v7  ;;  %v4864_v23 = vpop.f32.mrb[163].mxu1  ;;  %v5709_v41 = vadd.f32 %v10783_v58, %v5110_v38  ;;  %v5108_v57 = vld [vmem:[#allocation3 + $0x40] sm:$0xff] }
 0x33c   : > { %v11079_v13 = vpop.f32.mrb[211].mxu0  ;;  %5064 = vst.msk [vmem:[#allocation3 + $0x60] sm:$0xff] %vm345_vm1, %v5016_v25  ;;  %v5017_v44 = vadd.f32 %v4864_v23, %v4445_v42  ;;  %v5707_v10 = vadd.f32 %v10786_v48, %v5108_v57  ;;  %v5111_v39 = vld [vmem:[#allocation3 + $0x58] sm:$0xff]  ;;  %v4450_v25 = vld [vmem:[#allocation3 + $0x90] sm:$0xff] }
 0x33d   : > { %5067 = vst.msk [vmem:[#allocation3 + $0x78] sm:$0xff] %vm345_vm1, %v5019_v43  ;;  %5757 = vst.msk [vmem:[#allocation3 + $0x50] sm:$0xff] %vm345_vm1, %v5709_v41  ;;  %v5710_v2 = vadd.f32 %v10788_v63, %v5111_v39  ;;  %v5109_v7 = vld [vmem:[#allocation3 + $0x48] sm:$0xff]  ;;  %v4448_v43 = vld [vmem:[#allocation3 + $0x80] sm:$0xff] }
 0x33e   : > { %5065 = vst.msk [vmem:[#allocation3 + $0x68] sm:$0xff] %vm345_vm1, %v5017_v44  ;;  %5755 = vst.msk [vmem:[#allocation3 + $0x40] sm:$0xff] %vm345_vm1, %v5707_v10  ;;  %v5708_v58 = vadd.f32 %v10791_v49, %v5109_v7  ;;  %v4451_v41 = vld [vmem:[#allocation3 + $0x98] sm:$0xff]  ;;  %v4449_v39 = vld [vmem:[#allocation3 + $0x88] sm:$0xff] }
 0x33f   : > { %5758 = vst.msk [vmem:[#allocation3 + $0x58] sm:$0xff] %vm345_vm1, %v5710_v2 }
 0x340   : > { %v8326_v24 = vpop.f32.mrb[164].mxu1  ;;  %5756 = vst.msk [vmem:[#allocation3 + $0x48] sm:$0xff] %vm345_vm1, %v5708_v58 }
 0x341   : > { %v11091_v38 = vpop.f32.mrb[212].mxu0  ;;  %v5022_v48 = vadd.f32 %v8326_v24, %v4450_v25  ;;  %v4877_v42 = vpop.f32.mrb[165].mxu1 }
 0x342   : > { %v11094_v23 = vpop.f32.mrb[213].mxu0  ;;  %v5020_v63 = vadd.f32 %v4877_v42, %v4448_v43  ;;  %v8327_v57 = vpop.f32.mrb[166].mxu1  ;;  %v5114_v10 = vld [vmem:[#allocation3 + $0x70] sm:$0xff] }
 0x343   : > { %v11096_v44 = vpop.f32.mrb[214].mxu0  ;;  %5070 = vst.msk [vmem:[#allocation3 + $0x90] sm:$0xff] %vm345_vm1, %v5022_v48  ;;  %v5023_v49 = vadd.f32 %v8327_v57, %v4451_v41  ;;  %v4880_v2 = vpop.f32.mrb[167].mxu1  ;;  %v5713_v58 = vadd.f32 %v10807_v27, %v5114_v10  ;;  %v5112_v25 = vld [vmem:[#allocation3 + $0x60] sm:$0xff] }
 0x344   : > { %v11099_v7 = vpop.f32.mrb[215].mxu0  ;;  %5068 = vst.msk [vmem:[#allocation3 + $0x80] sm:$0xff] %vm345_vm1, %v5020_v63  ;;  %v5021_v24 = vadd.f32 %v4880_v2, %v4449_v39  ;;  %v5711_v43 = vadd.f32 %v10810_v6, %v5112_v25  ;;  %v5115_v42 = vld [vmem:[#allocation3 + $0x78] sm:$0xff]  ;;  %v4454_v63 = vld [vmem:[#allocation3 + $0xb0] sm:$0xff] }
 0x345   : > { %5071 = vst.msk [vmem:[#allocation3 + $0x98] sm:$0xff] %vm345_vm1, %v5023_v49  ;;  %5761 = vst.msk [vmem:[#allocation3 + $0x70] sm:$0xff] %vm345_vm1, %v5713_v58  ;;  %v5714_v48 = vadd.f32 %v10812_v26, %v5115_v42  ;;  %v5113_v41 = vld [vmem:[#allocation3 + $0x68] sm:$0xff]  ;;  %v4452_v49 = vld [vmem:[#allocation3 + $0xa0] sm:$0xff] }
 0x346   : > { %5069 = vst.msk [vmem:[#allocation3 + $0x88] sm:$0xff] %vm345_vm1, %v5021_v24  ;;  %5759 = vst.msk [vmem:[#allocation3 + $0x60] sm:$0xff] %vm345_vm1, %v5711_v43  ;;  %v5712_v27 = vadd.f32 %v10815_v60, %v5113_v41  ;;  %v4455_v58 = vld [vmem:[#allocation3 + $0xb8] sm:$0xff]  ;;  %v4453_v42 = vld [vmem:[#allocation3 + $0xa8] sm:$0xff] }
 0x347   : > { %5762 = vst.msk [vmem:[#allocation3 + $0x78] sm:$0xff] %vm345_vm1, %v5714_v48 }
 0x348   : > { %v8330_v57 = vpop.f32.mrb[168].mxu1  ;;  %5760 = vst.msk [vmem:[#allocation3 + $0x68] sm:$0xff] %vm345_vm1, %v5712_v27 }
 0x349   : > { %v11111_v10 = vpop.f32.mrb[216].mxu0  ;;  %v5026_v6 = vadd.f32 %v8330_v57, %v4454_v63  ;;  %v4893_v39 = vpop.f32.mrb[169].mxu1 }
 0x34a   : > { %v11114_v2 = vpop.f32.mrb[217].mxu0  ;;  %v5024_v26 = vadd.f32 %v4893_v39, %v4452_v49  ;;  %v8331_v25 = vpop.f32.mrb[170].mxu1  ;;  %v5118_v43 = vld [vmem:[#allocation3 + $0x90] sm:$0xff] }
 0x34b   : > { %v11116_v24 = vpop.f32.mrb[218].mxu0  ;;  %5074 = vst.msk [vmem:[#allocation3 + $0xb0] sm:$0xff] %vm345_vm1, %v5026_v6  ;;  %v5027_v60 = vadd.f32 %v8331_v25, %v4455_v58  ;;  %v4896_v48 = vpop.f32.mrb[171].mxu1  ;;  %v5717_v27 = vadd.f32 %v10831_v4, %v5118_v43  ;;  %v5116_v63 = vld [vmem:[#allocation3 + $0x80] sm:$0xff] }
 0x34c   : > { %v11119_v41 = vpop.f32.mrb[219].mxu0  ;;  %5072 = vst.msk [vmem:[#allocation3 + $0xa0] sm:$0xff] %vm345_vm1, %v5024_v26  ;;  %v5025_v57 = vadd.f32 %v4896_v48, %v4453_v42  ;;  %v5715_v49 = vadd.f32 %v10834_v31, %v5116_v63  ;;  %v5119_v39 = vld [vmem:[#allocation3 + $0x98] sm:$0xff]  ;;  %v4458_v26 = vld [vmem:[#allocation3 + $0xd0] sm:$0xff] }
 0x34d   : > { %5075 = vst.msk [vmem:[#allocation3 + $0xb8] sm:$0xff] %vm345_vm1, %v5027_v60  ;;  %5765 = vst.msk [vmem:[#allocation3 + $0x90] sm:$0xff] %vm345_vm1, %v5717_v27  ;;  %v5718_v6 = vadd.f32 %v10836_v32, %v5119_v39  ;;  %v5117_v58 = vld [vmem:[#allocation3 + $0x88] sm:$0xff]  ;;  %v4456_v60 = vld [vmem:[#allocation3 + $0xc0] sm:$0xff] }
 0x34e   : > { %5073 = vst.msk [vmem:[#allocation3 + $0xa8] sm:$0xff] %vm345_vm1, %v5025_v57  ;;  %5763 = vst.msk [vmem:[#allocation3 + $0x80] sm:$0xff] %vm345_vm1, %v5715_v49  ;;  %v5716_v4 = vadd.f32 %v10839_v8, %v5117_v58  ;;  %v4459_v27 = vld [vmem:[#allocation3 + $0xd8] sm:$0xff]  ;;  %v4457_v39 = vld [vmem:[#allocation3 + $0xc8] sm:$0xff] }
 0x34f   : > { %5766 = vst.msk [vmem:[#allocation3 + $0x98] sm:$0xff] %vm345_vm1, %v5718_v6 }
 0x350   : > { %v8334_v25 = vpop.f32.mrb[172].mxu1  ;;  %5764 = vst.msk [vmem:[#allocation3 + $0x88] sm:$0xff] %vm345_vm1, %v5716_v4 }
 0x351   : > { %v11131_v43 = vpop.f32.mrb[220].mxu0  ;;  %v5030_v31 = vadd.f32 %v8334_v25, %v4458_v26  ;;  %v4909_v42 = vpop.f32.mrb[173].mxu1 }
 0x352   : > { %v11134_v48 = vpop.f32.mrb[221].mxu0  ;;  %v5028_v32 = vadd.f32 %v4909_v42, %v4456_v60  ;;  %v8335_v63 = vpop.f32.mrb[174].mxu1  ;;  %v5122_v49 = vld [vmem:[#allocation3 + $0xb0] sm:$0xff] }
 0x353   : > { %v11136_v57 = vpop.f32.mrb[222].mxu0  ;;  %5078 = vst.msk [vmem:[#allocation3 + $0xd0] sm:$0xff] %vm345_vm1, %v5030_v31  ;;  %v5031_v8 = vadd.f32 %v8335_v63, %v4459_v27  ;;  %v4912_v6 = vpop.f32.mrb[175].mxu1  ;;  %v5721_v4 = vadd.f32 %v10855_v3, %v5122_v49  ;;  %v5120_v26 = vld [vmem:[#allocation3 + $0xa0] sm:$0xff] }
 0x354   : > { %v11139_v58 = vpop.f32.mrb[223].mxu0  ;;  %5076 = vst.msk [vmem:[#allocation3 + $0xc0] sm:$0xff] %vm345_vm1, %v5028_v32  ;;  %v5029_v25 = vadd.f32 %v4912_v6, %v4457_v39  ;;  %v5719_v60 = vadd.f32 %v10858_v11, %v5120_v26  ;;  %v5123_v42 = vld [vmem:[#allocation3 + $0xb8] sm:$0xff]  ;;  %v4462_v32 = vld [vmem:[#allocation3 + $0xf0] sm:$0xff] }
 0x355   : > { %5079 = vst.msk [vmem:[#allocation3 + $0xd8] sm:$0xff] %vm345_vm1, %v5031_v8  ;;  %5769 = vst.msk [vmem:[#allocation3 + $0xb0] sm:$0xff] %vm345_vm1, %v5721_v4  ;;  %v5722_v31 = vadd.f32 %v10860_v36, %v5123_v42  ;;  %v5121_v27 = vld [vmem:[#allocation3 + $0xa8] sm:$0xff]  ;;  %v4460_v8 = vld [vmem:[#allocation3 + $0xe0] sm:$0xff] }
 0x356   : > { %5077 = vst.msk [vmem:[#allocation3 + $0xc8] sm:$0xff] %vm345_vm1, %v5029_v25  ;;  %5767 = vst.msk [vmem:[#allocation3 + $0xa0] sm:$0xff] %vm345_vm1, %v5719_v60  ;;  %v5720_v3 = vadd.f32 %v10863_v28, %v5121_v27  ;;  %v4463_v4 = vld [vmem:[#allocation3 + $0xf8] sm:$0xff]  ;;  %v4461_v42 = vld [vmem:[#allocation3 + $0xe8] sm:$0xff] }
 0x357   : > { %5770 = vst.msk [vmem:[#allocation3 + $0xb8] sm:$0xff] %vm345_vm1, %v5722_v31 }
 0x358   : > { %v8338_v63 = vpop.f32.mrb[176].mxu1  ;;  %5768 = vst.msk [vmem:[#allocation3 + $0xa8] sm:$0xff] %vm345_vm1, %v5720_v3 }
 0x359   : > { %v11151_v49 = vpop.f32.mrb[224].mxu0  ;;  %v5034_v11 = vadd.f32 %v8338_v63, %v4462_v32  ;;  %v4925_v39 = vpop.f32.mrb[177].mxu1 }
 0x35a   : > { %v11154_v6 = vpop.f32.mrb[225].mxu0  ;;  %v5032_v36 = vadd.f32 %v4925_v39, %v4460_v8  ;;  %v8339_v26 = vpop.f32.mrb[178].mxu1  ;;  %v5126_v60 = vld [vmem:[#allocation3 + $0xd0] sm:$0xff] }
 0x35b   : > { %v11156_v25 = vpop.f32.mrb[226].mxu0  ;;  %5082 = vst.msk [vmem:[#allocation3 + $0xf0] sm:$0xff] %vm345_vm1, %v5034_v11  ;;  %v5035_v28 = vadd.f32 %v8339_v26, %v4463_v4  ;;  %v4928_v31 = vpop.f32.mrb[179].mxu1  ;;  %v5725_v3 = vadd.f32 %v10879_v16, %v5126_v60  ;;  %v5124_v32 = vld [vmem:[#allocation3 + $0xc0] sm:$0xff] }
 0x35c   : > { %v11159_v27 = vpop.f32.mrb[227].mxu0  ;;  %5080 = vst.msk [vmem:[#allocation3 + $0xe0] sm:$0xff] %vm345_vm1, %v5032_v36  ;;  %v5033_v63 = vadd.f32 %v4928_v31, %v4461_v42  ;;  %v5723_v8 = vadd.f32 %v10882_v5, %v5124_v32  ;;  %v5127_v39 = vld [vmem:[#allocation3 + $0xd8] sm:$0xff]  ;;  %v4466_v36 = vld [vmem:[#allocation3 + $0x110] sm:$0xff] }
 0x35d   : > { %5083 = vst.msk [vmem:[#allocation3 + $0xf8] sm:$0xff] %vm345_vm1, %v5035_v28  ;;  %5773 = vst.msk [vmem:[#allocation3 + $0xd0] sm:$0xff] %vm345_vm1, %v5725_v3  ;;  %v5726_v11 = vadd.f32 %v10884_v54, %v5127_v39  ;;  %v5125_v4 = vld [vmem:[#allocation3 + $0xc8] sm:$0xff]  ;;  %v4464_v28 = vld [vmem:[#allocation3 + $0x100] sm:$0xff] }
 0x35e   : > { %5081 = vst.msk [vmem:[#allocation3 + $0xe8] sm:$0xff] %vm345_vm1, %v5033_v63  ;;  %5771 = vst.msk [vmem:[#allocation3 + $0xc0] sm:$0xff] %vm345_vm1, %v5723_v8  ;;  %v5724_v16 = vadd.f32 %v10887_v33, %v5125_v4  ;;  %v4467_v3 = vld [vmem:[#allocation3 + $0x118] sm:$0xff]  ;;  %v4465_v39 = vld [vmem:[#allocation3 + $0x108] sm:$0xff] }
 0x35f   : > { %5774 = vst.msk [vmem:[#allocation3 + $0xd8] sm:$0xff] %vm345_vm1, %v5726_v11 }
 0x360   : > { %v8342_v26 = vpop.f32.mrb[180].mxu1  ;;  %5772 = vst.msk [vmem:[#allocation3 + $0xc8] sm:$0xff] %vm345_vm1, %v5724_v16 }
 0x361   : > { %v11171_v60 = vpop.f32.mrb[228].mxu0  ;;  %v5038_v5 = vadd.f32 %v8342_v26, %v4466_v36  ;;  %v4941_v42 = vpop.f32.mrb[181].mxu1 }
 0x362   : > { %v11174_v31 = vpop.f32.mrb[229].mxu0  ;;  %v5036_v54 = vadd.f32 %v4941_v42, %v4464_v28  ;;  %v8343_v32 = vpop.f32.mrb[182].mxu1  ;;  %v5130_v8 = vld [vmem:[#allocation3 + $0xf0] sm:$0xff] }
 0x363   : > { %v11176_v63 = vpop.f32.mrb[230].mxu0  ;;  %5086 = vst.msk [vmem:[#allocation3 + $0x110] sm:$0xff] %vm345_vm1, %v5038_v5  ;;  %v5039_v33 = vadd.f32 %v8343_v32, %v4467_v3  ;;  %v4944_v11 = vpop.f32.mrb[183].mxu1  ;;  %v5729_v16 = vadd.f32 %v10903_v12, %v5130_v8  ;;  %v5128_v36 = vld [vmem:[#allocation3 + $0xe0] sm:$0xff] }
 0x364   : > { %v11179_v4 = vpop.f32.mrb[231].mxu0  ;;  %5084 = vst.msk [vmem:[#allocation3 + $0x100] sm:$0xff] %vm345_vm1, %v5036_v54  ;;  %v5037_v26 = vadd.f32 %v4944_v11, %v4465_v39  ;;  %v5727_v28 = vadd.f32 %v10906_v56, %v5128_v36  ;;  %v5131_v42 = vld [vmem:[#allocation3 + $0xf8] sm:$0xff]  ;;  %v4470_v54 = vld [vmem:[#allocation3 + $0x130] sm:$0xff] }
 0x365   : > { %5087 = vst.msk [vmem:[#allocation3 + $0x118] sm:$0xff] %vm345_vm1, %v5039_v33  ;;  %5777 = vst.msk [vmem:[#allocation3 + $0xf0] sm:$0xff] %vm345_vm1, %v5729_v16  ;;  %v5730_v5 = vadd.f32 %v10908_v59, %v5131_v42  ;;  %v5129_v3 = vld [vmem:[#allocation3 + $0xe8] sm:$0xff]  ;;  %v4468_v33 = vld [vmem:[#allocation3 + $0x120] sm:$0xff] }
 0x366   : > { %5085 = vst.msk [vmem:[#allocation3 + $0x108] sm:$0xff] %vm345_vm1, %v5037_v26  ;;  %5775 = vst.msk [vmem:[#allocation3 + $0xe0] sm:$0xff] %vm345_vm1, %v5727_v28  ;;  %v5728_v12 = vadd.f32 %v10911_v46, %v5129_v3  ;;  %v4471_v16 = vld [vmem:[#allocation3 + $0x138] sm:$0xff]  ;;  %v4469_v42 = vld [vmem:[#allocation3 + $0x128] sm:$0xff] }
 0x367   : > { %5778 = vst.msk [vmem:[#allocation3 + $0xf8] sm:$0xff] %vm345_vm1, %v5730_v5 }
 0x368   : > { %v8346_v32 = vpop.f32.mrb[184].mxu1  ;;  %5776 = vst.msk [vmem:[#allocation3 + $0xe8] sm:$0xff] %vm345_vm1, %v5728_v12 }
 0x369   : > { %v11191_v8 = vpop.f32.mrb[232].mxu0  ;;  %v5042_v56 = vadd.f32 %v8346_v32, %v4470_v54  ;;  %v4957_v39 = vpop.f32.mrb[185].mxu1 }
 0x36a   : > { %11830 = vst [vmem:[#allocation29_spill] sm:$0xff] %v11191_v8  ;;  %v11194_v11 = vpop.f32.mrb[233].mxu0  ;;  %v5040_v59 = vadd.f32 %v4957_v39, %v4468_v33  ;;  %v8347_v36 = vpop.f32.mrb[186].mxu1  ;;  %v5134_v28 = vld [vmem:[#allocation3 + $0x110] sm:$0xff]  ;;  %v11833_v8 = vld [vmem:[#allocation24_spill] sm:$0xff] }
 0x36b   : > { %11831 = vst [vmem:[#allocation30_spill] sm:$0xff] %v11194_v11  ;;  %v11196_v26 = vpop.f32.mrb[234].mxu0  ;;  %5090 = vst.msk [vmem:[#allocation3 + $0x130] sm:$0xff] %vm345_vm1, %v5042_v56  ;;  %v5043_v46 = vadd.f32 %v8347_v36, %v4471_v16  ;;  %v4960_v5 = vpop.f32.mrb[187].mxu1  ;;  %v5733_v12 = vadd.f32 %v11833_v8, %v5134_v28  ;;  %v5132_v54 = vld [vmem:[#allocation3 + $0x100] sm:$0xff]  ;;  %v11834_v11 = vld [vmem:[#allocation25_spill] sm:$0xff] }
 0x36c   : > { %11832 = vst [vmem:[#allocation31_spill] sm:$0xff] %v11196_v26  ;;  %v11199_v3 = vpop.f32.mrb[235].mxu0  ;;  %5088 = vst.msk [vmem:[#allocation3 + $0x120] sm:$0xff] %vm345_vm1, %v5040_v59  ;;  %v5041_v32 = vadd.f32 %v4960_v5, %v4469_v42  ;;  %v5731_v33 = vadd.f32 %v11834_v11, %v5132_v54  ;;  %v5135_v39 = vld [vmem:[#allocation3 + $0x118] sm:$0xff]  ;;  %v11835_v26 = vld [vmem:[#allocation26_spill] sm:$0xff] }
 0x36d   : > { %5091 = vst.msk [vmem:[#allocation3 + $0x138] sm:$0xff] %vm345_vm1, %v5043_v46  ;;  %5781 = vst.msk [vmem:[#allocation3 + $0x110] sm:$0xff] %vm345_vm1, %v5733_v12  ;;  %v5734_v56 = vadd.f32 %v11835_v26, %v5135_v39  ;;  %v5133_v16 = vld [vmem:[#allocation3 + $0x108] sm:$0xff]  ;;  %v4474_v59 = vld [vmem:[#allocation3 + $0x150] sm:$0xff] }
 0x36e   : > { %5089 = vst.msk [vmem:[#allocation3 + $0x128] sm:$0xff] %vm345_vm1, %v5041_v32  ;;  %5779 = vst.msk [vmem:[#allocation3 + $0x100] sm:$0xff] %vm345_vm1, %v5731_v33  ;;  %v5732_v8 = vadd.f32 %v10935_v19, %v5133_v16  ;;  %v4472_v46 = vld [vmem:[#allocation3 + $0x140] sm:$0xff]  ;;  %v4475_v12 = vld [vmem:[#allocation3 + $0x158] sm:$0xff] }
 0x36f   : > { %5782 = vst.msk [vmem:[#allocation3 + $0x118] sm:$0xff] %vm345_vm1, %v5734_v56  ;;  %v4473_v39 = vld [vmem:[#allocation3 + $0x148] sm:$0xff] }
 0x370   : > { %v8350_v36 = vpop.f32.mrb[188].mxu1  ;;  %5780 = vst.msk [vmem:[#allocation3 + $0x108] sm:$0xff] %vm345_vm1, %v5732_v8 }
 0x371   : > { %v11211_v28 = vpop.f32.mrb[236].mxu0  ;;  %v5046_v11 = vadd.f32 %v8350_v36, %v4474_v59  ;;  %v4973_v42 = vpop.f32.mrb[189].mxu1 }
 0x372   : > { %v11214_v5 = vpop.f32.mrb[237].mxu0  ;;  %v5044_v26 = vadd.f32 %v4973_v42, %v4472_v46  ;;  %v8351_v54 = vpop.f32.mrb[190].mxu1  ;;  %v5138_v33 = vld [vmem:[#allocation3 + $0x130] sm:$0xff] }
 0x373   : > { %v11216_v32 = vpop.f32.mrb[238].mxu0  ;;  %5094 = vst.msk [vmem:[#allocation3 + $0x150] sm:$0xff] %vm345_vm1, %v5046_v11  ;;  %v5047_v19 = vadd.f32 %v8351_v54, %v4475_v12  ;;  %v4976_v56 = vpop.f32.mrb[191].mxu1  ;;  %v5737_v8 = vadd.f32 %v10951_v18, %v5138_v33  ;;  %v5136_v59 = vld [vmem:[#allocation3 + $0x120] sm:$0xff] }
 0x374   : > { %v11219_v16 = vpop.f32.mrb[239].mxu0  ;;  %5092 = vst.msk [vmem:[#allocation3 + $0x140] sm:$0xff] %vm345_vm1, %v5044_v26  ;;  %v5045_v36 = vadd.f32 %v4976_v56, %v4473_v39  ;;  %v5735_v46 = vadd.f32 %v10954_v62, %v5136_v59  ;;  %v5139_v42 = vld [vmem:[#allocation3 + $0x138] sm:$0xff]  ;;  %v4478_v26 = vld [vmem:[#allocation3 + $0x170] sm:$0xff] }
 0x375   : > { %5095 = vst.msk [vmem:[#allocation3 + $0x158] sm:$0xff] %vm345_vm1, %v5047_v19  ;;  %5785 = vst.msk [vmem:[#allocation3 + $0x130] sm:$0xff] %vm345_vm1, %v5737_v8  ;;  %v5738_v11 = vadd.f32 %v10956_v29, %v5139_v42  ;;  %v5137_v12 = vld [vmem:[#allocation3 + $0x128] sm:$0xff]  ;;  %v4476_v19 = vld [vmem:[#allocation3 + $0x160] sm:$0xff] }
 0x376   : > { %5093 = vst.msk [vmem:[#allocation3 + $0x148] sm:$0xff] %vm345_vm1, %v5045_v36  ;;  %5783 = vst.msk [vmem:[#allocation3 + $0x120] sm:$0xff] %vm345_vm1, %v5735_v46  ;;  %v5736_v18 = vadd.f32 %v10959_v30, %v5137_v12  ;;  %v4479_v8 = vld [vmem:[#allocation3 + $0x178] sm:$0xff]  ;;  %v4477_v42 = vld [vmem:[#allocation3 + $0x168] sm:$0xff] }
 0x377   : > { %5786 = vst.msk [vmem:[#allocation3 + $0x138] sm:$0xff] %vm345_vm1, %v5738_v11 }
 0x378   : > { %v8354_v54 = vpop.f32.mrb[192].mxu1  ;;  %5784 = vst.msk [vmem:[#allocation3 + $0x128] sm:$0xff] %vm345_vm1, %v5736_v18 }
 0x379   : > { %v11231_v33 = vpop.f32.mrb[240].mxu0  ;;  %v5050_v62 = vadd.f32 %v8354_v54, %v4478_v26  ;;  %v4989_v39 = vpop.f32.mrb[193].mxu1 }
 0x37a   : > { %v11234_v56 = vpop.f32.mrb[241].mxu0  ;;  %v5048_v29 = vadd.f32 %v4989_v39, %v4476_v19  ;;  %v8355_v59 = vpop.f32.mrb[194].mxu1  ;;  %v5142_v46 = vld [vmem:[#allocation3 + $0x150] sm:$0xff] }
 0x37b   : > { %v11236_v36 = vpop.f32.mrb[242].mxu0  ;;  %5098 = vst.msk [vmem:[#allocation3 + $0x170] sm:$0xff] %vm345_vm1, %v5050_v62  ;;  %v5051_v30 = vadd.f32 %v8355_v59, %v4479_v8  ;;  %v4992_v11 = vpop.f32.mrb[195].mxu1  ;;  %v5741_v18 = vadd.f32 %v10971_v52, %v5142_v46  ;;  %v5140_v26 = vld [vmem:[#allocation3 + $0x140] sm:$0xff] }
 0x37c   : > { %v11239_v12 = vpop.f32.mrb[243].mxu0  ;;  %5096 = vst.msk [vmem:[#allocation3 + $0x160] sm:$0xff] %vm345_vm1, %v5048_v29  ;;  %v5049_v54 = vadd.f32 %v4992_v11, %v4477_v42  ;;  %v5739_v19 = vadd.f32 %v10974_v61, %v5140_v26  ;;  %v5143_v39 = vld [vmem:[#allocation3 + $0x158] sm:$0xff]  ;;  %v5797_v29 = vld [vmem:[#allocation3 + $0x10] sm:$0xff]  ;;  %v5795_v46 = vld [vmem:[#allocation3] sm:$0xff] }
 0x37d   : > { %5099 = vst.msk [vmem:[#allocation3 + $0x178] sm:$0xff] %vm345_vm1, %v5051_v30  ;;  %5789 = vst.msk [vmem:[#allocation3 + $0x150] sm:$0xff] %vm345_vm1, %v5741_v18  ;;  %v5742_v62 = vadd.f32 %v10976_v14, %v5143_v39  ;;  %v5141_v8 = vld [vmem:[#allocation3 + $0x148] sm:$0xff]  ;;  %v5798_v11 = vld [vmem:[#allocation3 + $0x18] sm:$0xff] }
 0x37e   : > { %5097 = vst.msk [vmem:[#allocation3 + $0x168] sm:$0xff] %vm345_vm1, %v5049_v54  ;;  %5787 = vst.msk [vmem:[#allocation3 + $0x140] sm:$0xff] %vm345_vm1, %v5739_v19  ;;  %v5740_v52 = vadd.f32 %v10979_v55, %v5141_v8  ;;  %v5796_v54 = vld [vmem:[#allocation3 + $0x8] sm:$0xff] }
 0x37f   : > { %5790 = vst.msk [vmem:[#allocation3 + $0x158] sm:$0xff] %vm345_vm1, %v5742_v62 }
 0x380   : > { %v8410_v59 = vpop.f32.mrb[196].mxu1  ;;  %5788 = vst.msk [vmem:[#allocation3 + $0x148] sm:$0xff] %vm345_vm1, %v5740_v52 }
 0x381   : > { %v6246_v61 = vadd.f32 %v8410_v59, %v5797_v29  ;;  %v6053_v30 = vpop.f32.mrb[197].mxu1 }
 0x382   : > { %v6244_v42 = vadd.f32 %v6053_v30, %v5795_v46  ;;  %v8411_v18 = vpop.f32.mrb[198].mxu1  ;;  %v5146_v14 = vld [vmem:[#allocation3 + $0x170] sm:$0xff]  ;;  %v5799_v30 = vld [vmem:[#allocation3 + $0x20] sm:$0xff] }
 0x383   : > { %6294 = vst.msk [vmem:[#allocation3 + $0x10] sm:$0xff] %vm345_vm1, %v6246_v61  ;;  %v6247_v26 = vadd.f32 %v8411_v18, %v5798_v11  ;;  %v6056_v19 = vpop.f32.mrb[199].mxu1  ;;  %v5745_v55 = vadd.f32 %v10991_v45, %v5146_v14  ;;  %v5144_v39 = vld [vmem:[#allocation3 + $0x160] sm:$0xff]  ;;  %v5801_v61 = vld [vmem:[#allocation3 + $0x30] sm:$0xff]  ;;  %v5802_v14 = vld [vmem:[#allocation3 + $0x38] sm:$0xff] }
 0x384   : > { %6292 = vst.msk [vmem:[#allocation3] sm:$0xff] %vm345_vm1, %v6244_v42  ;;  %v6245_v62 = vadd.f32 %v6056_v19, %v5796_v54  ;;  %v5743_v8 = vadd.f32 %v10994_v37, %v5144_v39  ;;  %v5147_v52 = vld [vmem:[#allocation3 + $0x178] sm:$0xff] }
 0x385   : > { %6295 = vst.msk [vmem:[#allocation3 + $0x18] sm:$0xff] %vm345_vm1, %v6247_v26  ;;  %5793 = vst.msk [vmem:[#allocation3 + $0x170] sm:$0xff] %vm345_vm1, %v5745_v55  ;;  %v5746_v29 = vadd.f32 %v10996_v9, %v5147_v52  ;;  %v5145_v59 = vld [vmem:[#allocation3 + $0x168] sm:$0xff] }
 0x386   : > { %6293 = vst.msk [vmem:[#allocation3 + $0x8] sm:$0xff] %vm345_vm1, %v6245_v62  ;;  %5791 = vst.msk [vmem:[#allocation3 + $0x160] sm:$0xff] %vm345_vm1, %v5743_v8  ;;  %v5744_v45 = vadd.f32 %v10999_v0, %v5145_v59  ;;  %v5800_v0 = vld [vmem:[#allocation3 + $0x28] sm:$0xff] }
 0x387   : > { %5794 = vst.msk [vmem:[#allocation3 + $0x178] sm:$0xff] %vm345_vm1, %v5746_v29 }
 0x388   : > { %v8414_v46 = vpop.f32.mrb[200].mxu1  ;;  %5792 = vst.msk [vmem:[#allocation3 + $0x168] sm:$0xff] %vm345_vm1, %v5744_v45 }
 0x389   : > { %v6250_v37 = vadd.f32 %v8414_v46, %v5801_v61  ;;  %v6069_v42 = vpop.f32.mrb[201].mxu1  ;;  %v5803_v61 = vld [vmem:[#allocation3 + $0x40] sm:$0xff] }
 0x38a   : > { %v6342_v11 = vld [vmem:[#allocation3 + $0x10] sm:$0xff]  ;;  %v6248_v18 = vadd.f32 %v6069_v42, %v5799_v30  ;;  %v8415_v9 = vpop.f32.mrb[202].mxu1 }
 0x38b   : > { %v6941_v26 = vadd.f32 %v11011_v17, %v6342_v11  ;;  %v6340_v54 = vld [vmem:[#allocation3] sm:$0xff]  ;;  %6298 = vst.msk [vmem:[#allocation3 + $0x30] sm:$0xff] %vm345_vm1, %v6250_v37  ;;  %v6251_v19 = vadd.f32 %v8415_v9, %v5802_v14  ;;  %v6072_v55 = vpop.f32.mrb[203].mxu1  ;;  %v5804_v9 = vld [vmem:[#allocation3 + $0x48] sm:$0xff] }
 0x38c   : > { %v6939_v39 = vadd.f32 %v11014_v47, %v6340_v54  ;;  %v6343_v62 = vld [vmem:[#allocation3 + $0x18] sm:$0xff]  ;;  %6296 = vst.msk [vmem:[#allocation3 + $0x20] sm:$0xff] %vm345_vm1, %v6248_v18  ;;  %v6249_v8 = vadd.f32 %v6072_v55, %v5800_v0  ;;  %v5805_v47 = vld [vmem:[#allocation3 + $0x50] sm:$0xff] }
 0x38d   : > { %6989 = vst.msk [vmem:[#allocation3 + $0x10] sm:$0xff] %vm345_vm1, %v6941_v26  ;;  %v6942_v52 = vadd.f32 %v11016_v51, %v6343_v62  ;;  %v6341_v29 = vld [vmem:[#allocation3 + $0x8] sm:$0xff]  ;;  %6299 = vst.msk [vmem:[#allocation3 + $0x38] sm:$0xff] %vm345_vm1, %v6251_v19  ;;  %v11279_v51 = vld [vmem:[%s11630_s4] ss:$0 sm:$0xff] }
 0x38e   : > { %6987 = vst.msk [vmem:[#allocation3] sm:$0xff] %vm345_vm1, %v6939_v39  ;;  %v6940_v17 = vadd.f32 %v11019_v21, %v6341_v29  ;;  %6297 = vst.msk [vmem:[#allocation3 + $0x28] sm:$0xff] %vm345_vm1, %v6249_v8  ;;  %v5806_v21 = vld [vmem:[#allocation3 + $0x58] sm:$0xff] }
 0x38f   : > { %6990 = vst.msk [vmem:[#allocation3 + $0x18] sm:$0xff] %vm345_vm1, %v6942_v52 }
 0x390   : > { %6988 = vst.msk [vmem:[#allocation3 + $0x8] sm:$0xff] %vm345_vm1, %v6940_v17  ;;  %v8418_v59 = vpop.f32.mrb[204].mxu1 }
 0x391   : > { %v6254_v45 = vadd.f32 %v8418_v59, %v5805_v47  ;;  %v6085_v46 = vpop.f32.mrb[205].mxu1  ;;  %v7284_v47 = vld [vmem:[%s8633_s16 + $0x30] sm:$0xff] }
 0x392   : > { %v6346_v37 = vld [vmem:[#allocation3 + $0x30] sm:$0xff]  ;;  %v6252_v30 = vadd.f32 %v6085_v46, %v5803_v61  ;;  %v8419_v42 = vpop.f32.mrb[206].mxu1  ;;  %v7282_v61 = vld [vmem:[%s8633_s16 + $0x20] sm:$0xff] }
 0x393   : > { %v6945_v11 = vadd.f32 %v11031_v35, %v6346_v37  ;;  %v6344_v18 = vld [vmem:[#allocation3 + $0x20] sm:$0xff]  ;;  %6302 = vst.msk [vmem:[#allocation3 + $0x50] sm:$0xff] %vm345_vm1, %v6254_v45  ;;  %v6255_v14 = vadd.f32 %v8419_v42, %v5806_v21  ;;  %v6088_v26 = vpop.f32.mrb[207].mxu1  ;;  %v7285_v42 = vld [vmem:[%s8633_s16 + $0x38] sm:$0xff] }
 0x394   : > { %v7037_v54 = vld [vmem:[#allocation3 + $0x10] sm:$0xff]  ;;  %v6943_v19 = vadd.f32 %v11034_v50, %v6344_v18  ;;  %v6347_v0 = vld [vmem:[#allocation3 + $0x38] sm:$0xff]  ;;  %6300 = vst.msk [vmem:[#allocation3 + $0x40] sm:$0xff] %vm345_vm1, %v6252_v30  ;;  %v6253_v55 = vadd.f32 %v6088_v26, %v5804_v9 }
 0x395   : > { %v7092_v39 = vadd.f32 %v11279_v51, %v7037_v54  ;;  %v7035_v62 = vld [vmem:[#allocation3] sm:$0xff]  ;;  %6993 = vst.msk [vmem:[#allocation3 + $0x30] sm:$0xff] %vm345_vm1, %v6945_v11  ;;  %v6946_v35 = vadd.f32 %v11036_v20, %v6347_v0  ;;  %v6345_v8 = vld [vmem:[#allocation3 + $0x28] sm:$0xff]  ;;  %6303 = vst.msk [vmem:[#allocation3 + $0x58] sm:$0xff] %vm345_vm1, %v6255_v14 }
 0x396   : > { %v7090_v52 = vadd.f32 %v11279_v51, %v7035_v62  ;;  %v7038_v50 = vld [vmem:[#allocation3 + $0x18] sm:$0xff]  ;;  %6991 = vst.msk [vmem:[#allocation3 + $0x20] sm:$0xff] %vm345_vm1, %v6943_v19  ;;  %v6944_v29 = vadd.f32 %v11039_v22, %v6345_v8  ;;  %6301 = vst.msk [vmem:[#allocation3 + $0x48] sm:$0xff] %vm345_vm1, %v6253_v55  ;;  %v5809_v22 = vld [vmem:[#allocation3 + $0x70] sm:$0xff] }
 0x397   : > { %vm7140_vm2 = vcmp.ge.f32.partialorder %v7092_v39, 0.0  ;;  %v7188_v17 = vmul.f32 0.1, %v7092_v39  ;;  %v7093_v20 = vadd.f32 %v11279_v51, %v7038_v50  ;;  %v7036_v59 = vld [vmem:[#allocation3 + $0x8] sm:$0xff]  ;;  %6994 = vst.msk [vmem:[#allocation3 + $0x38] sm:$0xff] %vm345_vm1, %v6946_v35  ;;  %v5807_v0 = vld [vmem:[#allocation3 + $0x60] sm:$0xff] }
 0x398   : > { %vm7138_vm3 = vcmp.ge.f32.partialorder %v7090_v52, 0.0  ;;  %v7186_v45 = vmul.f32 0.1, %v7090_v52  ;;  %v7091_v46 = vadd.f32 %v11279_v51, %v7036_v59  ;;  %6992 = vst.msk [vmem:[#allocation3 + $0x28] sm:$0xff] %vm345_vm1, %v6944_v29  ;;  %v8422_v37 = vpop.f32.mrb[208].mxu1  ;;  %v7283_v11 = vld [vmem:[%s8633_s16 + $0x28] sm:$0xff] }
 0x399   : > { %v7236_v30 = vsel %vm7140_vm2, %v7092_v39, %v7188_v17  ;;  %vm7141_vm6 = vcmp.ge.f32.partialorder %v7093_v20, 0.0  ;;  %v7189_v21 = vmul.f32 0.1, %v7093_v20  ;;  %v6258_v18 = vadd.f32 %v8422_v37, %v5809_v22  ;;  %v6101_v14 = vpop.f32.mrb[209].mxu1  ;;  %v5810_v29 = vld [vmem:[#allocation3 + $0x78] sm:$0xff] }
 0x39a   : > { %v7332_v9 = vadd.f32 %v7284_v47, %v7236_v30  ;;  %v7234_v26 = vsel %vm7138_vm3, %v7090_v52, %v7186_v45  ;;  %vm7139_vm9 = vcmp.ge.f32.partialorder %v7091_v46, 0.0  ;;  %v7187_v54 = vmul.f32 0.1, %v7091_v46  ;;  %v6350_v19 = vld [vmem:[#allocation3 + $0x50] sm:$0xff]  ;;  %v8423_v55 = vpop.f32.mrb[210].mxu1  ;;  %v11836_v45 = vld [vmem:[#allocation27_spill] sm:$0xff] }
 0x39b   : > { %v7330_v62 = vadd.f32 %v7282_v61, %v7234_v26  ;;  %v7237_v35 = vsel %vm7141_vm6, %v7093_v20, %v7189_v21  ;;  %v6949_v39 = vadd.f32 %v11051_v1, %v6350_v19  ;;  %v6348_v8 = vld [vmem:[#allocation3 + $0x40] sm:$0xff]  ;;  %6306 = vst.msk [vmem:[#allocation3 + $0x70] sm:$0xff] %vm345_vm1, %v6258_v18  ;;  %v6256_v50 = vadd.f32 %v6101_v14, %v5807_v0  ;;  %v6104_v17 = vpop.f32.mrb[211].mxu1  ;;  %v5808_v30 = vld [vmem:[#allocation3 + $0x68] sm:$0xff] }
 0x39c   : > { %7380 = vst.msk [vmem:[%s11303_s23 + $0x10] sm:$0xff] %vm345_vm1, %v7332_v9  ;;  %v7333_v47 = vadd.f32 %v7285_v42, %v7237_v35  ;;  %v7235_v52 = vsel %vm7139_vm9, %v7091_v46, %v7187_v54  ;;  %v7041_v59 = vld [vmem:[#allocation3 + $0x30] sm:$0xff]  ;;  %v6947_v22 = vadd.f32 %v11836_v45, %v6348_v8  ;;  %v6351_v37 = vld [vmem:[#allocation3 + $0x58] sm:$0xff]  ;;  %v6259_v61 = vadd.f32 %v8423_v55, %v5810_v29 }
 0x39d   : > { %7378 = vst.msk [vmem:[%s11303_s23] sm:$0xff] %vm345_vm1, %v7330_v62  ;;  %v7331_v1 = vadd.f32 %v7283_v11, %v7235_v52  ;;  %v7096_v20 = vadd.f32 %v11279_v51, %v7041_v59  ;;  %v7039_v21 = vld [vmem:[#allocation3 + $0x20] sm:$0xff]  ;;  %6997 = vst.msk [vmem:[#allocation3 + $0x50] sm:$0xff] %vm345_vm1, %v6949_v39  ;;  %v6950_v42 = vadd.f32 %v11056_v40, %v6351_v37  ;;  %v6349_v18 = vld [vmem:[#allocation3 + $0x48] sm:$0xff] }
 0x39e   : > { %6304 = vst.msk [vmem:[#allocation3 + $0x60] sm:$0xff] %vm345_vm1, %v6256_v50  ;;  %v6257_v46 = vadd.f32 %v6104_v17, %v5808_v30  ;;  %7381 = vst.msk [vmem:[%s11303_s23 + $0x18] sm:$0xff] %vm345_vm1, %v7333_v47  ;;  %v7094_v14 = vadd.f32 %v11279_v51, %v7039_v21  ;;  %v7042_v9 = vld [vmem:[#allocation3 + $0x38] sm:$0xff]  ;;  %v11837_v11 = vld [vmem:[#allocation28_spill] sm:$0xff] }
 0x39f   : > { %6995 = vst.msk [vmem:[#allocation3 + $0x40] sm:$0xff] %vm345_vm1, %v6947_v22  ;;  %v6948_v26 = vadd.f32 %v11837_v11, %v6349_v18  ;;  %6307 = vst.msk [vmem:[#allocation3 + $0x78] sm:$0xff] %vm345_vm1, %v6259_v61  ;;  %vm7144_vm7 = vcmp.ge.f32.partialorder %v7096_v20, 0.0  ;;  %v7192_v40 = vmul.f32 0.1, %v7096_v20  ;;  %v7288_v54 = vld [vmem:[%s8633_s16 + $0x50] sm:$0xff]  ;;  %v7097_v19 = vadd.f32 %v11279_v51, %v7042_v9 }
 0x3a0   : > { %7379 = vst.msk [vmem:[%s11303_s23 + $0x8] sm:$0xff] %vm345_vm1, %v7331_v1  ;;  %v7040_v0 = vld [vmem:[#allocation3 + $0x28] sm:$0xff]  ;;  %6998 = vst.msk [vmem:[#allocation3 + $0x58] sm:$0xff] %vm345_vm1, %v6950_v42  ;;  %vm7142_vm8 = vcmp.ge.f32.partialorder %v7094_v14, 0.0  ;;  %v7190_v55 = vmul.f32 0.1, %v7094_v14 }
 0x3a1   : > { %6305 = vst.msk [vmem:[#allocation3 + $0x68] sm:$0xff] %vm345_vm1, %v6257_v46  ;;  %v7286_v62 = vld [vmem:[%s8633_s16 + $0x40] sm:$0xff]  ;;  %v7095_v35 = vadd.f32 %v11279_v51, %v7040_v0  ;;  %6996 = vst.msk [vmem:[#allocation3 + $0x48] sm:$0xff] %vm345_vm1, %v6948_v26  ;;  %v5813_v39 = vld [vmem:[#allocation3 + $0x90] sm:$0xff]  ;;  %v8426_v8 = vpop.f32.mrb[212].mxu1  ;;  %v7240_v50 = vsel %vm7144_vm7, %v7096_v20, %v7192_v40  ;;  %vm7145_vm10 = vcmp.ge.f32.partialorder %v7097_v19, 0.0 }
 0x3a2   : > { %v7193_v29 = vmul.f32 0.1, %v7097_v19  ;;  %v7289_v17 = vld [vmem:[%s8633_s16 + $0x58] sm:$0xff]  ;;  %v7287_v47 = vld [vmem:[%s8633_s16 + $0x48] sm:$0xff]  ;;  %v6262_v52 = vadd.f32 %v8426_v8, %v5813_v39  ;;  %v6117_v59 = vpop.f32.mrb[213].mxu1  ;;  %v7336_v45 = vadd.f32 %v7288_v54, %v7240_v50  ;;  %v7238_v22 = vsel %vm7142_vm8, %v7094_v14, %v7190_v55  ;;  %v6354_v61 = vld [vmem:[#allocation3 + $0x70] sm:$0xff] }
 0x3a3   : > { %vm7143_vm11 = vcmp.ge.f32.partialorder %v7095_v35, 0.0  ;;  %v7191_v37 = vmul.f32 0.1, %v7095_v35  ;;  %v5811_v30 = vld [vmem:[#allocation3 + $0x80] sm:$0xff]  ;;  %v8427_v1 = vpop.f32.mrb[214].mxu1  ;;  %v7334_v21 = vadd.f32 %v7286_v62, %v7238_v22  ;;  %v6953_v18 = vadd.f32 %v11071_v34, %v6354_v61  ;;  %v5814_v46 = vld [vmem:[#allocation3 + $0x98] sm:$0xff] }
 0x3a4   : > { %v7241_v42 = vsel %vm7145_vm10, %v7097_v19, %v7193_v29  ;;  %6310 = vst.msk [vmem:[#allocation3 + $0x90] sm:$0xff] %vm345_vm1, %v6262_v52  ;;  %v6260_v20 = vadd.f32 %v6117_v59, %v5811_v30  ;;  %v5812_v9 = vld [vmem:[#allocation3 + $0x88] sm:$0xff]  ;;  %v6120_v11 = vpop.f32.mrb[215].mxu1  ;;  %7384 = vst.msk [vmem:[%s11303_s23 + $0x30] sm:$0xff] %vm345_vm1, %v7336_v45  ;;  %v7045_v40 = vld [vmem:[#allocation3 + $0x50] sm:$0xff]  ;;  %v6263_v0 = vadd.f32 %v8427_v1, %v5814_v46 }
 0x3a5   : > { %v7337_v14 = vadd.f32 %v7289_v17, %v7241_v42  ;;  %v7239_v26 = vsel %vm7143_vm11, %v7095_v35, %v7191_v37  ;;  %v6352_v54 = vld [vmem:[#allocation3 + $0x60] sm:$0xff]  ;;  %v6261_v55 = vadd.f32 %v6120_v11, %v5812_v9  ;;  %7382 = vst.msk [vmem:[%s11303_s23 + $0x20] sm:$0xff] %vm345_vm1, %v7334_v21  ;;  %v7100_v34 = vadd.f32 %v11279_v51, %v7045_v40  ;;  %v5817_v61 = vld [vmem:[#allocation3 + $0xb0] sm:$0xff]  ;;  %v7293_v42 = vld [vmem:[%s8633_s16 + $0x78] sm:$0xff] }
 0x3a6   : > { %v7335_v19 = vadd.f32 %v7287_v47, %v7239_v26  ;;  %v7043_v62 = vld [vmem:[#allocation3 + $0x40] sm:$0xff]  ;;  %7001 = vst.msk [vmem:[#allocation3 + $0x70] sm:$0xff] %vm345_vm1, %v6953_v18  ;;  %v6951_v39 = vadd.f32 %v11074_v53, %v6352_v54  ;;  %v6355_v8 = vld [vmem:[#allocation3 + $0x78] sm:$0xff]  ;;  %6308 = vst.msk [vmem:[#allocation3 + $0x80] sm:$0xff] %vm345_vm1, %v6260_v20 }
 0x3a7   : > { %7385 = vst.msk [vmem:[%s11303_s23 + $0x38] sm:$0xff] %vm345_vm1, %v7337_v14  ;;  %v7098_v35 = vadd.f32 %v11279_v51, %v7043_v62  ;;  %v7046_v50 = vld [vmem:[#allocation3 + $0x58] sm:$0xff]  ;;  %v6954_v29 = vadd.f32 %v11076_v15, %v6355_v8  ;;  %6311 = vst.msk [vmem:[#allocation3 + $0x98] sm:$0xff] %vm345_vm1, %v6263_v0  ;;  %vm7148_vm12 = vcmp.ge.f32.partialorder %v7100_v34, 0.0  ;;  %v7196_v53 = vmul.f32 0.1, %v7100_v34 }
 0x3a8   : > { %v6353_v17 = vld [vmem:[#allocation3 + $0x68] sm:$0xff]  ;;  %6309 = vst.msk [vmem:[#allocation3 + $0x88] sm:$0xff] %vm345_vm1, %v6261_v55  ;;  %7383 = vst.msk [vmem:[%s11303_s23 + $0x28] sm:$0xff] %vm345_vm1, %v7335_v19  ;;  %v7292_v47 = vld [vmem:[%s8633_s16 + $0x70] sm:$0xff]  ;;  %v7101_v52 = vadd.f32 %v11279_v51, %v7046_v50  ;;  %v8430_v30 = vpop.f32.mrb[216].mxu1 }
 0x3a9   : > { %v7044_v59 = vld [vmem:[#allocation3 + $0x48] sm:$0xff]  ;;  %6999 = vst.msk [vmem:[#allocation3 + $0x60] sm:$0xff] %vm345_vm1, %v6951_v39  ;;  %v6952_v45 = vadd.f32 %v11079_v13, %v6353_v17  ;;  %vm7146_vm13 = vcmp.ge.f32.partialorder %v7098_v35, 0.0  ;;  %v7194_v15 = vmul.f32 0.1, %v7098_v35  ;;  %v7290_v22 = vld [vmem:[%s8633_s16 + $0x60] sm:$0xff]  ;;  %v7244_v1 = vsel %vm7148_vm12, %v7100_v34, %v7196_v53 }
 0x3aa   : > { %v7099_v37 = vadd.f32 %v11279_v51, %v7044_v59  ;;  %7002 = vst.msk [vmem:[#allocation3 + $0x78] sm:$0xff] %vm345_vm1, %v6954_v29  ;;  %vm7149_vm14 = vcmp.ge.f32.partialorder %v7101_v52, 0.0  ;;  %v7197_v21 = vmul.f32 0.1, %v7101_v52  ;;  %v7291_v18 = vld [vmem:[%s8633_s16 + $0x68] sm:$0xff]  ;;  %v6266_v20 = vadd.f32 %v8430_v30, %v5817_v61  ;;  %v6133_v46 = vpop.f32.mrb[217].mxu1 }
 0x3ab   : > { %7000 = vst.msk [vmem:[#allocation3 + $0x68] sm:$0xff] %vm345_vm1, %v6952_v45  ;;  %v7340_v13 = vadd.f32 %v7292_v47, %v7244_v1  ;;  %v7242_v9 = vsel %vm7146_vm13, %v7098_v35, %v7194_v15  ;;  %v6358_v14 = vld [vmem:[#allocation3 + $0x90] sm:$0xff]  ;;  %v5815_v26 = vld [vmem:[#allocation3 + $0xa0] sm:$0xff]  ;;  %v8431_v40 = vpop.f32.mrb[218].mxu1  ;;  %v5818_v34 = vld [vmem:[#allocation3 + $0xb8] sm:$0xff] }
 0x3ac   : > { %vm7147_vm15 = vcmp.ge.f32.partialorder %v7099_v37, 0.0  ;;  %v7195_v11 = vmul.f32 0.1, %v7099_v37  ;;  %v7338_v54 = vadd.f32 %v7290_v22, %v7242_v9  ;;  %v7245_v0 = vsel %vm7149_vm14, %v7101_v52, %v7197_v21  ;;  %6314 = vst.msk [vmem:[#allocation3 + $0xb0] sm:$0xff] %vm345_vm1, %v6266_v20  ;;  %v5816_v62 = vld [vmem:[#allocation3 + $0xa8] sm:$0xff]  ;;  %v6136_v39 = vpop.f32.mrb[219].mxu1 }
 0x3ad   : > { %v6957_v55 = vadd.f32 %v11091_v38, %v6358_v14  ;;  %v6264_v19 = vadd.f32 %v6133_v46, %v5815_v26  ;;  %7388 = vst.msk [vmem:[%s11303_s23 + $0x50] sm:$0xff] %vm345_vm1, %v7340_v13  ;;  %v7341_v8 = vadd.f32 %v7293_v42, %v7245_v0  ;;  %v7049_v50 = vld [vmem:[#allocation3 + $0x70] sm:$0xff]  ;;  %v6356_v29 = vld [vmem:[#allocation3 + $0x80] sm:$0xff]  ;;  %v6267_v17 = vadd.f32 %v8431_v40, %v5818_v34  ;;  %v7297_v46 = vld [vmem:[%s8633_s16 + $0x98] sm:$0xff] }
 0x3ae   : > { %v7243_v35 = vsel %vm7147_vm15, %v7099_v37, %v7195_v11  ;;  %v6265_v53 = vadd.f32 %v6136_v39, %v5816_v62  ;;  %7386 = vst.msk [vmem:[%s11303_s23 + $0x40] sm:$0xff] %vm345_vm1, %v7338_v54  ;;  %v7104_v38 = vadd.f32 %v11279_v51, %v7049_v50  ;;  %v6955_v52 = vadd.f32 %v11094_v23, %v6356_v29  ;;  %v6359_v59 = vld [vmem:[#allocation3 + $0x98] sm:$0xff]  ;;  %v7296_v61 = vld [vmem:[%s8633_s16 + $0x90] sm:$0xff]  ;;  %v7294_v21 = vld [vmem:[%s8633_s16 + $0x80] sm:$0xff] }
 0x3af   : > { %v7339_v47 = vadd.f32 %v7291_v18, %v7243_v35  ;;  %7005 = vst.msk [vmem:[#allocation3 + $0x90] sm:$0xff] %vm345_vm1, %v6957_v55  ;;  %v6357_v45 = vld [vmem:[#allocation3 + $0x88] sm:$0xff]  ;;  %6312 = vst.msk [vmem:[#allocation3 + $0xa0] sm:$0xff] %vm345_vm1, %v6264_v19  ;;  %v6958_v22 = vadd.f32 %v11096_v44, %v6359_v59  ;;  %v5821_v9 = vld [vmem:[#allocation3 + $0xd0] sm:$0xff] }
 0x3b0   : > { %7389 = vst.msk [vmem:[%s11303_s23 + $0x58] sm:$0xff] %vm345_vm1, %v7341_v8  ;;  %v7047_v15 = vld [vmem:[#allocation3 + $0x60] sm:$0xff]  ;;  %v6956_v37 = vadd.f32 %v11099_v7, %v6357_v45  ;;  %6315 = vst.msk [vmem:[#allocation3 + $0xb8] sm:$0xff] %vm345_vm1, %v6267_v17  ;;  %vm7152_vm0 = vcmp.ge.f32.partialorder %v7104_v38, 0.0  ;;  %v7200_v23 = vmul.f32 0.1, %v7104_v38 }
 0x3b1   : > { %6313 = vst.msk [vmem:[#allocation3 + $0xa8] sm:$0xff] %vm345_vm1, %v6265_v53  ;;  %7387 = vst.msk [vmem:[%s11303_s23 + $0x48] sm:$0xff] %vm345_vm1, %v7339_v47  ;;  %v7102_v30 = vadd.f32 %v11279_v51, %v7047_v15  ;;  %v7050_v1 = vld [vmem:[#allocation3 + $0x78] sm:$0xff]  ;;  %v8434_v42 = vpop.f32.mrb[220].mxu1  ;;  %v7295_v40 = vld [vmem:[%s8633_s16 + $0x88] sm:$0xff] }
 0x3b2   : > { %7003 = vst.msk [vmem:[#allocation3 + $0x80] sm:$0xff] %vm345_vm1, %v6955_v52  ;;  %v7105_v44 = vadd.f32 %v11279_v51, %v7050_v1  ;;  %v7048_v7 = vld [vmem:[#allocation3 + $0x68] sm:$0xff]  ;;  %7006 = vst.msk [vmem:[#allocation3 + $0x98] sm:$0xff] %vm345_vm1, %v6958_v22  ;;  %v7248_v18 = vsel %vm7152_vm0, %v7104_v38, %v7200_v23  ;;  %v6149_v11 = vpop.f32.mrb[221].mxu1  ;;  %v6270_v0 = vadd.f32 %v8434_v42, %v5821_v9  ;;  %v5819_v39 = vld [vmem:[#allocation3 + $0xc0] sm:$0xff] }
 0x3b3   : > { %7004 = vst.msk [vmem:[#allocation3 + $0x88] sm:$0xff] %vm345_vm1, %v6956_v37  ;;  %vm7150_vm4 = vcmp.ge.f32.partialorder %v7102_v30, 0.0  ;;  %v7198_v20 = vmul.f32 0.1, %v7102_v30  ;;  %v7103_v13 = vadd.f32 %v11279_v51, %v7048_v7  ;;  %v7344_v14 = vadd.f32 %v7296_v61, %v7248_v18  ;;  %v6362_v54 = vld [vmem:[#allocation3 + $0xb0] sm:$0xff]  ;;  %v8435_v55 = vpop.f32.mrb[222].mxu1 }
 0x3b4   : > { %vm7153_vm5 = vcmp.ge.f32.partialorder %v7105_v44, 0.0  ;;  %v7201_v26 = vmul.f32 0.1, %v7105_v44  ;;  %v6961_v62 = vadd.f32 %v11111_v10, %v6362_v54  ;;  %v5822_v8 = vld [vmem:[#allocation3 + $0xd8] sm:$0xff]  ;;  %v6152_v35 = vpop.f32.mrb[223].mxu1  ;;  %6318 = vst.msk [vmem:[#allocation3 + $0xd0] sm:$0xff] %vm345_vm1, %v6270_v0  ;;  %v6268_v47 = vadd.f32 %v6149_v11, %v5819_v39 }
 0x3b5   : > { %v7246_v19 = vsel %vm7150_vm4, %v7102_v30, %v7198_v20  ;;  %vm7151_vm2 = vcmp.ge.f32.partialorder %v7103_v13, 0.0  ;;  %v7199_v34 = vmul.f32 0.1, %v7103_v13  ;;  %7392 = vst.msk [vmem:[%s11303_s23 + $0x70] sm:$0xff] %vm345_vm1, %v7344_v14  ;;  %v6271_v38 = vadd.f32 %v8435_v55, %v5822_v8  ;;  %v5820_v37 = vld [vmem:[#allocation3 + $0xc8] sm:$0xff]  ;;  %v7301_v14 = vld [vmem:[%s8633_s16 + $0xb8] sm:$0xff] }
 0x3b6   : > { %v7342_v50 = vadd.f32 %v7294_v21, %v7246_v19  ;;  %v7249_v29 = vsel %vm7153_vm5, %v7105_v44, %v7201_v26  ;;  %v7053_v17 = vld [vmem:[#allocation3 + $0x90] sm:$0xff]  ;;  %v6360_v53 = vld [vmem:[#allocation3 + $0xa0] sm:$0xff]  ;;  %7009 = vst.msk [vmem:[#allocation3 + $0xb0] sm:$0xff] %vm345_vm1, %v6961_v62  ;;  %6316 = vst.msk [vmem:[#allocation3 + $0xc0] sm:$0xff] %vm345_vm1, %v6268_v47  ;;  %v6269_v21 = vadd.f32 %v6152_v35, %v5820_v37 }
 0x3b7   : > { %v7345_v52 = vadd.f32 %v7297_v46, %v7249_v29  ;;  %v7247_v59 = vsel %vm7151_vm2, %v7103_v13, %v7199_v34  ;;  %v7108_v45 = vadd.f32 %v11279_v51, %v7053_v17  ;;  %v6959_v10 = vadd.f32 %v11114_v2, %v6360_v53  ;;  %v6363_v15 = vld [vmem:[#allocation3 + $0xb8] sm:$0xff]  ;;  %6319 = vst.msk [vmem:[#allocation3 + $0xd8] sm:$0xff] %vm345_vm1, %v6271_v38  ;;  %v7300_v44 = vld [vmem:[%s8633_s16 + $0xb0] sm:$0xff]  ;;  %v7299_v8 = vld [vmem:[%s8633_s16 + $0xa8] sm:$0xff] }
 0x3b8   : > { %v6361_v22 = vld [vmem:[#allocation3 + $0xa8] sm:$0xff]  ;;  %7390 = vst.msk [vmem:[%s11303_s23 + $0x60] sm:$0xff] %vm345_vm1, %v7342_v50  ;;  %v7343_v23 = vadd.f32 %v7295_v40, %v7247_v59  ;;  %v6962_v30 = vadd.f32 %v11116_v24, %v6363_v15  ;;  %v7298_v24 = vld [vmem:[%s8633_s16 + $0xa0] sm:$0xff]  ;;  %6317 = vst.msk [vmem:[#allocation3 + $0xc8] sm:$0xff] %vm345_vm1, %v6269_v21  ;;  %v8438_v13 = vpop.f32.mrb[224].mxu1 }
 0x3b9   : > { %v7051_v61 = vld [vmem:[#allocation3 + $0x80] sm:$0xff]  ;;  %v6960_v1 = vadd.f32 %v11119_v41, %v6361_v22  ;;  %7393 = vst.msk [vmem:[%s11303_s23 + $0x78] sm:$0xff] %vm345_vm1, %v7345_v52  ;;  %vm7156_vm3 = vcmp.ge.f32.partialorder %v7108_v45, 0.0  ;;  %v7204_v2 = vmul.f32 0.1, %v7108_v45  ;;  %v7054_v42 = vld [vmem:[#allocation3 + $0x98] sm:$0xff] }
 0x3ba   : > { %v7106_v7 = vadd.f32 %v11279_v51, %v7051_v61  ;;  %v7052_v18 = vld [vmem:[#allocation3 + $0x88] sm:$0xff]  ;;  %7007 = vst.msk [vmem:[#allocation3 + $0xa0] sm:$0xff] %vm345_vm1, %v6959_v10  ;;  %7391 = vst.msk [vmem:[%s11303_s23 + $0x68] sm:$0xff] %vm345_vm1, %v7343_v23  ;;  %v7109_v41 = vadd.f32 %v11279_v51, %v7054_v42  ;;  %v5825_v46 = vld [vmem:[#allocation3 + $0xf0] sm:$0xff]  ;;  %v6165_v54 = vpop.f32.mrb[225].mxu1 }
 0x3bb   : > { %v7107_v20 = vadd.f32 %v11279_v51, %v7052_v18  ;;  %7010 = vst.msk [vmem:[#allocation3 + $0xb8] sm:$0xff] %vm345_vm1, %v6962_v30  ;;  %7008 = vst.msk [vmem:[#allocation3 + $0xa8] sm:$0xff] %vm345_vm1, %v6960_v1  ;;  %v7252_v9 = vsel %vm7156_vm3, %v7108_v45, %v7204_v2  ;;  %v6274_v26 = vadd.f32 %v8438_v13, %v5825_v46  ;;  %v5823_v40 = vld [vmem:[#allocation3 + $0xe0] sm:$0xff]  ;;  %v5826_v19 = vld [vmem:[#allocation3 + $0xf8] sm:$0xff]  ;;  %v8439_v34 = vpop.f32.mrb[226].mxu1 }
 0x3bc   : > { %vm7154_vm6 = vcmp.ge.f32.partialorder %v7106_v7, 0.0  ;;  %v7202_v11 = vmul.f32 0.1, %v7106_v7  ;;  %v7348_v0 = vadd.f32 %v7300_v44, %v7252_v9  ;;  %vm7157_vm9 = vcmp.ge.f32.partialorder %v7109_v41, 0.0  ;;  %v6366_v35 = vld [vmem:[#allocation3 + $0xd0] sm:$0xff]  ;;  %v5824_v17 = vld [vmem:[#allocation3 + $0xe8] sm:$0xff] }
 0x3bd   : > { %v7205_v55 = vmul.f32 0.1, %v7109_v41  ;;  %vm7155_vm7 = vcmp.ge.f32.partialorder %v7107_v20, 0.0  ;;  %v7203_v39 = vmul.f32 0.1, %v7107_v20  ;;  %6322 = vst.msk [vmem:[#allocation3 + $0xf0] sm:$0xff] %vm345_vm1, %v6274_v26  ;;  %v6272_v50 = vadd.f32 %v6165_v54, %v5823_v40 }
 0x3be   : > { %v7250_v62 = vsel %vm7154_vm6, %v7106_v7, %v7202_v11  ;;  %v6275_v29 = vadd.f32 %v8439_v34, %v5826_v19  ;;  %v6168_v53 = vpop.f32.mrb[227].mxu1  ;;  %7396 = vst.msk [vmem:[%s11303_s23 + $0x90] sm:$0xff] %vm345_vm1, %v7348_v0  ;;  %v7057_v52 = vld [vmem:[#allocation3 + $0xb0] sm:$0xff]  ;;  %v6965_v59 = vadd.f32 %v11131_v43, %v6366_v35  ;;  %v6364_v37 = vld [vmem:[#allocation3 + $0xc0] sm:$0xff]  ;;  %v6367_v23 = vld [vmem:[#allocation3 + $0xd8] sm:$0xff] }
 0x3bf   : > { %v7346_v47 = vadd.f32 %v7298_v24, %v7250_v62  ;;  %v7253_v38 = vsel %vm7157_vm9, %v7109_v41, %v7205_v55  ;;  %v6273_v45 = vadd.f32 %v6168_v53, %v5824_v17  ;;  %v7251_v15 = vsel %vm7155_vm7, %v7107_v20, %v7203_v39  ;;  %6320 = vst.msk [vmem:[#allocation3 + $0xe0] sm:$0xff] %vm345_vm1, %v6272_v50  ;;  %v7304_v30 = vld [vmem:[%s8633_s16 + $0xd0] sm:$0xff]  ;;  %v6365_v18 = vld [vmem:[#allocation3 + $0xc8] sm:$0xff]  ;;  %v7302_v24 = vld [vmem:[%s8633_s16 + $0xc0] sm:$0xff] }
 0x3c0   : > { %v7349_v10 = vadd.f32 %v7301_v14, %v7253_v38  ;;  %v7112_v22 = vadd.f32 %v11279_v51, %v7057_v52  ;;  %6323 = vst.msk [vmem:[#allocation3 + $0xf8] sm:$0xff] %vm345_vm1, %v6275_v29  ;;  %v7347_v61 = vadd.f32 %v7299_v8, %v7251_v15  ;;  %7013 = vst.msk [vmem:[#allocation3 + $0xd0] sm:$0xff] %vm345_vm1, %v6965_v59  ;;  %v5829_v20 = vld [vmem:[#allocation3 + $0x110] sm:$0xff]  ;;  %v8442_v46 = vpop.f32.mrb[228].mxu1  ;;  %v7305_v11 = vld [vmem:[%s8633_s16 + $0xd8] sm:$0xff] }
 0x3c1   : > { %7394 = vst.msk [vmem:[%s11303_s23 + $0x80] sm:$0xff] %vm345_vm1, %v7346_v47  ;;  %v7055_v43 = vld [vmem:[#allocation3 + $0xa0] sm:$0xff]  ;;  %v6963_v1 = vadd.f32 %v11134_v48, %v6364_v37  ;;  %v6966_v21 = vadd.f32 %v11136_v57, %v6367_v23  ;;  %6321 = vst.msk [vmem:[#allocation3 + $0xe8] sm:$0xff] %vm345_vm1, %v6273_v45  ;;  %v6964_v57 = vadd.f32 %v11139_v58, %v6365_v18  ;;  %v6181_v40 = vpop.f32.mrb[229].mxu1  ;;  %v7303_v62 = vld [vmem:[%s8633_s16 + $0xc8] sm:$0xff] }
 0x3c2   : > { %7397 = vst.msk [vmem:[%s11303_s23 + $0x98] sm:$0xff] %vm345_vm1, %v7349_v10  ;;  %vm7160_vm8 = vcmp.ge.f32.partialorder %v7112_v22, 0.0  ;;  %v7208_v2 = vmul.f32 0.1, %v7112_v22  ;;  %v7110_v44 = vadd.f32 %v11279_v51, %v7055_v43  ;;  %v7058_v7 = vld [vmem:[#allocation3 + $0xb8] sm:$0xff]  ;;  %v7056_v42 = vld [vmem:[#allocation3 + $0xa8] sm:$0xff]  ;;  %v6278_v14 = vadd.f32 %v8442_v46, %v5829_v20 }
 0x3c3   : > { %7395 = vst.msk [vmem:[%s11303_s23 + $0x88] sm:$0xff] %vm345_vm1, %v7347_v61  ;;  %v7113_v41 = vadd.f32 %v11279_v51, %v7058_v7  ;;  %v7111_v48 = vadd.f32 %v11279_v51, %v7056_v42  ;;  %7011 = vst.msk [vmem:[#allocation3 + $0xc0] sm:$0xff] %vm345_vm1, %v6963_v1  ;;  %v5827_v26 = vld [vmem:[#allocation3 + $0x100] sm:$0xff]  ;;  %v8443_v19 = vpop.f32.mrb[230].mxu1  ;;  %v5830_v35 = vld [vmem:[#allocation3 + $0x118] sm:$0xff] }
 0x3c4   : > { %7014 = vst.msk [vmem:[#allocation3 + $0xd8] sm:$0xff] %vm345_vm1, %v6966_v21  ;;  %v7256_v13 = vsel %vm7160_vm8, %v7112_v22, %v7208_v2  ;;  %vm7158_vm10 = vcmp.ge.f32.partialorder %v7110_v44, 0.0  ;;  %v7206_v9 = vmul.f32 0.1, %v7110_v44  ;;  %7012 = vst.msk [vmem:[#allocation3 + $0xc8] sm:$0xff] %vm345_vm1, %v6964_v57  ;;  %v6370_v55 = vld [vmem:[#allocation3 + $0xf0] sm:$0xff]  ;;  %v6276_v8 = vadd.f32 %v6181_v40, %v5827_v26 }
 0x3c5   : > { %v7352_v54 = vadd.f32 %v7304_v30, %v7256_v13  ;;  %vm7161_vm11 = vcmp.ge.f32.partialorder %v7113_v41, 0.0  ;;  %v7209_v0 = vmul.f32 0.1, %v7113_v41  ;;  %vm7159_vm12 = vcmp.ge.f32.partialorder %v7111_v48, 0.0  ;;  %6326 = vst.msk [vmem:[#allocation3 + $0x110] sm:$0xff] %vm345_vm1, %v6278_v14  ;;  %v5828_v50 = vld [vmem:[#allocation3 + $0x108] sm:$0xff] }
 0x3c6   : > { %v7254_v58 = vsel %vm7158_vm10, %v7110_v44, %v7206_v9  ;;  %v7207_v34 = vmul.f32 0.1, %v7111_v48  ;;  %v6969_v39 = vadd.f32 %v11151_v49, %v6370_v55  ;;  %v6184_v29 = vpop.f32.mrb[231].mxu1  ;;  %v6368_v47 = vld [vmem:[#allocation3 + $0xe0] sm:$0xff]  ;;  %v6279_v52 = vadd.f32 %v8443_v19, %v5830_v35  ;;  %6324 = vst.msk [vmem:[#allocation3 + $0x100] sm:$0xff] %vm345_vm1, %v6276_v8  ;;  %v7308_v1 = vld [vmem:[%s8633_s16 + $0xf0] sm:$0xff] }
 0x3c7   : > { %7400 = vst.msk [vmem:[%s11303_s23 + $0xb0] sm:$0xff] %vm345_vm1, %v7352_v54  ;;  %v7350_v17 = vadd.f32 %v7302_v24, %v7254_v58  ;;  %v7257_v53 = vsel %vm7161_vm11, %v7113_v41, %v7209_v0  ;;  %v6371_v38 = vld [vmem:[#allocation3 + $0xf8] sm:$0xff]  ;;  %v6277_v59 = vadd.f32 %v6184_v29, %v5828_v50  ;;  %v7061_v10 = vld [vmem:[#allocation3 + $0xd0] sm:$0xff]  ;;  %v6967_v15 = vadd.f32 %v11154_v6, %v6368_v47  ;;  %v7306_v7 = vld [vmem:[%s8633_s16 + $0xe0] sm:$0xff] }
 0x3c8   : > { %v7353_v45 = vadd.f32 %v7305_v11, %v7257_v53  ;;  %v7255_v49 = vsel %vm7159_vm12, %v7111_v48, %v7207_v34  ;;  %7017 = vst.msk [vmem:[#allocation3 + $0xf0] sm:$0xff] %vm345_vm1, %v6969_v39  ;;  %v6970_v22 = vadd.f32 %v11156_v25, %v6371_v38  ;;  %v6369_v37 = vld [vmem:[#allocation3 + $0xe8] sm:$0xff]  ;;  %v7116_v61 = vadd.f32 %v11279_v51, %v7061_v10  ;;  %v5833_v2 = vld [vmem:[#allocation3 + $0x130] sm:$0xff]  ;;  %v8446_v44 = vpop.f32.mrb[232].mxu1  ;;  %v7309_v42 = vld [vmem:[%s8633_s16 + $0xf8] sm:$0xff] }
 0x3c9   : > { %7398 = vst.msk [vmem:[%s11303_s23 + $0xa0] sm:$0xff] %vm345_vm1, %v7350_v17  ;;  %v7351_v23 = vadd.f32 %v7303_v62, %v7255_v49  ;;  %v6968_v30 = vadd.f32 %v11159_v27, %v6369_v37  ;;  %6327 = vst.msk [vmem:[#allocation3 + $0x118] sm:$0xff] %vm345_vm1, %v6279_v52  ;;  %v6282_v24 = vadd.f32 %v8446_v44, %v5833_v2  ;;  %v6197_v41 = vpop.f32.mrb[233].mxu1  ;;  %v5831_v26 = vld [vmem:[#allocation3 + $0x120] sm:$0xff]  ;;  %v5834_v40 = vld [vmem:[#allocation3 + $0x138] sm:$0xff] }
 0x3ca   : > { %6325 = vst.msk [vmem:[#allocation3 + $0x108] sm:$0xff] %vm345_vm1, %v6277_v59  ;;  %7401 = vst.msk [vmem:[%s11303_s23 + $0xb8] sm:$0xff] %vm345_vm1, %v7353_v45  ;;  %v7059_v6 = vld [vmem:[#allocation3 + $0xc0] sm:$0xff]  ;;  %vm7164_vm13 = vcmp.ge.f32.partialorder %v7116_v61, 0.0  ;;  %v7212_v43 = vmul.f32 0.1, %v7116_v61  ;;  %v6280_v34 = vadd.f32 %v6197_v41, %v5831_v26 }
 0x3cb   : > { %v7062_v25 = vld [vmem:[#allocation3 + $0xd8] sm:$0xff]  ;;  %7015 = vst.msk [vmem:[#allocation3 + $0xe0] sm:$0xff] %vm345_vm1, %v6967_v15  ;;  %7018 = vst.msk [vmem:[#allocation3 + $0xf8] sm:$0xff] %vm345_vm1, %v6970_v22  ;;  %v7114_v27 = vadd.f32 %v11279_v51, %v7059_v6  ;;  %v7060_v18 = vld [vmem:[#allocation3 + $0xc8] sm:$0xff]  ;;  %v8447_v46 = vpop.f32.mrb[234].mxu1 }
 0x3cc   : > { %7399 = vst.msk [vmem:[%s11303_s23 + $0xa8] sm:$0xff] %vm345_vm1, %v7351_v23  ;;  %v7117_v21 = vadd.f32 %v11279_v51, %v7062_v25  ;;  %7016 = vst.msk [vmem:[#allocation3 + $0xe8] sm:$0xff] %vm345_vm1, %v6968_v30  ;;  %v7260_v48 = vsel %vm7164_vm13, %v7116_v61, %v7212_v43  ;;  %v6374_v20 = vld [vmem:[#allocation3 + $0x110] sm:$0xff]  ;;  %v7115_v11 = vadd.f32 %v11279_v51, %v7060_v18  ;;  %v5832_v54 = vld [vmem:[#allocation3 + $0x128] sm:$0xff]  ;;  %v6200_v0 = vpop.f32.mrb[235].mxu1 }
 0x3cd   : > { %vm7162_vm14 = vcmp.ge.f32.partialorder %v7114_v27, 0.0  ;;  %v7210_v57 = vmul.f32 0.1, %v7114_v27  ;;  %v7356_v13 = vadd.f32 %v7308_v1, %v7260_v48  ;;  %v6973_v14 = vadd.f32 %v11171_v60, %v6374_v20  ;;  %6330 = vst.msk [vmem:[#allocation3 + $0x130] sm:$0xff] %vm345_vm1, %v6282_v24  ;;  %v6372_v58 = vld [vmem:[#allocation3 + $0x100] sm:$0xff]  ;;  %v7307_v50 = vld [vmem:[%s8633_s16 + $0xe8] sm:$0xff] }
 0x3ce   : > { %vm7165_vm15 = vcmp.ge.f32.partialorder %v7117_v21, 0.0  ;;  %v7213_v9 = vmul.f32 0.1, %v7117_v21  ;;  %v6283_v62 = vadd.f32 %v8447_v46, %v5834_v40  ;;  %v6281_v39 = vadd.f32 %v6200_v0, %v5832_v54  ;;  %6328 = vst.msk [vmem:[#allocation3 + $0x120] sm:$0xff] %vm345_vm1, %v6280_v34  ;;  %v7312_v10 = vld [vmem:[%s8633_s16 + $0x110] sm:$0xff]  ;;  %v7310_v22 = vld [vmem:[%s8633_s16 + $0x100] sm:$0xff] }
 0x3cf   : > { %v7258_v55 = vsel %vm7162_vm14, %v7114_v27, %v7210_v57  ;;  %v7065_v19 = vld [vmem:[#allocation3 + $0xf0] sm:$0xff]  ;;  %7404 = vst.msk [vmem:[%s11303_s23 + $0xd0] sm:$0xff] %vm345_vm1, %v7356_v13  ;;  %vm7163_vm0 = vcmp.ge.f32.partialorder %v7115_v11, 0.0  ;;  %v7211_v60 = vmul.f32 0.1, %v7115_v11  ;;  %7021 = vst.msk [vmem:[#allocation3 + $0x110] sm:$0xff] %vm345_vm1, %v6973_v14  ;;  %v6971_v59 = vadd.f32 %v11174_v31, %v6372_v58 }
 0x3d0   : > { %v7354_v8 = vadd.f32 %v7306_v7, %v7258_v55  ;;  %v7261_v35 = vsel %vm7165_vm15, %v7117_v21, %v7213_v9  ;;  %v6375_v29 = vld [vmem:[#allocation3 + $0x118] sm:$0xff]  ;;  %v7120_v47 = vadd.f32 %v11279_v51, %v7065_v19  ;;  %6331 = vst.msk [vmem:[#allocation3 + $0x138] sm:$0xff] %vm345_vm1, %v6283_v62  ;;  %6329 = vst.msk [vmem:[#allocation3 + $0x128] sm:$0xff] %vm345_vm1, %v6281_v39  ;;  %v5837_v25 = vld [vmem:[#allocation3 + $0x150] sm:$0xff]  ;;  %v8450_v43 = vpop.f32.mrb[236].mxu1 }
 0x3d1   : > { %v6373_v17 = vld [vmem:[#allocation3 + $0x108] sm:$0xff]  ;;  %v7357_v53 = vadd.f32 %v7309_v42, %v7261_v35  ;;  %v6974_v45 = vadd.f32 %v11176_v63, %v6375_v29  ;;  %v7259_v49 = vsel %vm7163_vm0, %v7115_v11, %v7211_v60  ;;  %v7313_v30 = vld [vmem:[%s8633_s16 + $0x118] sm:$0xff]  ;;  %7019 = vst.msk [vmem:[#allocation3 + $0x100] sm:$0xff] %vm345_vm1, %v6971_v59  ;;  %v6286_v7 = vadd.f32 %v8450_v43, %v5837_v25  ;;  %v6213_v42 = vpop.f32.mrb[237].mxu1  ;;  %v5835_v20 = vld [vmem:[#allocation3 + $0x140] sm:$0xff] }
 0x3d2   : > { %v7063_v38 = vld [vmem:[#allocation3 + $0xe0] sm:$0xff]  ;;  %v7066_v52 = vld [vmem:[#allocation3 + $0xf8] sm:$0xff]  ;;  %7402 = vst.msk [vmem:[%s11303_s23 + $0xc0] sm:$0xff] %vm345_vm1, %v7354_v8  ;;  %v6972_v63 = vadd.f32 %v11179_v4, %v6373_v17  ;;  %v7355_v23 = vadd.f32 %v7307_v50, %v7259_v49  ;;  %vm7168_vm4 = vcmp.ge.f32.partialorder %v7120_v47, 0.0  ;;  %v7216_v61 = vmul.f32 0.1, %v7120_v47 }
 0x3d3   : > { %v7118_v15 = vadd.f32 %v11279_v51, %v7063_v38  ;;  %v7121_v37 = vadd.f32 %v11279_v51, %v7066_v52  ;;  %v7064_v31 = vld [vmem:[#allocation3 + $0xe8] sm:$0xff]  ;;  %7405 = vst.msk [vmem:[%s11303_s23 + $0xd8] sm:$0xff] %vm345_vm1, %v7357_v53  ;;  %7022 = vst.msk [vmem:[#allocation3 + $0x118] sm:$0xff] %vm345_vm1, %v6974_v45  ;;  %v8451_v46 = vpop.f32.mrb[238].mxu1  ;;  %v6284_v26 = vadd.f32 %v6213_v42, %v5835_v20  ;;  %v5838_v40 = vld [vmem:[#allocation3 + $0x158] sm:$0xff] }
 0x3d4   : > { %v7119_v6 = vadd.f32 %v11279_v51, %v7064_v31  ;;  %7020 = vst.msk [vmem:[#allocation3 + $0x108] sm:$0xff] %vm345_vm1, %v6972_v63  ;;  %7403 = vst.msk [vmem:[%s11303_s23 + $0xc8] sm:$0xff] %vm345_vm1, %v7355_v23  ;;  %v7264_v27 = vsel %vm7168_vm4, %v7120_v47, %v7216_v61  ;;  %v7311_v2 = vld [vmem:[%s8633_s16 + $0x108] sm:$0xff]  ;;  %v6378_v44 = vld [vmem:[#allocation3 + $0x130] sm:$0xff]  ;;  %v6216_v0 = vpop.f32.mrb[239].mxu1  ;;  %v6287_v39 = vadd.f32 %v8451_v46, %v5838_v40 }
 0x3d5   : > { %vm7166_vm5 = vcmp.ge.f32.partialorder %v7118_v15, 0.0  ;;  %v7214_v1 = vmul.f32 0.1, %v7118_v15  ;;  %vm7169_vm2 = vcmp.ge.f32.partialorder %v7121_v37, 0.0  ;;  %v7217_v4 = vmul.f32 0.1, %v7121_v37 }
 0x3d6   : > { %vm7167_vm3 = vcmp.ge.f32.partialorder %v7119_v6, 0.0  ;;  %v7215_v21 = vmul.f32 0.1, %v7119_v6  ;;  %v7360_v18 = vadd.f32 %v7312_v10, %v7264_v27  ;;  %v11838_v48 = vld [vmem:[#allocation29_spill] sm:$0xff]  ;;  %v7069_v14 = vld [vmem:[#allocation3 + $0x110] sm:$0xff]  ;;  %6334 = vst.msk [vmem:[#allocation3 + $0x150] sm:$0xff] %vm345_vm1, %v6286_v7 }
 0x3d7   : > { %v7262_v24 = vsel %vm7166_vm5, %v7118_v15, %v7214_v1  ;;  %v7265_v41 = vsel %vm7169_vm2, %v7121_v37, %v7217_v4  ;;  %v6977_v57 = vadd.f32 %v11838_v48, %v6378_v44  ;;  %v5836_v54 = vld [vmem:[#allocation3 + $0x148] sm:$0xff]  ;;  %v7124_v19 = vadd.f32 %v11279_v51, %v7069_v14  ;;  %v6376_v58 = vld [vmem:[#allocation3 + $0x120] sm:$0xff]  ;;  %v6379_v34 = vld [vmem:[#allocation3 + $0x138] sm:$0xff]  ;;  %6332 = vst.msk [vmem:[#allocation3 + $0x140] sm:$0xff] %vm345_vm1, %v6284_v26 }
 0x3d8   : > { %v7358_v13 = vadd.f32 %v7310_v22, %v7262_v24  ;;  %v7361_v9 = vadd.f32 %v7313_v30, %v7265_v41  ;;  %v7263_v11 = vsel %vm7167_vm3, %v7119_v6, %v7215_v21  ;;  %7408 = vst.msk [vmem:[%s11303_s23 + $0xf0] sm:$0xff] %vm345_vm1, %v7360_v18  ;;  %v6377_v62 = vld [vmem:[#allocation3 + $0x128] sm:$0xff]  ;;  %v6285_v8 = vadd.f32 %v6216_v0, %v5836_v54  ;;  %v11839_v35 = vld [vmem:[#allocation30_spill] sm:$0xff]  ;;  %v11840_v50 = vld [vmem:[#allocation31_spill] sm:$0xff]  ;;  %v8454_v22 = vpop.f32.mrb[240].mxu1 }
 0x3d9   : > { %v7359_v55 = vadd.f32 %v7311_v2, %v7263_v11  ;;  %7025 = vst.msk [vmem:[#allocation3 + $0x130] sm:$0xff] %vm345_vm1, %v6977_v57  ;;  %v6975_v60 = vadd.f32 %v11839_v35, %v6376_v58  ;;  %v6978_v29 = vadd.f32 %v11840_v50, %v6379_v34  ;;  %v6976_v17 = vadd.f32 %v11199_v3, %v6377_v62  ;;  %v7316_v47 = vld [vmem:[%s8633_s16 + $0x130] sm:$0xff]  ;;  %v7067_v38 = vld [vmem:[#allocation3 + $0x100] sm:$0xff]  ;;  %v7315_v63 = vld [vmem:[%s8633_s16 + $0x128] sm:$0xff]  ;;  %v6229_v30 = vpop.f32.mrb[241].mxu1 }
 0x3da   : > { %7406 = vst.msk [vmem:[%s11303_s23 + $0xe0] sm:$0xff] %vm345_vm1, %v7358_v13  ;;  %7409 = vst.msk [vmem:[%s11303_s23 + $0xf8] sm:$0xff] %vm345_vm1, %v7361_v9  ;;  %vm7172_vm6 = vcmp.ge.f32.partialorder %v7124_v19, 0.0  ;;  %v7220_v53 = vmul.f32 0.1, %v7124_v19  ;;  %v7070_v52 = vld [vmem:[#allocation3 + $0x118] sm:$0xff]  ;;  %v7122_v59 = vadd.f32 %v11279_v51, %v7067_v38 }
 0x3db   : > { %7407 = vst.msk [vmem:[%s11303_s23 + $0xe8] sm:$0xff] %vm345_vm1, %v7359_v55  ;;  %6335 = vst.msk [vmem:[#allocation3 + $0x158] sm:$0xff] %vm345_vm1, %v6287_v39  ;;  %v7314_v45 = vld [vmem:[%s8633_s16 + $0x120] sm:$0xff]  ;;  %v7068_v10 = vld [vmem:[#allocation3 + $0x108] sm:$0xff]  ;;  %v8455_v1 = vpop.f32.mrb[242].mxu1 }
 0x3dc   : > { %6333 = vst.msk [vmem:[#allocation3 + $0x148] sm:$0xff] %vm345_vm1, %v6285_v8  ;;  %v11536_v3 = vld [vmem:[%s11630_s4] ss:$0 sm:$0xff]  ;;  %7023 = vst.msk [vmem:[#allocation3 + $0x120] sm:$0xff] %vm345_vm1, %v6975_v60  ;;  %v5841_v15 = vld [vmem:[#allocation3 + $0x170] sm:$0xff]  ;;  %v7268_v37 = vsel %vm7172_vm6, %v7124_v19, %v7220_v53  ;;  %vm7170_vm9 = vcmp.ge.f32.partialorder %v7122_v59, 0.0 }
 0x3dd   : > { %v7125_v49 = vadd.f32 %v11536_v3, %v7070_v52  ;;  %7026 = vst.msk [vmem:[#allocation3 + $0x138] sm:$0xff] %vm345_vm1, %v6978_v29  ;;  %7024 = vst.msk [vmem:[#allocation3 + $0x128] sm:$0xff] %vm345_vm1, %v6976_v17  ;;  %v7317_v51 = vld [vmem:[%s8633_s16 + $0x138] sm:$0xff]  ;;  %v7123_v31 = vadd.f32 %v11536_v3, %v7068_v10  ;;  %v6290_v23 = vadd.f32 %v8454_v22, %v5841_v15  ;;  %v5839_v61 = vld [vmem:[#allocation3 + $0x160] sm:$0xff]  ;;  %v7218_v25 = vmul.f32 0.1, %v7122_v59 }
 0x3de   : > { %v7364_v6 = vadd.f32 %v7316_v47, %v7268_v37  ;;  %v5842_v43 = vld [vmem:[#allocation3 + $0x178] sm:$0xff]  ;;  %v6382_v21 = vld [vmem:[#allocation3 + $0x150] sm:$0xff]  ;;  %v6288_v2 = vadd.f32 %v6229_v30, %v5839_v61  ;;  %v6232_v24 = vpop.f32.mrb[243].mxu1  ;;  %v6380_v46 = vld [vmem:[#allocation3 + $0x140] sm:$0xff] }
 0x3df   : > { %vm7173_vm7 = vcmp.ge.f32.partialorder %v7125_v49, 0.0  ;;  %v7221_v4 = vmul.f32 0.1, %v7125_v49  ;;  %vm7171_vm8 = vcmp.ge.f32.partialorder %v7123_v31, 0.0  ;;  %v7219_v27 = vmul.f32 0.1, %v7123_v31 }
 0x3e0   : > { %6338 = vst.msk [vmem:[#allocation3 + $0x170] sm:$0xff] %vm345_vm1, %v6290_v23  ;;  %7412 = vst.msk [vmem:[%s11303_s23 + $0x110] sm:$0xff] %vm345_vm1, %v7364_v6  ;;  %v7266_v44 = vsel %vm7170_vm9, %v7122_v59, %v7218_v25  ;;  %v7073_v7 = vld [vmem:[#allocation3 + $0x130] sm:$0xff]  ;;  %v6981_v42 = vadd.f32 %v11211_v28, %v6382_v21  ;;  %v6291_v18 = vadd.f32 %v8455_v1, %v5842_v43  ;;  %v5840_v13 = vld [vmem:[#allocation3 + $0x168] sm:$0xff] }
 0x3e1   : > { %v7362_v41 = vadd.f32 %v7314_v45, %v7266_v44  ;;  %v7269_v48 = vsel %vm7173_vm7, %v7125_v49, %v7221_v4  ;;  %v7267_v57 = vsel %vm7171_vm8, %v7123_v31, %v7219_v27  ;;  %v7128_v20 = vadd.f32 %v11536_v3, %v7073_v7  ;;  %6336 = vst.msk [vmem:[#allocation3 + $0x160] sm:$0xff] %vm345_vm1, %v6288_v2  ;;  %v7320_v14 = vld [vmem:[%s8633_s16 + $0x150] sm:$0xff]  ;;  %v7318_v35 = vld [vmem:[%s8633_s16 + $0x140] sm:$0xff]  ;;  %v7321_v50 = vld [vmem:[%s8633_s16 + $0x158] sm:$0xff] }
 0x3e2   : > { %v7365_v9 = vadd.f32 %v7317_v51, %v7269_v48  ;;  %v7363_v11 = vadd.f32 %v7315_v63, %v7267_v57  ;;  %7029 = vst.msk [vmem:[#allocation3 + $0x150] sm:$0xff] %vm345_vm1, %v6981_v42  ;;  %v6979_v28 = vadd.f32 %v11214_v5, %v6380_v46  ;;  %v6383_v26 = vld [vmem:[#allocation3 + $0x158] sm:$0xff]  ;;  %6339 = vst.msk [vmem:[#allocation3 + $0x178] sm:$0xff] %vm345_vm1, %v6291_v18  ;;  %v7319_v47 = vld [vmem:[%s8633_s16 + $0x148] sm:$0xff] }
 0x3e3   : > { %v6381_v40 = vld [vmem:[#allocation3 + $0x148] sm:$0xff]  ;;  %v6289_v54 = vadd.f32 %v6232_v24, %v5840_v13  ;;  %7410 = vst.msk [vmem:[%s11303_s23 + $0x100] sm:$0xff] %vm345_vm1, %v7362_v41  ;;  %vm7176_vm10 = vcmp.ge.f32.partialorder %v7128_v20, 0.0  ;;  %v7224_v0 = vmul.f32 0.1, %v7128_v20  ;;  %v7071_v55 = vld [vmem:[#allocation3 + $0x120] sm:$0xff]  ;;  %v6982_v34 = vadd.f32 %v11216_v32, %v6383_v26 }
 0x3e4   : > { %v7074_v19 = vld [vmem:[#allocation3 + $0x138] sm:$0xff]  ;;  %v7072_v58 = vld [vmem:[#allocation3 + $0x128] sm:$0xff]  ;;  %v6980_v62 = vadd.f32 %v11219_v16, %v6381_v40  ;;  %7413 = vst.msk [vmem:[%s11303_s23 + $0x118] sm:$0xff] %vm345_vm1, %v7365_v9  ;;  %7411 = vst.msk [vmem:[%s11303_s23 + $0x108] sm:$0xff] %vm345_vm1, %v7363_v11  ;;  %v7126_v5 = vadd.f32 %v11536_v3, %v7071_v55 }
 0x3e5   : > { %v7129_v39 = vadd.f32 %v11536_v3, %v7074_v19  ;;  %v7127_v8 = vadd.f32 %v11536_v3, %v7072_v58  ;;  %7027 = vst.msk [vmem:[#allocation3 + $0x140] sm:$0xff] %vm345_vm1, %v6979_v28  ;;  %6337 = vst.msk [vmem:[#allocation3 + $0x168] sm:$0xff] %vm345_vm1, %v6289_v54  ;;  %v7272_v32 = vsel %vm7176_vm10, %v7128_v20, %v7224_v0  ;;  %v7324_v30 = vld [vmem:[%s8633_s16 + $0x170] sm:$0xff]  ;;  %v7322_v2 = vld [vmem:[%s8633_s16 + $0x160] sm:$0xff] }
 0x3e6   : > { %7030 = vst.msk [vmem:[#allocation3 + $0x158] sm:$0xff] %vm345_vm1, %v6982_v34  ;;  %7028 = vst.msk [vmem:[#allocation3 + $0x148] sm:$0xff] %vm345_vm1, %v6980_v62  ;;  %v7368_v16 = vadd.f32 %v7320_v14, %v7272_v32  ;;  %vm7174_vm11 = vcmp.ge.f32.partialorder %v7126_v5, 0.0  ;;  %v7222_v60 = vmul.f32 0.1, %v7126_v5  ;;  %v7325_v42 = vld [vmem:[%s8633_s16 + $0x178] sm:$0xff] }
 0x3e7   : > { %vm7177_vm12 = vcmp.ge.f32.partialorder %v7129_v39, 0.0  ;;  %v6386_v29 = vld [vmem:[#allocation3 + $0x170] sm:$0xff]  ;;  %v7225_v17 = vmul.f32 0.1, %v7129_v39  ;;  %vm7175_vm13 = vcmp.ge.f32.partialorder %v7127_v8, 0.0  ;;  %v7323_v24 = vld [vmem:[%s8633_s16 + $0x168] sm:$0xff] }
 0x3e8   : > { %v7223_v53 = vmul.f32 0.1, %v7127_v8  ;;  %v6985_v38 = vadd.f32 %v11231_v33, %v6386_v29  ;;  %7416 = vst.msk [vmem:[%s11303_s23 + $0x130] sm:$0xff] %vm345_vm1, %v7368_v16  ;;  %v7270_v52 = vsel %vm7174_vm11, %v7126_v5, %v7222_v60  ;;  %v6384_v59 = vld [vmem:[#allocation3 + $0x160] sm:$0xff]  ;;  %v7328_v28 = vld [vmem:[%s8633_s16 + $0x190] sm:$0xff]  ;;  %v7329_v5 = vld [vmem:[%s8633_s16 + $0x198] sm:$0xff] }
 0x3e9   : > { %v7366_v45 = vadd.f32 %v7318_v35, %v7270_v52  ;;  %v7273_v49 = vsel %vm7177_vm12, %v7129_v39, %v7225_v17  ;;  %v7077_v15 = vld [vmem:[#allocation3 + $0x150] sm:$0xff]  ;;  %v6983_v22 = vadd.f32 %v11234_v56, %v6384_v59  ;;  %v6387_v37 = vld [vmem:[#allocation3 + $0x178] sm:$0xff]  ;;  %v7326_v19 = vld [vmem:[%s8633_s16 + $0x180] sm:$0xff] }
 0x3ea   : > { %v7271_v10 = vsel %vm7175_vm13, %v7127_v8, %v7223_v53  ;;  %7033 = vst.msk [vmem:[#allocation3 + $0x170] sm:$0xff] %vm345_vm1, %v6985_v38  ;;  %v7369_v51 = vadd.f32 %v7321_v50, %v7273_v49  ;;  %v7132_v33 = vadd.f32 %v11536_v3, %v7077_v15  ;;  %v6986_v63 = vadd.f32 %v11236_v36, %v6387_v37  ;;  %v7327_v60 = vld [vmem:[%s8633_s16 + $0x188] sm:$0xff] }
 0x3eb   : > { %v7367_v31 = vadd.f32 %v7319_v47, %v7271_v10  ;;  %7414 = vst.msk [vmem:[%s11303_s23 + $0x120] sm:$0xff] %vm345_vm1, %v7366_v45  ;;  %7031 = vst.msk [vmem:[#allocation3 + $0x160] sm:$0xff] %vm345_vm1, %v6983_v22 }
 0x3ec   : > { %v7075_v23 = vld [vmem:[#allocation3 + $0x140] sm:$0xff]  ;;  %v6385_v61 = vld [vmem:[#allocation3 + $0x168] sm:$0xff]  ;;  %7417 = vst.msk [vmem:[%s11303_s23 + $0x138] sm:$0xff] %vm345_vm1, %v7369_v51  ;;  %vm7180_vm14 = vcmp.ge.f32.partialorder %v7132_v33, 0.0  ;;  %v7228_v56 = vmul.f32 0.1, %v7132_v33 }
 0x3ed   : > { %7415 = vst.msk [vmem:[%s11303_s23 + $0x128] sm:$0xff] %vm345_vm1, %v7367_v31  ;;  %v7130_v6 = vadd.f32 %v11536_v3, %v7075_v23  ;;  %v7078_v25 = vld [vmem:[#allocation3 + $0x158] sm:$0xff]  ;;  %v7076_v43 = vld [vmem:[#allocation3 + $0x148] sm:$0xff]  ;;  %7034 = vst.msk [vmem:[#allocation3 + $0x178] sm:$0xff] %vm345_vm1, %v6986_v63  ;;  %v6984_v36 = vadd.f32 %v11239_v12, %v6385_v61 }
 0x3ee   : > { %v7133_v1 = vadd.f32 %v11536_v3, %v7078_v25  ;;  %v7131_v4 = vadd.f32 %v11536_v3, %v7076_v43  ;;  %v7276_v27 = vsel %vm7180_vm14, %v7132_v33, %v7228_v56 }
 0x3ef   : > { %vm7178_vm15 = vcmp.ge.f32.partialorder %v7130_v6, 0.0  ;;  %v7226_v21 = vmul.f32 0.1, %v7130_v6  ;;  %7032 = vst.msk [vmem:[#allocation3 + $0x168] sm:$0xff] %vm345_vm1, %v6984_v36  ;;  %v7372_v44 = vadd.f32 %v7324_v30, %v7276_v27 }
 0x3f0   : > { %vm7181_vm0 = vcmp.ge.f32.partialorder %v7133_v1, 0.0  ;;  %v7229_v7 = vmul.f32 0.1, %v7133_v1  ;;  %vm7179_vm4 = vcmp.ge.f32.partialorder %v7131_v4, 0.0  ;;  %v7227_v12 = vmul.f32 0.1, %v7131_v4 }
 0x3f1   : > { %v7274_v18 = vsel %vm7178_vm15, %v7130_v6, %v7226_v21  ;;  %v7081_v41 = vld [vmem:[#allocation3 + $0x170] sm:$0xff]  ;;  %7420 = vst.msk [vmem:[%s11303_s23 + $0x150] sm:$0xff] %vm345_vm1, %v7372_v44 }
 0x3f2   : > { %v7370_v48 = vadd.f32 %v7322_v2, %v7274_v18  ;;  %v7277_v57 = vsel %vm7181_vm0, %v7133_v1, %v7229_v7  ;;  %v7136_v20 = vadd.f32 %v11536_v3, %v7081_v41  ;;  %v7275_v13 = vsel %vm7179_vm4, %v7131_v4, %v7227_v12  ;;  %v7079_v9 = vld [vmem:[#allocation3 + $0x160] sm:$0xff] }
 0x3f3   : > { %v7373_v46 = vadd.f32 %v7325_v42, %v7277_v57  ;;  %v7371_v11 = vadd.f32 %v7323_v24, %v7275_v13  ;;  %v7134_v26 = vadd.f32 %v11536_v3, %v7079_v9 }
 0x3f4   : > { %7418 = vst.msk [vmem:[%s11303_s23 + $0x140] sm:$0xff] %vm345_vm1, %v7370_v48  ;;  %vm7184_vm5 = vcmp.ge.f32.partialorder %v7136_v20, 0.0  ;;  %v7232_v14 = vmul.f32 0.1, %v7136_v20  ;;  %v7082_v40 = vld [vmem:[#allocation3 + $0x178] sm:$0xff] }
 0x3f5   : > { %7421 = vst.msk [vmem:[%s11303_s23 + $0x158] sm:$0xff] %vm345_vm1, %v7373_v46  ;;  %v7137_v54 = vadd.f32 %v11536_v3, %v7082_v40  ;;  %7419 = vst.msk [vmem:[%s11303_s23 + $0x148] sm:$0xff] %vm345_vm1, %v7371_v11  ;;  %vm7182_vm2 = vcmp.ge.f32.partialorder %v7134_v26, 0.0  ;;  %v7230_v55 = vmul.f32 0.1, %v7134_v26 }
 0x3f6   : > { %v7280_v0 = vsel %vm7184_vm5, %v7136_v20, %v7232_v14  ;;  %v7080_v58 = vld [vmem:[#allocation3 + $0x168] sm:$0xff] }
 0x3f7   : > { %v7376_v34 = vadd.f32 %v7328_v28, %v7280_v0  ;;  %vm7185_vm3 = vcmp.ge.f32.partialorder %v7137_v54, 0.0  ;;  %v7233_v62 = vmul.f32 0.1, %v7137_v54  ;;  %v7135_v39 = vadd.f32 %v11536_v3, %v7080_v58 }
 0x3f8   : > { %v7278_v8 = vsel %vm7182_vm2, %v7134_v26, %v7230_v55 }
 0x3f9   : > { %7424 = vst.msk [vmem:[%s11303_s23 + $0x170] sm:$0xff] %vm345_vm1, %v7376_v34  ;;  %v7374_v32 = vadd.f32 %v7326_v19, %v7278_v8  ;;  %v7281_v35 = vsel %vm7185_vm3, %v7137_v54, %v7233_v62  ;;  %vm7183_vm6 = vcmp.ge.f32.partialorder %v7135_v39, 0.0  ;;  %v7231_v16 = vmul.f32 0.1, %v7135_v39 }
 0x3fa   : > { %v7377_v50 = vadd.f32 %v7329_v5, %v7281_v35 }
 0x3fb   : > { %7422 = vst.msk [vmem:[%s11303_s23 + $0x160] sm:$0xff] %vm345_vm1, %v7374_v32  ;;  %v7279_v29 = vsel %vm7183_vm6, %v7135_v39, %v7231_v16 }
 0x3fc   : > { %7425 = vst.msk [vmem:[%s11303_s23 + $0x178] sm:$0xff] %vm345_vm1, %v7377_v50  ;;  %v7375_v17 = vadd.f32 %v7327_v60, %v7279_v29 }
 0x3fe   : > { %7423 = vst.msk [vmem:[%s11303_s23 + $0x168] sm:$0xff] %vm345_vm1, %v7375_v17 }
 0x3ff PF: > { %s16_s21 = sadd.s32 1, %s8559_s21  }
 0x400   : > { %p13_p4 = scmp.ge.s32.totalorder %s16_s21, 4  }
 0x402   :  { %15 = sbr.rel (!%p13_p4) target bundleno = 1 (0x1), region = 82 }

</bundles_post_ra>
